<compile_context>
chip_gen: v5e
topology: v5e:2x2
jax: 0.10.0
libtpu: 0.0.40
codegen_flags: <defaults>
</compile_context>

<pallas_src>
import jax
import jax.numpy as jnp
from jax.experimental import pallas as pl
from jax.experimental.pallas import tpu as pltpu

H1, CAT, H2, H3, OUT = 4000, 5000, 400, 40, 5
Y_DIM = CAT - H1          # 1000
H2_PAD = 512              # 400 rounded up to a lane multiple (exact, zero-padded)


def aspectnet_kernel(x_ref, y_ref,
                     w1t_ref, b1_ref,
                     w2at_ref, w2bt_ref, b2_ref,
                     w3t_ref, b3_ref,
                     w4t_ref, b4_ref,
                     o_ref):
    # Cast activations to bf16 for the MXU; accumulate in f32.
    x_bf = x_ref[...].astype(jnp.bfloat16)
    y_bf = y_ref[...].astype(jnp.bfloat16)

    # fc1 + relu
    h = jnp.dot(x_bf, w1t_ref[...], preferred_element_type=jnp.float32)
    h = jnp.maximum(h + b1_ref[...], 0.0)

    # fc2 on the implicit concat [h, y]:
    #   cat @ W2.T + b2 == h @ W2[:, :4000].T + y @ W2[:, 4000:].T + b2
    h_bf = h.astype(jnp.bfloat16)
    h2 = jnp.dot(h_bf, w2at_ref[...], preferred_element_type=jnp.float32)
    h2 = h2 + jnp.dot(y_bf, w2bt_ref[...], preferred_element_type=jnp.float32)
    h2 = jnp.maximum(h2 + b2_ref[...], 0.0)

    # fc3 + relu
    h2_bf = h2.astype(jnp.bfloat16)
    h3 = jnp.dot(h2_bf, w3t_ref[...], preferred_element_type=jnp.float32)
    h3 = jnp.maximum(h3 + b3_ref[...], 0.0)

    # fc4 (no relu)
    h3_bf = h3.astype(jnp.bfloat16)
    out = jnp.dot(h3_bf, w4t_ref[...], preferred_element_type=jnp.float32) + b4_ref[...]
    o_ref[...] = out.astype(o_ref.dtype)


def prepare_params(params):
    """One-time layout plumbing: transpose weights, split W2 at the concat
    boundary, zero-pad fc2 width 400->512, cast weights to bf16, reshape
    biases to [1, F]. Keep out of the hot forward path."""
    w1, b1 = jnp.asarray(params["w1"]), jnp.asarray(params["b1"])
    w2, b2 = jnp.asarray(params["w2"]), jnp.asarray(params["b2"])
    w3, b3 = jnp.asarray(params["w3"]), jnp.asarray(params["b3"])
    w4, b4 = jnp.asarray(params["w4"]), jnp.asarray(params["b4"])

    pad2 = H2_PAD - H2
    w2at = jnp.pad(w2[:, :H1].T, ((0, 0), (0, pad2)))     # [4000, 512]
    w2bt = jnp.pad(w2[:, H1:].T, ((0, 0), (0, pad2)))     # [1000, 512]
    b2p = jnp.pad(b2, (0, pad2))                           # [512]
    w3tp = jnp.pad(w3.T, ((0, pad2), (0, 0)))              # [512, 40]

    return {
        "w1t": w1.T.astype(jnp.bfloat16),                  # [D, 4000]
        "b1": b1.astype(jnp.float32).reshape(1, H1),
        "w2at": w2at.astype(jnp.bfloat16),                 # [4000, 512]
        "w2bt": w2bt.astype(jnp.bfloat16),                 # [1000, 512]
        "b2": b2p.astype(jnp.float32).reshape(1, H2_PAD),
        "w3t": w3tp.astype(jnp.bfloat16),                  # [512, 40]
        "b3": b3.astype(jnp.float32).reshape(1, H3),
        "w4t": w4.T.astype(jnp.bfloat16),                  # [40, 5]
        "b4": b4.astype(jnp.float32).reshape(1, OUT),
    }


def _round_up(v, m):
    return ((v + m - 1) // m) * m


def _pick_tile_b(B):
    if B <= 256:
        # Tiny / weight-DMA-bound regime: one grid step, don't split (each TC
        # splitting would just re-read the same resident weights).
        return B
    # >= 2 grid steps so the "parallel" batch axis can shard across v7x's two
    # TensorCores; cap rows so activations + tiles fit VMEM.
    return min(512, _round_up(pl.cdiv(B, 2), 8))


@jax.jit
def aspectnet_forward(x, y, prep):
    B, D = x.shape
    assert y.shape == (B, Y_DIM)

    tile_b = _pick_tile_b(B)
    grid = (pl.cdiv(B, tile_b),)

    batch_map = lambda i: (i, 0)   # tiled along batch
    const_map = lambda i: (0, 0)   # resident weights: same block every step

    # --- VMEM budget (bf16 weights single-buffered, f32 I/O double-buffered,
    #     plus f32+bf16 activation temps), with headroom. ---
    weight_bytes = 2 * (D * H1 + H1 * H2_PAD + Y_DIM * H2_PAD
                        + H2_PAD * H3 + H3 * OUT)
    bias_bytes = 4 * (H1 + H2_PAD + H3 + OUT)
    io_bytes = 2 * tile_b * (D + Y_DIM + OUT) * 4            # double-buffered
    act_bytes = tile_b * (H1 + H2_PAD + H3) * 6               # f32 + bf16 copies
    vmem_limit = int(1.5 * (weight_bytes + bias_bytes + io_bytes + act_bytes))
    vmem_limit = max(32 * 1024 * 1024, min(vmem_limit, 100 * 1024 * 1024))

    # --- Honest cost estimate: bf16 weights, f32 activations/output. ---
    flops = 2 * B * (D * H1 + H1 * H2_PAD + Y_DIM * H2_PAD + H2_PAD * H3 + H3 * OUT)
    bytes_accessed = (
        4 * (B * D + B * Y_DIM + B * OUT)                     # x, y, out (f32)
        + weight_bytes                                        # bf16 weights
        + bias_bytes                                          # f32 biases
    )

    single = pl.Buffered(1)   # resident (constant index_map) operands
    return pl.pallas_call(
        aspectnet_kernel,
        out_shape=jax.ShapeDtypeStruct((B, OUT), jnp.float32),
        grid=grid,
        in_specs=[
            pl.BlockSpec((tile_b, D), batch_map),                                  # x
            pl.BlockSpec((tile_b, Y_DIM), batch_map),                              # y
            pl.BlockSpec((D, H1), const_map, pipeline_mode=single),                # w1t
            pl.BlockSpec((1, H1), const_map, pipeline_mode=single),                # b1
            pl.BlockSpec((H1, H2_PAD), const_map, pipeline_mode=single),           # w2at
            pl.BlockSpec((Y_DIM, H2_PAD), const_map, pipeline_mode=single),        # w2bt
            pl.BlockSpec((1, H2_PAD), const_map, pipeline_mode=single),            # b2
            pl.BlockSpec((H2_PAD, H3), const_map, pipeline_mode=single),           # w3t
            pl.BlockSpec((1, H3), const_map, pipeline_mode=single),                # b3
            pl.BlockSpec((H3, OUT), const_map, pipeline_mode=single),              # w4t
            pl.BlockSpec((1, OUT), const_map, pipeline_mode=single),               # b4
        ],
        out_specs=pl.BlockSpec((tile_b, OUT), batch_map),
        compiler_params=pltpu.CompilerParams(
            dimension_semantics=("parallel",),     # shard batch across TCs (v7x)
            vmem_limit_bytes=vmem_limit,
        ),
        cost_estimate=pl.CostEstimate(
            flops=flops, transcendentals=0, bytes_accessed=bytes_accessed),
    )(x, y,
      prep["w1t"], prep["b1"],
      prep["w2at"], prep["w2bt"], prep["b2"],
      prep["w3t"], prep["b3"],
      prep["w4t"], prep["b4"])


def init_params(key, data_dim):
    ks = jax.random.split(key, 8)

    def linear(kw, kb, fan_in, fan_out):
        bound = 1.0 / jnp.sqrt(float(fan_in))
        w = jax.random.uniform(kw, (fan_out, fan_in), jnp.float32, -bound, bound)
        b = jax.random.uniform(kb, (fan_out,), jnp.float32, -bound, bound)
        return w, b

    w1, b1 = linear(ks[0], ks[1], data_dim, H1)
    w2, b2 = linear(ks[2], ks[3], CAT, H2)
    w3, b3 = linear(ks[4], ks[5], H2, H3)
    w4, b4 = linear(ks[6], ks[7], H3, OUT)
    return {"w1": w1, "b1": b1, "w2": w2, "b2": b2,
            "w3": w3, "b3": b3, "w4": w4, "b4": b4}


def reference_forward(x, y, params):
    h = jnp.maximum(x @ params["w1"].T + params["b1"], 0.0)
    cat = jnp.concatenate([h, y], axis=1)
    assert cat.shape[1] == CAT
    h2 = jnp.maximum(cat @ params["w2"].T + params["b2"], 0.0)
    h3 = jnp.maximum(h2 @ params["w3"].T + params["b3"], 0.0)
    return h3 @ params["w4"].T + params["b4"]


if __name__ == "__main__":
    key = jax.random.PRNGKey(0)
    kx, ky, kp = jax.random.split(key, 3)

    B, data_dim = 8, 64
    x = jax.random.normal(kx, (B, data_dim), jnp.float32)
    y = jax.random.normal(ky, (B, Y_DIM), jnp.float32)

    params = init_params(kp, data_dim)
    prep = prepare_params(params)

    out = aspectnet_forward(x, y, prep)
    out = jax.block_until_ready(out)

    ref = reference_forward(x, y, params)
    assert out.shape == (B, OUT)
    # bf16 weights/activations with f32 accumulation: loosen tolerance vs f32 ref.
    max_err = float(jnp.max(jnp.abs(out - ref)))
    assert jnp.allclose(out, ref, atol=5e-2, rtol=5e-2), max_err

    print("KERNEL_OK")
</pallas_src>

<mosaic_0001>
module attributes {stable_mosaic.version = 11 : i64} {
  func.func @aspectnet_kernel(%arg0: i32, %arg1: memref<8x64xf32, #tpu.memory_space<vmem>>, %arg2: memref<8x1000xf32, #tpu.memory_space<vmem>>, %arg3: memref<64x4000xbf16, #tpu.memory_space<vmem>>, %arg4: memref<1x4000xf32, #tpu.memory_space<vmem>>, %arg5: memref<4000x512xbf16, #tpu.memory_space<vmem>>, %arg6: memref<1000x512xbf16, #tpu.memory_space<vmem>>, %arg7: memref<1x512xf32, #tpu.memory_space<vmem>>, %arg8: memref<512x40xbf16, #tpu.memory_space<vmem>>, %arg9: memref<1x40xf32, #tpu.memory_space<vmem>>, %arg10: memref<40x5xbf16, #tpu.memory_space<vmem>>, %arg11: memref<1x5xf32, #tpu.memory_space<vmem>>, %arg12: memref<8x5xf32, #tpu.memory_space<vmem>>) attributes {dimension_semantics = [#tpu.dimension_semantics<parallel>], iteration_bounds = array<i64: 1>, scalar_prefetch = 0 : i64, scratch_operands = 0 : i64, tpu.core_type = #tpu.core_type<tc>, window_params = [{transform_indices = @transform_0, window_bounds = array<i64: 8, 64>}, {transform_indices = @transform_1, window_bounds = array<i64: 8, 1000>}, {pipeline_mode = #tpu.pipeline_mode<synchronous>, transform_indices = @transform_2, window_bounds = array<i64: 64, 4000>}, {pipeline_mode = #tpu.pipeline_mode<synchronous>, transform_indices = @transform_3, window_bounds = array<i64: 1, 4000>}, {pipeline_mode = #tpu.pipeline_mode<synchronous>, transform_indices = @transform_4, window_bounds = array<i64: 4000, 512>}, {pipeline_mode = #tpu.pipeline_mode<synchronous>, transform_indices = @transform_5, window_bounds = array<i64: 1000, 512>}, {pipeline_mode = #tpu.pipeline_mode<synchronous>, transform_indices = @transform_6, window_bounds = array<i64: 1, 512>}, {pipeline_mode = #tpu.pipeline_mode<synchronous>, transform_indices = @transform_7, window_bounds = array<i64: 512, 40>}, {pipeline_mode = #tpu.pipeline_mode<synchronous>, transform_indices = @transform_8, window_bounds = array<i64: 1, 40>}, {pipeline_mode = #tpu.pipeline_mode<synchronous>, transform_indices = @transform_9, window_bounds = array<i64: 40, 5>}, {pipeline_mode = #tpu.pipeline_mode<synchronous>, transform_indices = @transform_10, window_bounds = array<i64: 1, 5>}, {transform_indices = @transform_11, window_bounds = array<i64: 8, 5>}]} {
    %c0 = arith.constant 0 : index
    %c0_0 = arith.constant 0 : index
    %0 = vector.load %arg1[%c0, %c0_0] : memref<8x64xf32, #tpu.memory_space<vmem>>, vector<8x64xf32>
    %1 = arith.truncf %0 : vector<8x64xf32> to vector<8x64xbf16>
    %c0_1 = arith.constant 0 : index
    %c0_2 = arith.constant 0 : index
    %2 = vector.load %arg2[%c0_1, %c0_2] : memref<8x1000xf32, #tpu.memory_space<vmem>>, vector<8x1000xf32>
    %3 = arith.truncf %2 : vector<8x1000xf32> to vector<8x1000xbf16>
    %c0_3 = arith.constant 0 : index
    %c0_4 = arith.constant 0 : index
    %4 = vector.load %arg3[%c0_3, %c0_4] : memref<64x4000xbf16, #tpu.memory_space<vmem>>, vector<64x4000xbf16>
    %cst = arith.constant dense<0.000000e+00> : vector<8x4000xf32>
    %5 = tpu.matmul %1, %4, %cst {dimension_numbers = #tpu.dot_dimension_numbers<[1], [0], [0], [1], [0, 0, 1, 1], [], []>} : vector<8x64xbf16>, vector<64x4000xbf16>, vector<8x4000xf32> -> vector<8x4000xf32>
    %c0_5 = arith.constant 0 : index
    %c0_6 = arith.constant 0 : index
    %6 = vector.load %arg4[%c0_5, %c0_6] : memref<1x4000xf32, #tpu.memory_space<vmem>>, vector<1x4000xf32>
    %7 = vector.broadcast %6 : vector<1x4000xf32> to vector<8x4000xf32>
    %8 = arith.addf %5, %7 : vector<8x4000xf32>
    %cst_7 = arith.constant 0.000000e+00 : f32
    %9 = vector.broadcast %cst_7 : f32 to vector<8x4000xf32>
    %10 = arith.maximumf %8, %9 : vector<8x4000xf32>
    %11 = arith.truncf %10 : vector<8x4000xf32> to vector<8x4000xbf16>
    %c0_8 = arith.constant 0 : index
    %c0_9 = arith.constant 0 : index
    %12 = vector.load %arg5[%c0_8, %c0_9] : memref<4000x512xbf16, #tpu.memory_space<vmem>>, vector<4000x512xbf16>
    %cst_10 = arith.constant dense<0.000000e+00> : vector<8x512xf32>
    %13 = tpu.matmul %11, %12, %cst_10 {dimension_numbers = #tpu.dot_dimension_numbers<[1], [0], [0], [1], [0, 0, 1, 1], [], []>} : vector<8x4000xbf16>, vector<4000x512xbf16>, vector<8x512xf32> -> vector<8x512xf32>
    %c0_11 = arith.constant 0 : index
    %c0_12 = arith.constant 0 : index
    %14 = vector.load %arg6[%c0_11, %c0_12] : memref<1000x512xbf16, #tpu.memory_space<vmem>>, vector<1000x512xbf16>
    %cst_13 = arith.constant dense<0.000000e+00> : vector<8x512xf32>
    %15 = tpu.matmul %3, %14, %cst_13 {dimension_numbers = #tpu.dot_dimension_numbers<[1], [0], [0], [1], [0, 0, 1, 1], [], []>} : vector<8x1000xbf16>, vector<1000x512xbf16>, vector<8x512xf32> -> vector<8x512xf32>
    %16 = arith.addf %13, %15 : vector<8x512xf32>
    %c0_14 = arith.constant 0 : index
    %c0_15 = arith.constant 0 : index
    %17 = vector.load %arg7[%c0_14, %c0_15] : memref<1x512xf32, #tpu.memory_space<vmem>>, vector<1x512xf32>
    %18 = vector.broadcast %17 : vector<1x512xf32> to vector<8x512xf32>
    %19 = arith.addf %16, %18 : vector<8x512xf32>
    %cst_16 = arith.constant 0.000000e+00 : f32
    %20 = vector.broadcast %cst_16 : f32 to vector<8x512xf32>
    %21 = arith.maximumf %19, %20 : vector<8x512xf32>
    %22 = arith.truncf %21 : vector<8x512xf32> to vector<8x512xbf16>
    %c0_17 = arith.constant 0 : index
    %c0_18 = arith.constant 0 : index
    %23 = vector.load %arg8[%c0_17, %c0_18] : memref<512x40xbf16, #tpu.memory_space<vmem>>, vector<512x40xbf16>
    %cst_19 = arith.constant dense<0.000000e+00> : vector<8x40xf32>
    %24 = tpu.matmul %22, %23, %cst_19 {dimension_numbers = #tpu.dot_dimension_numbers<[1], [0], [0], [1], [0, 0, 1, 1], [], []>} : vector<8x512xbf16>, vector<512x40xbf16>, vector<8x40xf32> -> vector<8x40xf32>
    %c0_20 = arith.constant 0 : index
    %c0_21 = arith.constant 0 : index
    %25 = vector.load %arg9[%c0_20, %c0_21] : memref<1x40xf32, #tpu.memory_space<vmem>>, vector<1x40xf32>
    %26 = vector.broadcast %25 : vector<1x40xf32> to vector<8x40xf32>
    %27 = arith.addf %24, %26 : vector<8x40xf32>
    %cst_22 = arith.constant 0.000000e+00 : f32
    %28 = vector.broadcast %cst_22 : f32 to vector<8x40xf32>
    %29 = arith.maximumf %27, %28 : vector<8x40xf32>
    %30 = arith.truncf %29 : vector<8x40xf32> to vector<8x40xbf16>
    %c0_23 = arith.constant 0 : index
    %c0_24 = arith.constant 0 : index
    %31 = vector.load %arg10[%c0_23, %c0_24] : memref<40x5xbf16, #tpu.memory_space<vmem>>, vector<40x5xbf16>
    %cst_25 = arith.constant dense<0.000000e+00> : vector<8x5xf32>
    %32 = tpu.matmul %30, %31, %cst_25 {dimension_numbers = #tpu.dot_dimension_numbers<[1], [0], [0], [1], [0, 0, 1, 1], [], []>} : vector<8x40xbf16>, vector<40x5xbf16>, vector<8x5xf32> -> vector<8x5xf32>
    %c0_26 = arith.constant 0 : index
    %c0_27 = arith.constant 0 : index
    %33 = vector.load %arg11[%c0_26, %c0_27] : memref<1x5xf32, #tpu.memory_space<vmem>>, vector<1x5xf32>
    %34 = vector.broadcast %33 : vector<1x5xf32> to vector<8x5xf32>
    %35 = arith.addf %32, %34 : vector<8x5xf32>
    %c0_28 = arith.constant 0 : index
    %c0_29 = arith.constant 0 : index
    %36 = vector.load %arg12[%c0_28, %c0_29] : memref<8x5xf32, #tpu.memory_space<vmem>>, vector<8x5xf32>
    tpu.vector_store %arg12[%c0_28, %c0_29], %35 {strides = array<i32>} : memref<8x5xf32, #tpu.memory_space<vmem>>, vector<8x5xf32>,
    return
  }
  func.func @transform_0(%arg0: i32) -> (i32, i32) {
    %c0_i32 = arith.constant 0 : i32
    %c0_i32_0 = arith.constant 0 : i32
    return %arg0, %c0_i32 : i32, i32
  }
  func.func @transform_1(%arg0: i32) -> (i32, i32) {
    %c0_i32 = arith.constant 0 : i32
    %c0_i32_0 = arith.constant 0 : i32
    return %arg0, %c0_i32 : i32, i32
  }
  func.func @transform_2(%arg0: i32) -> (i32, i32) {
    %c0_i32 = arith.constant 0 : i32
    %c0_i32_0 = arith.constant 0 : i32
    %c0_i32_1 = arith.constant 0 : i32
    return %c0_i32, %c0_i32_0 : i32, i32
  }
  func.func @transform_3(%arg0: i32) -> (i32, i32) {
    %c0_i32 = arith.constant 0 : i32
    %c0_i32_0 = arith.constant 0 : i32
    %c0_i32_1 = arith.constant 0 : i32
    return %c0_i32, %c0_i32_0 : i32, i32
  }
  func.func @transform_4(%arg0: i32) -> (i32, i32) {
    %c0_i32 = arith.constant 0 : i32
    %c0_i32_0 = arith.constant 0 : i32
    %c0_i32_1 = arith.constant 0 : i32
    return %c0_i32, %c0_i32_0 : i32, i32
  }
  func.func @transform_5(%arg0: i32) -> (i32, i32) {
    %c0_i32 = arith.constant 0 : i32
    %c0_i32_0 = arith.constant 0 : i32
    %c0_i32_1 = arith.constant 0 : i32
    return %c0_i32, %c0_i32_0 : i32, i32
  }
  func.func @transform_6(%arg0: i32) -> (i32, i32) {
    %c0_i32 = arith.constant 0 : i32
    %c0_i32_0 = arith.constant 0 : i32
    %c0_i32_1 = arith.constant 0 : i32
    return %c0_i32, %c0_i32_0 : i32, i32
  }
  func.func @transform_7(%arg0: i32) -> (i32, i32) {
    %c0_i32 = arith.constant 0 : i32
    %c0_i32_0 = arith.constant 0 : i32
    %c0_i32_1 = arith.constant 0 : i32
    return %c0_i32, %c0_i32_0 : i32, i32
  }
  func.func @transform_8(%arg0: i32) -> (i32, i32) {
    %c0_i32 = arith.constant 0 : i32
    %c0_i32_0 = arith.constant 0 : i32
    %c0_i32_1 = arith.constant 0 : i32
    return %c0_i32, %c0_i32_0 : i32, i32
  }
  func.func @transform_9(%arg0: i32) -> (i32, i32) {
    %c0_i32 = arith.constant 0 : i32
    %c0_i32_0 = arith.constant 0 : i32
    %c0_i32_1 = arith.constant 0 : i32
    return %c0_i32, %c0_i32_0 : i32, i32
  }
  func.func @transform_10(%arg0: i32) -> (i32, i32) {
    %c0_i32 = arith.constant 0 : i32
    %c0_i32_0 = arith.constant 0 : i32
    %c0_i32_1 = arith.constant 0 : i32
    return %c0_i32, %c0_i32_0 : i32, i32
  }
  func.func @transform_11(%arg0: i32) -> (i32, i32) {
    %c0_i32 = arith.constant 0 : i32
    %c0_i32_0 = arith.constant 0 : i32
    return %arg0, %c0_i32 : i32, i32
  }
}

</mosaic_0001>

<bundles_post_ra>
// kernel: aspectnet_forward.1
= control target key start
LH: loop header
LB: loop body
LE: loop exit
PB: predicated region body
PF: predicated region fallthrough
CT: control target
= control target key end

     0   :  { %16 = vsyncpa [#allocation3], 0  ;;  %s19686_s0 = inlined_call_operand.hbm [shape: f32[8,64], index: 0, kind: input, shape index: {}]   ;;  %s19687_s1 = inlined_call_operand.hbm [shape: f32[8,1000], index: 1, kind: input, shape index: {}]   ;;  %s19688_s2 = inlined_call_operand.hbm [shape: bf16[64,4000], index: 2, kind: input, shape index: {}]   ;;  %s19689_s3 = inlined_call_operand.hbm [shape: f32[1,4000], index: 3, kind: input, shape index: {}]   ;;  %s19690_s4 = inlined_call_operand.hbm [shape: bf16[4000,512], index: 4, kind: input, shape index: {}]   ;;  %s19691_s5 = inlined_call_operand.hbm [shape: bf16[1000,512], index: 5, kind: input, shape index: {}]   ;;  %s19692_s6 = inlined_call_operand.hbm [shape: f32[1,512], index: 6, kind: input, shape index: {}]   ;;  %s19693_s7 = inlined_call_operand.vmem [shape: bf16[512,40], index: 7, kind: input, shape index: {}]   ;;  %s19694_s8 = inlined_call_operand.hbm [shape: f32[1,40], index: 8, kind: input, shape index: {}]   ;;  %s19695_s9 = inlined_call_operand.vmem [shape: bf16[40,5], index: 9, kind: input, shape index: {}]   ;;  %s19696_s10 = inlined_call_operand.hbm [shape: f32[1,5], index: 10, kind: input, shape index: {}]   ;;  %s19697_s11 = inlined_call_operand.hbm [shape: f32[8,5], index: 11, kind: output, shape index: {}]  }
   0x1   :  { %17 = vsyncpa [#allocation6], 0 }
   0x2   :  { %18 = vsyncpa [#allocation9], 0 }
   0x3   :  { %19 = vsyncpa [#allocation12], 0 }
   0x4   :  { %20 = vsyncpa [#allocation15], 0  ;;  %s38_s19 = sshll.u32 %s19687_s1, 4  ;;  %s39_s19 = int_to_ptr.hbm [resolvable:$true] %s38_s19 }
   0x5   :  { %21 = vsyncpa [#allocation4], 0  ;;  %s18873_s20 = smov [#allocation5]   ;;  %s62_s24 = sshll.u32 %s19689_s3, 4  ;;  %s63_s24 = int_to_ptr.hbm [resolvable:$true] %s62_s24 }
   0x6   :  { %s40_s21 = sshll.u32 %s18873_s20, 4  ;;  %s18874_s25 = smov [#allocation8]   ;;  %s41_s21 = int_to_ptr.vmem [resolvable:$true] %s40_s21 }
   0x7   :  { %43 = dma.hbm_to_vmem [thread:$0]  %s39_s19, 1024, %s41_s21, [#allocation6]  }
   0x8   :  { %s64_s26 = sshll.u32 %s18874_s25, 4  ;;  %s85_s29 = sshll.u32 %s19691_s5, 4  ;;  %s65_s26 = int_to_ptr.vmem [resolvable:$true] %s64_s26  ;;  %s86_s29 = int_to_ptr.hbm [resolvable:$true] %s85_s29 }
   0x9   :  { %67 = dma.hbm_to_vmem [thread:$0]  %s63_s24, 512, %s65_s26, [#allocation9]  }
   0xa   :  { %s18875_s1 = smov [#allocation11]   ;;  %s112_s14 = sshll.u32 %s19694_s8, 4  ;;  %s113_s14 = int_to_ptr.hbm [resolvable:$true] %s112_s14 }
   0xb   :  { %s87_s30 = sshll.u32 %s18875_s1, 4  ;;  %s18876_s15 = smov 256   ;;  %s88_s30 = int_to_ptr.vmem [resolvable:$true] %s87_s30 }
   0xc   :  { %s18877_s3 = smov 16   ;;  %s18878_s16 = smov [#allocation14]  }
   0xd   :  { %93 = dma.hbm_to_vmem [thread:$0]  %s86_s29, 32000, %s88_s30, [#allocation12], %s18876_s15, %s18876_s15, %s18877_s3  }
   0xe   :  { %s114_s17 = sshll.u32 %s18878_s16, 4  ;;  %s27_s5 = sshll.u32 %s19686_s0, 4  ;;  %s115_s17 = int_to_ptr.vmem [resolvable:$true] %s114_s17  ;;  %s28_s5 = int_to_ptr.hbm [resolvable:$true] %s27_s5 }
   0xf   :  { %117 = dma.hbm_to_vmem [thread:$0]  %s113_s14, 16, %s115_s17, [#allocation15]  }
  0x10   :  { %s48_s8 = sshll.u32 %s19688_s2, 4  ;;  %s18879_s22 = smov [#allocation2]   ;;  %s49_s8 = int_to_ptr.hbm [resolvable:$true] %s48_s8 }
  0x11   :  { %s29_s23 = sshll.u32 %s18879_s22, 4  ;;  %s18880_s24 = smov [#allocation7]   ;;  %s30_s23 = int_to_ptr.vmem [resolvable:$true] %s29_s23 }
  0x12   :  { %32 = dma.hbm_to_vmem [thread:$0]  %s28_s5, 128, %s30_s23, [#allocation3]  }
  0x13   :  { %s50_s25 = sshll.u32 %s18880_s24, 4  ;;  %s18881_s26 = smov 2048   ;;  %s51_s25 = int_to_ptr.vmem [resolvable:$true] %s50_s25 }
  0x14   :  { %s18882_s27 = smov 128   ;;  %s72_s29 = sshll.u32 %s19690_s4, 4  ;;  %s73_s29 = int_to_ptr.hbm [resolvable:$true] %s72_s29 }
  0x15   :  { %56 = dma.hbm_to_vmem [thread:$0]  %s49_s8, 16384, %s51_s25, [#allocation6], %s18881_s26, %s18881_s26, %s18882_s27  }
  0x16   :  { %s18883_s1 = smov [#allocation10]   ;;  %s99_s13 = sshll.u32 %s19692_s6, 4  ;;  %s100_s13 = int_to_ptr.hbm [resolvable:$true] %s99_s13 }
  0x17   :  { %s74_s30 = sshll.u32 %s18883_s1, 4  ;;  %s18884_s14 = smov [#allocation13]   ;;  %s75_s30 = int_to_ptr.vmem [resolvable:$true] %s74_s30 }
  0x18   :  { %80 = dma.hbm_to_vmem [thread:$0]  %s73_s29, 128000, %s75_s30, [#allocation9], %s18876_s15, %s18876_s15, %s18877_s3  }
  0x19   :  { %s101_s16 = sshll.u32 %s18884_s14, 4  ;;  %s125_s19 = sshll.u32 %s19696_s10, 4  ;;  %s102_s16 = int_to_ptr.vmem [resolvable:$true] %s101_s16  ;;  %s126_s19 = int_to_ptr.hbm [resolvable:$true] %s125_s19 }
  0x1a   :  { %104 = dma.hbm_to_vmem [thread:$0]  %s100_s13, 64, %s102_s16, [#allocation12]  }
  0x1b   :  { %s18885_s4 = smov [#allocation16]  }
  0x1c   :  { %s127_s5 = sshll.u32 %s18885_s4, 4  ;;  %s128_s5 = int_to_ptr.vmem [resolvable:$true] %s127_s5 }
  0x1d   :  { %130 = dma.hbm_to_vmem [thread:$0]  %s126_s19, 16, %s128_s5, [#allocation15]  }
  0x1e   :  { %18861 = dma.done.wait [#allocation3], 128  }
  0x1f   :  { %18862 = vsyncadd [#allocation3], 4294967168 }
  0x20   :  { %18863 = dma.done.wait [#allocation6], 17408  }
  0x21   :  { %18864 = vsyncadd [#allocation6], 4294949888 }
  0x22   :  { %18865 = dma.done.wait [#allocation9], 128512  }
  0x23   :  { %18866 = vsyncadd [#allocation9], 4294838784 }
  0x24   :  { %18867 = dma.done.wait [#allocation12], 32064  }
  0x25   :  { %18868 = vsyncadd [#allocation12], 4294935232 }
  0x26   :  { %18869 = dma.done.wait [#allocation15], 32  }
  0x27   :  { %18870 = vsyncadd [#allocation15], 4294967264  ;;  %v11900_v0 = vld [vmem:[#allocation7 + $0x300] sm:$0xf]  ;;  %v17291_v2 = vld [vmem:[#allocation7 + $0x304] sm:$0xf] }
  0x28   :  { %v17307_v1 = vld [vmem:[#allocation7 + $0x37c] sm:$0xf0]  ;;  %v11902_v4 = vld [vmem:[#allocation7 + $0x380] sm:$0xf0]  ;;  %v11908_v5 = vld [vmem:[#allocation7 + $0x308] sm:$0xf] }
  0x29   :  { %v11901_v3 = vor.u32 %v17307_v1, %v11900_v0  ;;  %v17308_v6 = vld [vmem:[#allocation7 + $0x384] sm:$0xf0]  ;;  %v11905_v7 = vor.u32 %v17291_v2, %v11902_v4  ;;  %v17292_v9 = vld [vmem:[#allocation7 + $0x30c] sm:$0xf]  ;;  %v11772_v11 = vld [vmem:[#allocation7 + $0x200] sm:$0xf] }
  0x2a   :  { %v11909_v8 = vor.u32 %v17308_v6, %v11908_v5  ;;  %v11910_v10 = vld [vmem:[#allocation7 + $0x388] sm:$0xf0]  ;;  %v17275_v13 = vld [vmem:[#allocation7 + $0x27c] sm:$0xf0]  ;;  %v17259_v14 = vld [vmem:[#allocation7 + $0x204] sm:$0xf] }
  0x2b   :  { %1034 = vmatpush.bf16.msra.mxu0 %v11901_v3  ;;  %v11913_v12 = vor.u32 %v17292_v9, %v11910_v10  ;;  %v11774_v15 = vld [vmem:[#allocation7 + $0x280] sm:$0xf0]  ;;  %1047 = vmatpush.bf16.msra.mxu1 %v11905_v7  ;;  %v11773_v16 = vor.u32 %v17275_v13, %v11772_v11  ;;  %v11780_v18 = vld [vmem:[#allocation7 + $0x208] sm:$0xf]  ;;  %v17260_v20 = vld [vmem:[#allocation7 + $0x20c] sm:$0xf] }
  0x2c   :  { %1060 = vmatpush.bf16.msra.mxu2 %v11909_v8  ;;  %v11777_v17 = vor.u32 %v17259_v14, %v11774_v15  ;;  %v17276_v19 = vld [vmem:[#allocation7 + $0x284] sm:$0xf0]  ;;  %v11782_v22 = vld [vmem:[#allocation7 + $0x288] sm:$0xf0]  ;;  %v11644_v23 = vld [vmem:[#allocation7 + $0x100] sm:$0xf] }
  0x2d   :  { %1073 = vmatpush.bf16.msra.mxu3 %v11913_v12  ;;  %v11781_v21 = vor.u32 %v17276_v19, %v11780_v18  ;;  %v17243_v24 = vld [vmem:[#allocation7 + $0x17c] sm:$0xf0]  ;;  %v11785_v25 = vor.u32 %v17260_v20, %v11782_v22  ;;  %v17227_v26 = vld [vmem:[#allocation7 + $0x104] sm:$0xf]  ;;  %v11652_v28 = vld [vmem:[#allocation7 + $0x108] sm:$0xf] }
  0x2e   :  { %v11646_v27 = vld [vmem:[#allocation7 + $0x180] sm:$0xf0]  ;;  %v11645_v29 = vor.u32 %v17243_v24, %v11644_v23  ;;  %v17244_v30 = vld [vmem:[#allocation7 + $0x184] sm:$0xf0]  ;;  %v17228_v31 = vld [vmem:[#allocation7 + $0x10c] sm:$0xf] }
  0x2f   :  { %1035 = vmatpush.bf16.msra.mxu0 %v11773_v16  ;;  %v11654_v32 = vld [vmem:[#allocation7 + $0x188] sm:$0xf0]  ;;  %1048 = vmatpush.bf16.msra.mxu1 %v11777_v17  ;;  %v11649_v33 = vor.u32 %v17227_v26, %v11646_v27  ;;  %v11653_v34 = vor.u32 %v17244_v30, %v11652_v28  ;;  %v11516_v35 = vld [vmem:[#allocation7] sm:$0xf]  ;;  %v17195_v37 = vld [vmem:[#allocation7 + $0x4] sm:$0xf] }
  0x30   :  { %1061 = vmatpush.bf16.msra.mxu2 %v11781_v21  ;;  %v17211_v36 = vld [vmem:[#allocation7 + $0x7c] sm:$0xf0]  ;;  %v11657_v38 = vor.u32 %v17228_v31, %v11654_v32  ;;  %v11518_v39 = vld [vmem:[#allocation7 + $0x80] sm:$0xf0]  ;;  %v11524_v40 = vld [vmem:[#allocation7 + $0x8] sm:$0xf] }
  0x31   :  { %1074 = vmatpush.bf16.msra.mxu3 %v11785_v25  ;;  %v17212_v41 = vld [vmem:[#allocation7 + $0x84] sm:$0xf0]  ;;  %v17196_v42 = vld [vmem:[#allocation7 + $0xc] sm:$0xf]  ;;  %v168_v44 = vld [vmem:[#allocation2] sm:$0xff]  ;;  %v11517_v45 = vor.u32 %v17211_v36, %v11516_v35  ;;  %v11521_v49 = vor.u32 %v17195_v37, %v11518_v39  ;;  %vm1026_vm0 = vcmask 523264  }
  0x32   :  { %v11526_v43 = vld [vmem:[#allocation7 + $0x88] sm:$0xf0]  ;;  %v11916_v46 = vld [vmem:[#allocation7 + $0x310] sm:$0xf]  ;;  %v17293_v48 = vld [vmem:[#allocation7 + $0x314] sm:$0xf]  ;;  %v11525_v50 = vor.u32 %v17212_v41, %v11524_v40  ;;  %v18980_v57 = vpack.c.bf16 %v168_v44, %v168_v44 }
  0x33   :  { %1036 = vmatpush.bf16.msra.mxu0 %v11645_v29  ;;  %v17309_v47 = vld [vmem:[#allocation7 + $0x38c] sm:$0xf0]  ;;  %1049 = vmatpush.bf16.msra.mxu1 %v11649_v33  ;;  %v11918_v51 = vld [vmem:[#allocation7 + $0x390] sm:$0xf0]  ;;  %v11529_v52 = vor.u32 %v17196_v42, %v11526_v43  ;;  %v11924_v54 = vld [vmem:[#allocation7 + $0x318] sm:$0xf] }
  0x34   :  { %1062 = vmatpush.bf16.msra.mxu2 %v11653_v34  ;;  %v11917_v53 = vor.u32 %v17309_v47, %v11916_v46  ;;  %v17310_v55 = vld [vmem:[#allocation7 + $0x394] sm:$0xf0]  ;;  %v17294_v56 = vld [vmem:[#allocation7 + $0x31c] sm:$0xf]  ;;  %v11921_v58 = vor.u32 %v17293_v48, %v11918_v51  ;;  %v11788_v60 = vld [vmem:[#allocation7 + $0x210] sm:$0xf] }
  0x35   :  { %1075 = vmatpush.bf16.msra.mxu3 %v11657_v38  ;;  %v11926_v59 = vld [vmem:[#allocation7 + $0x398] sm:$0xf0]  ;;  %v17277_v61 = vld [vmem:[#allocation7 + $0x28c] sm:$0xf0]  ;;  %v17261_v62 = vld [vmem:[#allocation7 + $0x214] sm:$0xf]  ;;  %v11925_v0 = vor.u32 %v17310_v55, %v11924_v54 }
  0x36   :  { %v11790_v63 = vld [vmem:[#allocation7 + $0x290] sm:$0xf0]  ;;  %v11929_v1 = vor.u32 %v17294_v56, %v11926_v59  ;;  %v11789_v2 = vor.u32 %v17277_v61, %v11788_v60  ;;  %v11796_v3 = vld [vmem:[#allocation7 + $0x218] sm:$0xf]  ;;  %v17262_v5 = vld [vmem:[#allocation7 + $0x21c] sm:$0xf] }
  0x37   :  { %1037 = vmatpush.bf16.msra.mxu0 %v11517_v45  ;;  %1050 = vmatpush.bf16.msra.mxu1 %v11521_v49  ;;  %v17278_v4 = vld [vmem:[#allocation7 + $0x294] sm:$0xf0]  ;;  %v11793_v6 = vor.u32 %v17261_v62, %v11790_v63  ;;  %v11798_v7 = vld [vmem:[#allocation7 + $0x298] sm:$0xf0]  ;;  %v11660_v8 = vld [vmem:[#allocation7 + $0x110] sm:$0xf] }
  0x38   :  { %1063 = vmatpush.bf16.msra.mxu2 %v11525_v50  ;;  %v17245_v9 = vld [vmem:[#allocation7 + $0x18c] sm:$0xf0]  ;;  %v17229_v10 = vld [vmem:[#allocation7 + $0x114] sm:$0xf]  ;;  %v11797_v12 = vor.u32 %v17278_v4, %v11796_v3  ;;  %v11668_v13 = vld [vmem:[#allocation7 + $0x118] sm:$0xf]  ;;  %v11801_v14 = vor.u32 %v17262_v5, %v11798_v7 }
  0x39   :  { %1076 = vmatpush.bf16.msra.mxu3 %v11529_v52  ;;  %v11662_v11 = vld [vmem:[#allocation7 + $0x190] sm:$0xf0]  ;;  %v11661_v15 = vor.u32 %v17245_v9, %v11660_v8  ;;  %v17246_v16 = vld [vmem:[#allocation7 + $0x194] sm:$0xf0]  ;;  %v17230_v17 = vld [vmem:[#allocation7 + $0x11c] sm:$0xf] }
  0x3a   :  { %12026 = vmatmul.msk.bf16.vlgmr.msra.gmra.mxu0 %vm1026_vm0, %v18980_v57  ;;  %12027 = vmatmul.msk.bf16.vlgmr.msra.gmra.mxu1 %vm1026_vm0, %v18980_v57  ;;  %v11670_v18 = vld [vmem:[#allocation7 + $0x198] sm:$0xf0]  ;;  %v11665_v19 = vor.u32 %v17229_v10, %v11662_v11  ;;  %v11532_v20 = vld [vmem:[#allocation7 + $0x10] sm:$0xf]  ;;  %v17197_v22 = vld [vmem:[#allocation7 + $0x14] sm:$0xf]  ;;  %v11669_v26 = vor.u32 %v17246_v16, %v11668_v13 }
  0x3b   :  { %1086 = vmatpush.bf16.msrb.mxu0 %v11917_v53  ;;  %1099 = vmatpush.bf16.msrb.mxu1 %v11921_v58  ;;  %v17213_v21 = vld [vmem:[#allocation7 + $0x8c] sm:$0xf0]  ;;  %v11534_v23 = vld [vmem:[#allocation7 + $0x90] sm:$0xf0]  ;;  %v11932_v24 = vld [vmem:[#allocation7 + $0x320] sm:$0xf]  ;;  %v11673_v29 = vor.u32 %v17230_v17, %v11670_v18 }
  0x3c   :  { %12028 = vmatmul.msk.bf16.vlgmr.msra.gmra.mxu2 %vm1026_vm0, %v18980_v57  ;;  %12029 = vmatmul.msk.bf16.vlgmr.msra.gmra.mxu3 %vm1026_vm0, %v18980_v57  ;;  %v17311_v25 = vld [vmem:[#allocation7 + $0x39c] sm:$0xf0]  ;;  %v17295_v27 = vld [vmem:[#allocation7 + $0x324] sm:$0xf]  ;;  %v11533_v30 = vor.u32 %v17213_v21, %v11532_v20  ;;  %v11540_v31 = vld [vmem:[#allocation7 + $0x18] sm:$0xf]  ;;  %v11537_v34 = vor.u32 %v17197_v22, %v11534_v23 }
  0x3d   :  { %1112 = vmatpush.bf16.msrb.mxu2 %v11925_v0  ;;  %1125 = vmatpush.bf16.msrb.mxu3 %v11929_v1  ;;  %v11934_v28 = vld [vmem:[#allocation7 + $0x3a0] sm:$0xf0]  ;;  %v17214_v32 = vld [vmem:[#allocation7 + $0x94] sm:$0xf0]  ;;  %v17198_v33 = vld [vmem:[#allocation7 + $0x1c] sm:$0xf]  ;;  %v11933_v36 = vor.u32 %v17311_v25, %v11932_v24 }
  0x3e   :  { %v11542_v35 = vld [vmem:[#allocation7 + $0x98] sm:$0xf0]  ;;  %v11940_v37 = vld [vmem:[#allocation7 + $0x328] sm:$0xf]  ;;  %v11937_v39 = vor.u32 %v17295_v27, %v11934_v28  ;;  %v17296_v40 = vld [vmem:[#allocation7 + $0x32c] sm:$0xf]  ;;  %v11541_v42 = vor.u32 %v17214_v32, %v11540_v31 }
  0x3f   :  { %1087 = vmatpush.bf16.msrb.mxu0 %v11789_v2  ;;  %1100 = vmatpush.bf16.msrb.mxu1 %v11793_v6  ;;  %v17312_v38 = vld [vmem:[#allocation7 + $0x3a4] sm:$0xf0]  ;;  %v11942_v41 = vld [vmem:[#allocation7 + $0x3a8] sm:$0xf0]  ;;  %v11545_v43 = vor.u32 %v17198_v33, %v11542_v35  ;;  %v11804_v45 = vld [vmem:[#allocation7 + $0x220] sm:$0xf] }
  0x40   :  { %v11941_v44 = vor.u32 %v17312_v38, %v11940_v37  ;;  %v17279_v46 = vld [vmem:[#allocation7 + $0x29c] sm:$0xf0]  ;;  %v17263_v47 = vld [vmem:[#allocation7 + $0x224] sm:$0xf]  ;;  %v11945_v48 = vor.u32 %v17296_v40, %v11942_v41  ;;  %v11812_v50 = vld [vmem:[#allocation7 + $0x228] sm:$0xf] }
  0x41   :  { %1113 = vmatpush.bf16.msrb.mxu2 %v11797_v12  ;;  %1126 = vmatpush.bf16.msrb.mxu3 %v11801_v14  ;;  %v11806_v49 = vld [vmem:[#allocation7 + $0x2a0] sm:$0xf0]  ;;  %v17280_v51 = vld [vmem:[#allocation7 + $0x2a4] sm:$0xf0]  ;;  %v17264_v52 = vld [vmem:[#allocation7 + $0x22c] sm:$0xf]  ;;  %v11805_v54 = vor.u32 %v17279_v46, %v11804_v45 }
  0x42   :  { %v11814_v53 = vld [vmem:[#allocation7 + $0x2a8] sm:$0xf0]  ;;  %v11809_v55 = vor.u32 %v17263_v47, %v11806_v49  ;;  %v11813_v56 = vor.u32 %v17280_v51, %v11812_v50  ;;  %v11676_v58 = vld [vmem:[#allocation7 + $0x120] sm:$0xf]  ;;  %v17231_v60 = vld [vmem:[#allocation7 + $0x124] sm:$0xf] }
  0x43   :  { %1088 = vmatpush.bf16.msrb.mxu0 %v11661_v15  ;;  %1101 = vmatpush.bf16.msrb.mxu1 %v11665_v19  ;;  %v17247_v59 = vld [vmem:[#allocation7 + $0x19c] sm:$0xf0]  ;;  %v11817_v61 = vor.u32 %v17264_v52, %v11814_v53  ;;  %v11678_v62 = vld [vmem:[#allocation7 + $0x1a0] sm:$0xf0]  ;;  %v11684_v63 = vld [vmem:[#allocation7 + $0x128] sm:$0xf] }
  0x44   :  { %v17248_v0 = vld [vmem:[#allocation7 + $0x1a4] sm:$0xf0]  ;;  %v17232_v1 = vld [vmem:[#allocation7 + $0x12c] sm:$0xf]  ;;  %v11677_v3 = vor.u32 %v17247_v59, %v11676_v58  ;;  %v11548_v4 = vld [vmem:[#allocation7 + $0x20] sm:$0xf]  ;;  %v11681_v6 = vor.u32 %v17231_v60, %v11678_v62 }
  0x45   :  { %1114 = vmatpush.bf16.msrb.mxu2 %v11669_v26  ;;  %1127 = vmatpush.bf16.msrb.mxu3 %v11673_v29  ;;  %v11686_v2 = vld [vmem:[#allocation7 + $0x1a8] sm:$0xf0]  ;;  %v17215_v5 = vld [vmem:[#allocation7 + $0x9c] sm:$0xf0]  ;;  %v11685_v7 = vor.u32 %v17248_v0, %v11684_v63  ;;  %v17199_v8 = vld [vmem:[#allocation7 + $0x24] sm:$0xf] }
  0x46   :  { %v11550_v9 = vld [vmem:[#allocation7 + $0xa0] sm:$0xf0]  ;;  %v11556_v10 = vld [vmem:[#allocation7 + $0x28] sm:$0xf]  ;;  %v11689_v11 = vor.u32 %v17232_v1, %v11686_v2  ;;  %v17200_v13 = vld [vmem:[#allocation7 + $0x2c] sm:$0xf]  ;;  %v11549_v18 = vor.u32 %v17215_v5, %v11548_v4 }
  0x47   :  { %1089 = vmatpush.bf16.msrb.mxu0 %v11533_v30  ;;  %1102 = vmatpush.bf16.msrb.mxu1 %v11537_v34  ;;  %v17216_v12 = vld [vmem:[#allocation7 + $0xa4] sm:$0xf0]  ;;  %v11558_v14 = vld [vmem:[#allocation7 + $0xa8] sm:$0xf0]  ;;  %v11948_v15 = vld [vmem:[#allocation7 + $0x330] sm:$0xf]  ;;  %v11553_v22 = vor.u32 %v17199_v8, %v11550_v9 }
  0x48   :  { %v17313_v16 = vld [vmem:[#allocation7 + $0x3ac] sm:$0xf0]  ;;  %v17297_v17 = vld [vmem:[#allocation7 + $0x334] sm:$0xf]  ;;  %v11956_v20 = vld [vmem:[#allocation7 + $0x338] sm:$0xf]  ;;  %v11557_v23 = vor.u32 %v17216_v12, %v11556_v10  ;;  %v11561_v26 = vor.u32 %v17200_v13, %v11558_v14 }
  0x49   :  { %1115 = vmatpush.bf16.msrb.mxu2 %v11541_v42  ;;  %1128 = vmatpush.bf16.msrb.mxu3 %v11545_v43  ;;  %v11950_v19 = vld [vmem:[#allocation7 + $0x3b0] sm:$0xf0]  ;;  %v17314_v21 = vld [vmem:[#allocation7 + $0x3b4] sm:$0xf0]  ;;  %v17298_v24 = vld [vmem:[#allocation7 + $0x33c] sm:$0xf]  ;;  %v11949_v27 = vor.u32 %v17313_v16, %v11948_v15 }
  0x4a   :  { %12030 = vmatmul.msk.bf16.vlgmr.msrb.gmra.mxu0 %vm1026_vm0, %v18980_v57  ;;  %12031 = vmatmul.msk.bf16.vlgmr.msrb.gmra.mxu1 %vm1026_vm0, %v18980_v57  ;;  %v11958_v25 = vld [vmem:[#allocation7 + $0x3b8] sm:$0xf0]  ;;  %v11953_v28 = vor.u32 %v17297_v17, %v11950_v19  ;;  %v11957_v29 = vor.u32 %v17314_v21, %v11956_v20  ;;  %v11820_v31 = vld [vmem:[#allocation7 + $0x230] sm:$0xf]  ;;  %v17265_v33 = vld [vmem:[#allocation7 + $0x234] sm:$0xf] }
  0x4b   :  { %1138 = vmatpush.bf16.msra.mxu0 %v11933_v36  ;;  %1151 = vmatpush.bf16.msra.mxu1 %v11937_v39  ;;  %v11961_v30 = vor.u32 %v17298_v24, %v11958_v25  ;;  %v17281_v32 = vld [vmem:[#allocation7 + $0x2ac] sm:$0xf0]  ;;  %v11822_v34 = vld [vmem:[#allocation7 + $0x2b0] sm:$0xf0]  ;;  %v11828_v35 = vld [vmem:[#allocation7 + $0x238] sm:$0xf] }
  0x4c   :  { %12032 = vmatmul.msk.bf16.vlgmr.msrb.gmra.mxu2 %vm1026_vm0, %v18980_v57  ;;  %12033 = vmatmul.msk.bf16.vlgmr.msrb.gmra.mxu3 %vm1026_vm0, %v18980_v57  ;;  %v17282_v36 = vld [vmem:[#allocation7 + $0x2b4] sm:$0xf0]  ;;  %v17266_v37 = vld [vmem:[#allocation7 + $0x23c] sm:$0xf]  ;;  %v11821_v39 = vor.u32 %v17281_v32, %v11820_v31  ;;  %v11825_v40 = vor.u32 %v17265_v33, %v11822_v34  ;;  %v11692_v42 = vld [vmem:[#allocation7 + $0x130] sm:$0xf] }
  0x4d   :  { %1164 = vmatpush.bf16.msra.mxu2 %v11941_v44  ;;  %1177 = vmatpush.bf16.msra.mxu3 %v11945_v48  ;;  %v11830_v38 = vld [vmem:[#allocation7 + $0x2b8] sm:$0xf0]  ;;  %v11829_v41 = vor.u32 %v17282_v36, %v11828_v35  ;;  %v17249_v43 = vld [vmem:[#allocation7 + $0x1ac] sm:$0xf0]  ;;  %v17233_v44 = vld [vmem:[#allocation7 + $0x134] sm:$0xf] }
  0x4e   :  { %v11833_v45 = vor.u32 %v17266_v37, %v11830_v38  ;;  %v11694_v46 = vld [vmem:[#allocation7 + $0x1b0] sm:$0xf0]  ;;  %v11700_v47 = vld [vmem:[#allocation7 + $0x138] sm:$0xf]  ;;  %v17234_v49 = vld [vmem:[#allocation7 + $0x13c] sm:$0xf]  ;;  %v11693_v51 = vor.u32 %v17249_v43, %v11692_v42 }
  0x4f   :  { %1139 = vmatpush.bf16.msra.mxu0 %v11805_v54  ;;  %1152 = vmatpush.bf16.msra.mxu1 %v11809_v55  ;;  %v17250_v48 = vld [vmem:[#allocation7 + $0x1b4] sm:$0xf0]  ;;  %v11702_v50 = vld [vmem:[#allocation7 + $0x1b8] sm:$0xf0]  ;;  %v11564_v52 = vld [vmem:[#allocation7 + $0x30] sm:$0xf]  ;;  %v11697_v54 = vor.u32 %v17233_v44, %v11694_v46 }
  0x50   :  { %v17217_v53 = vld [vmem:[#allocation7 + $0xac] sm:$0xf0]  ;;  %v11701_v55 = vor.u32 %v17250_v48, %v11700_v47  ;;  %v11566_v58 = vld [vmem:[#allocation7 + $0xb0] sm:$0xf0]  ;;  %v11572_v59 = vld [vmem:[#allocation7 + $0x38] sm:$0xf]  ;;  %v11705_v60 = vor.u32 %v17234_v49, %v11702_v50 }
  0x51   :  { %1165 = vmatpush.bf16.msra.mxu2 %v11813_v56  ;;  %1178 = vmatpush.bf16.msra.mxu3 %v11817_v61  ;;  %v17201_v56 = vld [vmem:[#allocation7 + $0x34] sm:$0xf]  ;;  %v17218_v61 = vld [vmem:[#allocation7 + $0xb4] sm:$0xf0]  ;;  %v17202_v62 = vld [vmem:[#allocation7 + $0x3c] sm:$0xf] }
  0x52   :  { %v11574_v63 = vld [vmem:[#allocation7 + $0xb8] sm:$0xf0]  ;;  %v11964_v0 = vld [vmem:[#allocation7 + $0x340] sm:$0xf]  ;;  %v17299_v2 = vld [vmem:[#allocation7 + $0x344] sm:$0xf]  ;;  %v11573_v8 = vor.u32 %v17218_v61, %v11572_v59 }
  0x53   :  { %1140 = vmatpush.bf16.msra.mxu0 %v11677_v3  ;;  %1153 = vmatpush.bf16.msra.mxu1 %v11681_v6  ;;  %v17315_v1 = vld [vmem:[#allocation7 + $0x3bc] sm:$0xf0]  ;;  %v11565_v3 = vor.u32 %v17217_v53, %v11564_v52  ;;  %v11966_v4 = vld [vmem:[#allocation7 + $0x3c0] sm:$0xf0]  ;;  %v11972_v5 = vld [vmem:[#allocation7 + $0x348] sm:$0xf] }
  0x54   :  { %v17316_v6 = vld [vmem:[#allocation7 + $0x3c4] sm:$0xf0]  ;;  %v17300_v9 = vld [vmem:[#allocation7 + $0x34c] sm:$0xf]  ;;  %v11965_v12 = vor.u32 %v17315_v1, %v11964_v0  ;;  %v11969_v13 = vor.u32 %v17299_v2, %v11966_v4  ;;  %v11836_v16 = vld [vmem:[#allocation7 + $0x240] sm:$0xf] }
  0x55   :  { %1166 = vmatpush.bf16.msra.mxu2 %v11685_v7  ;;  %1179 = vmatpush.bf16.msra.mxu3 %v11689_v11  ;;  %v11569_v7 = vor.u32 %v17201_v56, %v11566_v58  ;;  %v11974_v10 = vld [vmem:[#allocation7 + $0x3c8] sm:$0xf0]  ;;  %v11577_v11 = vor.u32 %v17202_v62, %v11574_v63  ;;  %v11973_v14 = vor.u32 %v17316_v6, %v11972_v5  ;;  %v17283_v17 = vld [vmem:[#allocation7 + $0x2bc] sm:$0xf0]  ;;  %v11838_v19 = vld [vmem:[#allocation7 + $0x2c0] sm:$0xf0] }
  0x56   :  { %v11977_v15 = vor.u32 %v17300_v9, %v11974_v10  ;;  %v11844_v20 = vld [vmem:[#allocation7 + $0x248] sm:$0xf]  ;;  %v11837_v24 = vor.u32 %v17283_v17, %v11836_v16  ;;  %v11710_v31 = vld [vmem:[#allocation7 + $0x1c0] sm:$0xf0]  ;;  %v17236_v34 = vld [vmem:[#allocation7 + $0x14c] sm:$0xf] }
  0x57   :  { %1141 = vmatpush.bf16.msra.mxu0 %v11549_v18  ;;  %1154 = vmatpush.bf16.msra.mxu1 %v11553_v22  ;;  %v17267_v18 = vld [vmem:[#allocation7 + $0x244] sm:$0xf]  ;;  %v17284_v21 = vld [vmem:[#allocation7 + $0x2c4] sm:$0xf0]  ;;  %v17268_v22 = vld [vmem:[#allocation7 + $0x24c] sm:$0xf] }
  0x58   :  { %v11841_v25 = vor.u32 %v17267_v18, %v11838_v19  ;;  %v11716_v32 = vld [vmem:[#allocation7 + $0x148] sm:$0xf]  ;;  %v11718_v35 = vld [vmem:[#allocation7 + $0x1c8] sm:$0xf0]  ;;  %v11580_v37 = vld [vmem:[#allocation7 + $0x40] sm:$0xf] }
  0x59   :  { %1167 = vmatpush.bf16.msra.mxu2 %v11557_v23  ;;  %1180 = vmatpush.bf16.msra.mxu3 %v11561_v26  ;;  %v11846_v23 = vld [vmem:[#allocation7 + $0x2c8] sm:$0xf0]  ;;  %v11845_v26 = vor.u32 %v17284_v21, %v11844_v20  ;;  %v17252_v33 = vld [vmem:[#allocation7 + $0x1c4] sm:$0xf0]  ;;  %v17219_v38 = vld [vmem:[#allocation7 + $0xbc] sm:$0xf0]  ;;  %v11721_v44 = vor.u32 %v17236_v34, %v11718_v35 }
  0x5a   :  { %12034 = vmatmul.msk.bf16.vlgmr.msra.gmra.mxu0 %vm1026_vm0, %v18980_v57  ;;  %12035 = vmatmul.msk.bf16.vlgmr.msra.gmra.mxu1 %vm1026_vm0, %v18980_v57  ;;  %v11582_v42 = vld [vmem:[#allocation7 + $0xc0] sm:$0xf0]  ;;  %v11588_v43 = vld [vmem:[#allocation7 + $0x48] sm:$0xf]  ;;  %v17204_v46 = vld [vmem:[#allocation7 + $0x4c] sm:$0xf] }
  0x5b   :  { %1190 = vmatpush.bf16.msrb.mxu0 %v11949_v27  ;;  %1203 = vmatpush.bf16.msrb.mxu1 %v11953_v28  ;;  %v11708_v27 = vld [vmem:[#allocation7 + $0x140] sm:$0xf]  ;;  %v11590_v47 = vld [vmem:[#allocation7 + $0xc8] sm:$0xf0]  ;;  %v11980_v48 = vld [vmem:[#allocation7 + $0x350] sm:$0xf] }
  0x5c   :  { %12036 = vmatmul.msk.bf16.vlgmr.msra.gmra.mxu2 %vm1026_vm0, %v18980_v57  ;;  %12037 = vmatmul.msk.bf16.vlgmr.msra.gmra.mxu3 %vm1026_vm0, %v18980_v57  ;;  %v17251_v28 = vld [vmem:[#allocation7 + $0x1bc] sm:$0xf0]  ;;  %v17317_v49 = vld [vmem:[#allocation7 + $0x3cc] sm:$0xf0]  ;;  %v17301_v50 = vld [vmem:[#allocation7 + $0x354] sm:$0xf] }
  0x5d   :  { %1216 = vmatpush.bf16.msrb.mxu2 %v11957_v29  ;;  %1229 = vmatpush.bf16.msrb.mxu3 %v11961_v30  ;;  %v17235_v29 = vld [vmem:[#allocation7 + $0x144] sm:$0xf]  ;;  %v11849_v30 = vor.u32 %v17268_v22, %v11846_v23  ;;  %v11709_v36 = vor.u32 %v17251_v28, %v11708_v27  ;;  %v11982_v52 = vld [vmem:[#allocation7 + $0x3d0] sm:$0xf0]  ;;  %v11988_v53 = vld [vmem:[#allocation7 + $0x358] sm:$0xf]  ;;  %v11981_v61 = vor.u32 %v17317_v49, %v11980_v48 }
  0x5e   :  { %v17302_v58 = vld [vmem:[#allocation7 + $0x35c] sm:$0xf]  ;;  %v11985_v62 = vor.u32 %v17301_v50, %v11982_v52  ;;  %v11852_v0 = vld [vmem:[#allocation7 + $0x250] sm:$0xf]  ;;  %v17269_v2 = vld [vmem:[#allocation7 + $0x254] sm:$0xf] }
  0x5f   :  { %1191 = vmatpush.bf16.msrb.mxu0 %v11821_v39  ;;  %1204 = vmatpush.bf16.msrb.mxu1 %v11825_v40  ;;  %v11713_v39 = vor.u32 %v17235_v29, %v11710_v31  ;;  %v11717_v40 = vor.u32 %v17252_v33, %v11716_v32  ;;  %v11990_v59 = vld [vmem:[#allocation7 + $0x3d8] sm:$0xf0]  ;;  %v17285_v1 = vld [vmem:[#allocation7 + $0x2cc] sm:$0xf0]  ;;  %v11854_v4 = vld [vmem:[#allocation7 + $0x2d0] sm:$0xf0] }
  0x60   :  { %v11860_v5 = vld [vmem:[#allocation7 + $0x258] sm:$0xf]  ;;  %v11853_v9 = vor.u32 %v17285_v1, %v11852_v0  ;;  %v11857_v10 = vor.u32 %v17269_v2, %v11854_v4  ;;  %v11726_v16 = vld [vmem:[#allocation7 + $0x1d0] sm:$0xf0]  ;;  %v17238_v19 = vld [vmem:[#allocation7 + $0x15c] sm:$0xf] }
  0x61   :  { %1217 = vmatpush.bf16.msrb.mxu2 %v11829_v41  ;;  %1230 = vmatpush.bf16.msrb.mxu3 %v11833_v45  ;;  %v17203_v41 = vld [vmem:[#allocation7 + $0x44] sm:$0xf]  ;;  %v17220_v45 = vld [vmem:[#allocation7 + $0xc4] sm:$0xf0]  ;;  %v17286_v6 = vld [vmem:[#allocation7 + $0x2d4] sm:$0xf0] }
  0x62   :  { %v11589_v56 = vor.u32 %v17220_v45, %v11588_v43  ;;  %v11732_v17 = vld [vmem:[#allocation7 + $0x158] sm:$0xf]  ;;  %v11734_v20 = vld [vmem:[#allocation7 + $0x1d8] sm:$0xf0]  ;;  %v11596_v21 = vld [vmem:[#allocation7 + $0x50] sm:$0xf] }
  0x63   :  { %1192 = vmatpush.bf16.msrb.mxu0 %v11693_v51  ;;  %1205 = vmatpush.bf16.msrb.mxu1 %v11697_v54  ;;  %v11581_v51 = vor.u32 %v17219_v38, %v11580_v37  ;;  %v17318_v54 = vld [vmem:[#allocation7 + $0x3d4] sm:$0xf0]  ;;  %v17221_v23 = vld [vmem:[#allocation7 + $0xcc] sm:$0xf0]  ;;  %v11737_v29 = vor.u32 %v17238_v19, %v11734_v20  ;;  %v17206_v31 = vld [vmem:[#allocation7 + $0x5c] sm:$0xf] }
  0x64   :  { %v11989_v63 = vor.u32 %v17318_v54, %v11988_v53  ;;  %v17254_v18 = vld [vmem:[#allocation7 + $0x1d4] sm:$0xf0]  ;;  %v11606_v32 = vld [vmem:[#allocation7 + $0xd8] sm:$0xf0]  ;;  %v11996_v33 = vld [vmem:[#allocation7 + $0x360] sm:$0xf] }
  0x65   :  { %1218 = vmatpush.bf16.msrb.mxu2 %v11701_v55  ;;  %1231 = vmatpush.bf16.msrb.mxu3 %v11705_v60  ;;  %v11585_v55 = vor.u32 %v17203_v41, %v11582_v42  ;;  %v11593_v60 = vor.u32 %v17204_v46, %v11590_v47  ;;  %v11733_v27 = vor.u32 %v17254_v18, %v11732_v17  ;;  %v11604_v28 = vld [vmem:[#allocation7 + $0x58] sm:$0xf]  ;;  %v17319_v34 = vld [vmem:[#allocation7 + $0x3dc] sm:$0xf0]  ;;  %v17303_v35 = vld [vmem:[#allocation7 + $0x364] sm:$0xf] }
  0x66   :  { %v11998_v37 = vld [vmem:[#allocation7 + $0x3e0] sm:$0xf0]  ;;  %v12004_v38 = vld [vmem:[#allocation7 + $0x368] sm:$0xf]  ;;  %v17304_v42 = vld [vmem:[#allocation7 + $0x36c] sm:$0xf]  ;;  %v11997_v45 = vor.u32 %v17319_v34, %v11996_v33 }
  0x67   :  { %1193 = vmatpush.bf16.msrb.mxu0 %v11565_v3  ;;  %1206 = vmatpush.bf16.msrb.mxu1 %v11569_v7  ;;  %v11993_v3 = vor.u32 %v17302_v58, %v11990_v59  ;;  %v17270_v7 = vld [vmem:[#allocation7 + $0x25c] sm:$0xf]  ;;  %v12006_v43 = vld [vmem:[#allocation7 + $0x3e8] sm:$0xf0]  ;;  %v12001_v46 = vor.u32 %v17303_v35, %v11998_v37  ;;  %v11868_v48 = vld [vmem:[#allocation7 + $0x260] sm:$0xf] }
  0x68   :  { %v17287_v49 = vld [vmem:[#allocation7 + $0x2dc] sm:$0xf0]  ;;  %v17271_v50 = vld [vmem:[#allocation7 + $0x264] sm:$0xf]  ;;  %v11876_v53 = vld [vmem:[#allocation7 + $0x268] sm:$0xf] }
  0x69   :  { %1219 = vmatpush.bf16.msrb.mxu2 %v11573_v8  ;;  %1232 = vmatpush.bf16.msrb.mxu3 %v11577_v11  ;;  %v11862_v8 = vld [vmem:[#allocation7 + $0x2d8] sm:$0xf0]  ;;  %v11861_v11 = vor.u32 %v17286_v6, %v11860_v5  ;;  %v11870_v52 = vld [vmem:[#allocation7 + $0x2e0] sm:$0xf0]  ;;  %v17288_v54 = vld [vmem:[#allocation7 + $0x2e4] sm:$0xf0]  ;;  %v11869_v58 = vor.u32 %v17287_v49, %v11868_v48 }
  0x6a   :  { %12038 = vmatmul.msk.bf16.vlgmr.msrb.gmra.mxu0 %vm1026_vm0, %v18980_v57  ;;  %12039 = vmatmul.msk.bf16.vlgmr.msrb.gmra.mxu1 %vm1026_vm0, %v18980_v57  ;;  %v11873_v59 = vor.u32 %v17271_v50, %v11870_v52  ;;  %v11742_v1 = vld [vmem:[#allocation7 + $0x1e0] sm:$0xf0]  ;;  %v11748_v2 = vld [vmem:[#allocation7 + $0x168] sm:$0xf]  ;;  %v17240_v4 = vld [vmem:[#allocation7 + $0x16c] sm:$0xf] }
  0x6b   :  { %1242 = vmatpush.bf16.msra.mxu0 %v11965_v12  ;;  %1255 = vmatpush.bf16.msra.mxu1 %v11969_v13  ;;  %v11724_v12 = vld [vmem:[#allocation7 + $0x150] sm:$0xf]  ;;  %v11750_v5 = vld [vmem:[#allocation7 + $0x1e8] sm:$0xf0]  ;;  %v17305_v20 = vld [vmem:[#allocation7 + $0x374] sm:$0xf] }
  0x6c   :  { %12040 = vmatmul.msk.bf16.vlgmr.msrb.gmra.mxu2 %vm1026_vm0, %v18980_v57  ;;  %12041 = vmatmul.msk.bf16.vlgmr.msrb.gmra.mxu3 %vm1026_vm0, %v18980_v57  ;;  %v17253_v13 = vld [vmem:[#allocation7 + $0x1cc] sm:$0xf0]  ;;  %v11622_v17 = vld [vmem:[#allocation7 + $0xe8] sm:$0xf0]  ;;  %v17273_v35 = vld [vmem:[#allocation7 + $0x274] sm:$0xf] }
  0x6d   :  { %1268 = vmatpush.bf16.msra.mxu2 %v11973_v14  ;;  %1281 = vmatpush.bf16.msra.mxu3 %v11977_v15  ;;  %v17237_v14 = vld [vmem:[#allocation7 + $0x154] sm:$0xf]  ;;  %v11865_v15 = vor.u32 %v17270_v7, %v11862_v8  ;;  %v11725_v22 = vor.u32 %v17253_v13, %v11724_v12  ;;  %v11612_v7 = vld [vmem:[#allocation7 + $0x60] sm:$0xf]  ;;  %v11614_v12 = vld [vmem:[#allocation7 + $0xe0] sm:$0xf0] }
  0x6e   :  { %v17223_v8 = vld [vmem:[#allocation7 + $0xdc] sm:$0xf0]  ;;  %v11620_v13 = vld [vmem:[#allocation7 + $0x68] sm:$0xf]  ;;  %v12012_v18 = vld [vmem:[#allocation7 + $0x370] sm:$0xf] }
  0x6f   :  { %1243 = vmatpush.bf16.msra.mxu0 %v11837_v24  ;;  %1256 = vmatpush.bf16.msra.mxu1 %v11841_v25  ;;  %v17205_v24 = vld [vmem:[#allocation7 + $0x54] sm:$0xf]  ;;  %v17321_v19 = vld [vmem:[#allocation7 + $0x3ec] sm:$0xf0]  ;;  %v11764_v50 = vld [vmem:[#allocation7 + $0x178] sm:$0xf] }
  0x70   :  { %v11598_v25 = vld [vmem:[#allocation7 + $0xd0] sm:$0xf0]  ;;  %v11884_v33 = vld [vmem:[#allocation7 + $0x270] sm:$0xf]  ;;  %v17242_v52 = vld [vmem:[#allocation7 + $0x17c] sm:$0xf] }
  0x71   :  { %1269 = vmatpush.bf16.msra.mxu2 %v11845_v26  ;;  %1282 = vmatpush.bf16.msra.mxu3 %v11849_v30  ;;  %v11729_v26 = vor.u32 %v17237_v14, %v11726_v16  ;;  %v17222_v30 = vld [vmem:[#allocation7 + $0xd4] sm:$0xf0]  ;;  %v11753_v14 = vor.u32 %v17240_v4, %v11750_v5  ;;  %v17208_v16 = vld [vmem:[#allocation7 + $0x6c] sm:$0xf]  ;;  %v17289_v34 = vld [vmem:[#allocation7 + $0x2ec] sm:$0xf0] }
  0x72   :  { %v11605_v41 = vor.u32 %v17222_v30, %v11604_v28  ;;  %v12022_v28 = vld [vmem:[#allocation7 + $0x3f8] sm:$0xf0]  ;;  %v12013_v30 = vor.u32 %v17321_v19, %v12012_v18  ;;  %v11886_v37 = vld [vmem:[#allocation7 + $0x2f0] sm:$0xf0]  ;;  %v12156_v18 = vld [vmem:[#allocation11 + $0xc0] sm:$0xf] }
  0x73   :  { %1244 = vmatpush.bf16.msra.mxu0 %v11709_v36  ;;  %1257 = vmatpush.bf16.msra.mxu1 %v11713_v39  ;;  %v11597_v36 = vor.u32 %v17221_v23, %v11596_v21  ;;  %v17320_v39 = vld [vmem:[#allocation7 + $0x3e4] sm:$0xf0]  ;;  %v11613_v21 = vor.u32 %v17223_v8, %v11612_v7  ;;  %v12020_v23 = vld [vmem:[#allocation7 + $0x378] sm:$0xf]  ;;  %v11758_v49 = vld [vmem:[#allocation7 + $0x1f0] sm:$0xf0] }
  0x74   :  { %v12005_v47 = vor.u32 %v17320_v39, %v12004_v38  ;;  %v11892_v38 = vld [vmem:[#allocation7 + $0x278] sm:$0xf]  ;;  %v18353_v7 = vld [vmem:[#allocation11 + $0xec] sm:$0xf0]  ;;  %v12300_v8 = vld [vmem:[#allocation11 + $0x1e0] sm:$0xf] }
  0x75   :  { %1270 = vmatpush.bf16.msra.mxu2 %v11717_v40  ;;  %1283 = vmatpush.bf16.msra.mxu3 %v11721_v44  ;;  %v11601_v40 = vor.u32 %v17205_v24, %v11598_v25  ;;  %v11609_v44 = vor.u32 %v17206_v31, %v11606_v32  ;;  %v17322_v24 = vld [vmem:[#allocation7 + $0x3f4] sm:$0xf0]  ;;  %v18349_v19 = vld [vmem:[#allocation11 + $0xcc] sm:$0xf0]  ;;  %vm4014_vm1 = vcmask 1043456   ;;  %vm4010_vm2 = vcmask 850944  }
  0x76   :  { %v12021_v32 = vor.u32 %v17322_v24, %v12020_v23  ;;  %v17290_v39 = vld [vmem:[#allocation7 + $0x2f4] sm:$0xf0]  ;;  %v12412_v23 = vld [vmem:[#allocation11 + $0x2c0] sm:$0xf]  ;;  %v18413_v24 = vld [vmem:[#allocation11 + $0x2cc] sm:$0xf0] }
  0x77   :  { %1245 = vmatpush.bf16.msra.mxu0 %v11581_v51  ;;  %1258 = vmatpush.bf16.msra.mxu1 %v11585_v55  ;;  %v12009_v51 = vor.u32 %v17304_v42, %v12006_v43  ;;  %v17272_v55 = vld [vmem:[#allocation7 + $0x26c] sm:$0xf]  ;;  %v11885_v42 = vor.u32 %v17289_v34, %v11884_v33  ;;  %v11889_v43 = vor.u32 %v17273_v35, %v11886_v37  ;;  %v18377_v34 = vld [vmem:[#allocation11 + $0x1ac] sm:$0xf0]  ;;  %v12396_v35 = vld [vmem:[#allocation11 + $0x2a0] sm:$0xf] }
  0x78   :  { %v12524_v37 = vld [vmem:[#allocation11 + $0x3a0] sm:$0xf]  ;;  %vm9443_vm3 = vcmask 261120   ;;  %vm11471_vm4 = vcmask 326656   ;;  %s18886_s28 = smov [#allocation17]   ;;  %s11500_s30 = sshll.u32 %s19697_s11, 4  ;;  %s11501_s30 = int_to_ptr.hbm [resolvable:$true] %s11500_s30 }
  0x79   :  { %1271 = vmatpush.bf16.msra.mxu2 %v11589_v56  ;;  %1284 = vmatpush.bf16.msra.mxu3 %v11593_v60  ;;  %v11878_v56 = vld [vmem:[#allocation7 + $0x2e8] sm:$0xf0]  ;;  %v11877_v60 = vor.u32 %v17288_v54, %v11876_v53  ;;  %v11766_v53 = vld [vmem:[#allocation7 + $0x1f8] sm:$0xf0]  ;;  %s11498_s0 = sshll.u32 %s18886_s28, 4  ;;  %vm11491_vm5 = vcmask 39936   ;;  %s11499_s0 = int_to_ptr.vmem [resolvable:$true] %s11498_s0 }
  0x7a   :  { %12042 = vmatmul.msk.bf16.vlgmr.msra.gmra.mxu0 %vm1026_vm0, %v18980_v57  ;;  %12043 = vmatmul.msk.bf16.vlgmr.msra.gmra.mxu1 %vm1026_vm0, %v18980_v57  ;;  %v11881_v0 = vor.u32 %v17272_v55, %v11878_v56 }
  0x7b   :  { %1294 = vmatpush.bf16.msrb.mxu0 %v11981_v61  ;;  %1307 = vmatpush.bf16.msrb.mxu1 %v11985_v62  ;;  %v11740_v61 = vld [vmem:[#allocation7 + $0x160] sm:$0xf] }
  0x7c   :  { %12044 = vmatmul.msk.bf16.vlgmr.msra.gmra.mxu2 %vm1026_vm0, %v18980_v57  ;;  %12045 = vmatmul.msk.bf16.vlgmr.msra.gmra.mxu3 %vm1026_vm0, %v18980_v57  ;;  %v17255_v62 = vld [vmem:[#allocation7 + $0x1dc] sm:$0xf0] }
  0x7d   :  { %1320 = vmatpush.bf16.msrb.mxu2 %v11989_v63  ;;  %1333 = vmatpush.bf16.msrb.mxu3 %v11993_v3  ;;  %v17239_v63 = vld [vmem:[#allocation7 + $0x164] sm:$0xf]  ;;  %v17256_v3 = vld [vmem:[#allocation7 + $0x1e4] sm:$0xf0]  ;;  %v11741_v6 = vor.u32 %v17255_v62, %v11740_v61  ;;  %v11769_v61 = vor.u32 %v17242_v52, %v11766_v53  ;;  %v11630_v62 = vld [vmem:[#allocation7 + $0xf0] sm:$0xf0] }
  0x7f   :  { %1295 = vmatpush.bf16.msrb.mxu0 %v11853_v9  ;;  %1308 = vmatpush.bf16.msrb.mxu1 %v11857_v10  ;;  %v11745_v9 = vor.u32 %v17239_v63, %v11742_v1  ;;  %v11749_v10 = vor.u32 %v17256_v3, %v11748_v2  ;;  %v11636_v63 = vld [vmem:[#allocation7 + $0x78] sm:$0xf]  ;;  %v17210_v1 = vld [vmem:[#allocation7 + $0x7c] sm:$0xf] }
  0x80   :  { %v11638_v2 = vld [vmem:[#allocation7 + $0xf8] sm:$0xf0] }
  0x81   :  { %1321 = vmatpush.bf16.msrb.mxu2 %v11861_v11  ;;  %1334 = vmatpush.bf16.msrb.mxu3 %v11865_v15  ;;  %v17207_v11 = vld [vmem:[#allocation7 + $0x64] sm:$0xf]  ;;  %v17224_v15 = vld [vmem:[#allocation7 + $0xe4] sm:$0xf0] }
  0x82   :  { %v11617_v25 = vor.u32 %v17207_v11, %v11614_v12  ;;  %v12428_v11 = vld [vmem:[#allocation11 + $0x2e0] sm:$0xf]  ;;  %v18417_v12 = vld [vmem:[#allocation11 + $0x2ec] sm:$0xf0] }
  0x83   :  { %1296 = vmatpush.bf16.msrb.mxu0 %v11725_v22  ;;  %1309 = vmatpush.bf16.msrb.mxu1 %v11729_v26  ;;  %v12014_v22 = vld [vmem:[#allocation7 + $0x3f0] sm:$0xf0]  ;;  %v11621_v26 = vor.u32 %v17224_v15, %v11620_v13  ;;  %v12556_v13 = vld [vmem:[#allocation11 + $0x3e0] sm:$0xf] }
  0x84   :  { %v12017_v31 = vor.u32 %v17305_v20, %v12014_v22  ;;  %v12284_v20 = vld [vmem:[#allocation11 + $0x1c0] sm:$0xf]  ;;  %v18381_v22 = vld [vmem:[#allocation11 + $0x1cc] sm:$0xf0] }
  0x85   :  { %1322 = vmatpush.bf16.msrb.mxu2 %v11733_v27  ;;  %1335 = vmatpush.bf16.msrb.mxu3 %v11737_v29  ;;  %v17306_v27 = vld [vmem:[#allocation7 + $0x37c] sm:$0xf]  ;;  %v11625_v29 = vor.u32 %v17208_v16, %v11622_v17  ;;  %v12429_v17 = vor.u32 %v18417_v12, %v12428_v11  ;;  %v18429_v11 = vld [vmem:[#allocation11 + $0x34c] sm:$0xf0] }
  0x87   :  { %1297 = vmatpush.bf16.msrb.mxu0 %v11597_v36  ;;  %1310 = vmatpush.bf16.msrb.mxu1 %v11601_v40  ;;  %v12025_v36 = vor.u32 %v17306_v27, %v12022_v28  ;;  %v17274_v40 = vld [vmem:[#allocation7 + $0x27c] sm:$0xf]  ;;  %v12157_v27 = vor.u32 %v18349_v19, %v12156_v18  ;;  %v12285_v28 = vor.u32 %v18381_v22, %v12284_v20  ;;  %v18361_v18 = vld [vmem:[#allocation11 + $0x12c] sm:$0xf0]  ;;  %v12332_v20 = vld [vmem:[#allocation11 + $0x220] sm:$0xf] }
  0x88   :  { %v19046_v22 = vld [vmem:[#allocation11 + $0x7c0] sm:$0xff] }
  0x89   :  { %1323 = vmatpush.bf16.msrb.mxu2 %v11605_v41  ;;  %1336 = vmatpush.bf16.msrb.mxu3 %v11609_v44  ;;  %v11894_v41 = vld [vmem:[#allocation7 + $0x2f8] sm:$0xf0]  ;;  %v11893_v44 = vor.u32 %v17290_v39, %v11892_v38  ;;  %v18441_v38 = vld [vmem:[#allocation11 + $0x3ac] sm:$0xf0] }
  0x8a   :  { %12046 = vmatmul.msk.bf16.vlgmr.msrb.gmra.mxu0 %vm1026_vm0, %v18980_v57  ;;  %12047 = vmatmul.msk.bf16.vlgmr.msrb.gmra.mxu1 %vm1026_vm0, %v18980_v57  ;;  %v11897_v48 = vor.u32 %v17274_v40, %v11894_v41 }
  0x8b   :  { %1346 = vmatpush.bf16.msra.mxu0 %v11997_v45  ;;  %1359 = vmatpush.bf16.msra.mxu1 %v12001_v46  ;;  %v11756_v45 = vld [vmem:[#allocation7 + $0x170] sm:$0xf] }
  0x8c   :  { %12048 = vmatmul.msk.bf16.vlgmr.msrb.gmra.mxu2 %vm1026_vm0, %v18980_v57  ;;  %12049 = vmatmul.msk.bf16.vlgmr.msrb.gmra.mxu3 %vm1026_vm0, %v18980_v57  ;;  %v17257_v46 = vld [vmem:[#allocation7 + $0x1ec] sm:$0xf0] }
  0x8d   :  { %1372 = vmatpush.bf16.msra.mxu2 %v12005_v47  ;;  %1385 = vmatpush.bf16.msra.mxu3 %v12009_v51  ;;  %v17241_v47 = vld [vmem:[#allocation7 + $0x174] sm:$0xf]  ;;  %v17258_v51 = vld [vmem:[#allocation7 + $0x1f4] sm:$0xf0]  ;;  %v11757_v54 = vor.u32 %v17257_v46, %v11756_v45  ;;  %v12525_v45 = vor.u32 %v18441_v38, %v12524_v37  ;;  %v18373_v46 = vld [vmem:[#allocation11 + $0x18c] sm:$0xf0] }
  0x8e   :  { %v11761_v55 = vor.u32 %v17241_v47, %v11758_v49  ;;  %v11765_v56 = vor.u32 %v17258_v51, %v11764_v50  ;;  %v12380_v47 = vld [vmem:[#allocation11 + $0x280] sm:$0xf]  ;;  %v18437_v50 = vld [vmem:[#allocation11 + $0x38c] sm:$0xf0] }
  0x8f   :  { %1347 = vmatpush.bf16.msra.mxu0 %v11869_v58  ;;  %1360 = vmatpush.bf16.msra.mxu1 %v11873_v59  ;;  %v11628_v58 = vld [vmem:[#allocation7 + $0x70] sm:$0xf]  ;;  %v12508_v49 = vld [vmem:[#allocation11 + $0x380] sm:$0xf] }
  0x90   :  { %v17225_v59 = vld [vmem:[#allocation7 + $0xec] sm:$0xf0] }
  0x91   :  { %1373 = vmatpush.bf16.msra.mxu2 %v11877_v60  ;;  %1386 = vmatpush.bf16.msra.mxu3 %v11881_v0  ;;  %v17209_v60 = vld [vmem:[#allocation7 + $0x74] sm:$0xf]  ;;  %v17226_v0 = vld [vmem:[#allocation7 + $0xf4] sm:$0xf0]  ;;  %v11629_v3 = vor.u32 %v17225_v59, %v11628_v58  ;;  %v12509_v58 = vor.u32 %v18437_v50, %v12508_v49  ;;  %v18369_v59 = vld [vmem:[#allocation11 + $0x16c] sm:$0xf0] }
  0x92   :  { %v11633_v4 = vor.u32 %v17209_v60, %v11630_v62  ;;  %v11637_v5 = vor.u32 %v17226_v0, %v11636_v63  ;;  %v12364_v60 = vld [vmem:[#allocation11 + $0x260] sm:$0xf]  ;;  %v18433_v63 = vld [vmem:[#allocation11 + $0x36c] sm:$0xf0] }
  0x93   :  { %1348 = vmatpush.bf16.msra.mxu0 %v11741_v6  ;;  %1361 = vmatpush.bf16.msra.mxu1 %v11745_v9  ;;  %v12172_v6 = vld [vmem:[#allocation11 + $0xe0] sm:$0xf]  ;;  %v11641_v9 = vor.u32 %v17210_v1, %v11638_v2  ;;  %v18421_v37 = vld [vmem:[#allocation11 + $0x30c] sm:$0xf0] }
  0x94   :  { %v12173_v15 = vor.u32 %v18353_v7, %v12172_v6  ;;  %v12492_v62 = vld [vmem:[#allocation11 + $0x360] sm:$0xf]  ;;  %v18365_v7 = vld [vmem:[#allocation11 + $0x14c] sm:$0xf0] }
  0x95   :  { %1374 = vmatpush.bf16.msra.mxu2 %v11749_v10  ;;  %1387 = vmatpush.bf16.msra.mxu3 %v11753_v14  ;;  %v18385_v10 = vld [vmem:[#allocation11 + $0x1ec] sm:$0xf0]  ;;  %v12493_v6 = vor.u32 %v18433_v63, %v12492_v62  ;;  %v12924_v62 = vld [vmem:[#allocation11 + $0x6c0] sm:$0xf] }
  0x96   :  { %v18449_v14 = vld [vmem:[#allocation11 + $0x3ec] sm:$0xf0]  ;;  %v12301_v16 = vor.u32 %v18385_v10, %v12300_v8  ;;  %v12348_v8 = vld [vmem:[#allocation11 + $0x240] sm:$0xf] }
  0x97   :  { %1349 = vmatpush.bf16.msra.mxu0 %v11613_v21  ;;  %1362 = vmatpush.bf16.msra.mxu1 %v11617_v25  ;;  %v12557_v21 = vor.u32 %v18449_v14, %v12556_v13  ;;  %v12540_v25 = vld [vmem:[#allocation11 + $0x3c0] sm:$0xf]  ;;  %v172_v49 = vld [vmem:[#allocation5 + $0x10] sm:$0xff] }
  0x98   :  { %v12476_v10 = vld [vmem:[#allocation11 + $0x340] sm:$0xf]  ;;  %v18541_v63 = vld [vmem:[#allocation11 + $0x6cc] sm:$0xf0] }
  0x99   :  { %1375 = vmatpush.bf16.msra.mxu2 %v11621_v26  ;;  %1388 = vmatpush.bf16.msra.mxu3 %v11625_v29  ;;  %v18445_v26 = vld [vmem:[#allocation11 + $0x3cc] sm:$0xf0]  ;;  %v12413_v29 = vor.u32 %v18413_v24, %v12412_v23  ;;  %v12076_v13 = vld [vmem:[#allocation11 + $0x20] sm:$0xf]  ;;  %v12477_v19 = vor.u32 %v18429_v11, %v12476_v10 }
  0x9a   :  { %12050 = vmatmul.msk.bf16.vlgmr.msra.gmra.mxu0 %vm1026_vm0, %v18980_v57  ;;  %12051 = vmatmul.msk.bf16.vlgmr.msra.gmra.mxu1 %vm1026_vm0, %v18980_v57  ;;  %v12541_v33 = vor.u32 %v18445_v26, %v12540_v25  ;;  %v12460_v23 = vld [vmem:[#allocation11 + $0x320] sm:$0xf]  ;;  %v18425_v24 = vld [vmem:[#allocation11 + $0x32c] sm:$0xf0] }
  0x9b   :  { %1398 = vmatpush.bf16.msrb.mxu0 %v12013_v30  ;;  %1411 = vmatpush.bf16.msrb.mxu1 %v12017_v31  ;;  %v12140_v30 = vld [vmem:[#allocation11 + $0xa0] sm:$0xf]  ;;  %v18345_v31 = vld [vmem:[#allocation11 + $0xac] sm:$0xf0] }
  0x9c   :  { %12052 = vmatmul.msk.bf16.vlgmr.msra.gmra.mxu2 %vm1026_vm0, %v18980_v57  ;;  %12053 = vmatmul.msk.bf16.vlgmr.msra.gmra.mxu3 %vm1026_vm0, %v18980_v57  ;;  %v12141_v39 = vor.u32 %v18345_v31, %v12140_v30  ;;  %v12060_v26 = vld [vmem:[#allocation11] sm:$0xf]  ;;  %v18357_v30 = vld [vmem:[#allocation11 + $0x10c] sm:$0xf0] }
  0x9d   :  { %1424 = vmatpush.bf16.msrb.mxu2 %v12021_v32  ;;  %1437 = vmatpush.bf16.msrb.mxu3 %v12025_v36  ;;  %v12268_v32 = vld [vmem:[#allocation11 + $0x1a0] sm:$0xf]  ;;  %v18409_v36 = vld [vmem:[#allocation11 + $0x2ac] sm:$0xf0] }
  0x9e   :  { %v12269_v40 = vor.u32 %v18377_v34, %v12268_v32  ;;  %v12397_v41 = vor.u32 %v18409_v36, %v12396_v35  ;;  %v12316_v31 = vld [vmem:[#allocation11 + $0x200] sm:$0xf]  ;;  %v12461_v34 = vor.u32 %v18425_v24, %v12460_v23  ;;  %v18389_v35 = vld [vmem:[#allocation11 + $0x20c] sm:$0xf0] }
  0x9f   :  { %1399 = vmatpush.bf16.msrb.mxu0 %v11885_v42  ;;  %1412 = vmatpush.bf16.msrb.mxu1 %v11889_v43  ;;  %v12124_v42 = vld [vmem:[#allocation11 + $0x80] sm:$0xf]  ;;  %v18341_v43 = vld [vmem:[#allocation11 + $0x8c] sm:$0xf0] }
  0xa0   :  { %v12125_v51 = vor.u32 %v18341_v43, %v12124_v42  ;;  %v12444_v36 = vld [vmem:[#allocation11 + $0x300] sm:$0xf]  ;;  %v18513_v43 = vld [vmem:[#allocation11 + $0x5ec] sm:$0xf0] }
  0xa1   :  { %1425 = vmatpush.bf16.msrb.mxu2 %v11893_v44  ;;  %1438 = vmatpush.bf16.msrb.mxu3 %v11897_v48  ;;  %v12252_v44 = vld [vmem:[#allocation11 + $0x180] sm:$0xf]  ;;  %v18405_v48 = vld [vmem:[#allocation11 + $0x28c] sm:$0xf0]  ;;  %v12445_v50 = vor.u32 %v18421_v37, %v12444_v36 }
  0xa2   :  { %v12253_v52 = vor.u32 %v18373_v46, %v12252_v44  ;;  %v12381_v53 = vor.u32 %v18405_v48, %v12380_v47  ;;  %v12940_v44 = vld [vmem:[#allocation11 + $0x6e0] sm:$0xf]  ;;  %v12317_v47 = vor.u32 %v18389_v35, %v12316_v31  ;;  %v18565_v23 = vld [vmem:[#allocation11 + $0x78c] sm:$0xf0] }
  0xa3   :  { %1400 = vmatpush.bf16.msrb.mxu0 %v11757_v54  ;;  %1413 = vmatpush.bf16.msrb.mxu1 %v11761_v55  ;;  %v12108_v54 = vld [vmem:[#allocation11 + $0x60] sm:$0xf]  ;;  %v18337_v55 = vld [vmem:[#allocation11 + $0x6c] sm:$0xf0] }
  0xa4   :  { %v12109_v0 = vor.u32 %v18337_v55, %v12108_v54  ;;  %v173_v54 = vld [vmem:[#allocation5 + $0x18] sm:$0xff]  ;;  %v12892_v31 = vld [vmem:[#allocation11 + $0x680] sm:$0xf]  ;;  %v18561_v36 = vld [vmem:[#allocation11 + $0x76c] sm:$0xf0] }
  0xa5   :  { %1426 = vmatpush.bf16.msrb.mxu2 %v11765_v56  ;;  %1439 = vmatpush.bf16.msrb.mxu3 %v11769_v61  ;;  %v12236_v56 = vld [vmem:[#allocation11 + $0x160] sm:$0xf]  ;;  %v18401_v61 = vld [vmem:[#allocation11 + $0x26c] sm:$0xf0] }
  0xa6   :  { %v12237_v1 = vor.u32 %v18369_v59, %v12236_v56  ;;  %v12365_v2 = vor.u32 %v18401_v61, %v12364_v60  ;;  %v12796_v59 = vld [vmem:[#allocation11 + $0x5c0] sm:$0xf]  ;;  %v171_v60 = vld [vmem:[#allocation5 + $0x8] sm:$0xff]  ;;  %v18509_v61 = vld [vmem:[#allocation11 + $0x5cc] sm:$0xf0] }
  0xa7   :  { %1401 = vmatpush.bf16.msrb.mxu0 %v11629_v3  ;;  %1414 = vmatpush.bf16.msrb.mxu1 %v11633_v4  ;;  %v12092_v3 = vld [vmem:[#allocation11 + $0x40] sm:$0xf]  ;;  %v18333_v4 = vld [vmem:[#allocation11 + $0x4c] sm:$0xf0]  ;;  %v19064_v11 = vpack.c.bf16 %v171_v60, %v171_v60 }
  0xa8   :  { %v12093_v12 = vor.u32 %v18333_v4, %v12092_v3  ;;  %v13036_v3 = vld [vmem:[#allocation11 + $0x7a0] sm:$0xf]  ;;  %v18569_v4 = vld [vmem:[#allocation11 + $0x7ac] sm:$0xf0] }
  0xa9   :  { %1427 = vmatpush.bf16.msrb.mxu2 %v11637_v5  ;;  %1440 = vmatpush.bf16.msrb.mxu3 %v11641_v9  ;;  %v12220_v5 = vld [vmem:[#allocation11 + $0x140] sm:$0xf]  ;;  %v18397_v9 = vld [vmem:[#allocation11 + $0x24c] sm:$0xf0] }
  0xaa   :  { %12054 = vmatmul.msk.bf16.vlgmr.msrb.gmra.mxu0 %vm1026_vm0, %v18980_v57  ;;  %12055 = vmatmul.msk.bf16.vlgmr.msrb.gmra.mxu1 %vm1026_vm0, %v18980_v57  ;;  %v12221_v14 = vor.u32 %v18365_v7, %v12220_v5  ;;  %v13004_v35 = vld [vmem:[#allocation11 + $0x760] sm:$0xf] }
  0xab   :  { %4027 = vmatpush.bf16.msra.mxu0 %v12173_v15  ;;  %4040 = vmatpush.bf16.msra.mxu1 %v12301_v16  ;;  %v12349_v15 = vor.u32 %v18397_v9, %v12348_v8  ;;  %v18329_v16 = vld [vmem:[#allocation11 + $0x2c] sm:$0xf0]  ;;  %v19062_v8 = vpack.c.bf16 %v173_v54, %v173_v54 }
  0xac   :  { %12056 = vmatmul.msk.bf16.vlgmr.msrb.gmra.mxu2 %vm1026_vm0, %v18980_v57  ;;  %12057 = vmatmul.msk.bf16.vlgmr.msrb.gmra.mxu3 %vm1026_vm0, %v18980_v57  ;;  %v12077_v25 = vor.u32 %v18329_v16, %v12076_v13  ;;  %v18325_v57 = vld [vmem:[#allocation11 + $0xc] sm:$0xf0]  ;;  %v12925_v13 = vor.u32 %v18541_v63, %v12924_v62  ;;  %v12780_v16 = vld [vmem:[#allocation11 + $0x5a0] sm:$0xf] }
  0xad   :  { %4053 = vmatpush.bf16.msra.mxu2 %v12429_v17  ;;  %4066 = vmatpush.bf16.msra.mxu3 %v12557_v21  ;;  %v12204_v17 = vld [vmem:[#allocation11 + $0x120] sm:$0xf]  ;;  %v18393_v21 = vld [vmem:[#allocation11 + $0x22c] sm:$0xf0]  ;;  %v12061_v42 = vor.u32 %v18325_v57, %v12060_v26 }
  0xae   :  { %v12636_v57 = vld [vmem:[#allocation11 + $0x480] sm:$0xf]  ;;  %v18525_v63 = vld [vmem:[#allocation11 + $0x64c] sm:$0xf0] }
  0xaf   :  { %4028 = vmatpush.bf16.msra.mxu0 %v12157_v27  ;;  %4041 = vmatpush.bf16.msra.mxu1 %v12285_v28  ;;  %v12205_v27 = vor.u32 %v18361_v18, %v12204_v17  ;;  %v12333_v28 = vor.u32 %v18393_v21, %v12332_v20  ;;  %v13037_v17 = vor.u32 %v18569_v4, %v13036_v3  ;;  %v18505_v18 = vld [vmem:[#allocation11 + $0x5ac] sm:$0xf0]  ;;  %v13020_v21 = vld [vmem:[#allocation11 + $0x780] sm:$0xf] }
  0xb0   :  { %v18537_v20 = vld [vmem:[#allocation11 + $0x6ac] sm:$0xf0]  ;;  %v12860_v62 = vld [vmem:[#allocation11 + $0x640] sm:$0xf] }
  0xb1   :  { %4054 = vmatpush.bf16.msra.mxu2 %v12413_v29  ;;  %4067 = vmatpush.bf16.msra.mxu3 %v12541_v33  ;;  %v12188_v29 = vld [vmem:[#allocation11 + $0x100] sm:$0xf]  ;;  %v3506_v33 = vunpack.c.l.b16 %v19046_v22  ;;  %v18553_v4 = vld [vmem:[#allocation11 + $0x72c] sm:$0xf0] }
  0xb2   :  { %v12189_v46 = vor.u32 %v18357_v30, %v12188_v29  ;;  %v13021_v29 = vor.u32 %v18565_v23, %v13020_v21  ;;  %v18501_v30 = vld [vmem:[#allocation11 + $0x58c] sm:$0xf0]  ;;  %v12972_v3 = vld [vmem:[#allocation11 + $0x720] sm:$0xf] }
  0xb3   :  { %4029 = vmatpush.bf16.msra.mxu0 %v12141_v39  ;;  %4042 = vmatpush.bf16.msra.mxu1 %v12269_v40  ;;  %v12684_v39 = vld [vmem:[#allocation11 + $0x4e0] sm:$0xf]  ;;  %v18481_v40 = vld [vmem:[#allocation11 + $0x4ec] sm:$0xf0]  ;;  %v3758_v48 = vpack.c.b16 %v3506_v33, %v3506_v33 }
  0xb4   :  { %v18533_v33 = vld [vmem:[#allocation11 + $0x68c] sm:$0xf0]  ;;  %v12956_v23 = vld [vmem:[#allocation11 + $0x700] sm:$0xf] }
  0xb5   :  { %4055 = vmatpush.bf16.msra.mxu2 %v12397_v41  ;;  %4068 = vmatpush.bf16.msra.mxu3 %v12525_v45  ;;  %v12812_v41 = vld [vmem:[#allocation11 + $0x5e0] sm:$0xf]  ;;  %v18545_v45 = vld [vmem:[#allocation11 + $0x6ec] sm:$0xf0] }
  0xb6   :  { %v12813_v55 = vor.u32 %v18513_v43, %v12812_v41  ;;  %v12941_v56 = vor.u32 %v18545_v45, %v12940_v44  ;;  %v12893_v43 = vor.u32 %v18533_v33, %v12892_v31  ;;  %v12620_v44 = vld [vmem:[#allocation11 + $0x460] sm:$0xf]  ;;  %v18465_v45 = vld [vmem:[#allocation11 + $0x46c] sm:$0xf0] }
  0xb7   :  { %4030 = vmatpush.bf16.msra.mxu0 %v12125_v51  ;;  %4043 = vmatpush.bf16.msra.mxu1 %v12253_v52  ;;  %v19048_v32 = vpop.f32.mrf.mxu0  ;;  %v19051_v38 = vpop.f32.mrf.mxu1  ;;  %v12685_v51 = vor.u32 %v18481_v40, %v12684_v39  ;;  %v12668_v52 = vld [vmem:[#allocation11 + $0x4c0] sm:$0xf]  ;;  %v18521_v21 = vld [vmem:[#allocation11 + $0x62c] sm:$0xf0] }
  0xb8   :  { %v12700_v31 = vld [vmem:[#allocation11 + $0x500] sm:$0xf]  ;;  %v18485_v33 = vld [vmem:[#allocation11 + $0x50c] sm:$0xf0] }
  0xb9   :  { %4056 = vmatpush.bf16.msra.mxu2 %v12381_v53  ;;  %4069 = vmatpush.bf16.msra.mxu3 %v12509_v58  ;;  %v170_v53 = vld [vmem:[#allocation5] sm:$0xff]  ;;  %v18477_v58 = vld [vmem:[#allocation11 + $0x4cc] sm:$0xf0] }
  0xba   :  { %v19060_v7 = vpack.c.bf16 %v170_v53, %v170_v53  ;;  %v12669_v9 = vor.u32 %v18477_v58, %v12668_v52  ;;  %v18557_v52 = vld [vmem:[#allocation11 + $0x74c] sm:$0xf0]  ;;  %v12621_v53 = vor.u32 %v18465_v45, %v12620_v44  ;;  %v12302_v44 = vld [vmem:[#allocation11 + $0x1f0] sm:$0xf0]  ;;  %v18415_v45 = vld [vmem:[#allocation11 + $0x2e4] sm:$0xf] }
  0xbb   :  { %4031 = vmatpush.bf16.msra.mxu0 %v12109_v0  ;;  %4044 = vmatpush.bf16.msra.mxu1 %v12237_v1  ;;  %v19055_v1 = vpack.c.bf16 %v172_v49, %v172_v49  ;;  %v12876_v49 = vld [vmem:[#allocation11 + $0x660] sm:$0xf]  ;;  %v18461_v58 = vld [vmem:[#allocation11 + $0x44c] sm:$0xf0] }
  0xbd   :  { %4057 = vmatpush.bf16.msra.mxu2 %v12365_v2  ;;  %4070 = vmatpush.bf16.msra.mxu3 %v12493_v6  ;;  %v4016_v2 = vsel %vm4014_vm1, %v3758_v48, 0  ;;  %v18497_v48 = vld [vmem:[#allocation11 + $0x56c] sm:$0xf0] }
  0xbf   :  { %4032 = vmatpush.bf16.msra.mxu0 %v12093_v12  ;;  %4045 = vmatpush.bf16.msra.mxu1 %v12221_v14  ;;  %v19053_v0 = vpop.f32.mrf.mxu2  ;;  %v19058_v5 = vpop.f32.mrf.mxu3  ;;  %v12797_v12 = vor.u32 %v18509_v61, %v12796_v59  ;;  %v12652_v14 = vld [vmem:[#allocation11 + $0x4a0] sm:$0xf]  ;;  %v18493_v61 = vld [vmem:[#allocation11 + $0x54c] sm:$0xf0] }
  0xc0   :  { %v1041_v6 = vpop.f32.mrf.mxu0  ;;  %v1054_v10 = vpop.f32.mrf.mxu1  ;;  %v12732_v59 = vld [vmem:[#allocation11 + $0x540] sm:$0xf] }
  0xc1   :  { %4058 = vmatpush.bf16.msra.mxu2 %v12349_v15  ;;  %4071 = vmatpush.bf16.msra.mxu3 %v12477_v19  ;;  %v18473_v15 = vld [vmem:[#allocation11 + $0x4ac] sm:$0xf0]  ;;  %v12908_v19 = vld [vmem:[#allocation11 + $0x6a0] sm:$0xf] }
  0xc2   :  { %v12653_v24 = vor.u32 %v18473_v15, %v12652_v14  ;;  %v12909_v26 = vor.u32 %v18537_v20, %v12908_v19  ;;  %v12861_v14 = vor.u32 %v18525_v63, %v12860_v62  ;;  %v12588_v15 = vld [vmem:[#allocation11 + $0x420] sm:$0xf]  ;;  %v18489_v19 = vld [vmem:[#allocation11 + $0x52c] sm:$0xf0]  ;;  %v18379_v62 = vld [vmem:[#allocation11 + $0x1c4] sm:$0xf] }
  0xc3   :  { %4033 = vmatpush.bf16.msra.mxu0 %v12077_v25  ;;  %4046 = vmatpush.bf16.msra.mxu1 %v12205_v27  ;;  %v12781_v25 = vor.u32 %v18505_v18, %v12780_v16  ;;  %v18469_v27 = vld [vmem:[#allocation11 + $0x48c] sm:$0xf0]  ;;  %v12973_v18 = vor.u32 %v18553_v4, %v12972_v3  ;;  %v12844_v20 = vld [vmem:[#allocation11 + $0x620] sm:$0xf]  ;;  %v177_v63 = vld [vmem:[#allocation5 + $0x38] sm:$0xff] }
  0xc4   :  { %v12637_v40 = vor.u32 %v18469_v27, %v12636_v57  ;;  %v18457_v16 = vld [vmem:[#allocation11 + $0x42c] sm:$0xf0]  ;;  %v12174_v57 = vld [vmem:[#allocation11 + $0xf0] sm:$0xf0]  ;;  %v12572_v27 = vld [vmem:[#allocation11 + $0x400] sm:$0xf] }
  0xc5   :  { %4059 = vmatpush.bf16.msra.mxu2 %v12333_v28  ;;  %4072 = vmatpush.bf16.msra.mxu3 %v12461_v34  ;;  %v12764_v28 = vld [vmem:[#allocation11 + $0x580] sm:$0xf]  ;;  %v175_v3 = vld [vmem:[#allocation5 + $0x28] sm:$0xff] }
  0xc7   :  { %4034 = vmatpush.bf16.msra.mxu0 %v12061_v42  ;;  %4047 = vmatpush.bf16.msra.mxu1 %v12189_v46  ;;  %v1067_v34 = vpop.f32.mrf.mxu2  ;;  %v1080_v37 = vpop.f32.mrf.mxu3  ;;  %v12765_v42 = vor.u32 %v18501_v30, %v12764_v28  ;;  %v12748_v46 = vld [vmem:[#allocation11 + $0x560] sm:$0xf]  ;;  %v18453_v28 = vld [vmem:[#allocation11 + $0x40c] sm:$0xf0]  ;;  %v12845_v30 = vor.u32 %v18521_v21, %v12844_v20  ;;  %v19088_v20 = vpack.c.bf16 %v175_v3, %v175_v3  ;;  %v18399_v3 = vld [vmem:[#allocation11 + $0x264] sm:$0xf] }
  0xc8   :  { %v19070_v39 = vpop.f32.mrf.mxu0  ;;  %v19072_v41 = vpop.f32.mrf.mxu1  ;;  %v12749_v54 = vor.u32 %v18497_v48, %v12748_v46  ;;  %v12828_v34 = vld [vmem:[#allocation11 + $0x600] sm:$0xf]  ;;  %v18347_v37 = vld [vmem:[#allocation11 + $0xc4] sm:$0xf]  ;;  %v12430_v46 = vld [vmem:[#allocation11 + $0x2f0] sm:$0xf0] }
  0xc9   :  { %4060 = vmatpush.bf16.msra.mxu2 %v12317_v47  ;;  %4073 = vmatpush.bf16.msra.mxu3 %v12445_v50  ;;  %v13005_v47 = vor.u32 %v18561_v36, %v13004_v35  ;;  %v18529_v50 = vld [vmem:[#allocation11 + $0x66c] sm:$0xf0] }
  0xca   :  { %4035 = vmatmul.bf16.vlgmr.msra.gmra.mxu0 %v19060_v7  ;;  %4048 = vmatmul.bf16.vlgmr.msra.gmra.mxu1 %v19064_v11  ;;  %v18517_v36 = vld [vmem:[#allocation11 + $0x60c] sm:$0xf0] }
  0xcb   :  { %4079 = vmatpush.bf16.msrb.mxu0 %v12685_v51  ;;  %4092 = vmatpush.bf16.msrb.mxu1 %v12813_v55  ;;  %v12988_v51 = vld [vmem:[#allocation11 + $0x740] sm:$0xf]  ;;  %v12877_v55 = vor.u32 %v18529_v50, %v12876_v49  ;;  %v12573_v49 = vor.u32 %v18453_v28, %v12572_v27  ;;  %v12158_v50 = vld [vmem:[#allocation11 + $0xd0] sm:$0xf0] }
  0xcc   :  { %4061 = vmatmul.bf16.vlgmr.msra.gmra.mxu2 %v19055_v1  ;;  %4074 = vmatmul.bf16.vlgmr.msra.gmra.mxu3 %v19062_v8  ;;  %v12989_v60 = vor.u32 %v18557_v52, %v12988_v51  ;;  %v18447_v51 = vld [vmem:[#allocation11 + $0x3e4] sm:$0xf]  ;;  %v12558_v52 = vld [vmem:[#allocation11 + $0x3f0] sm:$0xf0]  ;;  %v12161_v4 = vor.u32 %v18347_v37, %v12158_v50 }
  0xcd   :  { %4105 = vmatpush.bf16.msrb.mxu2 %v12941_v56  ;;  %4119 = vmatpush.bf16.msrb.mxu3 %v4016_v2  ;;  %v12604_v56 = vld [vmem:[#allocation11 + $0x440] sm:$0xf]  ;;  %v12270_v28 = vld [vmem:[#allocation11 + $0x1b0] sm:$0xf0] }
  0xce   :  { %v12605_v10 = vor.u32 %v18461_v58, %v12604_v56  ;;  %v176_v56 = vld [vmem:[#allocation5 + $0x30] sm:$0xff]  ;;  %v174_v58 = vld [vmem:[#allocation5 + $0x20] sm:$0xff] }
  0xcf   :  { %4080 = vmatpush.bf16.msrb.mxu0 %v12669_v9  ;;  %4093 = vmatpush.bf16.msrb.mxu1 %v12797_v12  ;;  %v19074_v2 = vpop.f32.mrf.mxu2  ;;  %v19076_v6 = vpop.f32.mrf.mxu3  ;;  %v12382_v50 = vld [vmem:[#allocation11 + $0x290] sm:$0xf0] }
  0xd0   :  { %v1093_v9 = vpop.f32.mrf.mxu0  ;;  %v1106_v12 = vpop.f32.mrf.mxu1 }
  0xd1   :  { %4106 = vmatpush.bf16.msrb.mxu2 %v12925_v13  ;;  %4120 = vmatpush.bf16.msrb.mxu3 %v13037_v17  ;;  %v12733_v13 = vor.u32 %v18493_v61, %v12732_v59  ;;  %v12716_v17 = vld [vmem:[#allocation11 + $0x520] sm:$0xf]  ;;  %v18343_v61 = vld [vmem:[#allocation11 + $0xa4] sm:$0xf]  ;;  %v12561_v9 = vor.u32 %v18447_v51, %v12558_v52  ;;  %v12110_v51 = vld [vmem:[#allocation11 + $0x70] sm:$0xf0] }
  0xd2   :  { %v18411_v12 = vld [vmem:[#allocation11 + $0x2c4] sm:$0xf] }
  0xd3   :  { %4081 = vmatpush.bf16.msrb.mxu0 %v12653_v24  ;;  %4094 = vmatpush.bf16.msrb.mxu1 %v12781_v25  ;;  %v18549_v24 = vld [vmem:[#allocation11 + $0x70c] sm:$0xf0]  ;;  %v18351_v25 = vld [vmem:[#allocation11 + $0xe4] sm:$0xf] }
  0xd4   :  { %v12957_v35 = vor.u32 %v18549_v24, %v12956_v23  ;;  %v18339_v24 = vld [vmem:[#allocation11 + $0x84] sm:$0xf] }
  0xd5   :  { %4107 = vmatpush.bf16.msrb.mxu2 %v12909_v26  ;;  %4121 = vmatpush.bf16.msrb.mxu3 %v13021_v29  ;;  %v12589_v26 = vor.u32 %v18457_v16, %v12588_v15  ;;  %v12717_v29 = vor.u32 %v18489_v19, %v12716_v17  ;;  %v12142_v15 = vld [vmem:[#allocation11 + $0xb0] sm:$0xf0]  ;;  %v18443_v16 = vld [vmem:[#allocation11 + $0x3c4] sm:$0xf]  ;;  %v19086_v19 = vpack.c.bf16 %v177_v63, %v177_v63 }
  0xd6   :  { %v12542_v17 = vld [vmem:[#allocation11 + $0x3d0] sm:$0xf0]  ;;  %v18435_v52 = vld [vmem:[#allocation11 + $0x384] sm:$0xf] }
  0xd7   :  { %4082 = vmatpush.bf16.msrb.mxu0 %v12637_v40  ;;  %4095 = vmatpush.bf16.msrb.mxu1 %v12765_v42  ;;  %v18383_v40 = vld [vmem:[#allocation11 + $0x1e4] sm:$0xf]  ;;  %v1119_v42 = vpop.f32.mrf.mxu2  ;;  %v12545_v27 = vor.u32 %v18443_v16, %v12542_v17  ;;  %v12238_v63 = vld [vmem:[#allocation11 + $0x170] sm:$0xf0] }
  0xd8   :  { %v19078_v48 = vpop.f32.mrf.mxu0  ;;  %v12305_v59 = vor.u32 %v18383_v40, %v12302_v44  ;;  %v18371_v44 = vld [vmem:[#allocation11 + $0x184] sm:$0xf] }
  0xd9   :  { %4108 = vmatpush.bf16.msrb.mxu2 %v12893_v43  ;;  %4122 = vmatpush.bf16.msrb.mxu3 %v13005_v47  ;;  %v12177_v43 = vor.u32 %v18351_v25, %v12174_v57  ;;  %v1132_v47 = vpop.f32.mrf.mxu3  ;;  %v18375_v25 = vld [vmem:[#allocation11 + $0x1a4] sm:$0xf]  ;;  %v12145_v57 = vor.u32 %v18343_v61, %v12142_v15  ;;  %v12494_v15 = vld [vmem:[#allocation11 + $0x370] sm:$0xf0] }
  0xda   :  { %v12273_v40 = vor.u32 %v18375_v25, %v12270_v28  ;;  %v12254_v47 = vld [vmem:[#allocation11 + $0x190] sm:$0xf0]  ;;  %v18395_v28 = vld [vmem:[#allocation11 + $0x244] sm:$0xf] }
  0xdb   :  { %4083 = vmatpush.bf16.msrb.mxu0 %v12621_v53  ;;  %4096 = vmatpush.bf16.msrb.mxu1 %v12749_v54  ;;  %v19080_v53 = vpop.f32.mrf.mxu1  ;;  %v12701_v54 = vor.u32 %v18485_v33, %v12700_v31 }
  0xdd   :  { %4109 = vmatpush.bf16.msrb.mxu2 %v12877_v55  ;;  %4123 = vmatpush.bf16.msrb.mxu3 %v12989_v60  ;;  %v12829_v55 = vor.u32 %v18517_v36, %v12828_v34  ;;  %v12433_v60 = vor.u32 %v18415_v45, %v12430_v46  ;;  %v12126_v34 = vld [vmem:[#allocation11 + $0x90] sm:$0xf0] }
  0xde   :  { %v12526_v36 = vld [vmem:[#allocation11 + $0x3b0] sm:$0xf0]  ;;  %v12129_v45 = vor.u32 %v18339_v24, %v12126_v34  ;;  %v18363_v24 = vld [vmem:[#allocation11 + $0x144] sm:$0xf] }
  0xdf   :  { %4084 = vmatpush.bf16.msrb.mxu0 %v12605_v10  ;;  %4097 = vmatpush.bf16.msrb.mxu1 %v12733_v13  ;;  %v12286_v10 = vld [vmem:[#allocation11 + $0x1d0] sm:$0xf0] }
  0xe0   :  { %v12414_v13 = vld [vmem:[#allocation11 + $0x2d0] sm:$0xf0]  ;;  %v12289_v21 = vor.u32 %v18379_v62, %v12286_v10  ;;  %v1145_v33 = vpop.f32.mrf.mxu0 }
  0xe1   :  { %4110 = vmatpush.bf16.msrb.mxu2 %v12861_v14  ;;  %4124 = vmatpush.bf16.msrb.mxu3 %v12973_v18  ;;  %v19082_v14 = vpack.c.bf16 %v176_v56, %v176_v56  ;;  %v19084_v18 = vpack.c.bf16 %v174_v58, %v174_v58  ;;  %v12417_v23 = vor.u32 %v18411_v12, %v12414_v13  ;;  %v19092_v31 = vpop.f32.mrf.mxu3  ;;  %v18331_v58 = vld [vmem:[#allocation11 + $0x44] sm:$0xf]  ;;  %v12094_v12 = vld [vmem:[#allocation11 + $0x50] sm:$0xf0] }
  0xe2   :  { %v18431_v13 = vld [vmem:[#allocation11 + $0x364] sm:$0xf]  ;;  %v12097_v25 = vor.u32 %v18331_v58, %v12094_v12  ;;  %v12478_v34 = vld [vmem:[#allocation11 + $0x350] sm:$0xf0] }
  0xe3   :  { %4085 = vmatpush.bf16.msrb.mxu0 %v12589_v26  ;;  %4098 = vmatpush.bf16.msrb.mxu1 %v12717_v29  ;;  %v19090_v26 = vpop.f32.mrf.mxu2  ;;  %v18407_v29 = vld [vmem:[#allocation11 + $0x2a4] sm:$0xf]  ;;  %v1158_v37 = vpop.f32.mrf.mxu1  ;;  %v12686_v58 = vld [vmem:[#allocation11 + $0x4f0] sm:$0xf0] }
  0xe4   :  { %v18427_v33 = vld [vmem:[#allocation11 + $0x344] sm:$0xf]  ;;  %v12318_v12 = vld [vmem:[#allocation11 + $0x210] sm:$0xf0] }
  0xe5   :  { %4111 = vmatpush.bf16.msrb.mxu2 %v12845_v30  ;;  %4125 = vmatpush.bf16.msrb.mxu3 %v12957_v35  ;;  %v12398_v30 = vld [vmem:[#allocation11 + $0x2b0] sm:$0xf0]  ;;  %v18439_v35 = vld [vmem:[#allocation11 + $0x3a4] sm:$0xf] }
  0xe6   :  { %v12401_v42 = vor.u32 %v18407_v29, %v12398_v30  ;;  %v12529_v46 = vor.u32 %v18439_v35, %v12526_v36  ;;  %v12350_v29 = vld [vmem:[#allocation11 + $0x250] sm:$0xf0]  ;;  %v18323_v37 = vld [vmem:[#allocation11 + $0x4] sm:$0xf] }
  0xe7   :  { %4086 = vmatpush.bf16.msrb.mxu0 %v12573_v49  ;;  %4099 = vmatpush.bf16.msrb.mxu1 %v12701_v54  ;;  %v18403_v49 = vld [vmem:[#allocation11 + $0x284] sm:$0xf]  ;;  %v12510_v54 = vld [vmem:[#allocation11 + $0x390] sm:$0xf0]  ;;  %v12353_v36 = vor.u32 %v18395_v28, %v12350_v29 }
  0xe8   :  { %13050 = vmatmul.msk.bf16.vlgmr.msrb.gmra.mxu3 %vm4010_vm2, %v19086_v19  ;;  %v12385_v56 = vor.u32 %v18403_v49, %v12382_v50  ;;  %v12513_v62 = vor.u32 %v18435_v52, %v12510_v54  ;;  %v19099_v10 = vpop.f32.mrf.mxu0  ;;  %v12078_v30 = vld [vmem:[#allocation11 + $0x30] sm:$0xf0]  ;;  %v18423_v52 = vld [vmem:[#allocation11 + $0x324] sm:$0xf] }
  0xe9   :  { %4131 = vmatpush.bf16.msra.mxu3 %v12177_v43  ;;  %4112 = vmatpush.bf16.msrb.mxu2 %v12829_v55  ;;  %v18335_v43 = vld [vmem:[#allocation11 + $0x64] sm:$0xf]  ;;  %v12257_v55 = vor.u32 %v18371_v44, %v12254_v47  ;;  %v12481_v44 = vor.u32 %v18427_v33, %v12478_v34  ;;  %v12334_v47 = vld [vmem:[#allocation11 + $0x230] sm:$0xf0] }
  0xea   :  { %4087 = vmatmul.bf16.vlgmr.msrb.gmra.mxu0 %v19084_v18  ;;  %4100 = vmatmul.bf16.vlgmr.msrb.gmra.mxu1 %v19088_v20  ;;  %v12113_v61 = vor.u32 %v18335_v43, %v12110_v51  ;;  %v12062_v51 = vld [vmem:[#allocation11 + $0x10] sm:$0xf0] }
  0xeb   :  { %4144 = vmatpush.bf16.msra.mxu0 %v12305_v59  ;;  %4157 = vmatpush.bf16.msra.mxu1 %v12433_v60  ;;  %v18367_v59 = vld [vmem:[#allocation11 + $0x164] sm:$0xf]  ;;  %v1171_v60 = vpop.f32.mrf.mxu2  ;;  %v19101_v16 = vpop.f32.mrf.mxu1  ;;  %v12462_v54 = vld [vmem:[#allocation11 + $0x330] sm:$0xf0] }
  0xec   :  { %4113 = vmatmul.bf16.vlgmr.msrb.gmra.mxu2 %v19082_v14  ;;  %v12241_v17 = vor.u32 %v18367_v59, %v12238_v63  ;;  %v18387_v63 = vld [vmem:[#allocation11 + $0x204] sm:$0xf] }
  0xed   :  { %4132 = vmatpush.bf16.msra.mxu3 %v12161_v4  ;;  %4170 = vmatpush.bf16.msra.mxu2 %v12561_v9  ;;  %v12366_v4 = vld [vmem:[#allocation11 + $0x270] sm:$0xf0]  ;;  %v1184_v9 = vpop.f32.mrf.mxu3  ;;  %v12321_v29 = vor.u32 %v18387_v63, %v12318_v12  ;;  %v18563_v12 = vld [vmem:[#allocation11 + $0x784] sm:$0xf] }
  0xee   :  { %v12465_v9 = vor.u32 %v18423_v52, %v12462_v54  ;;  %v18567_v52 = vld [vmem:[#allocation11 + $0x7a4] sm:$0xf]  ;;  %v13038_v54 = vld [vmem:[#allocation11 + $0x7b0] sm:$0xf0] }
  0xef   :  { %4145 = vmatpush.bf16.msra.mxu0 %v12289_v21  ;;  %4158 = vmatpush.bf16.msra.mxu1 %v12417_v23  ;;  %v12369_v21 = vor.u32 %v18399_v3, %v12366_v4  ;;  %v18327_v23 = vld [vmem:[#allocation11 + $0x24] sm:$0xf]  ;;  %v3507_v3 = vunpack.c.h.b16 %v19046_v22  ;;  %v12065_v4 = vor.u32 %v18323_v37, %v12062_v51  ;;  %v13041_v63 = vor.u32 %v18567_v52, %v13038_v54  ;;  %v12878_v54 = vld [vmem:[#allocation11 + $0x670] sm:$0xf0] }
  0xf0   :  { %v12081_v43 = vor.u32 %v18327_v23, %v12078_v30  ;;  %v1197_v50 = vpop.f32.mrf.mxu0  ;;  %v18511_v23 = vld [vmem:[#allocation11 + $0x5e4] sm:$0xf] }
  0xf1   :  { %4133 = vmatpush.bf16.msra.mxu3 %v12145_v57  ;;  %4171 = vmatpush.bf16.msra.mxu2 %v12545_v27  ;;  %v12497_v57 = vor.u32 %v18431_v13, %v12494_v15  ;;  %v12222_v27 = vld [vmem:[#allocation11 + $0x150] sm:$0xf0]  ;;  %v18419_v13 = vld [vmem:[#allocation11 + $0x304] sm:$0xf]  ;;  %v3759_v30 = vpack.c.b16 %v3507_v3, %v3507_v3 }
  0xf2   :  { %v12225_v35 = vor.u32 %v18363_v24, %v12222_v27  ;;  %v12446_v15 = vld [vmem:[#allocation11 + $0x310] sm:$0xf0]  ;;  %v18527_v52 = vld [vmem:[#allocation11 + $0x664] sm:$0xf] }
  0xf3   :  { %4146 = vmatpush.bf16.msra.mxu0 %v12273_v40  ;;  %4159 = vmatpush.bf16.msra.mxu1 %v12401_v42  ;;  %v18359_v40 = vld [vmem:[#allocation11 + $0x124] sm:$0xf]  ;;  %v19103_v42 = vpop.f32.mrf.mxu2  ;;  %v12814_v24 = vld [vmem:[#allocation11 + $0x5f0] sm:$0xf0]  ;;  %v12449_v33 = vor.u32 %v18419_v13, %v12446_v15  ;;  %v4019_v51 = vsel %vm4014_vm1, %v3759_v30, 0 }
  0xf4   :  { %v12942_v27 = vld [vmem:[#allocation11 + $0x6f0] sm:$0xf0]  ;;  %v12817_v34 = vor.u32 %v18511_v23, %v12814_v24  ;;  %v18463_v24 = vld [vmem:[#allocation11 + $0x464] sm:$0xf] }
  0xf5   :  { %4134 = vmatpush.bf16.msra.mxu3 %v12129_v45  ;;  %4172 = vmatpush.bf16.msra.mxu2 %v12529_v46  ;;  %v12206_v45 = vld [vmem:[#allocation11 + $0x130] sm:$0xf0]  ;;  %v18391_v46 = vld [vmem:[#allocation11 + $0x224] sm:$0xf]  ;;  %v19105_v49 = vpop.f32.mrf.mxu3 }
  0xf6   :  { %v12209_v59 = vor.u32 %v18359_v40, %v12206_v45  ;;  %v12337_v60 = vor.u32 %v18391_v46, %v12334_v47  ;;  %v18471_v40 = vld [vmem:[#allocation11 + $0x4a4] sm:$0xf]  ;;  %v12654_v45 = vld [vmem:[#allocation11 + $0x4b0] sm:$0xf0] }
  0xf7   :  { %4147 = vmatpush.bf16.msra.mxu0 %v12257_v55  ;;  %4160 = vmatpush.bf16.msra.mxu1 %v12385_v56  ;;  %v1210_v55 = vpop.f32.mrf.mxu1  ;;  %v18479_v56 = vld [vmem:[#allocation11 + $0x4e4] sm:$0xf]  ;;  %v12926_v47 = vld [vmem:[#allocation11 + $0x6d0] sm:$0xf0] }
  0xf8   :  { %v18539_v46 = vld [vmem:[#allocation11 + $0x6c4] sm:$0xf]  ;;  %v19108_v50 = vpop.f32.mrf.mxu0  ;;  %v12638_v3 = vld [vmem:[#allocation11 + $0x490] sm:$0xf0] }
  0xf9   :  { %4135 = vmatpush.bf16.msra.mxu3 %v12113_v61  ;;  %4173 = vmatpush.bf16.msra.mxu2 %v12513_v62  ;;  %v18355_v61 = vld [vmem:[#allocation11 + $0x104] sm:$0xf]  ;;  %v12190_v62 = vld [vmem:[#allocation11 + $0x110] sm:$0xf0] }
  0xfa   :  { %v12193_v28 = vor.u32 %v18355_v61, %v12190_v62  ;;  %v18503_v61 = vld [vmem:[#allocation11 + $0x5a4] sm:$0xf]  ;;  %v12782_v62 = vld [vmem:[#allocation11 + $0x5b0] sm:$0xf0] }
  0xfb   :  { %4148 = vmatpush.bf16.msra.mxu0 %v12241_v17  ;;  %4161 = vmatpush.bf16.msra.mxu1 %v12369_v21  ;;  %v12689_v17 = vor.u32 %v18479_v56, %v12686_v58  ;;  %v18475_v21 = vld [vmem:[#allocation11 + $0x4c4] sm:$0xf]  ;;  %v1223_v22 = vpop.f32.mrf.mxu2  ;;  %v12657_v58 = vor.u32 %v18471_v40, %v12654_v45  ;;  %v13022_v13 = vld [vmem:[#allocation11 + $0x790] sm:$0xf0]  ;;  %v12785_v15 = vor.u32 %v18503_v61, %v12782_v62 }
  0xfc   :  { %v18531_v30 = vld [vmem:[#allocation11 + $0x684] sm:$0xf]  ;;  %v12894_v22 = vld [vmem:[#allocation11 + $0x690] sm:$0xf0]  ;;  %v12881_v61 = vor.u32 %v18527_v52, %v12878_v54  ;;  %v18354_v52 = vld [vmem:[#allocation11 + $0xf4] sm:$0xf0] }
  0xfd   :  { %4136 = vmatpush.bf16.msra.mxu3 %v12097_v25  ;;  %4174 = vmatpush.bf16.msra.mxu2 %v12497_v57  ;;  %v12670_v25 = vld [vmem:[#allocation11 + $0x4d0] sm:$0xf0]  ;;  %v18543_v57 = vld [vmem:[#allocation11 + $0x6e4] sm:$0xf] }
  0xfe   :  { %v12945_v37 = vor.u32 %v18543_v57, %v12942_v27  ;;  %v12766_v57 = vld [vmem:[#allocation11 + $0x590] sm:$0xf0]  ;;  %v13025_v27 = vor.u32 %v18563_v12, %v13022_v13  ;;  %v18495_v45 = vld [vmem:[#allocation11 + $0x564] sm:$0xf] }
  0xff   :  { %4149 = vmatpush.bf16.msra.mxu0 %v12225_v35  ;;  %4162 = vmatpush.bf16.msra.mxu1 %v12353_v36  ;;  %v1236_v35 = vpop.f32.mrf.mxu3  ;;  %v12673_v36 = vor.u32 %v18475_v21, %v12670_v25  ;;  %v19111_v55 = vpop.f32.mrf.mxu1  ;;  %v18499_v25 = vld [vmem:[#allocation11 + $0x584] sm:$0xf]  ;;  %v12590_v13 = vld [vmem:[#allocation11 + $0x430] sm:$0xf0] }
 0x100   :  { %v13006_v35 = vld [vmem:[#allocation11 + $0x770] sm:$0xf0]  ;;  %v18483_v54 = vld [vmem:[#allocation11 + $0x504] sm:$0xf] }
 0x101   :  { %4137 = vmatpush.bf16.msra.mxu3 %v12081_v43  ;;  %4175 = vmatpush.bf16.msra.mxu2 %v12481_v44  ;;  %v18507_v43 = vld [vmem:[#allocation11 + $0x5c4] sm:$0xf]  ;;  %v12798_v44 = vld [vmem:[#allocation11 + $0x5d0] sm:$0xf0] }
 0x102   :  { %v12801_v56 = vor.u32 %v18507_v43, %v12798_v44  ;;  %v12897_v43 = vor.u32 %v18531_v30, %v12894_v22  ;;  %v18459_v44 = vld [vmem:[#allocation11 + $0x444] sm:$0xf] }
 0x103   :  { %4150 = vmatpush.bf16.msra.mxu0 %v12209_v59  ;;  %4163 = vmatpush.bf16.msra.mxu1 %v12337_v60  ;;  %v12929_v59 = vor.u32 %v18539_v46, %v12926_v47  ;;  %v18467_v60 = vld [vmem:[#allocation11 + $0x484] sm:$0xf]  ;;  %v19117_v23 = vpop.f32.mrf.mxu2  ;;  %v12750_v46 = vld [vmem:[#allocation11 + $0x570] sm:$0xf0] }
 0x105   :  { %4138 = vmatpush.bf16.msra.mxu3 %v12065_v4  ;;  %4176 = vmatpush.bf16.msra.mxu2 %v12465_v9  ;;  %v18535_v4 = vld [vmem:[#allocation11 + $0x6a4] sm:$0xf]  ;;  %v12910_v9 = vld [vmem:[#allocation11 + $0x6b0] sm:$0xf0] }
 0x106   :  { %v12913_v21 = vor.u32 %v18535_v4, %v12910_v9  ;;  %v12734_v4 = vld [vmem:[#allocation11 + $0x550] sm:$0xf0] }
 0x107   :  { %4151 = vmatpush.bf16.msra.mxu0 %v12193_v28  ;;  %4164 = vmatpush.bf16.msra.mxu1 %v12321_v29  ;;  %v19119_v28 = vpop.f32.mrf.mxu3  ;;  %v12622_v29 = vld [vmem:[#allocation11 + $0x470] sm:$0xf0] }
 0x108   :  { %4139 = vmatmul.bf16.vlgmr.msra.gmra.mxu3 %v19060_v7  ;;  %v12625_v40 = vor.u32 %v18463_v24, %v12622_v29  ;;  %v12974_v24 = vld [vmem:[#allocation11 + $0x730] sm:$0xf0] }
 0x109   :  { %4183 = vmatpush.bf16.msrb.mxu3 %v12689_v17  ;;  %4177 = vmatpush.bf16.msra.mxu2 %v12449_v33  ;;  %v12641_v17 = vor.u32 %v18467_v60, %v12638_v3  ;;  %v1249_v33 = vpop.f32.mrf.mxu0  ;;  %v18491_v3 = vld [vmem:[#allocation11 + $0x544] sm:$0xf] }
 0x10a   :  { %4152 = vmatmul.bf16.vlgmr.msra.gmra.mxu0 %v19064_v11  ;;  %4165 = vmatmul.bf16.vlgmr.msra.gmra.mxu1 %v19055_v1  ;;  %v12574_v33 = vld [vmem:[#allocation11 + $0x410] sm:$0xf0] }
 0x10b   :  { %4196 = vmatpush.bf16.msrb.mxu0 %v12817_v34  ;;  %4209 = vmatpush.bf16.msrb.mxu1 %v12945_v37  ;;  %v18559_v34 = vld [vmem:[#allocation11 + $0x764] sm:$0xf]  ;;  %v12769_v37 = vor.u32 %v18499_v25, %v12766_v57  ;;  %v1275_v62 = vpop.f32.mrf.mxu2  ;;  %v12737_v25 = vor.u32 %v18491_v3, %v12734_v4  ;;  %v12292_v3 = vld [vmem:[#allocation11 + $0x1c8] sm:$0xf] }
 0x10c   :  { %4178 = vmatmul.bf16.vlgmr.msra.gmra.mxu2 %v19062_v8  ;;  %v13009_v47 = vor.u32 %v18559_v34, %v13006_v35  ;;  %v18487_v34 = vld [vmem:[#allocation11 + $0x524] sm:$0xf]  ;;  %v12718_v35 = vld [vmem:[#allocation11 + $0x530] sm:$0xf0]  ;;  %v12436_v4 = vld [vmem:[#allocation11 + $0x2e8] sm:$0xf] }
 0x10d   :  { %4184 = vmatpush.bf16.msrb.mxu3 %v12673_v36  ;;  %4223 = vmatpush.bf16.msrb.mxu2 %v4019_v51  ;;  %v1262_v36 = vpop.f32.mrf.mxu1  ;;  %v12606_v51 = vld [vmem:[#allocation11 + $0x450] sm:$0xf0] }
 0x10e   :  { %v12609_v60 = vor.u32 %v18459_v44, %v12606_v51  ;;  %v12958_v44 = vld [vmem:[#allocation11 + $0x710] sm:$0xf0]  ;;  %v12180_v51 = vld [vmem:[#allocation11 + $0xe8] sm:$0xf] }
 0x10f   :  { %4197 = vmatpush.bf16.msrb.mxu0 %v12801_v56  ;;  %4210 = vmatpush.bf16.msrb.mxu1 %v12929_v59  ;;  %v18555_v56 = vld [vmem:[#allocation11 + $0x744] sm:$0xf]  ;;  %v12753_v59 = vor.u32 %v18495_v45, %v12750_v46  ;;  %v1288_v12 = vpop.f32.mrf.mxu3  ;;  %v12308_v45 = vld [vmem:[#allocation11 + $0x1e8] sm:$0xf]  ;;  %v18386_v46 = vld [vmem:[#allocation11 + $0x1f4] sm:$0xf0] }
 0x110   :  { %v12181_v12 = vor.u32 %v18354_v52, %v12180_v51  ;;  %v18446_v51 = vld [vmem:[#allocation11 + $0x3d4] sm:$0xf0]  ;;  %v12148_v52 = vld [vmem:[#allocation11 + $0xa8] sm:$0xf] }
 0x111   :  { %4185 = vmatpush.bf16.msrb.mxu3 %v12657_v58  ;;  %4224 = vmatpush.bf16.msrb.mxu2 %v13041_v63  ;;  %v12990_v58 = vld [vmem:[#allocation11 + $0x750] sm:$0xf0]  ;;  %v18455_v63 = vld [vmem:[#allocation11 + $0x424] sm:$0xf]  ;;  %v19121_v57 = vpop.f32.mrf.mxu0 }
 0x112   :  { %v12993_v9 = vor.u32 %v18555_v56, %v12990_v58  ;;  %v12593_v29 = vor.u32 %v18455_v63, %v12590_v13  ;;  %v12309_v63 = vor.u32 %v18386_v46, %v12308_v45  ;;  %v18378_v46 = vld [vmem:[#allocation11 + $0x1b4] sm:$0xf0] }
 0x113   :  { %4198 = vmatpush.bf16.msrb.mxu0 %v12785_v15  ;;  %4211 = vmatpush.bf16.msrb.mxu1 %v12913_v21  ;;  %v18523_v15 = vld [vmem:[#allocation11 + $0x644] sm:$0xf]  ;;  %v19125_v13 = vpop.f32.mrf.mxu2 }
 0x114   :  { %v18551_v21 = vld [vmem:[#allocation11 + $0x724] sm:$0xf]  ;;  %19702 = vst [vmem:[#allocation24_spill] sm:$0xff] %v19125_v13  ;;  %v12294_v13 = vld [vmem:[#allocation11 + $0x1d8] sm:$0xf0] }
 0x115   :  { %4186 = vmatpush.bf16.msrb.mxu3 %v12641_v17  ;;  %4225 = vmatpush.bf16.msrb.mxu2 %v13025_v27  ;;  %v12862_v17 = vld [vmem:[#allocation11 + $0x650] sm:$0xf0]  ;;  %v18451_v27 = vld [vmem:[#allocation11 + $0x404] sm:$0xf]  ;;  %v19123_v22 = vpop.f32.mrf.mxu1  ;;  %v12977_v36 = vor.u32 %v18551_v21, %v12974_v24  ;;  %v18450_v21 = vld [vmem:[#allocation11 + $0x3f4] sm:$0xf0] }
 0x116   :  { %v12865_v30 = vor.u32 %v18523_v15, %v12862_v17  ;;  %v12577_v56 = vor.u32 %v18451_v27, %v12574_v33  ;;  %v18382_v15 = vld [vmem:[#allocation11 + $0x1d4] sm:$0xf0]  ;;  %v12564_v17 = vld [vmem:[#allocation11 + $0x3e8] sm:$0xf] }
 0x117   :  { %4199 = vmatpush.bf16.msrb.mxu0 %v12769_v37  ;;  %4212 = vmatpush.bf16.msrb.mxu1 %v12897_v43  ;;  %v18519_v37 = vld [vmem:[#allocation11 + $0x624] sm:$0xf]  ;;  %v19127_v24 = vpop.f32.mrf.mxu3  ;;  %v12164_v27 = vld [vmem:[#allocation11 + $0xc8] sm:$0xf] }
 0x118   :  { %v18547_v43 = vld [vmem:[#allocation11 + $0x704] sm:$0xf]  ;;  %19703 = vst [vmem:[#allocation25_spill] sm:$0xff] %v19127_v24  ;;  %v12566_v24 = vld [vmem:[#allocation11 + $0x3f8] sm:$0xf0] }
 0x119   :  { %4187 = vmatpush.bf16.msrb.mxu3 %v12625_v40  ;;  %4226 = vmatpush.bf16.msrb.mxu2 %v13009_v47  ;;  %v12846_v40 = vld [vmem:[#allocation11 + $0x630] sm:$0xf0]  ;;  %v12721_v47 = vor.u32 %v18487_v34, %v12718_v35  ;;  %v12961_v62 = vor.u32 %v18547_v43, %v12958_v44  ;;  %v12420_v43 = vld [vmem:[#allocation11 + $0x2c8] sm:$0xf]  ;;  %v18414_v44 = vld [vmem:[#allocation11 + $0x2d4] sm:$0xf0] }
 0x11a   :  { %v12849_v58 = vor.u32 %v18519_v37, %v12846_v40  ;;  %v12565_v37 = vor.u32 %v18450_v21, %v12564_v17  ;;  %v12276_v40 = vld [vmem:[#allocation11 + $0x1a8] sm:$0xf]  ;;  %v18342_v21 = vld [vmem:[#allocation11 + $0x94] sm:$0xf0] }
 0x11b   :  { %4200 = vmatpush.bf16.msrb.mxu0 %v12753_v59  ;;  %4213 = vmatpush.bf16.msrb.mxu1 %v12881_v61  ;;  %v12702_v59 = vld [vmem:[#allocation11 + $0x510] sm:$0xf0]  ;;  %v12132_v17 = vld [vmem:[#allocation11 + $0x88] sm:$0xf] }
 0x11c   :  { %v12830_v61 = vld [vmem:[#allocation11 + $0x610] sm:$0xf0] }
 0x11d   :  { %4188 = vmatpush.bf16.msrb.mxu3 %v12609_v60  ;;  %4227 = vmatpush.bf16.msrb.mxu2 %v12993_v9  ;;  %v18515_v60 = vld [vmem:[#allocation11 + $0x604] sm:$0xf]  ;;  %v18418_v9 = vld [vmem:[#allocation11 + $0x2f4] sm:$0xf0]  ;;  %v1314_v35 = vpop.f32.mrf.mxu1 }
 0x11e   :  { %v12833_v33 = vor.u32 %v18515_v60, %v12830_v61  ;;  %v12437_v34 = vor.u32 %v18418_v9, %v12436_v4  ;;  %v12260_v60 = vld [vmem:[#allocation11 + $0x188] sm:$0xf]  ;;  %v18374_v4 = vld [vmem:[#allocation11 + $0x194] sm:$0xf0] }
 0x11f   :  { %4201 = vmatpush.bf16.msrb.mxu0 %v12737_v25  ;;  %4214 = vmatpush.bf16.msrb.mxu1 %v12865_v30  ;;  %v12705_v25 = vor.u32 %v18483_v54, %v12702_v59  ;;  %v1301_v30 = vpop.f32.mrf.mxu0  ;;  %v18346_v54 = vld [vmem:[#allocation11 + $0xb4] sm:$0xf0]  ;;  %v12404_v61 = vld [vmem:[#allocation11 + $0x2a8] sm:$0xf] }
 0x120   :  { %v12532_v9 = vld [vmem:[#allocation11 + $0x3a8] sm:$0xf]  ;;  %v18406_v35 = vld [vmem:[#allocation11 + $0x294] sm:$0xf0] }
 0x121   :  { %4189 = vmatpush.bf16.msrb.mxu3 %v12593_v29  ;;  %4228 = vmatpush.bf16.msrb.mxu2 %v12977_v36  ;;  %v18350_v29 = vld [vmem:[#allocation11 + $0xd4] sm:$0xf0]  ;;  %v12293_v36 = vor.u32 %v18382_v15, %v12292_v3  ;;  %v1327_v3 = vpop.f32.mrf.mxu2  ;;  %v1340_v15 = vpop.f32.mrf.mxu3 }
 0x122   :  { %v12165_v45 = vor.u32 %v18350_v29, %v12164_v27  ;;  %v12261_v27 = vor.u32 %v18374_v4, %v12260_v60  ;;  %v18366_v60 = vld [vmem:[#allocation11 + $0x154] sm:$0xf0] }
 0x123   :  { %4202 = vmatpush.bf16.msrb.mxu0 %v12721_v47  ;;  %4215 = vmatpush.bf16.msrb.mxu1 %v12849_v58  ;;  %v12548_v47 = vld [vmem:[#allocation11 + $0x3c8] sm:$0xf]  ;;  %v12277_v58 = vor.u32 %v18378_v46, %v12276_v40  ;;  %v18370_v40 = vld [vmem:[#allocation11 + $0x174] sm:$0xf0] }
 0x124   :  { %v12549_v59 = vor.u32 %v18446_v51, %v12548_v47  ;;  %v18338_v46 = vld [vmem:[#allocation11 + $0x74] sm:$0xf0] }
 0x125   :  { %4190 = vmatpush.bf16.msrb.mxu3 %v12577_v56  ;;  %4229 = vmatpush.bf16.msrb.mxu2 %v12961_v62  ;;  %v12421_v56 = vor.u32 %v18414_v44, %v12420_v43  ;;  %v18410_v62 = vld [vmem:[#allocation11 + $0x2b4] sm:$0xf0]  ;;  %v12516_v43 = vld [vmem:[#allocation11 + $0x388] sm:$0xf] }
 0x126   :  { %v18438_v44 = vld [vmem:[#allocation11 + $0x394] sm:$0xf0] }
 0x127   :  { %4203 = vmatpush.bf16.msrb.mxu0 %v12705_v25  ;;  %4216 = vmatpush.bf16.msrb.mxu1 %v12833_v33  ;;  %v12405_v25 = vor.u32 %v18410_v62, %v12404_v61  ;;  %v19134_v30 = vpop.f32.mrf.mxu0  ;;  %v12244_v33 = vld [vmem:[#allocation11 + $0x168] sm:$0xf]  ;;  %v18434_v62 = vld [vmem:[#allocation11 + $0x374] sm:$0xf0] }
 0x128   :  { %4191 = vmatmul.bf16.vlgmr.msrb.gmra.mxu3 %v19084_v18  ;;  %13051 = vmatmul.msk.bf16.vlgmr.msrb.gmra.mxu2 %vm4010_vm2, %v19086_v19  ;;  %19704 = vst [vmem:[#allocation26_spill] sm:$0xff] %v19134_v30  ;;  %v12245_v51 = vor.u32 %v18370_v40, %v12244_v33  ;;  %v12500_v61 = vld [vmem:[#allocation11 + $0x368] sm:$0xf]  ;;  %v18334_v3 = vld [vmem:[#allocation11 + $0x54] sm:$0xf0] }
 0x129   :  { %4248 = vmatpush.bf16.msra.mxu3 %v12309_v63  ;;  %4235 = vmatpush.bf16.msra.mxu2 %v12181_v12  ;;  %v12149_v63 = vor.u32 %v18346_v54, %v12148_v52  ;;  %v18442_v12 = vld [vmem:[#allocation11 + $0x3b4] sm:$0xf0]  ;;  %v12517_v52 = vor.u32 %v18438_v44, %v12516_v43  ;;  %v12228_v54 = vld [vmem:[#allocation11 + $0x148] sm:$0xf]  ;;  %v19138_v4 = vpop.f32.mrf.mxu2  ;;  %v19140_v15 = vpop.f32.mrf.mxu3  ;;  %v18448_v30 = vld [vmem:[#allocation11 + $0x3ec] sm:$0xf] }
 0x12a   :  { %4204 = vmatmul.bf16.vlgmr.msrb.gmra.mxu0 %v19088_v20  ;;  %4217 = vmatmul.bf16.vlgmr.msrb.gmra.mxu1 %v19082_v14  ;;  %v12533_v29 = vor.u32 %v18442_v12, %v12532_v9  ;;  %19706 = vst [vmem:[#allocation28_spill] sm:$0xff] %v19138_v4  ;;  %v12212_v12 = vld [vmem:[#allocation11 + $0x128] sm:$0xf]  ;;  %v18398_v33 = vld [vmem:[#allocation11 + $0x254] sm:$0xf0] }
 0x12b   :  { %4261 = vmatpush.bf16.msra.mxu0 %v12437_v34  ;;  %4274 = vmatpush.bf16.msra.mxu1 %v12565_v37  ;;  %v12388_v34 = vld [vmem:[#allocation11 + $0x288] sm:$0xf]  ;;  %v19136_v37 = vpop.f32.mrf.mxu1  ;;  %19707 = vst [vmem:[#allocation29_spill] sm:$0xff] %v19140_v15  ;;  %v18430_v40 = vld [vmem:[#allocation11 + $0x354] sm:$0xf0] }
 0x12c   :  { %19705 = vst [vmem:[#allocation27_spill] sm:$0xff] %v19136_v37  ;;  %v12389_v47 = vor.u32 %v18406_v35, %v12388_v34  ;;  %v19142_v43 = vld [vmem:[#allocation11 + $0x7c8] sm:$0xff]  ;;  %v18422_v37 = vld [vmem:[#allocation11 + $0x314] sm:$0xf0] }
 0x12d   :  { %4249 = vmatpush.bf16.msra.mxu3 %v12293_v36  ;;  %4236 = vmatpush.bf16.msra.mxu2 %v12165_v45  ;;  %v12133_v36 = vor.u32 %v18342_v21, %v12132_v17  ;;  %v12116_v45 = vld [vmem:[#allocation11 + $0x68] sm:$0xf]  ;;  %v12229_v17 = vor.u32 %v18366_v60, %v12228_v54  ;;  %v12501_v21 = vor.u32 %v18434_v62, %v12500_v61  ;;  %v18358_v61 = vld [vmem:[#allocation11 + $0x114] sm:$0xf0] }
 0x12e   :  { %v12084_v44 = vld [vmem:[#allocation11 + $0x28] sm:$0xf] }
 0x12f   :  { %4262 = vmatpush.bf16.msra.mxu0 %v12421_v56  ;;  %4275 = vmatpush.bf16.msra.mxu1 %v12549_v59  ;;  %v12372_v56 = vld [vmem:[#allocation11 + $0x268] sm:$0xf]  ;;  %v12117_v59 = vor.u32 %v18338_v46, %v12116_v45  ;;  %v18330_v45 = vld [vmem:[#allocation11 + $0x34] sm:$0xf0] }
 0x130   :  { %v12196_v54 = vld [vmem:[#allocation11 + $0x108] sm:$0xf]  ;;  %v12085_v60 = vor.u32 %v18330_v45, %v12084_v44 }
 0x131   :  { %4250 = vmatpush.bf16.msra.mxu3 %v12277_v58  ;;  %4237 = vmatpush.bf16.msra.mxu2 %v12149_v63  ;;  %v18402_v58 = vld [vmem:[#allocation11 + $0x274] sm:$0xf0]  ;;  %v12100_v63 = vld [vmem:[#allocation11 + $0x48] sm:$0xf] }
 0x132   :  { %v12373_v9 = vor.u32 %v18402_v58, %v12372_v56  ;;  %v12101_v34 = vor.u32 %v18334_v3, %v12100_v63  ;;  %v12340_v56 = vld [vmem:[#allocation11 + $0x228] sm:$0xf]  ;;  %v18394_v58 = vld [vmem:[#allocation11 + $0x234] sm:$0xf0] }
 0x133   :  { %4263 = vmatpush.bf16.msra.mxu0 %v12405_v25  ;;  %4276 = vmatpush.bf16.msra.mxu1 %v12533_v29  ;;  %v1353_v25 = vpop.f32.mrf.mxu0  ;;  %v12356_v29 = vld [vmem:[#allocation11 + $0x248] sm:$0xf]  ;;  %v1366_v35 = vpop.f32.mrf.mxu1  ;;  %v18426_v63 = vld [vmem:[#allocation11 + $0x334] sm:$0xf0] }
 0x134   :  { %v12357_v46 = vor.u32 %v18398_v33, %v12356_v29  ;;  %v12468_v62 = vld [vmem:[#allocation11 + $0x328] sm:$0xf]  ;;  %v18326_v3 = vld [vmem:[#allocation11 + $0x14] sm:$0xf0]  ;;  %v12197_v29 = vor.u32 %v18358_v61, %v12196_v54 }
 0x135   :  { %4251 = vmatpush.bf16.msra.mxu3 %v12261_v27  ;;  %4238 = vmatpush.bf16.msra.mxu2 %v12133_v36  ;;  %v18362_v27 = vld [vmem:[#allocation11 + $0x134] sm:$0xf0]  ;;  %v12484_v36 = vld [vmem:[#allocation11 + $0x348] sm:$0xf]  ;;  %v12469_v33 = vor.u32 %v18426_v63, %v12468_v62 }
 0x136   :  { %v12820_v25 = vld [vmem:[#allocation11 + $0x5e8] sm:$0xf]  ;;  %v18514_v35 = vld [vmem:[#allocation11 + $0x5f4] sm:$0xf0] }
 0x137   :  { %4264 = vmatpush.bf16.msra.mxu0 %v12389_v47  ;;  %4277 = vmatpush.bf16.msra.mxu1 %v12517_v52  ;;  %v12213_v47 = vor.u32 %v18362_v27, %v12212_v12  ;;  %v12068_v52 = vld [vmem:[#allocation11 + $0x8] sm:$0xf]  ;;  %v18482_v12 = vld [vmem:[#allocation11 + $0x4f4] sm:$0xf0]  ;;  %v1392_v27 = vpop.f32.mrf.mxu3  ;;  %v12821_v4 = vor.u32 %v18514_v35, %v12820_v25 }
 0x138   :  { %v12069_v15 = vor.u32 %v18326_v3, %v12068_v52  ;;  %v12676_v61 = vld [vmem:[#allocation11 + $0x4c8] sm:$0xf]  ;;  %v18478_v62 = vld [vmem:[#allocation11 + $0x4d4] sm:$0xf0] }
 0x139   :  { %4252 = vmatpush.bf16.msra.mxu3 %v12245_v51  ;;  %4239 = vmatpush.bf16.msra.mxu2 %v12117_v59  ;;  %v12485_v51 = vor.u32 %v18430_v40, %v12484_v36  ;;  %v3508_v59 = vunpack.c.l.b16 %v19142_v43  ;;  %v12324_v36 = vld [vmem:[#allocation11 + $0x208] sm:$0xf]  ;;  %v18390_v40 = vld [vmem:[#allocation11 + $0x214] sm:$0xf0] }
 0x13a   :  { %v12325_v54 = vor.u32 %v18390_v40, %v12324_v36  ;;  %v12788_v3 = vld [vmem:[#allocation11 + $0x5a8] sm:$0xf]  ;;  %v18542_v35 = vld [vmem:[#allocation11 + $0x6d4] sm:$0xf0] }
 0x13b   :  { %4265 = vmatpush.bf16.msra.mxu0 %v12373_v9  ;;  %4278 = vmatpush.bf16.msra.mxu1 %v12501_v21  ;;  %v1379_v9 = vpop.f32.mrf.mxu2  ;;  %v12692_v21 = vld [vmem:[#allocation11 + $0x4e8] sm:$0xf]  ;;  %v3760_v44 = vpack.c.b16 %v3508_v59, %v3508_v59  ;;  %v19145_v45 = vpop.f32.mrf.mxu0  ;;  %v18474_v40 = vld [vmem:[#allocation11 + $0x4b4] sm:$0xf0] }
 0x13c   :  { %19708 = vst [vmem:[#allocation30_spill] sm:$0xff] %v19145_v45  ;;  %v18546_v9 = vld [vmem:[#allocation11 + $0x6f4] sm:$0xf0]  ;;  %v12932_v25 = vld [vmem:[#allocation11 + $0x6c8] sm:$0xf] }
 0x13d   :  { %4253 = vmatpush.bf16.msra.mxu3 %v12229_v17  ;;  %4240 = vmatpush.bf16.msra.mxu2 %v12101_v34  ;;  %v12341_v17 = vor.u32 %v18394_v58, %v12340_v56  ;;  %v12452_v34 = vld [vmem:[#allocation11 + $0x308] sm:$0xf]  ;;  %v19147_v56 = vpop.f32.mrf.mxu1  ;;  %v12693_v58 = vor.u32 %v18482_v12, %v12692_v21  ;;  %v12677_v21 = vor.u32 %v18478_v62, %v12676_v61  ;;  %v18506_v12 = vld [vmem:[#allocation11 + $0x5b4] sm:$0xf0]  ;;  %v18352_v45 = vld [vmem:[#allocation11 + $0xec] sm:$0xf] }
 0x13e   :  { %19709 = vst [vmem:[#allocation31_spill] sm:$0xff] %v19147_v56  ;;  %v12453_v59 = vor.u32 %v18422_v37, %v12452_v34  ;;  %v13044_v27 = vld [vmem:[#allocation11 + $0x7a8] sm:$0xf]  ;;  %v12933_v37 = vor.u32 %v18542_v35, %v12932_v25  ;;  %v18566_v61 = vld [vmem:[#allocation11 + $0x794] sm:$0xf0] }
 0x13f   :  { %4266 = vmatpush.bf16.msra.mxu0 %v12357_v46  ;;  %4279 = vmatpush.bf16.msra.mxu1 %v12485_v51  ;;  %v12948_v46 = vld [vmem:[#allocation11 + $0x6e8] sm:$0xf]  ;;  %v18510_v51 = vld [vmem:[#allocation11 + $0x5d4] sm:$0xf0] }
 0x140   :  { %v12949_v63 = vor.u32 %v18546_v9, %v12948_v46  ;;  %v12660_v36 = vld [vmem:[#allocation11 + $0x4a8] sm:$0xf]  ;;  %v18538_v9 = vld [vmem:[#allocation11 + $0x6b4] sm:$0xf0] }
 0x141   :  { %4254 = vmatpush.bf16.msra.mxu3 %v12213_v47  ;;  %4241 = vmatpush.bf16.msra.mxu2 %v12085_v60  ;;  %v12804_v47 = vld [vmem:[#allocation11 + $0x5c8] sm:$0xf]  ;;  %v4022_v60 = vsel %vm4014_vm1, %v3760_v44, 0  ;;  %v18534_v35 = vld [vmem:[#allocation11 + $0x694] sm:$0xf0] }
 0x142   :  { %v12805_v52 = vor.u32 %v18510_v51, %v12804_v47  ;;  %v12772_v44 = vld [vmem:[#allocation11 + $0x588] sm:$0xf]  ;;  %v12661_v47 = vor.u32 %v18474_v40, %v12660_v36  ;;  %v18502_v51 = vld [vmem:[#allocation11 + $0x594] sm:$0xf0] }
 0x143   :  { %4267 = vmatpush.bf16.msra.mxu0 %v12341_v17  ;;  %4280 = vmatpush.bf16.msra.mxu1 %v12469_v33  ;;  %v18570_v17 = vld [vmem:[#allocation11 + $0x7b4] sm:$0xf0]  ;;  %v12789_v33 = vor.u32 %v18506_v12, %v12788_v3  ;;  %v12916_v46 = vld [vmem:[#allocation11 + $0x6a8] sm:$0xf] }
 0x144   :  { %v13045_v34 = vor.u32 %v18570_v17, %v13044_v27  ;;  %v12644_v62 = vld [vmem:[#allocation11 + $0x488] sm:$0xf]  ;;  %v18498_v12 = vld [vmem:[#allocation11 + $0x574] sm:$0xf0] }
 0x145   :  { %4255 = vmatpush.bf16.msra.mxu3 %v12197_v29  ;;  %4242 = vmatpush.bf16.msra.mxu2 %v12069_v15  ;;  %v19150_v29 = vpop.f32.mrf.mxu2  ;;  %v19153_v15 = vpop.f32.mrf.mxu3  ;;  %v12756_v3 = vld [vmem:[#allocation11 + $0x568] sm:$0xf]  ;;  %v18562_v17 = vld [vmem:[#allocation11 + $0x774] sm:$0xf0] }
 0x146   :  { %19710 = vst [vmem:[#allocation32_spill] sm:$0xff] %v19150_v29  ;;  %v12900_v25 = vld [vmem:[#allocation11 + $0x688] sm:$0xf]  ;;  %v18466_v40 = vld [vmem:[#allocation11 + $0x474] sm:$0xf0] }
 0x147   :  { %4268 = vmatpush.bf16.msra.mxu0 %v12325_v54  ;;  %4281 = vmatpush.bf16.msra.mxu1 %v12453_v59  ;;  %19711 = vst [vmem:[#allocation33_spill] sm:$0xff] %v19153_v15  ;;  %v13028_v54 = vld [vmem:[#allocation11 + $0x788] sm:$0xf]  ;;  %v18470_v59 = vld [vmem:[#allocation11 + $0x494] sm:$0xf0] }
 0x148   :  { %4256 = vmatmul.bf16.vlgmr.msra.gmra.mxu3 %v19064_v11  ;;  %4243 = vmatmul.bf16.vlgmr.msra.gmra.mxu2 %v19060_v7  ;;  %v13012_v27 = vld [vmem:[#allocation11 + $0x768] sm:$0xf] }
 0x149   :  { %4300 = vmatpush.bf16.msrb.mxu3 %v12821_v4  ;;  %4287 = vmatpush.bf16.msrb.mxu2 %v12693_v58  ;;  %v1405_v4 = vpop.f32.mrf.mxu0  ;;  %v1418_v58 = vpop.f32.mrf.mxu1  ;;  %v12628_v36 = vld [vmem:[#allocation11 + $0x468] sm:$0xf] }
 0x14a   :  { %4269 = vmatmul.bf16.vlgmr.msra.gmra.mxu0 %v19055_v1  ;;  %4282 = vmatmul.bf16.vlgmr.msra.gmra.mxu1 %v19062_v8  ;;  %v12901_v58 = vor.u32 %v18534_v35, %v12900_v25  ;;  %v18526_v25 = vld [vmem:[#allocation11 + $0x654] sm:$0xf0] }
 0x14b   :  { %4313 = vmatpush.bf16.msrb.mxu0 %v12949_v63  ;;  %4327 = vmatpush.bf16.msrb.mxu1 %v4022_v60  ;;  %v12917_v63 = vor.u32 %v18538_v9, %v12916_v46  ;;  %v12773_v60 = vor.u32 %v18502_v51, %v12772_v44  ;;  %v12884_v44 = vld [vmem:[#allocation11 + $0x668] sm:$0xf]  ;;  %v18530_v46 = vld [vmem:[#allocation11 + $0x674] sm:$0xf0]  ;;  %v12629_v9 = vor.u32 %v18466_v40, %v12628_v36 }
 0x14c   :  { %v12996_v51 = vld [vmem:[#allocation11 + $0x748] sm:$0xf]  ;;  %v18458_v40 = vld [vmem:[#allocation11 + $0x434] sm:$0xf0] }
 0x14d   :  { %4301 = vmatpush.bf16.msrb.mxu3 %v12805_v52  ;;  %4288 = vmatpush.bf16.msrb.mxu2 %v12677_v21  ;;  %v13029_v52 = vor.u32 %v18566_v61, %v13028_v54  ;;  %v12645_v21 = vor.u32 %v18470_v59, %v12644_v62  ;;  %v1431_v4 = vpop.f32.mrf.mxu2  ;;  %v1444_v29 = vpop.f32.mrf.mxu3  ;;  %v18558_v54 = vld [vmem:[#allocation11 + $0x754] sm:$0xf0]  ;;  %v12612_v61 = vld [vmem:[#allocation11 + $0x448] sm:$0xf] }
 0x14e   :  { %v18462_v62 = vld [vmem:[#allocation11 + $0x454] sm:$0xf0]  ;;  %v12885_v4 = vor.u32 %v18530_v46, %v12884_v44  ;;  %v12596_v36 = vld [vmem:[#allocation11 + $0x428] sm:$0xf] }
 0x14f   :  { %4314 = vmatpush.bf16.msrb.mxu0 %v12933_v37  ;;  %4328 = vmatpush.bf16.msrb.mxu1 %v13045_v34  ;;  %v12757_v37 = vor.u32 %v18498_v12, %v12756_v3  ;;  %v12740_v34 = vld [vmem:[#allocation11 + $0x548] sm:$0xf]  ;;  %v18490_v12 = vld [vmem:[#allocation11 + $0x534] sm:$0xf0] }
 0x150   :  { %v12868_v3 = vld [vmem:[#allocation11 + $0x648] sm:$0xf]  ;;  %v18454_v44 = vld [vmem:[#allocation11 + $0x414] sm:$0xf0] }
 0x151   :  { %4302 = vmatpush.bf16.msrb.mxu3 %v12789_v33  ;;  %4289 = vmatpush.bf16.msrb.mxu2 %v12661_v47  ;;  %v13013_v33 = vor.u32 %v18562_v17, %v13012_v27  ;;  %v18494_v47 = vld [vmem:[#allocation11 + $0x554] sm:$0xf0]  ;;  %v4036_v59 = vpop.f32.mrf.mxu0  ;;  %v12980_v27 = vld [vmem:[#allocation11 + $0x728] sm:$0xf]  ;;  %v12869_v56 = vor.u32 %v18526_v25, %v12868_v3  ;;  %v18384_v3 = vld [vmem:[#allocation11 + $0x1ec] sm:$0xf] }
 0x152   :  { %v12741_v29 = vor.u32 %v18494_v47, %v12740_v34  ;;  %v18554_v17 = vld [vmem:[#allocation11 + $0x734] sm:$0xf0]  ;;  %v12580_v34 = vld [vmem:[#allocation11 + $0x408] sm:$0xf] }
 0x153   :  { %4315 = vmatpush.bf16.msrb.mxu0 %v12917_v63  ;;  %4329 = vmatpush.bf16.msrb.mxu1 %v13029_v52  ;;  %v4049_v63 = vpop.f32.mrf.mxu1  ;;  %v12724_v52 = vld [vmem:[#allocation11 + $0x528] sm:$0xf] }
 0x154   :  { %v4050_v35 = vadd.f32 %v4049_v63, %v4036_v59  ;;  %v12708_v46 = vld [vmem:[#allocation11 + $0x508] sm:$0xf]  ;;  %v18550_v63 = vld [vmem:[#allocation11 + $0x714] sm:$0xf0] }
 0x155   :  { %4303 = vmatpush.bf16.msrb.mxu3 %v12773_v60  ;;  %4290 = vmatpush.bf16.msrb.mxu2 %v12645_v21  ;;  %v12997_v60 = vor.u32 %v18558_v54, %v12996_v51  ;;  %v12613_v21 = vor.u32 %v18462_v62, %v12612_v61  ;;  %v12852_v47 = vld [vmem:[#allocation11 + $0x628] sm:$0xf]  ;;  %v18522_v51 = vld [vmem:[#allocation11 + $0x634] sm:$0xf0]  ;;  %v12597_v61 = vor.u32 %v18458_v40, %v12596_v36 }
 0x156   :  { %v18486_v62 = vld [vmem:[#allocation11 + $0x514] sm:$0xf0]  ;;  %v12964_v59 = vld [vmem:[#allocation11 + $0x708] sm:$0xf] }
 0x157   :  { %4316 = vmatpush.bf16.msrb.mxu0 %v12901_v58  ;;  %4330 = vmatpush.bf16.msrb.mxu1 %v13013_v33  ;;  %v4062_v58 = vpop.f32.mrf.mxu2  ;;  %v12981_v33 = vor.u32 %v18554_v17, %v12980_v27  ;;  %v12438_v27 = vld [vmem:[#allocation11 + $0x2f8] sm:$0xf0]  ;;  %v12836_v36 = vld [vmem:[#allocation11 + $0x608] sm:$0xf]  ;;  %v18518_v40 = vld [vmem:[#allocation11 + $0x614] sm:$0xf0] }
 0x158   :  { %v4063_v54 = vadd.f32 %v4062_v58, %v4050_v35  ;;  %v12709_v35 = vor.u32 %v18486_v62, %v12708_v46  ;;  %v12581_v58 = vor.u32 %v18454_v44, %v12580_v34  ;;  %v12569_v46 = vor.u32 %v18448_v30, %v12566_v24  ;;  %v18444_v34 = vld [vmem:[#allocation11 + $0x3cc] sm:$0xf]  ;;  %v12550_v44 = vld [vmem:[#allocation11 + $0x3d8] sm:$0xf0] }
 0x159   :  { %4304 = vmatpush.bf16.msrb.mxu3 %v12757_v37  ;;  %4291 = vmatpush.bf16.msrb.mxu2 %v12629_v9  ;;  %v12725_v37 = vor.u32 %v18490_v12, %v12724_v52  ;;  %v4075_v9 = vpop.f32.mrf.mxu3  ;;  %v12310_v52 = vld [vmem:[#allocation11 + $0x1f8] sm:$0xf0]  ;;  %v18416_v12 = vld [vmem:[#allocation11 + $0x2ec] sm:$0xf]  ;;  %v12553_v24 = vor.u32 %v18444_v34, %v12550_v44 }
 0x15a   :  { %v19158_v25 = vadd.f32 %v4075_v9, %v4063_v54  ;;  %v12313_v54 = vor.u32 %v18384_v3, %v12310_v52  ;;  %v12441_v9 = vor.u32 %v18416_v12, %v12438_v27  ;;  %v18376_v3 = vld [vmem:[#allocation11 + $0x1ac] sm:$0xf]  ;;  %v12406_v12 = vld [vmem:[#allocation11 + $0x2b8] sm:$0xf0] }
 0x15b   :  { %4317 = vmatpush.bf16.msrb.mxu0 %v12885_v4  ;;  %4331 = vmatpush.bf16.msrb.mxu1 %v12997_v60  ;;  %v12182_v4 = vld [vmem:[#allocation11 + $0xf8] sm:$0xf0]  ;;  %v12853_v60 = vor.u32 %v18522_v51, %v12852_v47  ;;  %v4051_v17 = vpop.f32.mrf.mxu1  ;;  %v18380_v47 = vld [vmem:[#allocation11 + $0x1cc] sm:$0xf]  ;;  %v12837_v51 = vor.u32 %v18518_v40, %v12836_v36 }
 0x15c   :  { %v12185_v15 = vor.u32 %v18352_v45, %v12182_v4  ;;  %v18412_v17 = vld [vmem:[#allocation11 + $0x2cc] sm:$0xf]  ;;  %v12150_v4 = vld [vmem:[#allocation11 + $0xb8] sm:$0xf0] }
 0x15d   :  { %4305 = vmatpush.bf16.msrb.mxu3 %v12741_v29  ;;  %4292 = vmatpush.bf16.msrb.mxu2 %v12613_v21  ;;  %v4038_v29 = vpop.f32.mrf.mxu0  ;;  %v12965_v21 = vor.u32 %v18550_v63, %v12964_v59  ;;  %v18344_v63 = vld [vmem:[#allocation11 + $0xac] sm:$0xf]  ;;  %v12534_v27 = vld [vmem:[#allocation11 + $0x3b8] sm:$0xf0] }
 0x15e   :  { %v18348_v29 = vld [vmem:[#allocation11 + $0xcc] sm:$0xf]  ;;  %v12153_v30 = vor.u32 %v18344_v63, %v12150_v4  ;;  %v12134_v36 = vld [vmem:[#allocation11 + $0x98] sm:$0xf0] }
 0x15f   :  { %4318 = vmatpush.bf16.msrb.mxu0 %v12869_v56  ;;  %4332 = vmatpush.bf16.msrb.mxu1 %v12981_v33  ;;  %v12166_v56 = vld [vmem:[#allocation11 + $0xd8] sm:$0xf0]  ;;  %v4064_v33 = vpop.f32.mrf.mxu2  ;;  %v18408_v52 = vld [vmem:[#allocation11 + $0x2ac] sm:$0xf] }
 0x160   :  { %v12169_v45 = vor.u32 %v18348_v29, %v12166_v56  ;;  %v18372_v40 = vld [vmem:[#allocation11 + $0x18c] sm:$0xf]  ;;  %v12374_v44 = vld [vmem:[#allocation11 + $0x278] sm:$0xf0] }
 0x161   :  { %4306 = vmatpush.bf16.msrb.mxu3 %v12725_v37  ;;  %4293 = vmatpush.bf16.msrb.mxu2 %v12597_v61  ;;  %v12422_v37 = vld [vmem:[#allocation11 + $0x2d8] sm:$0xf0]  ;;  %v4077_v62 = vpop.f32.mrf.mxu3  ;;  %v12297_v61 = vor.u32 %v18380_v47, %v12294_v13  ;;  %v18436_v47 = vld [vmem:[#allocation11 + $0x38c] sm:$0xf] }
 0x162   :  { %v12425_v59 = vor.u32 %v18412_v17, %v12422_v37  ;;  %v18336_v33 = vld [vmem:[#allocation11 + $0x6c] sm:$0xf]  ;;  %v12502_v4 = vld [vmem:[#allocation11 + $0x378] sm:$0xf0] }
 0x163   :  { %4319 = vmatpush.bf16.msrb.mxu0 %v12853_v60  ;;  %4333 = vmatpush.bf16.msrb.mxu1 %v12965_v21  ;;  %v12278_v60 = vld [vmem:[#allocation11 + $0x1b8] sm:$0xf0]  ;;  %v18340_v21 = vld [vmem:[#allocation11 + $0x8c] sm:$0xf] }
 0x164   :  { %v12281_v13 = vor.u32 %v18376_v3, %v12278_v60  ;;  %v12137_v56 = vor.u32 %v18340_v21, %v12134_v36  ;;  %v18368_v62 = vld [vmem:[#allocation11 + $0x16c] sm:$0xf] }
 0x165   :  { %4307 = vmatpush.bf16.msrb.mxu3 %v12709_v35  ;;  %4294 = vmatpush.bf16.msrb.mxu2 %v12581_v58  ;;  %v12409_v35 = vor.u32 %v18408_v52, %v12406_v12  ;;  %v12262_v58 = vld [vmem:[#allocation11 + $0x198] sm:$0xf0]  ;;  %v18400_v34 = vld [vmem:[#allocation11 + $0x26c] sm:$0xf] }
 0x166   :  { %13052 = vmatmul.msk.bf16.vlgmr.msrb.gmra.mxu1 %vm4010_vm2, %v19086_v19  ;;  %v12265_v17 = vor.u32 %v18372_v40, %v12262_v58  ;;  %v18432_v63 = vld [vmem:[#allocation11 + $0x36c] sm:$0xf]  ;;  %v12377_v60 = vor.u32 %v18400_v34, %v12374_v44  ;;  %v12102_v12 = vld [vmem:[#allocation11 + $0x58] sm:$0xf0] }
 0x167   :  { %4339 = vmatpush.bf16.msra.mxu1 %v12185_v15  ;;  %4320 = vmatpush.bf16.msrb.mxu0 %v12837_v51  ;;  %v18440_v15 = vld [vmem:[#allocation11 + $0x3ac] sm:$0xf]  ;;  %v12518_v51 = vld [vmem:[#allocation11 + $0x398] sm:$0xf0]  ;;  %v12505_v21 = vor.u32 %v18432_v63, %v12502_v4  ;;  %v4101_v36 = vpop.f32.mrf.mxu1 }
 0x168   :  { %4308 = vmatmul.bf16.vlgmr.msrb.gmra.mxu3 %v19088_v20  ;;  %4295 = vmatmul.bf16.vlgmr.msrb.gmra.mxu2 %v19084_v18  ;;  %v12537_v29 = vor.u32 %v18440_v15, %v12534_v27  ;;  %v18332_v52 = vld [vmem:[#allocation11 + $0x4c] sm:$0xf]  ;;  %v12230_v15 = vld [vmem:[#allocation11 + $0x158] sm:$0xf0] }
 0x169   :  { %4352 = vmatpush.bf16.msra.mxu2 %v12313_v54  ;;  %4365 = vmatpush.bf16.msra.mxu3 %v12441_v9  ;;  %v18404_v54 = vld [vmem:[#allocation11 + $0x28c] sm:$0xf]  ;;  %v12390_v9 = vld [vmem:[#allocation11 + $0x298] sm:$0xf0]  ;;  %v12105_v40 = vor.u32 %v18332_v52, %v12102_v12 }
 0x16a   :  { %4321 = vmatmul.bf16.vlgmr.msrb.gmra.mxu0 %v19082_v14  ;;  %v12393_v37 = vor.u32 %v18404_v54, %v12390_v9  ;;  %v18396_v27 = vld [vmem:[#allocation11 + $0x24c] sm:$0xf]  ;;  %v12486_v54 = vld [vmem:[#allocation11 + $0x358] sm:$0xf0] }
 0x16b   :  { %4378 = vmatpush.bf16.msra.mxu0 %v12569_v46  ;;  %4340 = vmatpush.bf16.msra.mxu1 %v12169_v45  ;;  %v12118_v46 = vld [vmem:[#allocation11 + $0x78] sm:$0xf0]  ;;  %v18428_v58 = vld [vmem:[#allocation11 + $0x34c] sm:$0xf] }
 0x16c   :  { %v12246_v45 = vld [vmem:[#allocation11 + $0x178] sm:$0xf0]  ;;  %v18356_v52 = vld [vmem:[#allocation11 + $0x10c] sm:$0xf] }
 0x16d   :  { %4353 = vmatpush.bf16.msra.mxu2 %v12297_v61  ;;  %4366 = vmatpush.bf16.msra.mxu3 %v12425_v59  ;;  %v12521_v61 = vor.u32 %v18436_v47, %v12518_v51  ;;  %v12121_v59 = vor.u32 %v18336_v33, %v12118_v46  ;;  %v12249_v3 = vor.u32 %v18368_v62, %v12246_v45  ;;  %v18328_v47 = vld [vmem:[#allocation11 + $0x2c] sm:$0xf]  ;;  %v12086_v51 = vld [vmem:[#allocation11 + $0x38] sm:$0xf0] }
 0x16e   :  { %v18392_v33 = vld [vmem:[#allocation11 + $0x22c] sm:$0xf]  ;;  %v12342_v46 = vld [vmem:[#allocation11 + $0x238] sm:$0xf0]  ;;  %v12489_v62 = vor.u32 %v18428_v58, %v12486_v54  ;;  %v12089_v34 = vor.u32 %v18328_v47, %v12086_v51 }
 0x16f   :  { %4379 = vmatpush.bf16.msra.mxu0 %v12553_v24  ;;  %4341 = vmatpush.bf16.msra.mxu1 %v12153_v30  ;;  %v18364_v24 = vld [vmem:[#allocation11 + $0x14c] sm:$0xf]  ;;  %v4088_v30 = vpop.f32.mrf.mxu0  ;;  %v4114_v45 = vpop.f32.mrf.mxu2  ;;  %v12070_v44 = vld [vmem:[#allocation11 + $0x18] sm:$0xf0] }
 0x170   :  { %v12233_v9 = vor.u32 %v18364_v24, %v12230_v15  ;;  %v12198_v12 = vld [vmem:[#allocation11 + $0x118] sm:$0xf0]  ;;  %v18388_v24 = vld [vmem:[#allocation11 + $0x20c] sm:$0xf] }
 0x171   :  { %4354 = vmatpush.bf16.msra.mxu2 %v12281_v13  ;;  %4367 = vmatpush.bf16.msra.mxu3 %v12409_v35  ;;  %v12358_v13 = vld [vmem:[#allocation11 + $0x258] sm:$0xf0]  ;;  %v4089_v35 = vadd.f32 %v4088_v30, %v19158_v25  ;;  %v18324_v25 = vld [vmem:[#allocation11 + $0xc] sm:$0xf]  ;;  %v3509_v30 = vunpack.c.h.b16 %v19142_v43  ;;  %v12201_v43 = vor.u32 %v18356_v52, %v12198_v12 }
 0x172   :  { %v12326_v15 = vld [vmem:[#allocation11 + $0x218] sm:$0xf0]  ;;  %v18544_v54 = vld [vmem:[#allocation11 + $0x6ec] sm:$0xf] }
 0x173   :  { %4380 = vmatpush.bf16.msra.mxu0 %v12537_v29  ;;  %4342 = vmatpush.bf16.msra.mxu1 %v12137_v56  ;;  %v12361_v29 = vor.u32 %v18396_v27, %v12358_v13  ;;  %v4102_v56 = vadd.f32 %v4101_v36, %v4089_v35  ;;  %v18480_v27 = vld [vmem:[#allocation11 + $0x4ec] sm:$0xf]  ;;  %v12694_v13 = vld [vmem:[#allocation11 + $0x4f8] sm:$0xf0] }
 0x174   :  { %v12822_v58 = vld [vmem:[#allocation11 + $0x5f8] sm:$0xf0]  ;;  %v18420_v47 = vld [vmem:[#allocation11 + $0x30c] sm:$0xf] }
 0x175   :  { %4355 = vmatpush.bf16.msra.mxu2 %v12265_v17  ;;  %4368 = vmatpush.bf16.msra.mxu3 %v12393_v37  ;;  %v18360_v17 = vld [vmem:[#allocation11 + $0x12c] sm:$0xf]  ;;  %v12214_v37 = vld [vmem:[#allocation11 + $0x138] sm:$0xf0]  ;;  %v4115_v63 = vadd.f32 %v4114_v45, %v4102_v56 }
 0x176   :  { %v12217_v4 = vor.u32 %v18360_v17, %v12214_v37  ;;  %v12950_v56 = vld [vmem:[#allocation11 + $0x6f8] sm:$0xf0]  ;;  %v12329_v17 = vor.u32 %v18388_v24, %v12326_v15  ;;  %v3761_v37 = vpack.c.b16 %v3509_v30, %v3509_v30  ;;  %v18472_v15 = vld [vmem:[#allocation11 + $0x4ac] sm:$0xf] }
 0x177   :  { %4381 = vmatpush.bf16.msra.mxu0 %v12521_v61  ;;  %4343 = vmatpush.bf16.msra.mxu1 %v12121_v59  ;;  %v18424_v61 = vld [vmem:[#allocation11 + $0x32c] sm:$0xf]  ;;  %v12470_v59 = vld [vmem:[#allocation11 + $0x338] sm:$0xf0]  ;;  %v4090_v35 = vpop.f32.mrf.mxu0  ;;  %v12953_v45 = vor.u32 %v18544_v54, %v12950_v56 }
 0x178   :  { %v12473_v36 = vor.u32 %v18424_v61, %v12470_v59  ;;  %v12454_v51 = vld [vmem:[#allocation11 + $0x318] sm:$0xf0]  ;;  %v18504_v35 = vld [vmem:[#allocation11 + $0x5ac] sm:$0xf] }
 0x179   :  { %4356 = vmatpush.bf16.msra.mxu2 %v12249_v3  ;;  %4369 = vmatpush.bf16.msra.mxu3 %v12377_v60  ;;  %v12345_v3 = vor.u32 %v18392_v33, %v12342_v46  ;;  %v4127_v60 = vpop.f32.mrf.mxu3  ;;  %v12697_v33 = vor.u32 %v18480_v27, %v12694_v13  ;;  %v12457_v61 = vor.u32 %v18420_v47, %v12454_v51  ;;  %v12678_v59 = vld [vmem:[#allocation11 + $0x4d8] sm:$0xf0]  ;;  %v18468_v51 = vld [vmem:[#allocation11 + $0x48c] sm:$0xf] }
 0x17a   :  { %v13046_v52 = vld [vmem:[#allocation11 + $0x7b8] sm:$0xf0] }
 0x17b   :  { %4382 = vmatpush.bf16.msra.mxu0 %v12505_v21  ;;  %4344 = vmatpush.bf16.msra.mxu1 %v12105_v40  ;;  %v19167_v21 = vadd.f32 %v4127_v60, %v4115_v63  ;;  %v18512_v40 = vld [vmem:[#allocation11 + $0x5ec] sm:$0xf]  ;;  %v12806_v60 = vld [vmem:[#allocation11 + $0x5d8] sm:$0xf0] }
 0x17c   :  { %v12825_v46 = vor.u32 %v18512_v40, %v12822_v58  ;;  %v18508_v63 = vld [vmem:[#allocation11 + $0x5cc] sm:$0xf]  ;;  %v12662_v13 = vld [vmem:[#allocation11 + $0x4b8] sm:$0xf0] }
 0x17d   :  { %4357 = vmatpush.bf16.msra.mxu2 %v12233_v9  ;;  %4370 = vmatpush.bf16.msra.mxu3 %v12361_v29  ;;  %v4103_v9 = vpop.f32.mrf.mxu1  ;;  %v12073_v29 = vor.u32 %v18324_v25, %v12070_v44  ;;  %v12934_v25 = vld [vmem:[#allocation11 + $0x6d8] sm:$0xf0]  ;;  %v4116_v44 = vpop.f32.mrf.mxu2  ;;  %v12809_v30 = vor.u32 %v18508_v63, %v12806_v60  ;;  %v18536_v40 = vld [vmem:[#allocation11 + $0x6ac] sm:$0xf]  ;;  %v12665_v56 = vor.u32 %v18472_v15, %v12662_v13 }
 0x17e   :  { %v12918_v58 = vld [vmem:[#allocation11 + $0x6b8] sm:$0xf0]  ;;  %v18564_v9 = vld [vmem:[#allocation11 + $0x78c] sm:$0xf] }
 0x17f   :  { %4383 = vmatpush.bf16.msra.mxu0 %v12489_v62  ;;  %4345 = vmatpush.bf16.msra.mxu1 %v12089_v34  ;;  %v18476_v62 = vld [vmem:[#allocation11 + $0x4cc] sm:$0xf]  ;;  %v12630_v60 = vld [vmem:[#allocation11 + $0x478] sm:$0xf0] }
 0x180   :  { %v18540_v34 = vld [vmem:[#allocation11 + $0x6cc] sm:$0xf]  ;;  %v12681_v24 = vor.u32 %v18476_v62, %v12678_v59 }
 0x181   :  { %4358 = vmatpush.bf16.msra.mxu2 %v12217_v4  ;;  %4371 = vmatpush.bf16.msra.mxu3 %v12345_v3  ;;  %v4025_v4 = vsel %vm4014_vm1, %v3761_v37, 0  ;;  %v18568_v3 = vld [vmem:[#allocation11 + $0x7ac] sm:$0xf]  ;;  %v4129_v12 = vpop.f32.mrf.mxu3  ;;  %v12937_v27 = vor.u32 %v18540_v34, %v12934_v25  ;;  %v12758_v25 = vld [vmem:[#allocation11 + $0x578] sm:$0xf0] }
 0x182   :  { %v13049_v54 = vor.u32 %v18568_v3, %v13046_v52  ;;  %v18500_v37 = vld [vmem:[#allocation11 + $0x58c] sm:$0xf]  ;;  %v12998_v52 = vld [vmem:[#allocation11 + $0x758] sm:$0xf0] }
 0x183   :  { %4384 = vmatpush.bf16.msra.mxu0 %v12473_v36  ;;  %4346 = vmatpush.bf16.msra.mxu1 %v12073_v29  ;;  %v12790_v36 = vld [vmem:[#allocation11 + $0x5b8] sm:$0xf0]  ;;  %v18464_v59 = vld [vmem:[#allocation11 + $0x46c] sm:$0xf] }
 0x184   :  { %v13030_v29 = vld [vmem:[#allocation11 + $0x798] sm:$0xf0]  ;;  %v12793_v47 = vor.u32 %v18504_v35, %v12790_v36  ;;  %v18496_v34 = vld [vmem:[#allocation11 + $0x56c] sm:$0xf]  ;;  %v12633_v12 = vor.u32 %v18464_v59, %v12630_v60 }
 0x185   :  { %4359 = vmatpush.bf16.msra.mxu2 %v12201_v43  ;;  %4372 = vmatpush.bf16.msra.mxu3 %v12329_v17  ;;  %v12921_v43 = vor.u32 %v18536_v40, %v12918_v58  ;;  %v12646_v17 = vld [vmem:[#allocation11 + $0x498] sm:$0xf0]  ;;  %v13033_v62 = vor.u32 %v18564_v9, %v13030_v29  ;;  %v18528_v44 = vld [vmem:[#allocation11 + $0x66c] sm:$0xf] }
 0x186   :  { %4347 = vmatmul.bf16.vlgmr.msra.gmra.mxu1 %v19060_v7  ;;  %v18532_v7 = vld [vmem:[#allocation11 + $0x68c] sm:$0xf]  ;;  %v12742_v35 = vld [vmem:[#allocation11 + $0x558] sm:$0xf0] }
 0x187   :  { %4391 = vmatpush.bf16.msrb.mxu1 %v12697_v33  ;;  %4385 = vmatpush.bf16.msra.mxu0 %v12457_v61  ;;  %v12774_v33 = vld [vmem:[#allocation11 + $0x598] sm:$0xf0]  ;;  %v18556_v3 = vld [vmem:[#allocation11 + $0x74c] sm:$0xf] }
 0x188   :  { %4360 = vmatmul.bf16.vlgmr.msra.gmra.mxu2 %v19064_v11  ;;  %4373 = vmatmul.bf16.vlgmr.msra.gmra.mxu3 %v19055_v1  ;;  %v13014_v11 = vld [vmem:[#allocation11 + $0x778] sm:$0xf0]  ;;  %v12649_v1 = vor.u32 %v18468_v51, %v12646_v17  ;;  %v12777_v61 = vor.u32 %v18500_v37, %v12774_v33  ;;  %v18492_v13 = vld [vmem:[#allocation11 + $0x54c] sm:$0xf]  ;;  %v13001_v58 = vor.u32 %v18556_v3, %v12998_v52 }
 0x189   :  { %4404 = vmatpush.bf16.msrb.mxu2 %v12825_v46  ;;  %4417 = vmatpush.bf16.msrb.mxu3 %v12953_v45  ;;  %v12902_v46 = vld [vmem:[#allocation11 + $0x698] sm:$0xf0]  ;;  %v18560_v45 = vld [vmem:[#allocation11 + $0x76c] sm:$0xf]  ;;  %v12745_v51 = vor.u32 %v18492_v13, %v12742_v35  ;;  %v17385_v13 = vld [vmem:[#allocation10 + $0x1ec] sm:$0xf0] }
 0x18a   :  { %4386 = vmatmul.bf16.vlgmr.msra.gmra.mxu0 %v19062_v8  ;;  %v12905_v63 = vor.u32 %v18532_v7, %v12902_v46  ;;  %v13017_v8 = vor.u32 %v18560_v45, %v13014_v11  ;;  %v18524_v36 = vld [vmem:[#allocation11 + $0x64c] sm:$0xf]  ;;  %v12870_v40 = vld [vmem:[#allocation11 + $0x658] sm:$0xf0]  ;;  %v13424_v35 = vld [vmem:[#allocation10 + $0x2e0] sm:$0xf] }
 0x18b   :  { %4431 = vmatpush.bf16.msrb.mxu0 %v4025_v4  ;;  %4392 = vmatpush.bf16.msrb.mxu1 %v12681_v24  ;;  %v12886_v4 = vld [vmem:[#allocation11 + $0x678] sm:$0xf0]  ;;  %v12761_v24 = vor.u32 %v18496_v34, %v12758_v25  ;;  %v18552_v9 = vld [vmem:[#allocation11 + $0x72c] sm:$0xf]  ;;  %v12873_v17 = vor.u32 %v18524_v36, %v12870_v40 }
 0x18c   :  { %v12889_v15 = vor.u32 %v18528_v44, %v12886_v4  ;;  %v12982_v29 = vld [vmem:[#allocation11 + $0x738] sm:$0xf0]  ;;  %v18488_v33 = vld [vmem:[#allocation11 + $0x52c] sm:$0xf]  ;;  %v13168_v44 = vld [vmem:[#allocation10 + $0xe0] sm:$0xf] }
 0x18d   :  { %4405 = vmatpush.bf16.msrb.mxu2 %v12809_v30  ;;  %4418 = vmatpush.bf16.msrb.mxu3 %v12937_v27  ;;  %v18460_v30 = vld [vmem:[#allocation11 + $0x44c] sm:$0xf]  ;;  %v12614_v27 = vld [vmem:[#allocation11 + $0x458] sm:$0xf0]  ;;  %v12985_v45 = vor.u32 %v18552_v9, %v12982_v29  ;;  %v17353_v4 = vld [vmem:[#allocation10 + $0xec] sm:$0xf0] }
 0x18e   :  { %v12598_v37 = vld [vmem:[#allocation11 + $0x438] sm:$0xf0]  ;;  %v18520_v46 = vld [vmem:[#allocation11 + $0x62c] sm:$0xf]  ;;  %v17417_v9 = vld [vmem:[#allocation10 + $0x2ec] sm:$0xf0] }
 0x18f   :  { %4432 = vmatpush.bf16.msrb.mxu0 %v13049_v54  ;;  %4393 = vmatpush.bf16.msrb.mxu1 %v12665_v56  ;;  %v4153_v54 = vpop.f32.mrf.mxu0  ;;  %v4166_v56 = vpop.f32.mrf.mxu1  ;;  %v12726_v7 = vld [vmem:[#allocation11 + $0x538] sm:$0xf0]  ;;  %v18452_v11 = vld [vmem:[#allocation11 + $0x40c] sm:$0xf]  ;;  %v13552_v29 = vld [vmem:[#allocation10 + $0x3e0] sm:$0xf] }
 0x190   :  { %v12966_v59 = vld [vmem:[#allocation11 + $0x718] sm:$0xf0]  ;;  %v12729_v34 = vor.u32 %v18488_v33, %v12726_v7  ;;  %v18484_v25 = vld [vmem:[#allocation11 + $0x50c] sm:$0xf]  ;;  %v4179_v3 = vpop.f32.mrf.mxu2  ;;  %v13152_v7 = vld [vmem:[#allocation10 + $0xc0] sm:$0xf] }
 0x191   :  { %4406 = vmatpush.bf16.msrb.mxu2 %v12793_v47  ;;  %4419 = vmatpush.bf16.msrb.mxu3 %v12921_v43  ;;  %v12617_v47 = vor.u32 %v18460_v30, %v12614_v27  ;;  %v18456_v43 = vld [vmem:[#allocation11 + $0x42c] sm:$0xf]  ;;  %v12838_v30 = vld [vmem:[#allocation11 + $0x618] sm:$0xf0]  ;;  %v13296_v27 = vld [vmem:[#allocation10 + $0x1e0] sm:$0xf] }
 0x192   :  { %v12601_v60 = vor.u32 %v18456_v43, %v12598_v37  ;;  %v13297_v33 = vor.u32 %v17385_v13, %v13296_v27  ;;  %v13520_v27 = vld [vmem:[#allocation10 + $0x3a0] sm:$0xf]  ;;  %v17441_v13 = vld [vmem:[#allocation10 + $0x3ac] sm:$0xf0] }
 0x193   :  { %4433 = vmatpush.bf16.msrb.mxu0 %v13033_v62  ;;  %4394 = vmatpush.bf16.msrb.mxu1 %v12649_v1  ;;  %v12854_v62 = vld [vmem:[#allocation11 + $0x638] sm:$0xf0] }
 0x194   :  { %v12582_v1 = vld [vmem:[#allocation11 + $0x418] sm:$0xf0]  ;;  %v12857_v52 = vor.u32 %v18520_v46, %v12854_v62  ;;  %v17349_v46 = vld [vmem:[#allocation10 + $0xcc] sm:$0xf0]  ;;  %v13425_v62 = vor.u32 %v17417_v9, %v13424_v35 }
 0x195   :  { %4407 = vmatpush.bf16.msrb.mxu2 %v12777_v61  ;;  %4420 = vmatpush.bf16.msrb.mxu3 %v12905_v63  ;;  %v18548_v61 = vld [vmem:[#allocation11 + $0x70c] sm:$0xf]  ;;  %v4140_v63 = vpop.f32.mrf.mxu3 }
 0x197   :  { %4434 = vmatpush.bf16.msrb.mxu0 %v13017_v8  ;;  %4395 = vmatpush.bf16.msrb.mxu1 %v12633_v12  ;;  %v4154_v8 = vadd.f32 %v4153_v54, %v4140_v63  ;;  %v12710_v12 = vld [vmem:[#allocation11 + $0x518] sm:$0xf0]  ;;  %v4155_v40 = vpop.f32.mrf.mxu0  ;;  %v12585_v54 = vor.u32 %v18452_v11, %v12582_v1  ;;  %v17413_v63 = vld [vmem:[#allocation10 + $0x2cc] sm:$0xf0]  ;;  %v13153_v11 = vor.u32 %v17349_v46, %v13152_v7 }
 0x198   :  { %v12713_v43 = vor.u32 %v18484_v25, %v12710_v12  ;;  %v4181_v1 = vpop.f32.mrf.mxu2  ;;  %v13264_v12 = vld [vmem:[#allocation10 + $0x1a0] sm:$0xf]  ;;  %v17337_v7 = vld [vmem:[#allocation10 + $0x6c] sm:$0xf0] }
 0x199   :  { %4408 = vmatpush.bf16.msrb.mxu2 %v12761_v24  ;;  %4421 = vmatpush.bf16.msrb.mxu3 %v12889_v15  ;;  %v18516_v24 = vld [vmem:[#allocation11 + $0x60c] sm:$0xf]  ;;  %v12969_v15 = vor.u32 %v18548_v61, %v12966_v59  ;;  %v4167_v36 = vadd.f32 %v4166_v56, %v4154_v8  ;;  %v17381_v61 = vld [vmem:[#allocation10 + $0x1cc] sm:$0xf0]  ;;  %v13408_v59 = vld [vmem:[#allocation10 + $0x2c0] sm:$0xf] }
 0x19a   :  { %v12841_v37 = vor.u32 %v18516_v24, %v12838_v30  ;;  %v17345_v8 = vld [vmem:[#allocation10 + $0xac] sm:$0xf0]  ;;  %v13392_v30 = vld [vmem:[#allocation10 + $0x2a0] sm:$0xf] }
 0x19b   :  { %4435 = vmatpush.bf16.msrb.mxu0 %v13001_v58  ;;  %4396 = vmatpush.bf16.msrb.mxu1 %v12617_v47  ;;  %v13169_v58 = vor.u32 %v17353_v4, %v13168_v44  ;;  %v17449_v47 = vld [vmem:[#allocation10 + $0x3ec] sm:$0xf0]  ;;  %v13536_v44 = vld [vmem:[#allocation10 + $0x3c0] sm:$0xf] }
 0x19c   :  { %v13553_v56 = vor.u32 %v17449_v47, %v13552_v29  ;;  %v13136_v4 = vld [vmem:[#allocation10 + $0xa0] sm:$0xf]  ;;  %v17377_v24 = vld [vmem:[#allocation10 + $0x1ac] sm:$0xf0] }
 0x19d   :  { %4409 = vmatpush.bf16.msrb.mxu2 %v12745_v51  ;;  %4422 = vmatpush.bf16.msrb.mxu3 %v12873_v17  ;;  %v4168_v51 = vpop.f32.mrf.mxu1  ;;  %v19174_v17 = vadd.f32 %v4179_v3, %v4167_v36  ;;  %v13409_v3 = vor.u32 %v17413_v63, %v13408_v59  ;;  %v13137_v35 = vor.u32 %v17345_v8, %v13136_v4  ;;  %v13120_v40 = vld [vmem:[#allocation10 + $0x80] sm:$0xf]  ;;  %v17433_v63 = vld [vmem:[#allocation10 + $0x36c] sm:$0xf0] }
 0x19e   :  { %v13265_v36 = vor.u32 %v17377_v24, %v13264_v12  ;;  %v13248_v29 = vld [vmem:[#allocation10 + $0x180] sm:$0xf]  ;;  %v17405_v51 = vld [vmem:[#allocation10 + $0x28c] sm:$0xf0] }
 0x19f   :  { %4436 = vmatpush.bf16.msrb.mxu0 %v12985_v45  ;;  %4397 = vmatpush.bf16.msrb.mxu1 %v12601_v60  ;;  %v13280_v45 = vld [vmem:[#allocation10 + $0x1c0] sm:$0xf]  ;;  %v17445_v60 = vld [vmem:[#allocation10 + $0x3cc] sm:$0xf0] }
 0x1a0   :  { %v13281_v25 = vor.u32 %v17381_v61, %v13280_v45  ;;  %v13376_v47 = vld [vmem:[#allocation10 + $0x280] sm:$0xf]  ;;  %v17401_v61 = vld [vmem:[#allocation10 + $0x26c] sm:$0xf0] }
 0x1a1   :  { %4410 = vmatpush.bf16.msrb.mxu2 %v12729_v34  ;;  %4423 = vmatpush.bf16.msrb.mxu3 %v12857_v52  ;;  %v4142_v34 = vpop.f32.mrf.mxu3  ;;  %v13537_v52 = vor.u32 %v17445_v60, %v13536_v44  ;;  %v13360_v45 = vld [vmem:[#allocation10 + $0x260] sm:$0xf]  ;;  %v17333_v1 = vld [vmem:[#allocation10 + $0x4c] sm:$0xf0] }
 0x1a2   :  { %v13488_v59 = vld [vmem:[#allocation10 + $0x360] sm:$0xf]  ;;  %v17397_v24 = vld [vmem:[#allocation10 + $0x24c] sm:$0xf0] }
 0x1a3   :  { %4437 = vmatpush.bf16.msrb.mxu0 %v12969_v15  ;;  %4398 = vmatpush.bf16.msrb.mxu1 %v12585_v54  ;;  %v17409_v15 = vld [vmem:[#allocation10 + $0x2ac] sm:$0xf0]  ;;  %v13504_v54 = vld [vmem:[#allocation10 + $0x380] sm:$0xf]  ;;  %v13489_v4 = vor.u32 %v17433_v63, %v13488_v59 }
 0x1a4   :  { %v13393_v9 = vor.u32 %v17409_v15, %v13392_v30  ;;  %v19181_v60 = vld [vmem:[#allocation8] sm:$0xff]  ;;  %v17429_v15 = vld [vmem:[#allocation10 + $0x34c] sm:$0xf0] }
 0x1a5   :  { %4411 = vmatpush.bf16.msrb.mxu2 %v12713_v43  ;;  %4424 = vmatpush.bf16.msrb.mxu3 %v12841_v37  ;;  %v17437_v43 = vld [vmem:[#allocation10 + $0x38c] sm:$0xf0]  ;;  %v13344_v12 = vld [vmem:[#allocation10 + $0x240] sm:$0xf] }
 0x1a6   :  { %4399 = vmatmul.bf16.vlgmr.msrb.gmra.mxu1 %v19084_v18  ;;  %13053 = vmatmul.msk.bf16.vlgmr.msrb.gmra.mxu0 %vm4010_vm2, %v19086_v19  ;;  %v13521_v18 = vor.u32 %v17441_v13, %v13520_v27  ;;  %v13377_v19 = vor.u32 %v17405_v51, %v13376_v47  ;;  %v13505_v46 = vor.u32 %v17437_v43, %v13504_v54  ;;  %v13472_v30 = vld [vmem:[#allocation10 + $0x340] sm:$0xf]  ;;  %v322_v13 = vperm.slane %v19181_v60, 0 }
 0x1a7   :  { %9447 = vmatpush.bf16.msra.mxu0 %v13169_v58  ;;  %9460 = vmatpush.bf16.msra.mxu1 %v13297_v33  ;;  %v17341_v58 = vld [vmem:[#allocation10 + $0x8c] sm:$0xf0]  ;;  %v13104_v33 = vld [vmem:[#allocation10 + $0x60] sm:$0xf]  ;;  %v4205_v8 = vpop.f32.mrf.mxu0  ;;  %v4218_v27 = vpop.f32.mrf.mxu1  ;;  %v13345_v51 = vor.u32 %v17397_v24, %v13344_v12  ;;  %v13473_v54 = vor.u32 %v17429_v15, %v13472_v30 }
 0x1a8   :  { %4412 = vmatmul.bf16.vlgmr.msrb.gmra.mxu2 %v19088_v20  ;;  %4425 = vmatmul.bf16.vlgmr.msrb.gmra.mxu3 %v19082_v14  ;;  %v17373_v20 = vld [vmem:[#allocation10 + $0x18c] sm:$0xf0]  ;;  %v13121_v14 = vor.u32 %v17341_v58, %v13120_v40  ;;  %v13105_v44 = vor.u32 %v17337_v7, %v13104_v33  ;;  %v324_v40 = vperm.slane %v19181_v60, 2  ;;  %v325_v58 = vperm.slane %v19181_v60, 3  ;;  %v13200_v43 = vld [vmem:[#allocation10 + $0x120] sm:$0xf] }
 0x1a9   :  { %9473 = vmatpush.bf16.msra.mxu2 %v13425_v62  ;;  %9486 = vmatpush.bf16.msra.mxu3 %v13553_v56  ;;  %v13249_v37 = vor.u32 %v17373_v20, %v13248_v29  ;;  %v13232_v62 = vld [vmem:[#allocation10 + $0x160] sm:$0xf]  ;;  %v17369_v56 = vld [vmem:[#allocation10 + $0x16c] sm:$0xf0] }
 0x1aa   :  { %v13233_v34 = vor.u32 %v17369_v56, %v13232_v62  ;;  %v13072_v29 = vld [vmem:[#allocation10 + $0x20] sm:$0xf]  ;;  %v17329_v20 = vld [vmem:[#allocation10 + $0x2c] sm:$0xf0]  ;;  %v19194_v63 = vadd.f32 %v19058_v5, %v325_v58 }
 0x1ab   :  { %9448 = vmatpush.bf16.msra.mxu0 %v13153_v11  ;;  %9461 = vmatpush.bf16.msra.mxu1 %v13281_v25  ;;  %v13088_v11 = vld [vmem:[#allocation10 + $0x40] sm:$0xf]  ;;  %v13361_v25 = vor.u32 %v17401_v61, %v13360_v45  ;;  %v17393_v33 = vld [vmem:[#allocation10 + $0x22c] sm:$0xf0]  ;;  %v13073_v56 = vor.u32 %v17329_v20, %v13072_v29 }
 0x1ac   :  { %v13456_v7 = vld [vmem:[#allocation10 + $0x320] sm:$0xf]  ;;  %v17325_v61 = vld [vmem:[#allocation10 + $0xc] sm:$0xf0] }
 0x1ad   :  { %9474 = vmatpush.bf16.msra.mxu2 %v13409_v3  ;;  %9487 = vmatpush.bf16.msra.mxu3 %v13537_v52  ;;  %v13216_v3 = vld [vmem:[#allocation10 + $0x140] sm:$0xf]  ;;  %v17365_v52 = vld [vmem:[#allocation10 + $0x14c] sm:$0xf0] }
 0x1ae   :  { %v13056_v45 = vld [vmem:[#allocation10] sm:$0xf]  ;;  %v17481_v12 = vld [vmem:[#allocation10 + $0x4ec] sm:$0xf0] }
 0x1af   :  { %9449 = vmatpush.bf16.msra.mxu0 %v13137_v35  ;;  %9462 = vmatpush.bf16.msra.mxu1 %v13265_v36  ;;  %v323_v35 = vperm.slane %v19181_v60, 1  ;;  %v13089_v36 = vor.u32 %v17333_v1, %v13088_v11  ;;  %v13184_v11 = vld [vmem:[#allocation10 + $0x100] sm:$0xf]  ;;  %v17357_v1 = vld [vmem:[#allocation10 + $0x10c] sm:$0xf0]  ;;  %v4220_v5 = vpop.f32.mrf.mxu1 }
 0x1b0   :  { %v13440_v24 = vld [vmem:[#allocation10 + $0x300] sm:$0xf]  ;;  %v17577_v20 = vld [vmem:[#allocation10 + $0x7ec] sm:$0xf0] }
 0x1b1   :  { %9475 = vmatpush.bf16.msra.mxu2 %v13393_v9  ;;  %9488 = vmatpush.bf16.msra.mxu3 %v13521_v18  ;;  %v4192_v9 = vpop.f32.mrf.mxu3  ;;  %v13217_v18 = vor.u32 %v17365_v52, %v13216_v3  ;;  %v1053_v59 = vadd.f32 %v19051_v38, %v323_v35  ;;  %v17389_v3 = vld [vmem:[#allocation10 + $0x20c] sm:$0xf0]  ;;  %v13680_v52 = vld [vmem:[#allocation10 + $0x4e0] sm:$0xf]  ;;  %v4207_v38 = vpop.f32.mrf.mxu0 }
 0x1b2   :  { %v4193_v47 = vadd.f32 %v4192_v9, %v19174_v17  ;;  %v1066_v17 = vadd.f32 %v19053_v0, %v324_v40  ;;  %v17421_v0 = vld [vmem:[#allocation10 + $0x30c] sm:$0xf0]  ;;  %v13808_v30 = vld [vmem:[#allocation10 + $0x5e0] sm:$0xf]  ;;  %v13185_v9 = vor.u32 %v17357_v1, %v13184_v11 }
 0x1b3   :  { %9450 = vmatpush.bf16.msra.mxu0 %v13121_v14  ;;  %9463 = vmatpush.bf16.msra.mxu1 %v13249_v37  ;;  %v17361_v14 = vld [vmem:[#allocation10 + $0x12c] sm:$0xf0]  ;;  %v13328_v37 = vld [vmem:[#allocation10 + $0x220] sm:$0xf] }
 0x1b4   :  { %v4206_v62 = vadd.f32 %v4205_v8, %v4193_v47  ;;  %v17513_v35 = vld [vmem:[#allocation10 + $0x5ec] sm:$0xf0]  ;;  %v14064_v29 = vld [vmem:[#allocation10 + $0x7e0] sm:$0xf] }
 0x1b5   :  { %9476 = vmatpush.bf16.msra.mxu2 %v13377_v19  ;;  %9489 = vmatpush.bf16.msra.mxu3 %v13505_v46  ;;  %v17425_v19 = vld [vmem:[#allocation10 + $0x32c] sm:$0xf0]  ;;  %v19189_v46 = vadd.f32 %v19048_v32, %v322_v13  ;;  %v13057_v13 = vor.u32 %v17325_v61, %v13056_v45  ;;  %v13920_v45 = vld [vmem:[#allocation10 + $0x6c0] sm:$0xf] }
 0x1b6   :  { %v4219_v32 = vadd.f32 %v4218_v27, %v4206_v62  ;;  %v13457_v8 = vor.u32 %v17425_v19, %v13456_v7  ;;  %v17545_v40 = vld [vmem:[#allocation10 + $0x6ec] sm:$0xf0]  ;;  %v1447_v27 = vmax.f32 %v1053_v59, 0.0  ;;  %v13664_v7 = vld [vmem:[#allocation10 + $0x4c0] sm:$0xf] }
 0x1b7   :  { %9451 = vmatpush.bf16.msra.mxu0 %v13105_v44  ;;  %9464 = vmatpush.bf16.msra.mxu1 %v13233_v34  ;;  %v4231_v44 = vpop.f32.mrf.mxu2  ;;  %v13201_v34 = vor.u32 %v17361_v14, %v13200_v43  ;;  %v1446_v58 = vmax.f32 %v19189_v46, 0.0  ;;  %v13441_v14 = vor.u32 %v17421_v0, %v13440_v24  ;;  %v17477_v19 = vld [vmem:[#allocation10 + $0x4cc] sm:$0xf0]  ;;  %v13792_v62 = vld [vmem:[#allocation10 + $0x5c0] sm:$0xf]  ;;  %v14065_v46 = vor.u32 %v17577_v20, %v14064_v29 }
 0x1b8   :  { %v19196_v15 = vadd.f32 %v4231_v44, %v4219_v32  ;;  %v17541_v61 = vld [vmem:[#allocation10 + $0x6cc] sm:$0xf0]  ;;  %v14048_v59 = vld [vmem:[#allocation10 + $0x7c0] sm:$0xf]  ;;  %v13665_v11 = vor.u32 %v17477_v19, %v13664_v7 }
 0x1b9   :  { %9477 = vmatpush.bf16.msra.mxu2 %v13361_v25  ;;  %9490 = vmatpush.bf16.msra.mxu3 %v13489_v4  ;;  %v13312_v25 = vld [vmem:[#allocation10 + $0x200] sm:$0xf]  ;;  %v13329_v4 = vor.u32 %v17393_v33, %v13328_v37  ;;  %v4194_v47 = vpop.f32.mrf.mxu3  ;;  %v13809_v37 = vor.u32 %v17513_v35, %v13808_v30  ;;  %v13921_v32 = vor.u32 %v17541_v61, %v13920_v45  ;;  %v17505_v38 = vld [vmem:[#allocation10 + $0x5ac] sm:$0xf0] }
 0x1ba   :  { %v13313_v43 = vor.u32 %v17389_v3, %v13312_v25  ;;  %v13776_v3 = vld [vmem:[#allocation10 + $0x5a0] sm:$0xf]  ;;  %v17537_v0 = vld [vmem:[#allocation10 + $0x6ac] sm:$0xf0] }
 0x1bb   :  { %9452 = vmatpush.bf16.msra.mxu0 %v13089_v36  ;;  %9465 = vmatpush.bf16.msra.mxu1 %v13217_v18  ;;  %v13936_v36 = vld [vmem:[#allocation10 + $0x6e0] sm:$0xf]  ;;  %v13681_v18 = vor.u32 %v17481_v12, %v13680_v52  ;;  %v17569_v5 = vld [vmem:[#allocation10 + $0x7ac] sm:$0xf0]  ;;  %v13777_v35 = vor.u32 %v17505_v38, %v13776_v3 }
 0x1bc   :  { %v13937_v33 = vor.u32 %v17545_v40, %v13936_v36  ;;  %v13904_v24 = vld [vmem:[#allocation10 + $0x6a0] sm:$0xf]  ;;  %v17533_v20 = vld [vmem:[#allocation10 + $0x68c] sm:$0xf0] }
 0x1bd   :  { %9478 = vmatpush.bf16.msra.mxu2 %v13345_v51  ;;  %9491 = vmatpush.bf16.msra.mxu3 %v13473_v54  ;;  %v1448_v51 = vmax.f32 %v1066_v17, 0.0  ;;  %v1449_v54 = vmax.f32 %v19194_v63, 0.0  ;;  %v17573_v17 = vld [vmem:[#allocation10 + $0x7cc] sm:$0xf0]  ;;  %v19200_v63 = vpack.c.bf16 %v1446_v58, %v1446_v58  ;;  %v14032_v30 = vld [vmem:[#allocation10 + $0x7a0] sm:$0xf]  ;;  %v13905_v36 = vor.u32 %v17537_v0, %v13904_v24 }
 0x1be   :  { %v14049_v12 = vor.u32 %v17573_v17, %v14048_v59  ;;  %v13632_v40 = vld [vmem:[#allocation10 + $0x480] sm:$0xf]  ;;  %v17469_v58 = vld [vmem:[#allocation10 + $0x48c] sm:$0xf0]  ;;  %v326_v59 = vperm.slane %v19181_v60, 4 }
 0x1bf   :  { %9453 = vmatpush.bf16.msra.mxu0 %v13073_v56  ;;  %9466 = vmatpush.bf16.msra.mxu1 %v13201_v34  ;;  %v17509_v56 = vld [vmem:[#allocation10 + $0x5cc] sm:$0xf0]  ;;  %v4233_v44 = vpop.f32.mrf.mxu2  ;;  %v19202_v34 = vpack.c.bf16 %v1447_v27, %v1447_v27  ;;  %v19204_v1 = vpack.c.bf16 %v1448_v51, %v1448_v51  ;;  %v19206_v52 = vpack.c.bf16 %v1449_v54, %v1449_v54  ;;  %v13760_v27 = vld [vmem:[#allocation10 + $0x580] sm:$0xf] }
 0x1c0   :  { %v13793_v25 = vor.u32 %v17509_v56, %v13792_v62  ;;  %v13888_v29 = vld [vmem:[#allocation10 + $0x680] sm:$0xf]  ;;  %v17565_v51 = vld [vmem:[#allocation10 + $0x78c] sm:$0xf0]  ;;  %v13633_v54 = vor.u32 %v17469_v58, %v13632_v40  ;;  %v329_v40 = vperm.slane %v19181_v60, 7 }
 0x1c1   :  { %9479 = vmatpush.bf16.msra.mxu2 %v13329_v4  ;;  %9492 = vmatpush.bf16.msra.mxu3 %v13457_v8  ;;  %v13648_v4 = vld [vmem:[#allocation10 + $0x4a0] sm:$0xf]  ;;  %v17473_v8 = vld [vmem:[#allocation10 + $0x4ac] sm:$0xf0] }
 0x1c2   :  { %v14016_v47 = vld [vmem:[#allocation10 + $0x780] sm:$0xf]  ;;  %v17497_v62 = vld [vmem:[#allocation10 + $0x56c] sm:$0xf0] }
 0x1c3   :  { %9454 = vmatpush.bf16.msra.mxu0 %v13057_v13  ;;  %9467 = vmatpush.bf16.msra.mxu1 %v13185_v9  ;;  %v13649_v13 = vor.u32 %v17473_v8, %v13648_v4  ;;  %v14033_v9 = vor.u32 %v17569_v5, %v14032_v30  ;;  %v13744_v7 = vld [vmem:[#allocation10 + $0x560] sm:$0xf]  ;;  %v14017_v19 = vor.u32 %v17565_v51, %v14016_v47  ;;  %v17529_v56 = vld [vmem:[#allocation10 + $0x66c] sm:$0xf0]  ;;  %v327_v30 = vperm.slane %v19181_v60, 5 }
 0x1c4   :  { %v14000_v45 = vld [vmem:[#allocation10 + $0x760] sm:$0xf]  ;;  %v17561_v61 = vld [vmem:[#allocation10 + $0x76c] sm:$0xf0]  ;;  %v13745_v44 = vor.u32 %v17497_v62, %v13744_v7 }
 0x1c5   :  { %9480 = vmatpush.bf16.msra.mxu2 %v13313_v43  ;;  %9493 = vmatpush.bf16.msra.mxu3 %v13441_v14  ;;  %v13889_v14 = vor.u32 %v17533_v20, %v13888_v29  ;;  %v13728_v4 = vld [vmem:[#allocation10 + $0x540] sm:$0xf]  ;;  %v14001_v3 = vor.u32 %v17561_v61, %v14000_v45  ;;  %v17525_v24 = vld [vmem:[#allocation10 + $0x64c] sm:$0xf0] }
 0x1c6   :  { %9455 = vmatmul.bf16.vlgmr.msra.gmra.mxu0 %v19200_v63  ;;  %9468 = vmatmul.bf16.vlgmr.msra.gmra.mxu1 %v19202_v34  ;;  %v13856_v38 = vld [vmem:[#allocation10 + $0x640] sm:$0xf]  ;;  %v17457_v20 = vld [vmem:[#allocation10 + $0x42c] sm:$0xf0] }
 0x1c7   :  { %9499 = vmatpush.bf16.msrb.mxu0 %v13681_v18  ;;  %9512 = vmatpush.bf16.msrb.mxu1 %v13809_v37  ;;  %v17501_v18 = vld [vmem:[#allocation10 + $0x58c] sm:$0xf0]  ;;  %v13616_v37 = vld [vmem:[#allocation10 + $0x460] sm:$0xf]  ;;  %v4270_v8 = vpop.f32.mrf.mxu0  ;;  %v19213_v0 = vpop.f32.mrf.mxu1 }
 0x1c8   :  { %9481 = vmatmul.bf16.vlgmr.msra.gmra.mxu2 %v19204_v1  ;;  %9494 = vmatmul.bf16.vlgmr.msra.gmra.mxu3 %v19206_v52  ;;  %v13761_v43 = vor.u32 %v17501_v18, %v13760_v27  ;;  %v13984_v5 = vld [vmem:[#allocation10 + $0x740] sm:$0xf]  ;;  %v13857_v18 = vor.u32 %v17525_v24, %v13856_v38  ;;  %v17453_v62 = vld [vmem:[#allocation10 + $0x40c] sm:$0xf0] }
 0x1c9   :  { %9525 = vmatpush.bf16.msrb.mxu2 %v13937_v33  ;;  %9538 = vmatpush.bf16.msrb.mxu3 %v14065_v46  ;;  %v17465_v33 = vld [vmem:[#allocation10 + $0x46c] sm:$0xf0]  ;;  %v13872_v46 = vld [vmem:[#allocation10 + $0x660] sm:$0xf] }
 0x1ca   :  { %v13617_v17 = vor.u32 %v17465_v33, %v13616_v37  ;;  %v13584_v29 = vld [vmem:[#allocation10 + $0x420] sm:$0xf]  ;;  %v17553_v37 = vld [vmem:[#allocation10 + $0x72c] sm:$0xf0] }
 0x1cb   :  { %9500 = vmatpush.bf16.msrb.mxu0 %v13665_v11  ;;  %9513 = vmatpush.bf16.msrb.mxu1 %v13793_v25  ;;  %v13873_v11 = vor.u32 %v17529_v56, %v13872_v46  ;;  %v13600_v25 = vld [vmem:[#allocation10 + $0x440] sm:$0xf]  ;;  %v4257_v27 = vpop.f32.mrf.mxu3  ;;  %v13585_v7 = vor.u32 %v17457_v20, %v13584_v29  ;;  %v4244_v46 = vpop.f32.mrf.mxu2  ;;  %v17705_v29 = vld [vmem:[#allocation10 + $0xbec] sm:$0xf0] }
 0x1cc   :  { %v13712_v47 = vld [vmem:[#allocation10 + $0x520] sm:$0xf] }
 0x1cd   :  { %9526 = vmatpush.bf16.msrb.mxu2 %v13921_v32  ;;  %9539 = vmatpush.bf16.msrb.mxu3 %v14049_v12  ;;  %v17461_v32 = vld [vmem:[#allocation10 + $0x44c] sm:$0xf0]  ;;  %v13696_v61 = vld [vmem:[#allocation10 + $0x500] sm:$0xf] }
 0x1ce   :  { %v17493_v12 = vld [vmem:[#allocation10 + $0x54c] sm:$0xf0]  ;;  %v13601_v58 = vor.u32 %v17461_v32, %v13600_v25  ;;  %v1131_v32 = vadd.f32 %v19076_v6, %v329_v40  ;;  %v14192_v24 = vld [vmem:[#allocation10 + $0x8e0] sm:$0xf] }
 0x1cf   :  { %9501 = vmatpush.bf16.msrb.mxu0 %v13649_v13  ;;  %9514 = vmatpush.bf16.msrb.mxu1 %v13777_v35  ;;  %v17557_v13 = vld [vmem:[#allocation10 + $0x74c] sm:$0xf0]  ;;  %v19217_v35 = vadd.f32 %v19070_v39, %v326_v59  ;;  %v4285_v38 = vpop.f32.mrf.mxu1  ;;  %v14576_v40 = vld [vmem:[#allocation10 + $0xbe0] sm:$0xf] }
 0x1d0   :  { %v13985_v51 = vor.u32 %v17557_v13, %v13984_v5  ;;  %v17521_v39 = vld [vmem:[#allocation10 + $0x62c] sm:$0xf0]  ;;  %v14320_v5 = vld [vmem:[#allocation10 + $0x9e0] sm:$0xf] }
 0x1d1   :  { %9527 = vmatpush.bf16.msrb.mxu2 %v13905_v36  ;;  %9540 = vmatpush.bf16.msrb.mxu3 %v14033_v9  ;;  %v328_v36 = vperm.slane %v19181_v60, 6  ;;  %v13729_v9 = vor.u32 %v17493_v12, %v13728_v4  ;;  %v1450_v33 = vmax.f32 %v19217_v35, 0.0  ;;  %v19223_v60 = vadd.f32 %v19072_v41, %v327_v30  ;;  %v17485_v59 = vld [vmem:[#allocation10 + $0x50c] sm:$0xf0]  ;;  %v14416_v38 = vld [vmem:[#allocation10 + $0xaa0] sm:$0xf] }
 0x1d2   :  { %v17517_v4 = vld [vmem:[#allocation10 + $0x60c] sm:$0xf0]  ;;  %v13697_v6 = vor.u32 %v17485_v59, %v13696_v61 }
 0x1d3   :  { %9502 = vmatpush.bf16.msrb.mxu0 %v13633_v54  ;;  %9515 = vmatpush.bf16.msrb.mxu1 %v13761_v43  ;;  %v17489_v54 = vld [vmem:[#allocation10 + $0x52c] sm:$0xf0]  ;;  %v13840_v43 = vld [vmem:[#allocation10 + $0x620] sm:$0xf]  ;;  %v1118_v25 = vadd.f32 %v19074_v2, %v328_v36  ;;  %v1451_v2 = vmax.f32 %v19223_v60, 0.0  ;;  %v14577_v60 = vor.u32 %v17705_v29, %v14576_v40  ;;  %v19231_v61 = vpack.c.bf16 %v1450_v33, %v1450_v33 }
 0x1d4   :  { %v13713_v56 = vor.u32 %v17489_v54, %v13712_v47  ;;  %v13841_v45 = vor.u32 %v17521_v39, %v13840_v43  ;;  %v17549_v12 = vld [vmem:[#allocation10 + $0x70c] sm:$0xf0]  ;;  %v14528_v29 = vld [vmem:[#allocation10 + $0xb80] sm:$0xf] }
 0x1d5   :  { %9528 = vmatpush.bf16.msrb.mxu2 %v13889_v14  ;;  %9541 = vmatpush.bf16.msrb.mxu3 %v14017_v19  ;;  %v13968_v14 = vld [vmem:[#allocation10 + $0x720] sm:$0xf]  ;;  %v17609_v30 = vld [vmem:[#allocation10 + $0x8ec] sm:$0xf0]  ;;  %v1452_v47 = vmax.f32 %v1118_v25, 0.0  ;;  %v19233_v59 = vpack.c.bf16 %v1451_v2, %v1451_v2 }
 0x1d6   :  { %v13568_v19 = vld [vmem:[#allocation10 + $0x400] sm:$0xf]  ;;  %v13969_v41 = vor.u32 %v17553_v37, %v13968_v14  ;;  %v14193_v54 = vor.u32 %v17609_v30, %v14192_v24  ;;  %v17605_v37 = vld [vmem:[#allocation10 + $0x8cc] sm:$0xf0] }
 0x1d7   :  { %9503 = vmatpush.bf16.msrb.mxu0 %v13617_v17  ;;  %9516 = vmatpush.bf16.msrb.mxu1 %v13745_v44  ;;  %v13824_v17 = vld [vmem:[#allocation10 + $0x600] sm:$0xf]  ;;  %v4258_v44 = vadd.f32 %v4257_v27, %v4244_v46  ;;  %v13569_v35 = vor.u32 %v17453_v62, %v13568_v19  ;;  %v17673_v27 = vld [vmem:[#allocation10 + $0xaec] sm:$0xf0] }
 0x1d8   :  { %v13825_v36 = vor.u32 %v17517_v4, %v13824_v17  ;;  %v14176_v14 = vld [vmem:[#allocation10 + $0x8c0] sm:$0xf]  ;;  %v17637_v19 = vld [vmem:[#allocation10 + $0x9cc] sm:$0xf0] }
 0x1d9   :  { %9529 = vmatpush.bf16.msrb.mxu2 %v13873_v11  ;;  %9542 = vmatpush.bf16.msrb.mxu3 %v14001_v3  ;;  %v4272_v11 = vpop.f32.mrf.mxu0  ;;  %v13952_v3 = vld [vmem:[#allocation10 + $0x700] sm:$0xf]  ;;  %v4271_v13 = vadd.f32 %v4270_v8, %v4258_v44  ;;  %v17669_v46 = vld [vmem:[#allocation10 + $0xacc] sm:$0xf0]  ;;  %v14177_v17 = vor.u32 %v17605_v37, %v14176_v14  ;;  %v19235_v44 = vpack.c.bf16 %v1452_v47, %v1452_v47 }
 0x1da   :  { %v13953_v8 = vor.u32 %v17549_v12, %v13952_v3  ;;  %v14432_v62 = vld [vmem:[#allocation10 + $0xac0] sm:$0xf]  ;;  %v17633_v12 = vld [vmem:[#allocation10 + $0x9ac] sm:$0xf0] }
 0x1db   :  { %9504 = vmatpush.bf16.msrb.mxu0 %v13601_v58  ;;  %9517 = vmatpush.bf16.msrb.mxu1 %v13729_v9  ;;  %v17641_v58 = vld [vmem:[#allocation10 + $0x9ec] sm:$0xf0]  ;;  %v14448_v9 = vld [vmem:[#allocation10 + $0xae0] sm:$0xf]  ;;  %v19229_v20 = vadd.f32 %v19213_v0, %v4271_v13  ;;  %v14433_v25 = vor.u32 %v17669_v46, %v14432_v62 }
 0x1dc   :  { %v14321_v43 = vor.u32 %v17641_v58, %v14320_v5  ;;  %v14449_v39 = vor.u32 %v17673_v27, %v14448_v9  ;;  %v14560_v0 = vld [vmem:[#allocation10 + $0xbc0] sm:$0xf]  ;;  %v17665_v24 = vld [vmem:[#allocation10 + $0xaac] sm:$0xf0] }
 0x1dd   :  { %9530 = vmatpush.bf16.msrb.mxu2 %v13857_v18  ;;  %9543 = vmatpush.bf16.msrb.mxu3 %v13985_v51  ;;  %v4259_v18 = vpop.f32.mrf.mxu3  ;;  %v1453_v51 = vmax.f32 %v1131_v32, 0.0  ;;  %v14160_v32 = vld [vmem:[#allocation10 + $0x8a0] sm:$0xf]  ;;  %v17697_v5 = vld [vmem:[#allocation10 + $0xbac] sm:$0xf0]  ;;  %v14417_v58 = vor.u32 %v17665_v24, %v14416_v38 }
 0x1de   :  { %v14288_v4 = vld [vmem:[#allocation10 + $0x9a0] sm:$0xf]  ;;  %v17597_v27 = vld [vmem:[#allocation10 + $0x88c] sm:$0xf0] }
 0x1df   :  { %9505 = vmatpush.bf16.msrb.mxu0 %v13585_v7  ;;  %9518 = vmatpush.bf16.msrb.mxu1 %v13713_v56  ;;  %v14304_v7 = vld [vmem:[#allocation10 + $0x9c0] sm:$0xf]  ;;  %v4246_v56 = vpop.f32.mrf.mxu2  ;;  %v19237_v3 = vpack.c.bf16 %v1453_v51, %v1453_v51  ;;  %v17661_v40 = vld [vmem:[#allocation10 + $0xa8c] sm:$0xf0] }
 0x1e0   :  { %v14305_v11 = vor.u32 %v17637_v19, %v14304_v7  ;;  %v14544_v30 = vld [vmem:[#allocation10 + $0xba0] sm:$0xf]  ;;  %v17693_v47 = vld [vmem:[#allocation10 + $0xb8c] sm:$0xf0]  ;;  %v19243_v56 = vld [vmem:[#allocation8 + $0x8] sm:$0xff] }
 0x1e1   :  { %9531 = vmatpush.bf16.msrb.mxu2 %v13841_v45  ;;  %9544 = vmatpush.bf16.msrb.mxu3 %v13969_v41  ;;  %v17701_v45 = vld [vmem:[#allocation10 + $0xbcc] sm:$0xf0]  ;;  %v14144_v9 = vld [vmem:[#allocation10 + $0x880] sm:$0xf]  ;;  %v14545_v2 = vor.u32 %v17697_v5, %v14544_v30  ;;  %v14529_v37 = vor.u32 %v17693_v47, %v14528_v29  ;;  %v330_v30 = vperm.slane %v19243_v56, 0 }
 0x1e2   :  { %v17601_v41 = vld [vmem:[#allocation10 + $0x8ac] sm:$0xf0]  ;;  %v14561_v33 = vor.u32 %v17701_v45, %v14560_v0  ;;  %v14272_v18 = vld [vmem:[#allocation10 + $0x980] sm:$0xf]  ;;  %v14145_v51 = vor.u32 %v17597_v27, %v14144_v9  ;;  %v332_v9 = vperm.slane %v19243_v56, 2  ;;  %v333_v27 = vperm.slane %v19243_v56, 3 }
 0x1e3   :  { %9506 = vmatpush.bf16.msrb.mxu0 %v13569_v35  ;;  %9519 = vmatpush.bf16.msrb.mxu1 %v13697_v6  ;;  %v14161_v13 = vor.u32 %v17601_v41, %v14160_v32  ;;  %v14289_v35 = vor.u32 %v17633_v12, %v14288_v4  ;;  %v17629_v6 = vld [vmem:[#allocation10 + $0x98c] sm:$0xf0]  ;;  %v14256_v14 = vld [vmem:[#allocation10 + $0x960] sm:$0xf]  ;;  %v4335_v4 = vpop.f32.mrf.mxu1 }
 0x1e4   :  { %v17625_v7 = vld [vmem:[#allocation10 + $0x96c] sm:$0xf0]  ;;  %v14512_v62 = vld [vmem:[#allocation10 + $0xb60] sm:$0xf] }
 0x1e5   :  { %9532 = vmatpush.bf16.msrb.mxu2 %v13825_v36  ;;  %9545 = vmatpush.bf16.msrb.mxu3 %v13953_v8  ;;  %v14400_v36 = vld [vmem:[#allocation10 + $0xa80] sm:$0xf]  ;;  %v14273_v8 = vor.u32 %v17629_v6, %v14272_v18  ;;  %v17657_v19 = vld [vmem:[#allocation10 + $0xa6c] sm:$0xf0]  ;;  %v14257_v45 = vor.u32 %v17625_v7, %v14256_v14 }
 0x1e6   :  { %9507 = vmatmul.bf16.vlgmr.msrb.gmra.mxu0 %v19231_v61  ;;  %9520 = vmatmul.bf16.vlgmr.msrb.gmra.mxu1 %v19233_v59  ;;  %v17689_v46 = vld [vmem:[#allocation10 + $0xb6c] sm:$0xf0]  ;;  %v14240_v32 = vld [vmem:[#allocation10 + $0x940] sm:$0xf] }
 0x1e7   :  { %9551 = vmatpush.bf16.msra.mxu0 %v14193_v54  ;;  %9564 = vmatpush.bf16.msra.mxu1 %v14321_v43  ;;  %v14401_v54 = vor.u32 %v17661_v40, %v14400_v36  ;;  %v14128_v43 = vld [vmem:[#allocation10 + $0x860] sm:$0xf]  ;;  %v4322_v41 = vpop.f32.mrf.mxu0  ;;  %v17621_v12 = vld [vmem:[#allocation10 + $0x94c] sm:$0xf0] }
 0x1e8   :  { %9533 = vmatmul.bf16.vlgmr.msrb.gmra.mxu2 %v19235_v44  ;;  %9546 = vmatmul.bf16.vlgmr.msrb.gmra.mxu3 %v19237_v3  ;;  %v14368_v38 = vld [vmem:[#allocation10 + $0xa40] sm:$0xf]  ;;  %v17653_v24 = vld [vmem:[#allocation10 + $0xa4c] sm:$0xf0]  ;;  %v14241_v36 = vor.u32 %v17621_v12, %v14240_v32 }
 0x1e9   :  { %9577 = vmatpush.bf16.msra.mxu2 %v14449_v39  ;;  %9590 = vmatpush.bf16.msra.mxu3 %v14577_v60  ;;  %v17593_v39 = vld [vmem:[#allocation10 + $0x86c] sm:$0xf0]  ;;  %v14384_v60 = vld [vmem:[#allocation10 + $0xa60] sm:$0xf]  ;;  %v14369_v40 = vor.u32 %v17653_v24, %v14368_v38  ;;  %v1170_v38 = vadd.f32 %v19090_v26, %v332_v9 }
 0x1ea   :  { %v14129_v0 = vor.u32 %v17593_v39, %v14128_v43  ;;  %v14096_v29 = vld [vmem:[#allocation10 + $0x820] sm:$0xf]  ;;  %v17585_v47 = vld [vmem:[#allocation10 + $0x82c] sm:$0xf0] }
 0x1eb   :  { %9552 = vmatpush.bf16.msra.mxu0 %v14177_v17  ;;  %9565 = vmatpush.bf16.msra.mxu1 %v14305_v11  ;;  %v14385_v17 = vor.u32 %v17657_v19, %v14384_v60  ;;  %v14112_v11 = vld [vmem:[#allocation10 + $0x840] sm:$0xf]  ;;  %v4309_v5 = vpop.f32.mrf.mxu3  ;;  %v4296_v18 = vpop.f32.mrf.mxu2  ;;  %v17649_v39 = vld [vmem:[#allocation10 + $0xa2c] sm:$0xf0]  ;;  %v1144_v60 = vadd.f32 %v19078_v48, %v330_v30  ;;  %v1183_v48 = vadd.f32 %v19092_v31, %v333_v27 }
 0x1ec   :  { %v4297_v6 = vadd.f32 %v4296_v18, %v19229_v20  ;;  %v14352_v43 = vld [vmem:[#allocation10 + $0xa20] sm:$0xf]  ;;  %v17681_v7 = vld [vmem:[#allocation10 + $0xb2c] sm:$0xf0]  ;;  %v4337_v12 = vpop.f32.mrf.mxu1 }
 0x1ed   :  { %9578 = vmatpush.bf16.msra.mxu2 %v14433_v25  ;;  %9591 = vmatpush.bf16.msra.mxu3 %v14561_v33  ;;  %v17589_v25 = vld [vmem:[#allocation10 + $0x84c] sm:$0xf0]  ;;  %v14513_v33 = vor.u32 %v17689_v46, %v14512_v62  ;;  %v14097_v62 = vor.u32 %v17585_v47, %v14096_v29  ;;  %v14080_v20 = vld [vmem:[#allocation10 + $0x800] sm:$0xf]  ;;  %v1454_v26 = vmax.f32 %v1144_v60, 0.0 }
 0x1ee   :  { %v4310_v14 = vadd.f32 %v4309_v5, %v4297_v6  ;;  %v17581_v46 = vld [vmem:[#allocation10 + $0x80c] sm:$0xf0]  ;;  %v14336_v32 = vld [vmem:[#allocation10 + $0xa00] sm:$0xf] }
 0x1ef   :  { %9553 = vmatpush.bf16.msra.mxu0 %v14161_v13  ;;  %9566 = vmatpush.bf16.msra.mxu1 %v14289_v35  ;;  %v14496_v13 = vld [vmem:[#allocation10 + $0xb40] sm:$0xf]  ;;  %v17685_v35 = vld [vmem:[#allocation10 + $0xb4c] sm:$0xf0] }
 0x1f0   :  { %v17645_v24 = vld [vmem:[#allocation10 + $0xa0c] sm:$0xf0]  ;;  %v14464_v30 = vld [vmem:[#allocation10 + $0xb00] sm:$0xf] }
 0x1f1   :  { %9579 = vmatpush.bf16.msra.mxu2 %v14417_v58  ;;  %9592 = vmatpush.bf16.msra.mxu3 %v14545_v2  ;;  %v331_v58 = vperm.slane %v19243_v56, 1  ;;  %v14113_v2 = vor.u32 %v17589_v25, %v14112_v11  ;;  %v14208_v11 = vld [vmem:[#allocation10 + $0x900] sm:$0xf]  ;;  %v17613_v25 = vld [vmem:[#allocation10 + $0x90c] sm:$0xf0]  ;;  %v14337_v27 = vor.u32 %v17645_v24, %v14336_v32 }
 0x1f2   :  { %v17677_v5 = vld [vmem:[#allocation10 + $0xb0c] sm:$0xf0]  ;;  %v14209_v31 = vor.u32 %v17613_v25, %v14208_v11  ;;  %v15088_v47 = vld [vmem:[#allocation10 + $0xfe0] sm:$0xf] }
 0x1f3   :  { %9554 = vmatpush.bf16.msra.mxu0 %v14145_v51  ;;  %9567 = vmatpush.bf16.msra.mxu1 %v14273_v8  ;;  %v14224_v51 = vld [vmem:[#allocation10 + $0x920] sm:$0xf]  ;;  %v14497_v8 = vor.u32 %v17685_v35, %v14496_v13  ;;  %v1157_v19 = vadd.f32 %v19080_v53, %v331_v58  ;;  %v4311_v18 = vpop.f32.mrf.mxu3  ;;  %v17769_v6 = vld [vmem:[#allocation10 + $0xdec] sm:$0xf0]  ;;  %v4298_v29 = vpop.f32.mrf.mxu2 }
 0x1f4   :  { %v14704_v35 = vld [vmem:[#allocation10 + $0xce0] sm:$0xf]  ;;  %v17765_v60 = vld [vmem:[#allocation10 + $0xdcc] sm:$0xf0] }
 0x1f5   :  { %9580 = vmatpush.bf16.msra.mxu2 %v14401_v54  ;;  %9593 = vmatpush.bf16.msra.mxu3 %v14529_v37  ;;  %v17617_v54 = vld [vmem:[#allocation10 + $0x92c] sm:$0xf0]  ;;  %v14480_v37 = vld [vmem:[#allocation10 + $0xb20] sm:$0xf]  ;;  %v1455_v9 = vmax.f32 %v1157_v19, 0.0 }
 0x1f6   :  { %v14481_v53 = vor.u32 %v17681_v7, %v14480_v37  ;;  %v14832_v58 = vld [vmem:[#allocation10 + $0xde0] sm:$0xf]  ;;  %v17733_v7 = vld [vmem:[#allocation10 + $0xccc] sm:$0xf0] }
 0x1f7   :  { %9555 = vmatpush.bf16.msra.mxu0 %v14129_v0  ;;  %9568 = vmatpush.bf16.msra.mxu1 %v14257_v45  ;;  %v4323_v0 = vadd.f32 %v4322_v41, %v4310_v14  ;;  %v14225_v45 = vor.u32 %v17617_v54, %v14224_v51  ;;  %v17737_v41 = vld [vmem:[#allocation10 + $0xcec] sm:$0xf0]  ;;  %v14465_v54 = vor.u32 %v17677_v5, %v14464_v30  ;;  %v14688_v37 = vld [vmem:[#allocation10 + $0xcc0] sm:$0xf] }
 0x1f8   :  { %v17833_v51 = vld [vmem:[#allocation10 + $0xfec] sm:$0xf0]  ;;  %v14944_v19 = vld [vmem:[#allocation10 + $0xec0] sm:$0xf]  ;;  %v19258_v11 = vpack.c.bf16 %v1455_v9, %v1455_v9  ;;  %v14689_v25 = vor.u32 %v17733_v7, %v14688_v37 }
 0x1f9   :  { %9581 = vmatpush.bf16.msra.mxu2 %v14385_v17  ;;  %9594 = vmatpush.bf16.msra.mxu3 %v14513_v33  ;;  %v14353_v17 = vor.u32 %v17649_v39, %v14352_v43  ;;  %v4324_v33 = vpop.f32.mrf.mxu0  ;;  %v19254_v13 = vadd.f32 %v4335_v4, %v4323_v0  ;;  %v1456_v4 = vmax.f32 %v1170_v38, 0.0  ;;  %v14705_v43 = vor.u32 %v17737_v41, %v14704_v35  ;;  %v15072_v0 = vld [vmem:[#allocation10 + $0xfc0] sm:$0xf]  ;;  %v17761_v5 = vld [vmem:[#allocation10 + $0xdac] sm:$0xf0] }
 0x1fa   :  { %v14833_v39 = vor.u32 %v17769_v6, %v14832_v58  ;;  %v14672_v38 = vld [vmem:[#allocation10 + $0xca0] sm:$0xf]  ;;  %v17793_v41 = vld [vmem:[#allocation10 + $0xeac] sm:$0xf0] }
 0x1fb   :  { %9556 = vmatpush.bf16.msra.mxu0 %v14113_v2  ;;  %9569 = vmatpush.bf16.msra.mxu1 %v14241_v36  ;;  %19712 = vst [vmem:[#allocation34_spill] sm:$0xff] %v19254_v13  ;;  %v14081_v2 = vor.u32 %v17581_v46, %v14080_v20  ;;  %v14960_v36 = vld [vmem:[#allocation10 + $0xee0] sm:$0xf]  ;;  %v15089_v20 = vor.u32 %v17833_v51, %v15088_v47  ;;  %v17797_v46 = vld [vmem:[#allocation10 + $0xecc] sm:$0xf0] }
 0x1fc   :  { %v19260_v32 = vpack.c.bf16 %v1456_v4, %v1456_v4  ;;  %v14945_v12 = vor.u32 %v17797_v46, %v14944_v19  ;;  %v14928_v35 = vld [vmem:[#allocation10 + $0xea0] sm:$0xf]  ;;  %v17825_v18 = vld [vmem:[#allocation10 + $0xfac] sm:$0xf0]  ;;  %v13298_v13 = vld [vmem:[#allocation10 + $0x1f0] sm:$0xf0] }
 0x1fd   :  { %9582 = vmatpush.bf16.msra.mxu2 %v14369_v40  ;;  %9595 = vmatpush.bf16.msra.mxu3 %v14497_v8  ;;  %v17801_v40 = vld [vmem:[#allocation10 + $0xeec] sm:$0xf0]  ;;  %v1457_v8 = vmax.f32 %v1183_v48, 0.0  ;;  %v15056_v58 = vld [vmem:[#allocation10 + $0xfa0] sm:$0xf] }
 0x1fe   :  { %v14961_v14 = vor.u32 %v17801_v40, %v14960_v36  ;;  %v17729_v48 = vld [vmem:[#allocation10 + $0xcac] sm:$0xf0]  ;;  %v14929_v36 = vor.u32 %v17793_v41, %v14928_v35  ;;  %v14656_v40 = vld [vmem:[#allocation10 + $0xc80] sm:$0xf]  ;;  %v15057_v9 = vor.u32 %v17825_v18, %v15056_v58  ;;  %v334_v58 = vperm.slane %v19243_v56, 4 }
 0x1ff   :  { %9557 = vmatpush.bf16.msra.mxu0 %v14097_v62  ;;  %9570 = vmatpush.bf16.msra.mxu1 %v14225_v45  ;;  %v14816_v62 = vld [vmem:[#allocation10 + $0xdc0] sm:$0xf]  ;;  %v17829_v45 = vld [vmem:[#allocation10 + $0xfcc] sm:$0xf0]  ;;  %v19262_v24 = vpack.c.bf16 %v1457_v8, %v1457_v8 }
 0x200   :  { %v14817_v33 = vor.u32 %v17765_v60, %v14816_v62  ;;  %v15073_v30 = vor.u32 %v17829_v45, %v15072_v0  ;;  %v17725_v29 = vld [vmem:[#allocation10 + $0xc8c] sm:$0xf0]  ;;  %v15040_v51 = vld [vmem:[#allocation10 + $0xf80] sm:$0xf] }
 0x201   :  { %9583 = vmatpush.bf16.msra.mxu2 %v14353_v17  ;;  %9596 = vmatpush.bf16.msra.mxu3 %v14481_v53  ;;  %v19256_v17 = vpack.c.bf16 %v1454_v26, %v1454_v26  ;;  %v14800_v53 = vld [vmem:[#allocation10 + $0xda0] sm:$0xf]  ;;  %v17789_v47 = vld [vmem:[#allocation10 + $0xe8c] sm:$0xf0]  ;;  %v14657_v8 = vor.u32 %v17725_v29, %v14656_v40  ;;  %v337_v40 = vperm.slane %v19243_v56, 7 }
 0x202   :  { %v14801_v6 = vor.u32 %v17761_v5, %v14800_v53  ;;  %v14784_v26 = vld [vmem:[#allocation10 + $0xd80] sm:$0xf]  ;;  %v17821_v4 = vld [vmem:[#allocation10 + $0xf8c] sm:$0xf0] }
 0x203   :  { %9558 = vmatpush.bf16.msra.mxu0 %v14081_v2  ;;  %9571 = vmatpush.bf16.msra.mxu1 %v14209_v31  ;;  %v14673_v2 = vor.u32 %v17729_v48, %v14672_v38  ;;  %v17757_v31 = vld [vmem:[#allocation10 + $0xd8c] sm:$0xf0]  ;;  %v14768_v37 = vld [vmem:[#allocation10 + $0xd60] sm:$0xf]  ;;  %v4348_v7 = vpop.f32.mrf.mxu1  ;;  %v15041_v62 = vor.u32 %v17821_v4, %v15040_v51 }
 0x204   :  { %v14896_v60 = vld [vmem:[#allocation10 + $0xe60] sm:$0xf]  ;;  %v17785_v19 = vld [vmem:[#allocation10 + $0xe6c] sm:$0xf0] }
 0x205   :  { %9584 = vmatpush.bf16.msra.mxu2 %v14337_v27  ;;  %9597 = vmatpush.bf16.msra.mxu3 %v14465_v54  ;;  %v14912_v27 = vld [vmem:[#allocation10 + $0xe80] sm:$0xf]  ;;  %v14785_v54 = vor.u32 %v17757_v31, %v14784_v26  ;;  %v17817_v0 = vld [vmem:[#allocation10 + $0xf6c] sm:$0xf0] }
 0x206   :  { %9559 = vmatmul.bf16.vlgmr.msra.gmra.mxu0 %v19256_v17  ;;  %9572 = vmatmul.bf16.vlgmr.msra.gmra.mxu1 %v19258_v11  ;;  %v15024_v46 = vld [vmem:[#allocation10 + $0xf60] sm:$0xf]  ;;  %v17717_v48 = vld [vmem:[#allocation10 + $0xc4c] sm:$0xf0] }
 0x207   :  { %9603 = vmatpush.bf16.msrb.mxu0 %v14705_v43  ;;  %9616 = vmatpush.bf16.msrb.mxu1 %v14833_v39  ;;  %v14913_v43 = vor.u32 %v17789_v47, %v14912_v27  ;;  %v14640_v39 = vld [vmem:[#allocation10 + $0xc60] sm:$0xf]  ;;  %v17749_v5 = vld [vmem:[#allocation10 + $0xd4c] sm:$0xf0] }
 0x208   :  { %9585 = vmatmul.bf16.vlgmr.msra.gmra.mxu2 %v19260_v32  ;;  %9598 = vmatmul.bf16.vlgmr.msra.gmra.mxu3 %v19262_v24  ;;  %v14624_v38 = vld [vmem:[#allocation10 + $0xc40] sm:$0xf]  ;;  %v17781_v41 = vld [vmem:[#allocation10 + $0xe4c] sm:$0xf0] }
 0x209   :  { %9629 = vmatpush.bf16.msrb.mxu2 %v14961_v14  ;;  %9642 = vmatpush.bf16.msrb.mxu3 %v15089_v20  ;;  %v17721_v14 = vld [vmem:[#allocation10 + $0xc6c] sm:$0xf0]  ;;  %v14752_v53 = vld [vmem:[#allocation10 + $0xd40] sm:$0xf]  ;;  %v14625_v29 = vor.u32 %v17717_v48, %v14624_v38 }
 0x20a   :  { %v17753_v20 = vld [vmem:[#allocation10 + $0xd6c] sm:$0xf0]  ;;  %v14641_v45 = vor.u32 %v17721_v14, %v14640_v39  ;;  %v14880_v35 = vld [vmem:[#allocation10 + $0xe40] sm:$0xf]  ;;  %v14753_v31 = vor.u32 %v17749_v5, %v14752_v53 }
 0x20b   :  { %9604 = vmatpush.bf16.msrb.mxu0 %v14689_v25  ;;  %9617 = vmatpush.bf16.msrb.mxu1 %v14817_v33  ;;  %v4387_v25 = vpop.f32.mrf.mxu0  ;;  %v14769_v33 = vor.u32 %v17753_v20, %v14768_v37  ;;  %v15008_v18 = vld [vmem:[#allocation10 + $0xf40] sm:$0xf]  ;;  %v4361_v26 = vpop.f32.mrf.mxu2  ;;  %v14881_v27 = vor.u32 %v17781_v41, %v14880_v35  ;;  %v17713_v51 = vld [vmem:[#allocation10 + $0xc2c] sm:$0xf0] }
 0x20c   :  { %v14608_v47 = vld [vmem:[#allocation10 + $0xc20] sm:$0xf]  ;;  %v17745_v39 = vld [vmem:[#allocation10 + $0xd2c] sm:$0xf0] }
 0x20d   :  { %9630 = vmatpush.bf16.msrb.mxu2 %v14945_v12  ;;  %9643 = vmatpush.bf16.msrb.mxu3 %v15073_v30  ;;  %v14897_v12 = vor.u32 %v17785_v19, %v14896_v60  ;;  %v15025_v30 = vor.u32 %v17817_v0, %v15024_v46  ;;  %v14736_v4 = vld [vmem:[#allocation10 + $0xd20] sm:$0xf]  ;;  %v17777_v37 = vld [vmem:[#allocation10 + $0xe2c] sm:$0xf0]  ;;  %v1196_v60 = vadd.f32 %v19099_v10, %v334_v58 }
 0x20e   :  { %v14864_v14 = vld [vmem:[#allocation10 + $0xe20] sm:$0xf]  ;;  %v14609_v46 = vor.u32 %v17713_v51, %v14608_v47  ;;  %v17741_v48 = vld [vmem:[#allocation10 + $0xd0c] sm:$0xf0]  ;;  %v1235_v10 = vadd.f32 %v19105_v49, %v337_v40 }
 0x20f   :  { %9605 = vmatpush.bf16.msrb.mxu0 %v14673_v2  ;;  %9618 = vmatpush.bf16.msrb.mxu1 %v14801_v6  ;;  %v17813_v2 = vld [vmem:[#allocation10 + $0xf4c] sm:$0xf0]  ;;  %v335_v6 = vperm.slane %v19243_v56, 5  ;;  %v14592_v0 = vld [vmem:[#allocation10 + $0xc00] sm:$0xf]  ;;  %v1458_v47 = vmax.f32 %v1196_v60, 0.0 }
 0x210   :  { %v14720_v38 = vld [vmem:[#allocation10 + $0xd00] sm:$0xf]  ;;  %v17773_v35 = vld [vmem:[#allocation10 + $0xe0c] sm:$0xf0] }
 0x211   :  { %9631 = vmatpush.bf16.msrb.mxu2 %v14929_v36  ;;  %9644 = vmatpush.bf16.msrb.mxu3 %v15057_v9  ;;  %v336_v36 = vperm.slane %v19243_v56, 6  ;;  %v4374_v9 = vpop.f32.mrf.mxu3  ;;  %v17809_v56 = vld [vmem:[#allocation10 + $0xf2c] sm:$0xf0]  ;;  %v1209_v19 = vadd.f32 %v19101_v16, %v335_v6  ;;  %v14848_v53 = vld [vmem:[#allocation10 + $0xe00] sm:$0xf] }
 0x212   :  { %v14976_v41 = vld [vmem:[#allocation10 + $0xf00] sm:$0xf]  ;;  %v17805_v58 = vld [vmem:[#allocation10 + $0xf0c] sm:$0xf0]  ;;  %v14849_v49 = vor.u32 %v17773_v35, %v14848_v53 }
 0x213   :  { %9606 = vmatpush.bf16.msrb.mxu0 %v14657_v8  ;;  %9619 = vmatpush.bf16.msrb.mxu1 %v14785_v54  ;;  %v4362_v8 = vadd.f32 %v4361_v26, %v4348_v7  ;;  %v4350_v54 = vpop.f32.mrf.mxu1  ;;  %v14737_v7 = vor.u32 %v17745_v39, %v14736_v4  ;;  %v1222_v5 = vadd.f32 %v19103_v42, %v336_v36  ;;  %v15344_v6 = vld [vmem:[#allocation10 + $0x11e0] sm:$0xf]  ;;  %v17897_v26 = vld [vmem:[#allocation10 + $0x11ec] sm:$0xf0]  ;;  %v1459_v51 = vmax.f32 %v1209_v19, 0.0 }
 0x214   :  { %v14721_v42 = vor.u32 %v17741_v48, %v14720_v38  ;;  %v15600_v36 = vld [vmem:[#allocation10 + $0x13e0] sm:$0xf]  ;;  %v17961_v40 = vld [vmem:[#allocation10 + $0x13ec] sm:$0xf0]  ;;  %v14977_v54 = vor.u32 %v17805_v58, %v14976_v41  ;;  %v15345_v39 = vor.u32 %v17897_v26, %v15344_v6 }
 0x215   :  { %9632 = vmatpush.bf16.msrb.mxu2 %v14913_v43  ;;  %9645 = vmatpush.bf16.msrb.mxu3 %v15041_v62  ;;  %v15009_v43 = vor.u32 %v17813_v2, %v15008_v18  ;;  %v14992_v62 = vld [vmem:[#allocation10 + $0xf20] sm:$0xf]  ;;  %v4375_v20 = vadd.f32 %v4374_v9, %v4362_v8  ;;  %v17865_v2 = vld [vmem:[#allocation10 + $0x10ec] sm:$0xf0]  ;;  %v1460_v4 = vmax.f32 %v1222_v5, 0.0  ;;  %v1461_v8 = vmax.f32 %v1235_v10, 0.0 }
 0x216   :  { %v14993_v16 = vor.u32 %v17809_v56, %v14992_v62  ;;  %v15216_v18 = vld [vmem:[#allocation10 + $0x10e0] sm:$0xf]  ;;  %v17861_v62 = vld [vmem:[#allocation10 + $0x10cc] sm:$0xf0] }
 0x217   :  { %9607 = vmatpush.bf16.msrb.mxu0 %v14641_v45  ;;  %9620 = vmatpush.bf16.msrb.mxu1 %v14769_v33  ;;  %v17709_v45 = vld [vmem:[#allocation10 + $0xc0c] sm:$0xf0]  ;;  %v4389_v33 = vpop.f32.mrf.mxu0  ;;  %v15472_v9 = vld [vmem:[#allocation10 + $0x12e0] sm:$0xf]  ;;  %v19282_v38 = vpack.c.bf16 %v1460_v4, %v1460_v4  ;;  %v19284_v35 = vpack.c.bf16 %v1461_v8, %v1461_v8 }
 0x218   :  { %v15328_v56 = vld [vmem:[#allocation10 + $0x11c0] sm:$0xf]  ;;  %v17893_v60 = vld [vmem:[#allocation10 + $0x11cc] sm:$0xf0]  ;;  %v19278_v33 = vpack.c.bf16 %v1458_v47, %v1458_v47 }
 0x219   :  { %9633 = vmatpush.bf16.msrb.mxu2 %v14897_v12  ;;  %9646 = vmatpush.bf16.msrb.mxu3 %v15025_v30  ;;  %v14865_v12 = vor.u32 %v17777_v37, %v14864_v14  ;;  %v19274_v30 = vadd.f32 %v4387_v25, %v4375_v20  ;;  %v4376_v25 = vpop.f32.mrf.mxu3  ;;  %v15200_v37 = vld [vmem:[#allocation10 + $0x10c0] sm:$0xf]  ;;  %v15601_v20 = vor.u32 %v17961_v40, %v15600_v36  ;;  %v17857_v10 = vld [vmem:[#allocation10 + $0x10ac] sm:$0xf0] }
 0x21a   :  { %v15456_v19 = vld [vmem:[#allocation10 + $0x12c0] sm:$0xf]  ;;  %v15329_v48 = vor.u32 %v17893_v60, %v15328_v56  ;;  %v17889_v58 = vld [vmem:[#allocation10 + $0x11ac] sm:$0xf0] }
 0x21b   :  { %9608 = vmatpush.bf16.msrb.mxu0 %v14625_v29  ;;  %9621 = vmatpush.bf16.msrb.mxu1 %v14753_v31  ;;  %v14593_v29 = vor.u32 %v17709_v45, %v14592_v0  ;;  %v17929_v31 = vld [vmem:[#allocation10 + $0x12ec] sm:$0xf0]  ;;  %v15584_v0 = vld [vmem:[#allocation10 + $0x13c0] sm:$0xf] }
 0x21c   :  { %v15473_v14 = vor.u32 %v17929_v31, %v15472_v9  ;;  %v17957_v45 = vld [vmem:[#allocation10 + $0x13cc] sm:$0xf0]  ;;  %v15184_v5 = vld [vmem:[#allocation10 + $0x10a0] sm:$0xf] }
 0x21d   :  { %9634 = vmatpush.bf16.msrb.mxu2 %v14881_v27  ;;  %9647 = vmatpush.bf16.msrb.mxu3 %v15009_v43  ;;  %v4363_v27 = vpop.f32.mrf.mxu2  ;;  %v15217_v43 = vor.u32 %v17865_v2, %v15216_v18  ;;  %v15585_v41 = vor.u32 %v17957_v45, %v15584_v0  ;;  %v15440_v18 = vld [vmem:[#allocation10 + $0x12a0] sm:$0xf]  ;;  %v17921_v2 = vld [vmem:[#allocation10 + $0x12ac] sm:$0xf0]  ;;  %v15185_v26 = vor.u32 %v17857_v10, %v15184_v5 }
 0x21e   :  { %v15568_v6 = vld [vmem:[#allocation10 + $0x13a0] sm:$0xf]  ;;  %v15441_v31 = vor.u32 %v17921_v2, %v15440_v18  ;;  %v17853_v25 = vld [vmem:[#allocation10 + $0x108c] sm:$0xf0] }
 0x21f   :  { %9609 = vmatpush.bf16.msrb.mxu0 %v14609_v46  ;;  %9622 = vmatpush.bf16.msrb.mxu1 %v14737_v7  ;;  %v17925_v46 = vld [vmem:[#allocation10 + $0x12cc] sm:$0xf0]  ;;  %v19280_v7 = vpack.c.bf16 %v1459_v51, %v1459_v51  ;;  %v15168_v27 = vld [vmem:[#allocation10 + $0x1080] sm:$0xf] }
 0x220   :  { %v15457_v53 = vor.u32 %v17925_v46, %v15456_v19  ;;  %v15296_v47 = vld [vmem:[#allocation10 + $0x1180] sm:$0xf]  ;;  %v17917_v36 = vld [vmem:[#allocation10 + $0x128c] sm:$0xf0] }
 0x221   :  { %9635 = vmatpush.bf16.msrb.mxu2 %v14865_v12  ;;  %9648 = vmatpush.bf16.msrb.mxu3 %v14993_v16  ;;  %v15201_v12 = vor.u32 %v17861_v62, %v15200_v37  ;;  %v15312_v16 = vld [vmem:[#allocation10 + $0x11a0] sm:$0xf]  ;;  %v17949_v4 = vld [vmem:[#allocation10 + $0x138c] sm:$0xf0] }
 0x222   :  { %v15313_v9 = vor.u32 %v17889_v58, %v15312_v16  ;;  %v15552_v40 = vld [vmem:[#allocation10 + $0x1380] sm:$0xf]  ;;  %v17849_v62 = vld [vmem:[#allocation10 + $0x106c] sm:$0xf0] }
 0x223   :  { %9610 = vmatpush.bf16.msrb.mxu0 %v14593_v29  ;;  %9623 = vmatpush.bf16.msrb.mxu1 %v14721_v42  ;;  %v17953_v29 = vld [vmem:[#allocation10 + $0x13ac] sm:$0xf0]  ;;  %v4400_v8 = vpop.f32.mrf.mxu1  ;;  %v15152_v37 = vld [vmem:[#allocation10 + $0x1060] sm:$0xf]  ;;  %v4439_v0 = vpop.f32.mrf.mxu0 }
 0x224   :  { %v15569_v51 = vor.u32 %v17953_v29, %v15568_v6  ;;  %v17885_v42 = vld [vmem:[#allocation10 + $0x118c] sm:$0xf0]  ;;  %v15280_v56 = vld [vmem:[#allocation10 + $0x1160] sm:$0xf] }
 0x225   :  { %9636 = vmatpush.bf16.msrb.mxu2 %v14849_v49  ;;  %9649 = vmatpush.bf16.msrb.mxu3 %v14977_v54  ;;  %v15424_v49 = vld [vmem:[#allocation10 + $0x1280] sm:$0xf]  ;;  %v15169_v54 = vor.u32 %v17853_v25, %v15168_v27  ;;  %v17881_v60 = vld [vmem:[#allocation10 + $0x116c] sm:$0xf0] }
 0x226   :  { %9611 = vmatmul.bf16.vlgmr.msrb.gmra.mxu0 %v19278_v33  ;;  %9624 = vmatmul.bf16.vlgmr.msrb.gmra.mxu1 %v19280_v7  ;;  %v15408_v19 = vld [vmem:[#allocation10 + $0x1260] sm:$0xf]  ;;  %v17913_v46 = vld [vmem:[#allocation10 + $0x126c] sm:$0xf0] }
 0x227   :  { %9655 = vmatpush.bf16.msra.mxu0 %v15217_v43  ;;  %9668 = vmatpush.bf16.msra.mxu1 %v15345_v39  ;;  %v4401_v43 = vadd.f32 %v4400_v8, %v19274_v30  ;;  %v15297_v39 = vor.u32 %v17885_v42, %v15296_v47  ;;  %v15536_v45 = vld [vmem:[#allocation10 + $0x1360] sm:$0xf]  ;;  %v15281_v30 = vor.u32 %v17881_v60, %v15280_v56  ;;  %v17845_v16 = vld [vmem:[#allocation10 + $0x104c] sm:$0xf0] }
 0x228   :  { %9637 = vmatmul.bf16.vlgmr.msrb.gmra.mxu2 %v19282_v38  ;;  %9650 = vmatmul.bf16.vlgmr.msrb.gmra.mxu3 %v19284_v35  ;;  %v15409_v5 = vor.u32 %v17913_v46, %v15408_v19  ;;  %v15136_v10 = vld [vmem:[#allocation10 + $0x1040] sm:$0xf]  ;;  %v17877_v2 = vld [vmem:[#allocation10 + $0x114c] sm:$0xf0] }
 0x229   :  { %9681 = vmatpush.bf16.msra.mxu2 %v15473_v14  ;;  %9694 = vmatpush.bf16.msra.mxu3 %v15601_v20  ;;  %v15425_v14 = vor.u32 %v17917_v36, %v15424_v49  ;;  %v15553_v20 = vor.u32 %v17949_v4, %v15552_v40  ;;  %v15392_v6 = vld [vmem:[#allocation10 + $0x1240] sm:$0xf]  ;;  %v17909_v29 = vld [vmem:[#allocation10 + $0x124c] sm:$0xf0]  ;;  %v15137_v49 = vor.u32 %v17845_v16, %v15136_v10 }
 0x22a   :  { %v15520_v27 = vld [vmem:[#allocation10 + $0x1340] sm:$0xf]  ;;  %v17941_v25 = vld [vmem:[#allocation10 + $0x134c] sm:$0xf0]  ;;  %v15393_v8 = vor.u32 %v17909_v29, %v15392_v6 }
 0x22b   :  { %9656 = vmatpush.bf16.msra.mxu0 %v15201_v12  ;;  %9669 = vmatpush.bf16.msra.mxu1 %v15329_v48  ;;  %v17945_v12 = vld [vmem:[#allocation10 + $0x136c] sm:$0xf0]  ;;  %v4413_v18 = vpop.f32.mrf.mxu2  ;;  %v4402_v36 = vpop.f32.mrf.mxu1  ;;  %v15504_v19 = vld [vmem:[#allocation10 + $0x1320] sm:$0xf] }
 0x22c   :  { %v19291_v48 = vld [vmem:[#allocation8 + $0x10] sm:$0xff]  ;;  %v15537_v58 = vor.u32 %v17945_v12, %v15536_v45  ;;  %v15488_v29 = vld [vmem:[#allocation10 + $0x1300] sm:$0xf] }
 0x22d   :  { %9682 = vmatpush.bf16.msra.mxu2 %v15457_v53  ;;  %9695 = vmatpush.bf16.msra.mxu3 %v15585_v41  ;;  %v15153_v53 = vor.u32 %v17849_v62, %v15152_v37  ;;  %v15264_v41 = vld [vmem:[#allocation10 + $0x1140] sm:$0xf]  ;;  %v339_v47 = vperm.slane %v19291_v48, 1  ;;  %v341_v42 = vperm.slane %v19291_v48, 3  ;;  %v17873_v37 = vld [vmem:[#allocation10 + $0x112c] sm:$0xf0] }
 0x22e   :  { %v15265_v4 = vor.u32 %v17877_v2, %v15264_v41  ;;  %v15376_v62 = vld [vmem:[#allocation10 + $0x1220] sm:$0xf]  ;;  %v17905_v56 = vld [vmem:[#allocation10 + $0x122c] sm:$0xf0] }
 0x22f   :  { %9657 = vmatpush.bf16.msra.mxu0 %v15185_v26  ;;  %9670 = vmatpush.bf16.msra.mxu1 %v15313_v9  ;;  %v338_v26 = vperm.slane %v19291_v48, 0  ;;  %v4414_v9 = vadd.f32 %v4413_v18, %v4401_v43  ;;  %v15248_v43 = vld [vmem:[#allocation10 + $0x1120] sm:$0xf]  ;;  %v17937_v46 = vld [vmem:[#allocation10 + $0x132c] sm:$0xf0]  ;;  %v15377_v16 = vor.u32 %v17905_v56, %v15376_v62  ;;  %v1287_v2 = vadd.f32 %v19119_v28, %v341_v42 }
 0x230   :  { %v15249_v10 = vor.u32 %v17873_v37, %v15248_v43  ;;  %v15232_v41 = vld [vmem:[#allocation10 + $0x1100] sm:$0xf]  ;;  %v15505_v6 = vor.u32 %v17937_v46, %v15504_v19  ;;  %v18089_v42 = vld [vmem:[#allocation10 + $0x17ec] sm:$0xf0] }
 0x231   :  { %9683 = vmatpush.bf16.msra.mxu2 %v15441_v31  ;;  %9696 = vmatpush.bf16.msra.mxu3 %v15569_v51  ;;  %v4426_v31 = vpop.f32.mrf.mxu3  ;;  %v340_v51 = vperm.slane %v19291_v48, 2  ;;  %v1248_v45 = vadd.f32 %v19108_v50, %v338_v26  ;;  %v15360_v18 = vld [vmem:[#allocation10 + $0x1200] sm:$0xf]  ;;  %v17901_v50 = vld [vmem:[#allocation10 + $0x120c] sm:$0xf0] }
 0x232   :  { %v4427_v40 = vadd.f32 %v4426_v31, %v4414_v9  ;;  %v17933_v26 = vld [vmem:[#allocation10 + $0x130c] sm:$0xf0]  ;;  %v15728_v31 = vld [vmem:[#allocation10 + $0x14e0] sm:$0xf]  ;;  %v15361_v28 = vor.u32 %v17901_v50, %v15360_v18 }
 0x233   :  { %9658 = vmatpush.bf16.msra.mxu0 %v15169_v54  ;;  %9671 = vmatpush.bf16.msra.mxu1 %v15297_v39  ;;  %v15120_v54 = vld [vmem:[#allocation10 + $0x1020] sm:$0xf]  ;;  %v17841_v39 = vld [vmem:[#allocation10 + $0x102c] sm:$0xf0]  ;;  %v4415_v9 = vpop.f32.mrf.mxu2  ;;  %v15489_v43 = vor.u32 %v17933_v26, %v15488_v29 }
 0x234   :  { %v19297_v60 = vadd.f32 %v4439_v0, %v4427_v40  ;;  %v15121_v12 = vor.u32 %v17841_v39, %v15120_v54  ;;  %v1274_v0 = vadd.f32 %v19117_v23, %v340_v51  ;;  %v15984_v36 = vld [vmem:[#allocation10 + $0x16e0] sm:$0xf]  ;;  %v18057_v40 = vld [vmem:[#allocation10 + $0x16ec] sm:$0xf0]  ;;  %v1465_v39 = vmax.f32 %v1287_v2, 0.0 }
 0x235   :  { %9684 = vmatpush.bf16.msra.mxu2 %v15425_v14  ;;  %9697 = vmatpush.bf16.msra.mxu3 %v15553_v20  ;;  %v15521_v14 = vor.u32 %v17941_v25, %v15520_v27  ;;  %v4441_v20 = vpop.f32.mrf.mxu0  ;;  %v17993_v27 = vld [vmem:[#allocation10 + $0x14ec] sm:$0xf0]  ;;  %v16112_v51 = vld [vmem:[#allocation10 + $0x17e0] sm:$0xf]  ;;  %v15985_v62 = vor.u32 %v18057_v40, %v15984_v36 }
 0x236   :  { %19713 = vst [vmem:[#allocation35_spill] sm:$0xff] %v19297_v60  ;;  %v1464_v54 = vmax.f32 %v1274_v0, 0.0  ;;  %v15712_v56 = vld [vmem:[#allocation10 + $0x14c0] sm:$0xf]  ;;  %v17989_v20 = vld [vmem:[#allocation10 + $0x14cc] sm:$0xf0]  ;;  %v16113_v46 = vor.u32 %v18089_v42, %v16112_v51  ;;  %v19309_v29 = vpack.c.bf16 %v1465_v39, %v1465_v39 }
 0x237   :  { %9659 = vmatpush.bf16.msra.mxu0 %v15153_v53  ;;  %9672 = vmatpush.bf16.msra.mxu1 %v15281_v30  ;;  %v15104_v53 = vld [vmem:[#allocation10 + $0x1000] sm:$0xf]  ;;  %v17837_v30 = vld [vmem:[#allocation10 + $0x100c] sm:$0xf0] }
 0x238   :  { %v15840_v19 = vld [vmem:[#allocation10 + $0x15c0] sm:$0xf]  ;;  %v18017_v9 = vld [vmem:[#allocation10 + $0x15ac] sm:$0xf0] }
 0x239   :  { %9685 = vmatpush.bf16.msra.mxu2 %v15409_v5  ;;  %9698 = vmatpush.bf16.msra.mxu3 %v15537_v58  ;;  %v1261_v5 = vadd.f32 %v19111_v55, %v339_v47  ;;  %v17869_v58 = vld [vmem:[#allocation10 + $0x110c] sm:$0xf0]  ;;  %v15856_v55 = vld [vmem:[#allocation10 + $0x15e0] sm:$0xf]  ;;  %v4428_v25 = vpop.f32.mrf.mxu3  ;;  %v15105_v47 = vor.u32 %v17837_v30, %v15104_v53 }
 0x23a   :  { %v15233_v23 = vor.u32 %v17869_v58, %v15232_v41  ;;  %v18053_v53 = vld [vmem:[#allocation10 + $0x16cc] sm:$0xf0]  ;;  %v16096_v30 = vld [vmem:[#allocation10 + $0x17c0] sm:$0xf]  ;;  %v15713_v41 = vor.u32 %v17989_v20, %v15712_v56  ;;  %v19307_v58 = vpack.c.bf16 %v1464_v54, %v1464_v54 }
 0x23b   :  { %9660 = vmatpush.bf16.msra.mxu0 %v15137_v49  ;;  %9673 = vmatpush.bf16.msra.mxu1 %v15265_v4  ;;  %v18025_v49 = vld [vmem:[#allocation10 + $0x15ec] sm:$0xf0]  ;;  %v1462_v4 = vmax.f32 %v1248_v45, 0.0  ;;  %v15696_v2 = vld [vmem:[#allocation10 + $0x14a0] sm:$0xf] }
 0x23c   :  { %v15857_v37 = vor.u32 %v18025_v49, %v15856_v55  ;;  %v18021_v45 = vld [vmem:[#allocation10 + $0x15cc] sm:$0xf0]  ;;  %v15824_v50 = vld [vmem:[#allocation10 + $0x15a0] sm:$0xf] }
 0x23d   :  { %9686 = vmatpush.bf16.msra.mxu2 %v15393_v8  ;;  %9699 = vmatpush.bf16.msra.mxu3 %v15521_v14  ;;  %v1463_v8 = vmax.f32 %v1261_v5, 0.0  ;;  %v15729_v14 = vor.u32 %v17993_v27, %v15728_v31  ;;  %v18085_v5 = vld [vmem:[#allocation10 + $0x17cc] sm:$0xf0]  ;;  %v15841_v18 = vor.u32 %v18021_v45, %v15840_v19  ;;  %v15952_v31 = vld [vmem:[#allocation10 + $0x16a0] sm:$0xf]  ;;  %v15825_v49 = vor.u32 %v18017_v9, %v15824_v50 }
 0x23e   :  { %v16097_v26 = vor.u32 %v18085_v5, %v16096_v30  ;;  %v18049_v27 = vld [vmem:[#allocation10 + $0x16ac] sm:$0xf0]  ;;  %v16080_v55 = vld [vmem:[#allocation10 + $0x17a0] sm:$0xf] }
 0x23f   :  { %9661 = vmatpush.bf16.msra.mxu0 %v15121_v12  ;;  %9674 = vmatpush.bf16.msra.mxu1 %v15249_v10  ;;  %v15968_v12 = vld [vmem:[#allocation10 + $0x16c0] sm:$0xf]  ;;  %v19303_v10 = vpack.c.bf16 %v1462_v4, %v1462_v4  ;;  %v18081_v25 = vld [vmem:[#allocation10 + $0x17ac] sm:$0xf0]  ;;  %v15953_v36 = vor.u32 %v18049_v27, %v15952_v31 }
 0x240   :  { %v15969_v0 = vor.u32 %v18053_v53, %v15968_v12  ;;  %v15680_v40 = vld [vmem:[#allocation10 + $0x1480] sm:$0xf]  ;;  %v17981_v4 = vld [vmem:[#allocation10 + $0x148c] sm:$0xf0] }
 0x241   :  { %9687 = vmatpush.bf16.msra.mxu2 %v15377_v16  ;;  %9700 = vmatpush.bf16.msra.mxu3 %v15505_v6  ;;  %v19305_v16 = vpack.c.bf16 %v1463_v8, %v1463_v8  ;;  %v17985_v6 = vld [vmem:[#allocation10 + $0x14ac] sm:$0xf0]  ;;  %v15808_v8 = vld [vmem:[#allocation10 + $0x1580] sm:$0xf] }
 0x242   :  { %v15936_v51 = vld [vmem:[#allocation10 + $0x1680] sm:$0xf]  ;;  %v18045_v42 = vld [vmem:[#allocation10 + $0x168c] sm:$0xf0] }
 0x243   :  { %9662 = vmatpush.bf16.msra.mxu0 %v15105_v47  ;;  %9675 = vmatpush.bf16.msra.mxu1 %v15233_v23  ;;  %v15697_v47 = vor.u32 %v17985_v6, %v15696_v2  ;;  %v16081_v23 = vor.u32 %v18081_v25, %v16080_v55  ;;  %v9456_v54 = vpop.f32.mrf.mxu0  ;;  %v16064_v39 = vld [vmem:[#allocation10 + $0x1780] sm:$0xf]  ;;  %v15937_v20 = vor.u32 %v18045_v42, %v15936_v51  ;;  %v18009_v30 = vld [vmem:[#allocation10 + $0x156c] sm:$0xf0]  ;;  %v344_v51 = vperm.slane %v19291_v48, 6 }
 0x244   :  { %v15664_v19 = vld [vmem:[#allocation10 + $0x1460] sm:$0xf]  ;;  %v18005_v55 = vld [vmem:[#allocation10 + $0x154c] sm:$0xf0]  ;;  %v345_v42 = vperm.slane %v19291_v48, 7 }
 0x245   :  { %9688 = vmatpush.bf16.msra.mxu2 %v15361_v28  ;;  %9701 = vmatpush.bf16.msra.mxu3 %v15489_v43  ;;  %v18013_v28 = vld [vmem:[#allocation10 + $0x158c] sm:$0xf0]  ;;  %v15792_v45 = vld [vmem:[#allocation10 + $0x1560] sm:$0xf] }
 0x246   :  { %9663 = vmatmul.bf16.vlgmr.msra.gmra.mxu0 %v19303_v10  ;;  %9676 = vmatmul.bf16.vlgmr.msra.gmra.mxu1 %v19305_v16  ;;  %v18077_v43 = vld [vmem:[#allocation10 + $0x178c] sm:$0xf0]  ;;  %v15809_v56 = vor.u32 %v18013_v28, %v15808_v8  ;;  %v15920_v5 = vld [vmem:[#allocation10 + $0x1660] sm:$0xf]  ;;  %v343_v28 = vperm.slane %v19291_v48, 5 }
 0x247   :  { %9707 = vmatpush.bf16.msrb.mxu0 %v15729_v14  ;;  %9720 = vmatpush.bf16.msrb.mxu1 %v15857_v37  ;;  %v9457_v14 = vadd.f32 %v9456_v54, %v19167_v21  ;;  %v9469_v37 = vpop.f32.mrf.mxu1  ;;  %v16065_v53 = vor.u32 %v18077_v43, %v16064_v39  ;;  %v15793_v21 = vor.u32 %v18009_v30, %v15792_v45  ;;  %v15648_v50 = vld [vmem:[#allocation10 + $0x1440] sm:$0xf]  ;;  %v18065_v30 = vld [vmem:[#allocation10 + $0x172c] sm:$0xf0] }
 0x248   :  { %9689 = vmatmul.bf16.vlgmr.msra.gmra.mxu2 %v19307_v58  ;;  %9702 = vmatmul.bf16.vlgmr.msra.gmra.mxu3 %v19309_v29  ;;  %v15776_v9 = vld [vmem:[#allocation10 + $0x1540] sm:$0xf] }
 0x249   :  { %9733 = vmatpush.bf16.msrb.mxu2 %v15985_v62  ;;  %9746 = vmatpush.bf16.msrb.mxu3 %v16113_v46  ;;  %v15681_v62 = vor.u32 %v17981_v4, %v15680_v40  ;;  %v17977_v46 = vld [vmem:[#allocation10 + $0x146c] sm:$0xf0]  ;;  %v9470_v12 = vadd.f32 %v9469_v37, %v9457_v14  ;;  %v15904_v25 = vld [vmem:[#allocation10 + $0x1640] sm:$0xf]  ;;  %v15777_v14 = vor.u32 %v18005_v55, %v15776_v9 }
 0x24a   :  { %v15665_v2 = vor.u32 %v17977_v46, %v15664_v19  ;;  %v16032_v8 = vld [vmem:[#allocation10 + $0x1740] sm:$0xf]  ;;  %v18001_v46 = vld [vmem:[#allocation10 + $0x152c] sm:$0xf0] }
 0x24b   :  { %9708 = vmatpush.bf16.msrb.mxu0 %v15713_v41  ;;  %9721 = vmatpush.bf16.msrb.mxu1 %v15841_v18  ;;  %v18041_v41 = vld [vmem:[#allocation10 + $0x166c] sm:$0xf0]  ;;  %v16048_v18 = vld [vmem:[#allocation10 + $0x1760] sm:$0xf]  ;;  %v9482_v27 = vpop.f32.mrf.mxu2  ;;  %v9495_v40 = vpop.f32.mrf.mxu3 }
 0x24c   :  { %v15921_v6 = vor.u32 %v18041_v41, %v15920_v5  ;;  %v9458_v4 = vpop.f32.mrf.mxu0  ;;  %v15888_v45 = vld [vmem:[#allocation10 + $0x1620] sm:$0xf] }
 0x24d   :  { %9734 = vmatpush.bf16.msrb.mxu2 %v15969_v0  ;;  %9747 = vmatpush.bf16.msrb.mxu3 %v16097_v26  ;;  %v18073_v0 = vld [vmem:[#allocation10 + $0x176c] sm:$0xf0]  ;;  %v15616_v41 = vld [vmem:[#allocation10 + $0x1400] sm:$0xf] }
 0x24e   :  { %v17973_v26 = vld [vmem:[#allocation10 + $0x144c] sm:$0xf0]  ;;  %v16049_v31 = vor.u32 %v18073_v0, %v16048_v18  ;;  %v1313_v0 = vadd.f32 %v19123_v22, %v343_v28  ;;  %v19714_v9 = vld [vmem:[#allocation24_spill] sm:$0xff] }
 0x24f   :  { %9709 = vmatpush.bf16.msrb.mxu0 %v15697_v47  ;;  %9722 = vmatpush.bf16.msrb.mxu1 %v15825_v49  ;;  %v18037_v47 = vld [vmem:[#allocation10 + $0x164c] sm:$0xf0]  ;;  %v342_v49 = vperm.slane %v19291_v48, 4  ;;  %v9471_v54 = vpop.f32.mrf.mxu1  ;;  %v15649_v39 = vor.u32 %v17973_v26, %v15648_v50  ;;  %v15872_v26 = vld [vmem:[#allocation10 + $0x1600] sm:$0xf] }
 0x250   :  { %v15905_v37 = vor.u32 %v18037_v47, %v15904_v25  ;;  %v17965_v18 = vld [vmem:[#allocation10 + $0x140c] sm:$0xf0]  ;;  %v16240_v4 = vld [vmem:[#allocation10 + $0x18e0] sm:$0xf] }
 0x251   :  { %9735 = vmatpush.bf16.msrb.mxu2 %v15953_v36  ;;  %9748 = vmatpush.bf16.msrb.mxu3 %v16081_v23  ;;  %v9483_v36 = vadd.f32 %v9482_v27, %v9470_v12  ;;  %v18069_v23 = vld [vmem:[#allocation10 + $0x174c] sm:$0xf0]  ;;  %v1300_v48 = vadd.f32 %v19121_v57, %v342_v49  ;;  %v19715_v27 = vld [vmem:[#allocation25_spill] sm:$0xff]  ;;  %v16000_v49 = vld [vmem:[#allocation10 + $0x1700] sm:$0xf] }
 0x252   :  { %v16033_v19 = vor.u32 %v18069_v23, %v16032_v8  ;;  %v18033_v12 = vld [vmem:[#allocation10 + $0x162c] sm:$0xf0]  ;;  %v1339_v55 = vadd.f32 %v19715_v27, %v345_v42  ;;  %v16368_v8 = vld [vmem:[#allocation10 + $0x19e0] sm:$0xf]  ;;  %v15617_v23 = vor.u32 %v17965_v18, %v15616_v41 }
 0x253   :  { %9710 = vmatpush.bf16.msrb.mxu0 %v15681_v62  ;;  %9723 = vmatpush.bf16.msrb.mxu1 %v15809_v56  ;;  %v19320_v43 = vadd.f32 %v9495_v40, %v9483_v36  ;;  %v15632_v62 = vld [vmem:[#allocation10 + $0x1420] sm:$0xf]  ;;  %v17969_v56 = vld [vmem:[#allocation10 + $0x142c] sm:$0xf0]  ;;  %v9484_v57 = vpop.f32.mrf.mxu2  ;;  %v9497_v40 = vpop.f32.mrf.mxu3 }
 0x254   :  { %v15633_v5 = vor.u32 %v17969_v56, %v15632_v62  ;;  %v17997_v50 = vld [vmem:[#allocation10 + $0x150c] sm:$0xf0]  ;;  %v16496_v54 = vld [vmem:[#allocation10 + $0x1ae0] sm:$0xf] }
 0x255   :  { %9736 = vmatpush.bf16.msrb.mxu2 %v15937_v20  ;;  %9749 = vmatpush.bf16.msrb.mxu3 %v16065_v53  ;;  %v15760_v20 = vld [vmem:[#allocation10 + $0x1520] sm:$0xf]  ;;  %v18029_v47 = vld [vmem:[#allocation10 + $0x160c] sm:$0xf0] }
 0x256   :  { %v16016_v53 = vld [vmem:[#allocation10 + $0x1720] sm:$0xf]  ;;  %v18061_v36 = vld [vmem:[#allocation10 + $0x170c] sm:$0xf0]  ;;  %v15873_v42 = vor.u32 %v18029_v47, %v15872_v26 }
 0x257   :  { %9711 = vmatpush.bf16.msrb.mxu0 %v15665_v2  ;;  %9724 = vmatpush.bf16.msrb.mxu1 %v15793_v21  ;;  %v15761_v2 = vor.u32 %v18001_v46, %v15760_v20  ;;  %v15889_v21 = vor.u32 %v18033_v12, %v15888_v45  ;;  %v16017_v25 = vor.u32 %v18065_v30, %v16016_v53  ;;  %v18121_v22 = vld [vmem:[#allocation10 + $0x18ec] sm:$0xf0]  ;;  %v16624_v62 = vld [vmem:[#allocation10 + $0x1be0] sm:$0xf] }
 0x258   :  { %v18153_v28 = vld [vmem:[#allocation10 + $0x19ec] sm:$0xf0]  ;;  %v16001_v46 = vor.u32 %v18061_v36, %v16000_v49  ;;  %v16241_v45 = vor.u32 %v18121_v22, %v16240_v4  ;;  %v16224_v30 = vld [vmem:[#allocation10 + $0x18c0] sm:$0xf] }
 0x259   :  { %9737 = vmatpush.bf16.msrb.mxu2 %v15921_v6  ;;  %9750 = vmatpush.bf16.msrb.mxu3 %v16049_v31  ;;  %v15744_v6 = vld [vmem:[#allocation10 + $0x1500] sm:$0xf]  ;;  %v1326_v31 = vadd.f32 %v19714_v9, %v344_v51  ;;  %v18217_v56 = vld [vmem:[#allocation10 + $0x1bec] sm:$0xf0]  ;;  %v16369_v12 = vor.u32 %v18153_v28, %v16368_v8 }
 0x25a   :  { %v15745_v51 = vor.u32 %v17997_v50, %v15744_v6  ;;  %v16352_v41 = vld [vmem:[#allocation10 + $0x19c0] sm:$0xf]  ;;  %v16625_v18 = vor.u32 %v18217_v56, %v16624_v62  ;;  %v18213_v6 = vld [vmem:[#allocation10 + $0x1bcc] sm:$0xf0] }
 0x25b   :  { %9712 = vmatpush.bf16.msrb.mxu0 %v15649_v39  ;;  %9725 = vmatpush.bf16.msrb.mxu1 %v15777_v14  ;;  %v18185_v39 = vld [vmem:[#allocation10 + $0x1aec] sm:$0xf0]  ;;  %v1466_v14 = vmax.f32 %v1300_v48, 0.0  ;;  %v1468_v20 = vmax.f32 %v1326_v31, 0.0  ;;  %v16336_v47 = vld [vmem:[#allocation10 + $0x19a0] sm:$0xf] }
 0x25c   :  { %v16497_v53 = vor.u32 %v18185_v39, %v16496_v54  ;;  %v18149_v48 = vld [vmem:[#allocation10 + $0x19cc] sm:$0xf0]  ;;  %v16464_v4 = vld [vmem:[#allocation10 + $0x1aa0] sm:$0xf] }
 0x25d   :  { %9738 = vmatpush.bf16.msrb.mxu2 %v15905_v37  ;;  %9751 = vmatpush.bf16.msrb.mxu3 %v16033_v19  ;;  %v1467_v37 = vmax.f32 %v1313_v0, 0.0  ;;  %v1469_v19 = vmax.f32 %v1339_v55, 0.0  ;;  %v16480_v0 = vld [vmem:[#allocation10 + $0x1ac0] sm:$0xf]  ;;  %v19326_v50 = vpack.c.bf16 %v1466_v14, %v1466_v14  ;;  %v19330_v31 = vpack.c.bf16 %v1468_v20, %v1468_v20  ;;  %v18113_v57 = vld [vmem:[#allocation10 + $0x18ac] sm:$0xf0] }
 0x25e   :  { %v16353_v27 = vor.u32 %v18149_v48, %v16352_v41  ;;  %v18145_v40 = vld [vmem:[#allocation10 + $0x19ac] sm:$0xf0]  ;;  %v16592_v8 = vld [vmem:[#allocation10 + $0x1ba0] sm:$0xf] }
 0x25f   :  { %9713 = vmatpush.bf16.msrb.mxu0 %v15633_v5  ;;  %9726 = vmatpush.bf16.msrb.mxu1 %v15761_v2  ;;  %v18117_v5 = vld [vmem:[#allocation10 + $0x18cc] sm:$0xf0]  ;;  %v19328_v26 = vpack.c.bf16 %v1467_v37, %v1467_v37  ;;  %v19332_v49 = vpack.c.bf16 %v1469_v19, %v1469_v19  ;;  %v16337_v54 = vor.u32 %v18145_v40, %v16336_v47  ;;  %v16192_v14 = vld [vmem:[#allocation10 + $0x1880] sm:$0xf] }
 0x260   :  { %v18181_v2 = vld [vmem:[#allocation10 + $0x1acc] sm:$0xf0]  ;;  %v16225_v9 = vor.u32 %v18117_v5, %v16224_v30  ;;  %v16448_v56 = vld [vmem:[#allocation10 + $0x1a80] sm:$0xf] }
 0x261   :  { %9739 = vmatpush.bf16.msrb.mxu2 %v15889_v21  ;;  %9752 = vmatpush.bf16.msrb.mxu3 %v16017_v25  ;;  %v16608_v21 = vld [vmem:[#allocation10 + $0x1bc0] sm:$0xf]  ;;  %v16481_v55 = vor.u32 %v18181_v2, %v16480_v0  ;;  %v18177_v22 = vld [vmem:[#allocation10 + $0x1aac] sm:$0xf0] }
 0x262   :  { %v16208_v25 = vld [vmem:[#allocation10 + $0x18a0] sm:$0xf]  ;;  %v16609_v36 = vor.u32 %v18213_v6, %v16608_v21  ;;  %v16465_v39 = vor.u32 %v18177_v22, %v16464_v4  ;;  %v18109_v37 = vld [vmem:[#allocation10 + $0x188c] sm:$0xf0] }
 0x263   :  { %9714 = vmatpush.bf16.msrb.mxu0 %v15617_v23  ;;  %9727 = vmatpush.bf16.msrb.mxu1 %v15745_v51  ;;  %v18209_v23 = vld [vmem:[#allocation10 + $0x1bac] sm:$0xf0]  ;;  %v16209_v28 = vor.u32 %v18113_v57, %v16208_v25  ;;  %v16320_v51 = vld [vmem:[#allocation10 + $0x1980] sm:$0xf]  ;;  %v9508_v19 = vpop.f32.mrf.mxu0  ;;  %v16193_v30 = vor.u32 %v18109_v37, %v16192_v14  ;;  %v19339_v57 = vld [vmem:[#allocation8 + $0x18] sm:$0xff] }
 0x264   :  { %v18141_v62 = vld [vmem:[#allocation10 + $0x198c] sm:$0xf0]  ;;  %v16304_v0 = vld [vmem:[#allocation10 + $0x1960] sm:$0xf]  ;;  %v346_v14 = vperm.slane %v19339_v57, 0 }
 0x265   :  { %9740 = vmatpush.bf16.msrb.mxu2 %v15873_v42  ;;  %9753 = vmatpush.bf16.msrb.mxu3 %v16001_v46  ;;  %v16593_v42 = vor.u32 %v18209_v23, %v16592_v8  ;;  %v18173_v20 = vld [vmem:[#allocation10 + $0x1a8c] sm:$0xf0]  ;;  %v16576_v46 = vld [vmem:[#allocation10 + $0x1b80] sm:$0xf]  ;;  %v16321_v5 = vor.u32 %v18141_v62, %v16320_v51 }
 0x266   :  { %9715 = vmatmul.bf16.vlgmr.msrb.gmra.mxu0 %v19326_v50  ;;  %9728 = vmatmul.bf16.vlgmr.msrb.gmra.mxu1 %v19328_v26  ;;  %v16449_v41 = vor.u32 %v18173_v20, %v16448_v56  ;;  %v18105_v48 = vld [vmem:[#allocation10 + $0x186c] sm:$0xf0]  ;;  %v16160_v40 = vld [vmem:[#allocation10 + $0x1840] sm:$0xf]  ;;  %v347_v20 = vperm.slane %v19339_v57, 1 }
 0x267   :  { %9759 = vmatpush.bf16.msra.mxu0 %v16241_v45  ;;  %9772 = vmatpush.bf16.msra.mxu1 %v16369_v12  ;;  %v18205_v45 = vld [vmem:[#allocation10 + $0x1b8c] sm:$0xf0]  ;;  %v9509_v12 = vadd.f32 %v9508_v19, %v19320_v43  ;;  %v16288_v22 = vld [vmem:[#allocation10 + $0x1940] sm:$0xf]  ;;  %v348_v19 = vperm.slane %v19339_v57, 2 }
 0x268   :  { %9741 = vmatmul.bf16.vlgmr.msrb.gmra.mxu2 %v19330_v31  ;;  %9754 = vmatmul.bf16.vlgmr.msrb.gmra.mxu3 %v19332_v49  ;;  %v16577_v21 = vor.u32 %v18205_v45, %v16576_v46  ;;  %v18137_v6 = vld [vmem:[#allocation10 + $0x196c] sm:$0xf0]  ;;  %v16544_v62 = vld [vmem:[#allocation10 + $0x1b40] sm:$0xf]  ;;  %v349_v46 = vperm.slane %v19339_v57, 3 }
 0x269   :  { %9785 = vmatpush.bf16.msra.mxu2 %v16497_v53  ;;  %9798 = vmatpush.bf16.msra.mxu3 %v16625_v18  ;;  %v9521_v53 = vpop.f32.mrf.mxu1  ;;  %v16176_v18 = vld [vmem:[#allocation10 + $0x1860] sm:$0xf]  ;;  %v18201_v25 = vld [vmem:[#allocation10 + $0x1b6c] sm:$0xf0]  ;;  %v16305_v47 = vor.u32 %v18137_v6, %v16304_v0 }
 0x26a   :  { %v9522_v2 = vadd.f32 %v9521_v53, %v9509_v12  ;;  %v16177_v43 = vor.u32 %v18105_v48, %v16176_v18  ;;  %v18101_v4 = vld [vmem:[#allocation10 + $0x184c] sm:$0xf0]  ;;  %v16272_v48 = vld [vmem:[#allocation10 + $0x1920] sm:$0xf] }
 0x26b   :  { %9760 = vmatpush.bf16.msra.mxu0 %v16225_v9  ;;  %9773 = vmatpush.bf16.msra.mxu1 %v16353_v27  ;;  %v16432_v9 = vld [vmem:[#allocation10 + $0x1a60] sm:$0xf]  ;;  %v18169_v27 = vld [vmem:[#allocation10 + $0x1a6c] sm:$0xf0]  ;;  %v9534_v23 = vpop.f32.mrf.mxu2  ;;  %v9547_v51 = vpop.f32.mrf.mxu3  ;;  %v16161_v12 = vor.u32 %v18101_v4, %v16160_v40  ;;  %v19717_v40 = vld [vmem:[#allocation27_spill] sm:$0xff] }
 0x26c   :  { %v9535_v37 = vadd.f32 %v9534_v23, %v9522_v2  ;;  %v18197_v56 = vld [vmem:[#allocation10 + $0x1b4c] sm:$0xf0]  ;;  %v1365_v4 = vadd.f32 %v19717_v40, %v347_v20 }
 0x26d   :  { %9786 = vmatpush.bf16.msra.mxu2 %v16481_v55  ;;  %9799 = vmatpush.bf16.msra.mxu3 %v16609_v36  ;;  %v16560_v55 = vld [vmem:[#allocation10 + $0x1b60] sm:$0xf]  ;;  %v16433_v36 = vor.u32 %v18169_v27, %v16432_v9  ;;  %v18097_v18 = vld [vmem:[#allocation10 + $0x182c] sm:$0xf0]  ;;  %v16545_v0 = vor.u32 %v18197_v56, %v16544_v62 }
 0x26e   :  { %v16561_v8 = vor.u32 %v18201_v25, %v16560_v55  ;;  %v19345_v53 = vadd.f32 %v9547_v51, %v9535_v37  ;;  %v18129_v2 = vld [vmem:[#allocation10 + $0x192c] sm:$0xf0]  ;;  %v16528_v9 = vld [vmem:[#allocation10 + $0x1b20] sm:$0xf]  ;;  %v19719_v51 = vld [vmem:[#allocation29_spill] sm:$0xff] }
 0x26f   :  { %9761 = vmatpush.bf16.msra.mxu0 %v16209_v28  ;;  %9774 = vmatpush.bf16.msra.mxu1 %v16337_v54  ;;  %v18133_v28 = vld [vmem:[#allocation10 + $0x194c] sm:$0xf0]  ;;  %v16416_v54 = vld [vmem:[#allocation10 + $0x1a40] sm:$0xf] }
 0x270   :  { %v18161_v6 = vld [vmem:[#allocation10 + $0x1a2c] sm:$0xf0] }
 0x271   :  { %9787 = vmatpush.bf16.msra.mxu2 %v16465_v39  ;;  %9800 = vmatpush.bf16.msra.mxu3 %v16593_v42  ;;  %v18165_v39 = vld [vmem:[#allocation10 + $0x1a4c] sm:$0xf0]  ;;  %v9510_v42 = vpop.f32.mrf.mxu0  ;;  %v9523_v45 = vpop.f32.mrf.mxu1 }
 0x272   :  { %v18193_v27 = vld [vmem:[#allocation10 + $0x1b2c] sm:$0xf0]  ;;  %v1391_v42 = vadd.f32 %v19719_v51, %v349_v46  ;;  %v16512_v45 = vld [vmem:[#allocation10 + $0x1b00] sm:$0xf] }
 0x273   :  { %9762 = vmatpush.bf16.msra.mxu0 %v16193_v30  ;;  %9775 = vmatpush.bf16.msra.mxu1 %v16321_v5  ;;  %v16289_v30 = vor.u32 %v18133_v28, %v16288_v22  ;;  %v16417_v5 = vor.u32 %v18165_v39, %v16416_v54  ;;  %v19716_v55 = vld [vmem:[#allocation26_spill] sm:$0xff]  ;;  %v16273_v22 = vor.u32 %v18129_v2, %v16272_v48  ;;  %v16256_v28 = vld [vmem:[#allocation10 + $0x1900] sm:$0xf] }
 0x274   :  { %v1352_v25 = vadd.f32 %v19716_v55, %v346_v14  ;;  %v16384_v54 = vld [vmem:[#allocation10 + $0x1a00] sm:$0xf]  ;;  %v16529_v62 = vor.u32 %v18193_v27, %v16528_v9  ;;  %v9536_v14 = vpop.f32.mrf.mxu2  ;;  %v18157_v56 = vld [vmem:[#allocation10 + $0x1a0c] sm:$0xf0]  ;;  %v1471_v55 = vmax.f32 %v1365_v4, 0.0  ;;  %v1473_v40 = vmax.f32 %v1391_v42, 0.0 }
 0x275   :  { %9788 = vmatpush.bf16.msra.mxu2 %v16449_v41  ;;  %9801 = vmatpush.bf16.msra.mxu3 %v16577_v21  ;;  %v16144_v41 = vld [vmem:[#allocation10 + $0x1820] sm:$0xf]  ;;  %v18249_v20 = vld [vmem:[#allocation10 + $0x1cec] sm:$0xf0]  ;;  %v16385_v46 = vor.u32 %v18157_v56, %v16384_v54  ;;  %v17351_v42 = vld [vmem:[#allocation10 + $0xe4] sm:$0xf] }
 0x276   :  { %v16400_v21 = vld [vmem:[#allocation10 + $0x1a20] sm:$0xf]  ;;  %v18281_v48 = vld [vmem:[#allocation10 + $0x1dec] sm:$0xf0]  ;;  %v19353_v54 = vpack.c.bf16 %v1471_v55, %v1471_v55 }
 0x277   :  { %9763 = vmatpush.bf16.msra.mxu0 %v16177_v43  ;;  %9776 = vmatpush.bf16.msra.mxu1 %v16305_v47  ;;  %v16145_v43 = vor.u32 %v18097_v18, %v16144_v41  ;;  %v16128_v47 = vld [vmem:[#allocation10 + $0x1800] sm:$0xf]  ;;  %v16401_v23 = vor.u32 %v18161_v6, %v16400_v21  ;;  %v9549_v41 = vpop.f32.mrf.mxu3  ;;  %v18313_v21 = vld [vmem:[#allocation10 + $0x1eec] sm:$0xf0]  ;;  %v1470_v6 = vmax.f32 %v1352_v25, 0.0 }
 0x278   :  { %v19718_v39 = vld [vmem:[#allocation28_spill] sm:$0xff]  ;;  %v18321_v9 = vld [vmem:[#allocation10 + $0x1f2c] sm:$0xf0] }
 0x279   :  { %9789 = vmatpush.bf16.msra.mxu2 %v16433_v36  ;;  %9802 = vmatpush.bf16.msra.mxu3 %v16561_v8  ;;  %v18093_v36 = vld [vmem:[#allocation10 + $0x180c] sm:$0xf0]  ;;  %v1378_v37 = vadd.f32 %v19718_v39, %v348_v19  ;;  %v16752_v18 = vld [vmem:[#allocation10 + $0x1ce0] sm:$0xf] }
 0x27a   :  { %v18125_v8 = vld [vmem:[#allocation10 + $0x190c] sm:$0xf0]  ;;  %v17008_v2 = vld [vmem:[#allocation10 + $0x1ee0] sm:$0xf]  ;;  %v16753_v51 = vor.u32 %v18249_v20, %v16752_v18 }
 0x27b   :  { %9764 = vmatpush.bf16.msra.mxu0 %v16161_v12  ;;  %9777 = vmatpush.bf16.msra.mxu1 %v16289_v30  ;;  %v18189_v12 = vld [vmem:[#allocation10 + $0x1b0c] sm:$0xf0]  ;;  %v16880_v30 = vld [vmem:[#allocation10 + $0x1de0] sm:$0xf]  ;;  %v16257_v19 = vor.u32 %v18125_v8, %v16256_v28  ;;  %v1472_v27 = vmax.f32 %v1378_v37, 0.0  ;;  %v17009_v41 = vor.u32 %v18313_v21, %v17008_v2  ;;  %v19351_v8 = vpack.c.bf16 %v1470_v6, %v1470_v6 }
 0x27c   :  { %v16513_v39 = vor.u32 %v18189_v12, %v16512_v45  ;;  %v16881_v14 = vor.u32 %v18281_v48, %v16880_v30  ;;  %v18277_v25 = vld [vmem:[#allocation10 + $0x1dcc] sm:$0xf0]  ;;  %v16992_v4 = vld [vmem:[#allocation10 + $0x1ec0] sm:$0xf] }
 0x27d   :  { %9790 = vmatpush.bf16.msra.mxu2 %v16417_v5  ;;  %9803 = vmatpush.bf16.msra.mxu3 %v16545_v0  ;;  %v16129_v5 = vor.u32 %v18093_v36, %v16128_v47  ;;  %v17040_v0 = vld [vmem:[#allocation10 + $0x1f20] sm:$0xf]  ;;  %v18245_v47 = vld [vmem:[#allocation10 + $0x1ccc] sm:$0xf0]  ;;  %v19355_v56 = vpack.c.bf16 %v1472_v27, %v1472_v27 }
 0x27e   :  { %v16864_v36 = vld [vmem:[#allocation10 + $0x1dc0] sm:$0xf]  ;;  %v17041_v60 = vor.u32 %v18321_v9, %v17040_v0  ;;  %v18317_v28 = vld [vmem:[#allocation10 + $0x1f0c] sm:$0xf0]  ;;  %v17347_v0 = vld [vmem:[#allocation10 + $0xc4] sm:$0xf] }
 0x27f   :  { %9765 = vmatpush.bf16.msra.mxu0 %v16145_v43  ;;  %9778 = vmatpush.bf16.msra.mxu1 %v16273_v22  ;;  %v16736_v43 = vld [vmem:[#allocation10 + $0x1cc0] sm:$0xf]  ;;  %v18309_v22 = vld [vmem:[#allocation10 + $0x1ecc] sm:$0xf0]  ;;  %v16865_v45 = vor.u32 %v18277_v25, %v16864_v36  ;;  %v13154_v9 = vld [vmem:[#allocation10 + $0xd0] sm:$0xf0] }
 0x280   :  { %v16737_v37 = vor.u32 %v18245_v47, %v16736_v43  ;;  %v16993_v12 = vor.u32 %v18309_v22, %v16992_v4  ;;  %v16720_v18 = vld [vmem:[#allocation10 + $0x1ca0] sm:$0xf]  ;;  %v18241_v20 = vld [vmem:[#allocation10 + $0x1cac] sm:$0xf0]  ;;  %v13157_v47 = vor.u32 %v17347_v0, %v13154_v9  ;;  %v19721_v25 = vld [vmem:[#allocation33_spill] sm:$0xff] }
 0x281   :  { %9791 = vmatpush.bf16.msra.mxu2 %v16401_v23  ;;  %9804 = vmatpush.bf16.msra.mxu3 %v16529_v62  ;;  %v17024_v23 = vld [vmem:[#allocation10 + $0x1f00] sm:$0xf]  ;;  %v13170_v62 = vld [vmem:[#allocation10 + $0xf0] sm:$0xf0]  ;;  %v18273_v2 = vld [vmem:[#allocation10 + $0x1dac] sm:$0xf0] }
 0x282   :  { %v16848_v30 = vld [vmem:[#allocation10 + $0x1da0] sm:$0xf]  ;;  %v17025_v48 = vor.u32 %v18317_v28, %v17024_v23  ;;  %v18305_v6 = vld [vmem:[#allocation10 + $0x1eac] sm:$0xf0]  ;;  %v13173_v55 = vor.u32 %v17351_v42, %v13170_v62  ;;  %v13138_v42 = vld [vmem:[#allocation10 + $0xb0] sm:$0xf0] }
 0x283   :  { %9766 = vmatpush.bf16.msra.mxu0 %v16129_v5  ;;  %9779 = vmatpush.bf16.msra.mxu1 %v16257_v19  ;;  %v19357_v5 = vpack.c.bf16 %v1473_v40, %v1473_v40  ;;  %v16976_v21 = vld [vmem:[#allocation10 + $0x1ea0] sm:$0xf]  ;;  %v353_v19 = vperm.slane %v19339_v57, 7  ;;  %v18301_v43 = vld [vmem:[#allocation10 + $0x1e8c] sm:$0xf0]  ;;  %v9560_v36 = vpop.f32.mrf.mxu0  ;;  %v9573_v23 = vpop.f32.mrf.mxu1 }
 0x284   :  { %v16977_v27 = vor.u32 %v18305_v6, %v16976_v21  ;;  %v16704_v40 = vld [vmem:[#allocation10 + $0x1c80] sm:$0xf]  ;;  %v9561_v22 = vadd.f32 %v9560_v36, %v19345_v53  ;;  %v18297_v21 = vld [vmem:[#allocation10 + $0x1e6c] sm:$0xf0] }
 0x285   :  { %9792 = vmatpush.bf16.msra.mxu2 %v16385_v46  ;;  %9805 = vmatpush.bf16.msra.mxu3 %v16513_v39  ;;  %19720 = vst [vmem:[#allocation24_spill] sm:$0xff] %v19357_v5  ;;  %v16721_v46 = vor.u32 %v18241_v20, %v16720_v18  ;;  %v18237_v39 = vld [vmem:[#allocation10 + $0x1c8c] sm:$0xf0]  ;;  %v1443_v4 = vadd.f32 %v19721_v25, %v353_v19  ;;  %v16816_v20 = vld [vmem:[#allocation10 + $0x1d60] sm:$0xf] }
 0x286   :  { %9767 = vmatmul.bf16.vlgmr.msra.gmra.mxu0 %v19351_v8  ;;  %9780 = vmatmul.bf16.vlgmr.msra.gmra.mxu1 %v19353_v54  ;;  %v16705_v28 = vor.u32 %v18237_v39, %v16704_v40  ;;  %v18233_v18 = vld [vmem:[#allocation10 + $0x1c6c] sm:$0xf0]  ;;  %v17339_v19 = vld [vmem:[#allocation10 + $0x84] sm:$0xf]  ;;  %v16800_v40 = vld [vmem:[#allocation10 + $0x1d40] sm:$0xf] }
 0x287   :  { %9811 = vmatpush.bf16.msrb.mxu0 %v16753_v51  ;;  %9824 = vmatpush.bf16.msrb.mxu1 %v16881_v14  ;;  %v16832_v51 = vld [vmem:[#allocation10 + $0x1d80] sm:$0xf]  ;;  %v18269_v14 = vld [vmem:[#allocation10 + $0x1d8c] sm:$0xf0] }
 0x288   :  { %9793 = vmatmul.bf16.vlgmr.msra.gmra.mxu2 %v19355_v56  ;;  %9806 = vmatmul.bf16.vlgmr.msra.gmra.mxu3 %v19357_v5  ;;  %v16833_v62 = vor.u32 %v18269_v14, %v16832_v51  ;;  %v18261_v51 = vld [vmem:[#allocation10 + $0x1d4c] sm:$0xf0]  ;;  %v16928_v14 = vld [vmem:[#allocation10 + $0x1e40] sm:$0xf]  ;;  %v17443_v5 = vld [vmem:[#allocation10 + $0x3c4] sm:$0xf] }
 0x289   :  { %9837 = vmatpush.bf16.msrb.mxu2 %v17009_v41  ;;  %9856 = vmatpush.bf16.msrb.mxu3 %v17041_v60  ;;  %v16849_v60 = vor.u32 %v18273_v2, %v16848_v30  ;;  %v16960_v41 = vld [vmem:[#allocation10 + $0x1e80] sm:$0xf]  ;;  %v9574_v30 = vadd.f32 %v9573_v23, %v9561_v22  ;;  %v352_v23 = vperm.slane %v19339_v57, 6 }
 0x28a   :  { %v16944_v2 = vld [vmem:[#allocation10 + $0x1e60] sm:$0xf] }
 0x28b   :  { %9812 = vmatpush.bf16.msrb.mxu0 %v16737_v37  ;;  %9825 = vmatpush.bf16.msrb.mxu1 %v16865_v45  ;;  %v17343_v37 = vld [vmem:[#allocation10 + $0xa4] sm:$0xf]  ;;  %v16961_v45 = vor.u32 %v18301_v43, %v16960_v41  ;;  %v16945_v9 = vor.u32 %v18297_v21, %v16944_v2  ;;  %v9586_v39 = vpop.f32.mrf.mxu2  ;;  %v18293_v41 = vld [vmem:[#allocation10 + $0x1e4c] sm:$0xf0]  ;;  %v350_v43 = vperm.slane %v19339_v57, 4  ;;  %v9599_v25 = vpop.f32.mrf.mxu3 }
 0x28c   :  { %v13141_v6 = vor.u32 %v17343_v37, %v13138_v42  ;;  %v9587_v36 = vadd.f32 %v9586_v39, %v9574_v30  ;;  %v9562_v22 = vpop.f32.mrf.mxu0  ;;  %v17335_v42 = vld [vmem:[#allocation10 + $0x64] sm:$0xf]  ;;  %v16784_v30 = vld [vmem:[#allocation10 + $0x1d20] sm:$0xf]  ;;  %v18257_v21 = vld [vmem:[#allocation10 + $0x1d2c] sm:$0xf0] }
 0x28d   :  { %9838 = vmatpush.bf16.msrb.mxu2 %v16993_v12  ;;  %9857 = vmatpush.bf16.msrb.mxu3 %v17025_v48  ;;  %v16688_v12 = vld [vmem:[#allocation10 + $0x1c60] sm:$0xf]  ;;  %v18265_v48 = vld [vmem:[#allocation10 + $0x1d6c] sm:$0xf0] }
 0x28e   :  { %v16689_v53 = vor.u32 %v18233_v18, %v16688_v12  ;;  %v16817_v0 = vor.u32 %v18265_v48, %v16816_v20  ;;  %v16801_v12 = vor.u32 %v18261_v51, %v16800_v40  ;;  %v16929_v18 = vor.u32 %v18293_v41, %v16928_v14  ;;  %v16656_v20 = vld [vmem:[#allocation10 + $0x1c20] sm:$0xf]  ;;  %v18225_v48 = vld [vmem:[#allocation10 + $0x1c2c] sm:$0xf0] }
 0x28f   :  { %9813 = vmatpush.bf16.msrb.mxu0 %v16721_v46  ;;  %9826 = vmatpush.bf16.msrb.mxu1 %v16849_v60  ;;  %v13122_v46 = vld [vmem:[#allocation10 + $0x90] sm:$0xf0]  ;;  %v16672_v60 = vld [vmem:[#allocation10 + $0x1c40] sm:$0xf]  ;;  %v18253_v14 = vld [vmem:[#allocation10 + $0x1d0c] sm:$0xf0] }
 0x290   :  { %v16768_v51 = vld [vmem:[#allocation10 + $0x1d00] sm:$0xf] }
 0x291   :  { %9863 = vmatpush.bf16.msra.mxu3 %v13173_v55  ;;  %9839 = vmatpush.bf16.msrb.mxu2 %v16977_v27  ;;  %v1477_v55 = vmax.f32 %v1443_v4, 0.0  ;;  %v18229_v27 = vld [vmem:[#allocation10 + $0x1c4c] sm:$0xf0]  ;;  %v13125_v4 = vor.u32 %v17339_v19, %v13122_v46  ;;  %v17331_v19 = vld [vmem:[#allocation10 + $0x44] sm:$0xf]  ;;  %v16657_v46 = vor.u32 %v18225_v48, %v16656_v20 }
 0x292   :  { %v16673_v37 = vor.u32 %v18229_v27, %v16672_v60  ;;  %v18221_v60 = vld [vmem:[#allocation10 + $0x1c0c] sm:$0xf0]  ;;  %v16896_v41 = vld [vmem:[#allocation10 + $0x1e00] sm:$0xf] }
 0x293   :  { %9814 = vmatpush.bf16.msrb.mxu0 %v16705_v28  ;;  %9827 = vmatpush.bf16.msrb.mxu1 %v16833_v62  ;;  %v9575_v28 = vpop.f32.mrf.mxu1  ;;  %v13106_v62 = vld [vmem:[#allocation10 + $0x70] sm:$0xf0]  ;;  %v19371_v2 = vpack.c.bf16 %v1477_v55, %v1477_v55  ;;  %v16785_v55 = vor.u32 %v18257_v21, %v16784_v30  ;;  %v9601_v20 = vpop.f32.mrf.mxu3  ;;  %v17447_v21 = vld [vmem:[#allocation10 + $0x3e4] sm:$0xf] }
 0x294   :  { %v19723_v27 = vld [vmem:[#allocation30_spill] sm:$0xff]  ;;  %v9588_v28 = vpop.f32.mrf.mxu2  ;;  %v17379_v20 = vld [vmem:[#allocation10 + $0x1c4] sm:$0xf] }
 0x295   :  { %9864 = vmatpush.bf16.msra.mxu3 %v13157_v47  ;;  %9840 = vmatpush.bf16.msrb.mxu2 %v16961_v45  ;;  %v351_v47 = vperm.slane %v19339_v57, 5  ;;  %v19369_v45 = vadd.f32 %v9599_v25, %v9587_v36  ;;  %19722 = vst [vmem:[#allocation25_spill] sm:$0xff] %v19371_v2  ;;  %v18289_v57 = vld [vmem:[#allocation10 + $0x1e2c] sm:$0xf0]  ;;  %v1404_v40 = vadd.f32 %v19723_v27, %v350_v43  ;;  %v19724_v36 = vld [vmem:[#allocation31_spill] sm:$0xff] }
 0x296   :  { %v17415_v43 = vld [vmem:[#allocation10 + $0x2e4] sm:$0xf]  ;;  %v13074_v30 = vld [vmem:[#allocation10 + $0x30] sm:$0xf0] }
 0x297   :  { %9815 = vmatpush.bf16.msrb.mxu0 %v16689_v53  ;;  %9828 = vmatpush.bf16.msrb.mxu1 %v16817_v0  ;;  %v13109_v53 = vor.u32 %v17335_v42, %v13106_v62  ;;  %v13090_v0 = vld [vmem:[#allocation10 + $0x50] sm:$0xf0]  ;;  %v1417_v25 = vadd.f32 %v19724_v36, %v351_v47  ;;  %v18285_v42 = vld [vmem:[#allocation10 + $0x1e0c] sm:$0xf0]  ;;  %v17383_v62 = vld [vmem:[#allocation10 + $0x1e4] sm:$0xf]  ;;  %v16769_v47 = vor.u32 %v18253_v14, %v16768_v51 }
 0x298   :  { %17054 = vmatmul.msk.bf16.vlgmr.msrb.gmra.mxu3 %vm9443_vm3, %v19371_v2  ;;  %v13093_v48 = vor.u32 %v17331_v19, %v13090_v0  ;;  %v13282_v2 = vld [vmem:[#allocation10 + $0x1d0] sm:$0xf0] }
 0x299   :  { %9865 = vmatpush.bf16.msra.mxu3 %v13141_v6  ;;  %9841 = vmatpush.bf16.msrb.mxu2 %v16945_v9  ;;  %v16912_v6 = vld [vmem:[#allocation10 + $0x1e20] sm:$0xf]  ;;  %v1475_v27 = vmax.f32 %v1417_v25, 0.0  ;;  %v13682_v51 = vld [vmem:[#allocation10 + $0x4f0] sm:$0xf0]  ;;  %v13285_v14 = vor.u32 %v17379_v20, %v13282_v2 }
 0x29a   :  { %v16640_v9 = vld [vmem:[#allocation10 + $0x1c00] sm:$0xf]  ;;  %v16913_v39 = vor.u32 %v18289_v57, %v16912_v6  ;;  %v13554_v6 = vld [vmem:[#allocation10 + $0x3f0] sm:$0xf0]  ;;  %v1474_v57 = vmax.f32 %v1404_v40, 0.0 }
 0x29b   :  { %9816 = vmatpush.bf16.msrb.mxu0 %v16673_v37  ;;  %9829 = vmatpush.bf16.msrb.mxu1 %v16801_v12  ;;  %v17327_v37 = vld [vmem:[#allocation10 + $0x24] sm:$0xf]  ;;  %v13426_v12 = vld [vmem:[#allocation10 + $0x2f0] sm:$0xf0]  ;;  %v13557_v0 = vor.u32 %v17447_v21, %v13554_v6 }
 0x29c   :  { %v13429_v28 = vor.u32 %v17415_v43, %v13426_v12  ;;  %v13077_v19 = vor.u32 %v17327_v37, %v13074_v30  ;;  %v13538_v40 = vld [vmem:[#allocation10 + $0x3d0] sm:$0xf0]  ;;  %v17375_v37 = vld [vmem:[#allocation10 + $0x1a4] sm:$0xf] }
 0x29d   :  { %9866 = vmatpush.bf16.msra.mxu3 %v13125_v4  ;;  %9842 = vmatpush.bf16.msrb.mxu2 %v16929_v18  ;;  %v19725_v4 = vld [vmem:[#allocation32_spill] sm:$0xff]  ;;  %v16641_v18 = vor.u32 %v18221_v60, %v16640_v9  ;;  %v13410_v9 = vld [vmem:[#allocation10 + $0x2d0] sm:$0xf0] }
 0x29e   :  { %v1430_v22 = vadd.f32 %v19725_v4, %v352_v23  ;;  %v16897_v23 = vor.u32 %v18285_v42, %v16896_v41  ;;  %v13301_v4 = vor.u32 %v17383_v62, %v13298_v13  ;;  %v13058_v60 = vld [vmem:[#allocation10 + $0x10] sm:$0xf0]  ;;  %v19380_v13 = vpack.c.bf16 %v1475_v27, %v1475_v27  ;;  %v17475_v2 = vld [vmem:[#allocation10 + $0x4c4] sm:$0xf] }
 0x29f   :  { %9817 = vmatpush.bf16.msrb.mxu0 %v16657_v46  ;;  %9830 = vmatpush.bf16.msrb.mxu1 %v16785_v55  ;;  %v17411_v46 = vld [vmem:[#allocation10 + $0x2c4] sm:$0xf]  ;;  %v19378_v55 = vpack.c.bf16 %v1474_v57, %v1474_v57  ;;  %v13541_v42 = vor.u32 %v17443_v5, %v13538_v40  ;;  %v13266_v62 = vld [vmem:[#allocation10 + $0x1b0] sm:$0xf0] }
 0x2a0   :  { %v1476_v36 = vmax.f32 %v1430_v22, 0.0  ;;  %v13413_v41 = vor.u32 %v17411_v46, %v13410_v9  ;;  %v13394_v12 = vld [vmem:[#allocation10 + $0x2b0] sm:$0xf0]  ;;  %v13269_v6 = vor.u32 %v17375_v37, %v13266_v62  ;;  %v17403_v27 = vld [vmem:[#allocation10 + $0x284] sm:$0xf] }
 0x2a1   :  { %9867 = vmatpush.bf16.msra.mxu3 %v13109_v53  ;;  %9843 = vmatpush.bf16.msrb.mxu2 %v16913_v39  ;;  %v17323_v53 = vld [vmem:[#allocation10 + $0x4] sm:$0xf]  ;;  %v13522_v30 = vld [vmem:[#allocation10 + $0x3b0] sm:$0xf0] }
 0x2a2   :  { %v17479_v39 = vld [vmem:[#allocation10 + $0x4e4] sm:$0xf]  ;;  %v19382_v25 = vpack.c.bf16 %v1476_v36, %v1476_v36  ;;  %v13061_v22 = vor.u32 %v17323_v53, %v13058_v60  ;;  %v13666_v21 = vld [vmem:[#allocation10 + $0x4d0] sm:$0xf0] }
 0x2a3   :  { %9818 = vmatpush.bf16.msrb.mxu0 %v16641_v18  ;;  %9831 = vmatpush.bf16.msrb.mxu1 %v16769_v47  ;;  %v13685_v43 = vor.u32 %v17479_v39, %v13682_v51  ;;  %v17439_v18 = vld [vmem:[#allocation10 + $0x3a4] sm:$0xf]  ;;  %v13669_v36 = vor.u32 %v17475_v2, %v13666_v21  ;;  %v13506_v53 = vld [vmem:[#allocation10 + $0x390] sm:$0xf0]  ;;  %v9612_v20 = vpop.f32.mrf.mxu0  ;;  %v9625_v9 = vpop.f32.mrf.mxu1 }
 0x2a4   :  { %v13525_v57 = vor.u32 %v17439_v18, %v13522_v30  ;;  %v17371_v47 = vld [vmem:[#allocation10 + $0x184] sm:$0xf]  ;;  %v9613_v46 = vadd.f32 %v9612_v20, %v19369_v45  ;;  %v13362_v37 = vld [vmem:[#allocation10 + $0x270] sm:$0xf0] }
 0x2a5   :  { %9868 = vmatpush.bf16.msra.mxu3 %v13093_v48  ;;  %9844 = vmatpush.bf16.msrb.mxu2 %v16897_v23  ;;  %v17407_v48 = vld [vmem:[#allocation10 + $0x2a4] sm:$0xf]  ;;  %v13250_v23 = vld [vmem:[#allocation10 + $0x190] sm:$0xf0] }
 0x2a6   :  { %9819 = vmatmul.bf16.vlgmr.msrb.gmra.mxu0 %v19378_v55  ;;  %9832 = vmatmul.bf16.vlgmr.msrb.gmra.mxu1 %v19380_v13  ;;  %v13397_v5 = vor.u32 %v17407_v48, %v13394_v12  ;;  %v13253_v60 = vor.u32 %v17371_v47, %v13250_v23  ;;  %v17367_v51 = vld [vmem:[#allocation10 + $0x164] sm:$0xf]  ;;  %v13490_v48 = vld [vmem:[#allocation10 + $0x370] sm:$0xf0] }
 0x2a7   :  { %9876 = vmatpush.bf16.msra.mxu0 %v13301_v4  ;;  %9889 = vmatpush.bf16.msra.mxu1 %v13429_v28  ;;  %v13378_v4 = vld [vmem:[#allocation10 + $0x290] sm:$0xf0]  ;;  %v17435_v28 = vld [vmem:[#allocation10 + $0x384] sm:$0xf] }
 0x2a8   :  { %9845 = vmatmul.bf16.vlgmr.msrb.gmra.mxu2 %v19382_v25  ;;  %v13381_v40 = vor.u32 %v17403_v27, %v13378_v4  ;;  %v13509_v39 = vor.u32 %v17435_v28, %v13506_v53  ;;  %v17431_v62 = vld [vmem:[#allocation10 + $0x364] sm:$0xf]  ;;  %v13634_v12 = vld [vmem:[#allocation10 + $0x490] sm:$0xf0] }
 0x2a9   :  { %9869 = vmatpush.bf16.msra.mxu3 %v13077_v19  ;;  %9902 = vmatpush.bf16.msra.mxu2 %v13557_v0  ;;  %v17471_v19 = vld [vmem:[#allocation10 + $0x4a4] sm:$0xf]  ;;  %v13650_v0 = vld [vmem:[#allocation10 + $0x4b0] sm:$0xf0]  ;;  %v13493_v30 = vor.u32 %v17431_v62, %v13490_v48 }
 0x2aa   :  { %v17363_v2 = vld [vmem:[#allocation10 + $0x144] sm:$0xf]  ;;  %v13218_v21 = vld [vmem:[#allocation10 + $0x150] sm:$0xf0] }
 0x2ab   :  { %9877 = vmatpush.bf16.msra.mxu0 %v13285_v14  ;;  %9890 = vmatpush.bf16.msra.mxu1 %v13413_v41  ;;  %v13234_v14 = vld [vmem:[#allocation10 + $0x170] sm:$0xf0]  ;;  %v17399_v41 = vld [vmem:[#allocation10 + $0x264] sm:$0xf]  ;;  %v9651_v4 = vpop.f32.mrf.mxu3  ;;  %v9614_v28 = vpop.f32.mrf.mxu0 }
 0x2ac   :  { %v13237_v18 = vor.u32 %v17367_v51, %v13234_v14  ;;  %v13365_v45 = vor.u32 %v17399_v41, %v13362_v37  ;;  %v13346_v47 = vld [vmem:[#allocation10 + $0x250] sm:$0xf0]  ;;  %v17427_v23 = vld [vmem:[#allocation10 + $0x344] sm:$0xf] }
 0x2ad   :  { %9870 = vmatpush.bf16.msra.mxu3 %v13061_v22  ;;  %9903 = vmatpush.bf16.msra.mxu2 %v13541_v42  ;;  %v9626_v22 = vadd.f32 %v9625_v9, %v9613_v46  ;;  %v13653_v42 = vor.u32 %v17471_v19, %v13650_v0  ;;  %v13474_v27 = vld [vmem:[#allocation10 + $0x350] sm:$0xf0]  ;;  %v17463_v53 = vld [vmem:[#allocation10 + $0x464] sm:$0xf]  ;;  %v9627_v19 = vpop.f32.mrf.mxu1  ;;  %v13221_v0 = vor.u32 %v17363_v2, %v13218_v21 }
 0x2ae   :  { %v13618_v20 = vld [vmem:[#allocation10 + $0x470] sm:$0xf0]  ;;  %v17391_v51 = vld [vmem:[#allocation10 + $0x224] sm:$0xf] }
 0x2af   :  { %9878 = vmatpush.bf16.msra.mxu0 %v13269_v6  ;;  %9891 = vmatpush.bf16.msra.mxu1 %v13397_v5  ;;  %v17395_v6 = vld [vmem:[#allocation10 + $0x244] sm:$0xf]  ;;  %v9638_v5 = vpop.f32.mrf.mxu2  ;;  %v13621_v14 = vor.u32 %v17463_v53, %v13618_v20  ;;  %v13330_v41 = vld [vmem:[#allocation10 + $0x230] sm:$0xf0] }
 0x2b0   :  { %9871 = vmatmul.bf16.vlgmr.msra.gmra.mxu3 %v19200_v63  ;;  %v13349_v9 = vor.u32 %v17395_v6, %v13346_v47  ;;  %v17459_v37 = vld [vmem:[#allocation10 + $0x444] sm:$0xf]  ;;  %v13602_v62 = vld [vmem:[#allocation10 + $0x450] sm:$0xf0] }
 0x2b1   :  { %9915 = vmatpush.bf16.msrb.mxu3 %v13685_v43  ;;  %9904 = vmatpush.bf16.msra.mxu2 %v13525_v57  ;;  %v17467_v43 = vld [vmem:[#allocation10 + $0x484] sm:$0xf]  ;;  %v13314_v2 = vld [vmem:[#allocation10 + $0x210] sm:$0xf0] }
 0x2b2   :  { %v13637_v57 = vor.u32 %v17467_v43, %v13634_v12  ;;  %v17355_v43 = vld [vmem:[#allocation10 + $0x104] sm:$0xf]  ;;  %v13186_v12 = vld [vmem:[#allocation10 + $0x110] sm:$0xf0] }
 0x2b3   :  { %9879 = vmatpush.bf16.msra.mxu0 %v13253_v60  ;;  %9892 = vmatpush.bf16.msra.mxu1 %v13381_v40  ;;  %v13477_v60 = vor.u32 %v17427_v23, %v13474_v27  ;;  %v17359_v40 = vld [vmem:[#allocation10 + $0x124] sm:$0xf]  ;;  %v13586_v23 = vld [vmem:[#allocation10 + $0x430] sm:$0xf0]  ;;  %v9653_v27 = vpop.f32.mrf.mxu3  ;;  %v13189_v53 = vor.u32 %v17355_v43, %v13186_v12 }
 0x2b4   :  { %v17419_v21 = vld [vmem:[#allocation10 + $0x304] sm:$0xf]  ;;  %v13938_v20 = vld [vmem:[#allocation10 + $0x6f0] sm:$0xf0] }
 0x2b5   :  { %9916 = vmatpush.bf16.msrb.mxu3 %v13669_v36  ;;  %9905 = vmatpush.bf16.msra.mxu2 %v13509_v39  ;;  %v9639_v36 = vadd.f32 %v9638_v5, %v9626_v22  ;;  %v13202_v39 = vld [vmem:[#allocation10 + $0x130] sm:$0xf0]  ;;  %v17423_v22 = vld [vmem:[#allocation10 + $0x324] sm:$0xf]  ;;  %v13605_v5 = vor.u32 %v17459_v37, %v13602_v62 }
 0x2b6   :  { %v13205_v48 = vor.u32 %v17359_v40, %v13202_v39  ;;  %v17455_v47 = vld [vmem:[#allocation10 + $0x424] sm:$0xf]  ;;  %v13794_v37 = vld [vmem:[#allocation10 + $0x5d0] sm:$0xf0] }
 0x2b7   :  { %9880 = vmatpush.bf16.msra.mxu0 %v13237_v18  ;;  %9893 = vmatpush.bf16.msra.mxu1 %v13365_v45  ;;  %v19389_v46 = vadd.f32 %v9651_v4, %v9639_v36  ;;  %v13333_v18 = vor.u32 %v17391_v51, %v13330_v41  ;;  %v9640_v6 = vpop.f32.mrf.mxu2  ;;  %v17511_v36 = vld [vmem:[#allocation10 + $0x5e4] sm:$0xf]  ;;  %v13810_v4 = vld [vmem:[#allocation10 + $0x5f0] sm:$0xf0]  ;;  %v13589_v40 = vor.u32 %v17455_v47, %v13586_v23 }
 0x2b8   :  { %v17543_v28 = vld [vmem:[#allocation10 + $0x6e4] sm:$0xf]  ;;  %v13813_v39 = vor.u32 %v17511_v36, %v13810_v4  ;;  %v14050_v12 = vld [vmem:[#allocation10 + $0x7d0] sm:$0xf0] }
 0x2b9   :  { %9917 = vmatpush.bf16.msrb.mxu3 %v13653_v42  ;;  %9906 = vmatpush.bf16.msra.mxu2 %v13493_v30  ;;  %v13458_v42 = vld [vmem:[#allocation10 + $0x330] sm:$0xf0]  ;;  %v17387_v30 = vld [vmem:[#allocation10 + $0x204] sm:$0xf]  ;;  %v13941_v41 = vor.u32 %v17543_v28, %v13938_v20 }
 0x2ba   :  { %v13461_v45 = vor.u32 %v17423_v22, %v13458_v42  ;;  %v17575_v19 = vld [vmem:[#allocation10 + $0x7e4] sm:$0xf]  ;;  %v13906_v27 = vld [vmem:[#allocation10 + $0x6b0] sm:$0xf0] }
 0x2bb   :  { %9881 = vmatpush.bf16.msra.mxu0 %v13221_v0  ;;  %9894 = vmatpush.bf16.msra.mxu1 %v13349_v9  ;;  %v14066_v0 = vld [vmem:[#allocation10 + $0x7f0] sm:$0xf0]  ;;  %v13317_v9 = vor.u32 %v17387_v30, %v13314_v2  ;;  %v17451_v51 = vld [vmem:[#allocation10 + $0x404] sm:$0xf] }
 0x2bc   :  { %v14069_v22 = vor.u32 %v17575_v19, %v14066_v0  ;;  %v17507_v42 = vld [vmem:[#allocation10 + $0x5c4] sm:$0xf]  ;;  %v14034_v4 = vld [vmem:[#allocation10 + $0x7b0] sm:$0xf0] }
 0x2bd   :  { %9918 = vmatpush.bf16.msrb.mxu3 %v13637_v57  ;;  %9907 = vmatpush.bf16.msra.mxu2 %v13477_v60  ;;  %v13442_v57 = vld [vmem:[#allocation10 + $0x310] sm:$0xf0]  ;;  %v17539_v62 = vld [vmem:[#allocation10 + $0x6c4] sm:$0xf]  ;;  %v13797_v2 = vor.u32 %v17507_v42, %v13794_v37 }
 0x2be   :  { %v13445_v60 = vor.u32 %v17419_v21, %v13442_v57  ;;  %v17571_v43 = vld [vmem:[#allocation10 + $0x7c4] sm:$0xf]  ;;  %v13778_v57 = vld [vmem:[#allocation10 + $0x5b0] sm:$0xf0] }
 0x2bf   :  { %9882 = vmatpush.bf16.msra.mxu0 %v13205_v48  ;;  %9895 = vmatpush.bf16.msra.mxu1 %v13333_v18  ;;  %v13922_v48 = vld [vmem:[#allocation10 + $0x6d0] sm:$0xf0]  ;;  %v17607_v18 = vld [vmem:[#allocation10 + $0x8e4] sm:$0xf]  ;;  %v14053_v6 = vor.u32 %v17571_v43, %v14050_v12 }
 0x2c0   :  { %v13925_v21 = vor.u32 %v17539_v62, %v13922_v48  ;;  %v17535_v47 = vld [vmem:[#allocation10 + $0x6a4] sm:$0xf]  ;;  %v14162_v37 = vld [vmem:[#allocation10 + $0x8b0] sm:$0xf0] }
 0x2c1   :  { %9919 = vmatpush.bf16.msrb.mxu3 %v13621_v14  ;;  %9908 = vmatpush.bf16.msra.mxu2 %v13461_v45  ;;  %v13570_v14 = vld [vmem:[#allocation10 + $0x410] sm:$0xf0]  ;;  %v17567_v36 = vld [vmem:[#allocation10 + $0x7a4] sm:$0xf]  ;;  %v13909_v19 = vor.u32 %v17535_v47, %v13906_v27 }
 0x2c2   :  { %v14194_v45 = vld [vmem:[#allocation10 + $0x8f0] sm:$0xf0]  ;;  %v13573_v30 = vor.u32 %v17451_v51, %v13570_v14  ;;  %v17603_v28 = vld [vmem:[#allocation10 + $0x8c4] sm:$0xf]  ;;  %v14037_v0 = vor.u32 %v17567_v36, %v14034_v4 }
 0x2c3   :  { %9883 = vmatpush.bf16.msra.mxu0 %v13189_v53  ;;  %9896 = vmatpush.bf16.msra.mxu1 %v13317_v9  ;;  %v14197_v23 = vor.u32 %v17607_v18, %v14194_v45  ;;  %v14178_v53 = vld [vmem:[#allocation10 + $0x8d0] sm:$0xf0]  ;;  %v17499_v9 = vld [vmem:[#allocation10 + $0x584] sm:$0xf]  ;;  %v9677_v48 = vpop.f32.mrf.mxu1 }
 0x2c4   :  { %v13890_v51 = vld [vmem:[#allocation10 + $0x690] sm:$0xf0]  ;;  %v17563_v14 = vld [vmem:[#allocation10 + $0x784] sm:$0xf] }
 0x2c5   :  { %9920 = vmatpush.bf16.msrb.mxu3 %v13605_v5  ;;  %9909 = vmatpush.bf16.msra.mxu2 %v13445_v60  ;;  %v17503_v5 = vld [vmem:[#allocation10 + $0x5a4] sm:$0xf]  ;;  %v13762_v60 = vld [vmem:[#allocation10 + $0x590] sm:$0xf0] }
 0x2c6   :  { %9884 = vmatmul.bf16.vlgmr.msra.gmra.mxu0 %v19202_v34  ;;  %9897 = vmatmul.bf16.vlgmr.msra.gmra.mxu1 %v19204_v1  ;;  %v13781_v20 = vor.u32 %v17503_v5, %v13778_v57  ;;  %v17599_v42 = vld [vmem:[#allocation10 + $0x8a4] sm:$0xf]  ;;  %v13765_v43 = vor.u32 %v17499_v9, %v13762_v60  ;;  %v13874_v5 = vld [vmem:[#allocation10 + $0x670] sm:$0xf0] }
 0x2c7   :  { %9928 = vmatpush.bf16.msrb.mxu0 %v13813_v39  ;;  %9941 = vmatpush.bf16.msrb.mxu1 %v13941_v41  ;;  %v14181_v39 = vor.u32 %v17603_v28, %v14178_v53  ;;  %v14018_v41 = vld [vmem:[#allocation10 + $0x790] sm:$0xf0]  ;;  %v17495_v45 = vld [vmem:[#allocation10 + $0x564] sm:$0xf] }
 0x2c8   :  { %9910 = vmatmul.bf16.vlgmr.msra.gmra.mxu2 %v19206_v52  ;;  %v14021_v18 = vor.u32 %v17563_v14, %v14018_v41  ;;  %v17559_v57 = vld [vmem:[#allocation10 + $0x764] sm:$0xf]  ;;  %v14002_v47 = vld [vmem:[#allocation10 + $0x770] sm:$0xf0] }
 0x2c9   :  { %9921 = vmatpush.bf16.msrb.mxu3 %v13589_v40  ;;  %9954 = vmatpush.bf16.msrb.mxu2 %v14069_v22  ;;  %v17531_v40 = vld [vmem:[#allocation10 + $0x684] sm:$0xf]  ;;  %v9664_v22 = vpop.f32.mrf.mxu0  ;;  %v14146_v27 = vld [vmem:[#allocation10 + $0x890] sm:$0xf0]  ;;  %v14005_v4 = vor.u32 %v17559_v57, %v14002_v47 }
 0x2ca   :  { %v9665_v62 = vadd.f32 %v9664_v22, %v19389_v46  ;;  %v13893_v12 = vor.u32 %v17531_v40, %v13890_v51  ;;  %v17491_v28 = vld [vmem:[#allocation10 + $0x544] sm:$0xf]  ;;  %v13730_v53 = vld [vmem:[#allocation10 + $0x550] sm:$0xf0] }
 0x2cb   :  { %9929 = vmatpush.bf16.msrb.mxu0 %v13797_v2  ;;  %9942 = vmatpush.bf16.msrb.mxu1 %v13925_v21  ;;  %v17527_v2 = vld [vmem:[#allocation10 + $0x664] sm:$0xf]  ;;  %v13858_v9 = vld [vmem:[#allocation10 + $0x650] sm:$0xf0]  ;;  %v9703_v51 = vpop.f32.mrf.mxu3 }
 0x2cc   :  { %v9678_v21 = vadd.f32 %v9677_v48, %v9665_v62  ;;  %v13877_v46 = vor.u32 %v17527_v2, %v13874_v5  ;;  %v17555_v60 = vld [vmem:[#allocation10 + $0x744] sm:$0xf]  ;;  %v13986_v40 = vld [vmem:[#allocation10 + $0x750] sm:$0xf0] }
 0x2cd   :  { %9922 = vmatpush.bf16.msrb.mxu3 %v13573_v30  ;;  %9955 = vmatpush.bf16.msrb.mxu2 %v14053_v6  ;;  %v13746_v30 = vld [vmem:[#allocation10 + $0x570] sm:$0xf0]  ;;  %v14165_v6 = vor.u32 %v17599_v42, %v14162_v37  ;;  %v17591_v41 = vld [vmem:[#allocation10 + $0x864] sm:$0xf]  ;;  %v9679_v42 = vpop.f32.mrf.mxu1  ;;  %v13733_v37 = vor.u32 %v17491_v28, %v13730_v53 }
 0x2ce   :  { %v13749_v36 = vor.u32 %v17495_v45, %v13746_v30  ;;  %v14130_v22 = vld [vmem:[#allocation10 + $0x870] sm:$0xf0]  ;;  %v17519_v45 = vld [vmem:[#allocation10 + $0x624] sm:$0xf] }
 0x2cf   :  { %9930 = vmatpush.bf16.msrb.mxu0 %v13781_v20  ;;  %9943 = vmatpush.bf16.msrb.mxu1 %v13909_v19  ;;  %v17523_v20 = vld [vmem:[#allocation10 + $0x644] sm:$0xf]  ;;  %v9690_v19 = vpop.f32.mrf.mxu2  ;;  %v14133_v30 = vor.u32 %v17591_v41, %v14130_v22  ;;  %v13842_v2 = vld [vmem:[#allocation10 + $0x630] sm:$0xf0] }
 0x2d0   :  { %9923 = vmatmul.bf16.vlgmr.msrb.gmra.mxu3 %v19231_v61  ;;  %v13861_v48 = vor.u32 %v17523_v20, %v13858_v9  ;;  %v17587_v5 = vld [vmem:[#allocation10 + $0x844] sm:$0xf]  ;;  %v14114_v57 = vld [vmem:[#allocation10 + $0x850] sm:$0xf0] }
 0x2d1   :  { %9967 = vmatpush.bf16.msra.mxu3 %v14197_v23  ;;  %9956 = vmatpush.bf16.msrb.mxu2 %v14037_v0  ;;  %v17595_v23 = vld [vmem:[#allocation10 + $0x884] sm:$0xf]  ;;  %v9666_v14 = vpop.f32.mrf.mxu0  ;;  %v13826_v28 = vld [vmem:[#allocation10 + $0x610] sm:$0xf0] }
 0x2d2   :  { %v14149_v0 = vor.u32 %v17595_v23, %v14146_v27  ;;  %v17483_v23 = vld [vmem:[#allocation10 + $0x504] sm:$0xf]  ;;  %v13698_v27 = vld [vmem:[#allocation10 + $0x510] sm:$0xf0] }
 0x2d3   :  { %9931 = vmatpush.bf16.msrb.mxu0 %v13765_v43  ;;  %9944 = vmatpush.bf16.msrb.mxu1 %v13893_v12  ;;  %v13989_v43 = vor.u32 %v17555_v60, %v13986_v40  ;;  %v17487_v12 = vld [vmem:[#allocation10 + $0x524] sm:$0xf]  ;;  %v14098_v60 = vld [vmem:[#allocation10 + $0x830] sm:$0xf0]  ;;  %v9705_v40 = vpop.f32.mrf.mxu3  ;;  %v13701_v41 = vor.u32 %v17483_v23, %v13698_v27 }
 0x2d4   :  { %v17547_v53 = vld [vmem:[#allocation10 + $0x704] sm:$0xf]  ;;  %v14450_v22 = vld [vmem:[#allocation10 + $0xaf0] sm:$0xf0] }
 0x2d5   :  { %9968 = vmatpush.bf16.msra.mxu3 %v14181_v39  ;;  %9957 = vmatpush.bf16.msrb.mxu2 %v14021_v18  ;;  %v9691_v39 = vadd.f32 %v9690_v19, %v9678_v21  ;;  %v13714_v18 = vld [vmem:[#allocation10 + $0x530] sm:$0xf0]  ;;  %v17551_v21 = vld [vmem:[#allocation10 + $0x724] sm:$0xf]  ;;  %v14117_v19 = vor.u32 %v17587_v5, %v14114_v57 }
 0x2d6   :  { %v13717_v47 = vor.u32 %v17487_v12, %v13714_v18  ;;  %v17583_v9 = vld [vmem:[#allocation10 + $0x824] sm:$0xf]  ;;  %v14306_v5 = vld [vmem:[#allocation10 + $0x9d0] sm:$0xf0] }
 0x2d7   :  { %9932 = vmatpush.bf16.msrb.mxu0 %v13749_v36  ;;  %9945 = vmatpush.bf16.msrb.mxu1 %v13877_v46  ;;  %v19396_v62 = vadd.f32 %v9703_v51, %v9691_v39  ;;  %v13845_v36 = vor.u32 %v17519_v45, %v13842_v2  ;;  %v9692_v20 = vpop.f32.mrf.mxu2  ;;  %v17639_v39 = vld [vmem:[#allocation10 + $0x9e4] sm:$0xf]  ;;  %v14322_v51 = vld [vmem:[#allocation10 + $0x9f0] sm:$0xf0]  ;;  %v14101_v12 = vor.u32 %v17583_v9, %v14098_v60 }
 0x2d8   :  { %v17671_v14 = vld [vmem:[#allocation10 + $0xae4] sm:$0xf]  ;;  %v14325_v18 = vor.u32 %v17639_v39, %v14322_v51  ;;  %v14562_v27 = vld [vmem:[#allocation10 + $0xbd0] sm:$0xf0] }
 0x2d9   :  { %9969 = vmatpush.bf16.msra.mxu3 %v14165_v6  ;;  %9958 = vmatpush.bf16.msrb.mxu2 %v14005_v4  ;;  %v13970_v6 = vld [vmem:[#allocation10 + $0x730] sm:$0xf0]  ;;  %v17515_v4 = vld [vmem:[#allocation10 + $0x604] sm:$0xf]  ;;  %v14453_v2 = vor.u32 %v17671_v14, %v14450_v22 }
 0x2da   :  { %v13973_v46 = vor.u32 %v17551_v21, %v13970_v6  ;;  %v17703_v42 = vld [vmem:[#allocation10 + $0xbe4] sm:$0xf]  ;;  %v14418_v40 = vld [vmem:[#allocation10 + $0xab0] sm:$0xf0] }
 0x2db   :  { %9933 = vmatpush.bf16.msrb.mxu0 %v13733_v37  ;;  %9946 = vmatpush.bf16.msrb.mxu1 %v13861_v48  ;;  %v14578_v37 = vld [vmem:[#allocation10 + $0xbf0] sm:$0xf0]  ;;  %v13829_v48 = vor.u32 %v17515_v4, %v13826_v28  ;;  %v17579_v45 = vld [vmem:[#allocation10 + $0x804] sm:$0xf] }
 0x2dc   :  { %v14581_v21 = vor.u32 %v17703_v42, %v14578_v37  ;;  %v17635_v6 = vld [vmem:[#allocation10 + $0x9c4] sm:$0xf]  ;;  %v14546_v51 = vld [vmem:[#allocation10 + $0xbb0] sm:$0xf0] }
 0x2dd   :  { %9970 = vmatpush.bf16.msra.mxu3 %v14149_v0  ;;  %9959 = vmatpush.bf16.msrb.mxu2 %v13989_v43  ;;  %v13954_v0 = vld [vmem:[#allocation10 + $0x710] sm:$0xf0]  ;;  %v17667_v57 = vld [vmem:[#allocation10 + $0xac4] sm:$0xf]  ;;  %v14309_v28 = vor.u32 %v17635_v6, %v14306_v5 }
 0x2de   :  { %v13957_v43 = vor.u32 %v17547_v53, %v13954_v0  ;;  %v17699_v23 = vld [vmem:[#allocation10 + $0xbc4] sm:$0xf]  ;;  %v14290_v0 = vld [vmem:[#allocation10 + $0x9b0] sm:$0xf0] }
 0x2df   :  { %9934 = vmatpush.bf16.msrb.mxu0 %v13717_v47  ;;  %9947 = vmatpush.bf16.msrb.mxu1 %v13845_v36  ;;  %v14434_v47 = vld [vmem:[#allocation10 + $0xad0] sm:$0xf0]  ;;  %v17735_v36 = vld [vmem:[#allocation10 + $0xce4] sm:$0xf]  ;;  %v14565_v20 = vor.u32 %v17699_v23, %v14562_v27 }
 0x2e0   :  { %v14437_v53 = vor.u32 %v17667_v57, %v14434_v47  ;;  %v17663_v9 = vld [vmem:[#allocation10 + $0xaa4] sm:$0xf]  ;;  %v14674_v5 = vld [vmem:[#allocation10 + $0xcb0] sm:$0xf0] }
 0x2e1   :  { %9971 = vmatpush.bf16.msra.mxu3 %v14133_v30  ;;  %9960 = vmatpush.bf16.msrb.mxu2 %v13973_v46  ;;  %v14082_v30 = vld [vmem:[#allocation10 + $0x810] sm:$0xf0]  ;;  %v17695_v39 = vld [vmem:[#allocation10 + $0xba4] sm:$0xf]  ;;  %v14421_v42 = vor.u32 %v17663_v9, %v14418_v40 }
 0x2e2   :  { %v14706_v46 = vld [vmem:[#allocation10 + $0xcf0] sm:$0xf0]  ;;  %v14085_v4 = vor.u32 %v17579_v45, %v14082_v30  ;;  %v17731_v14 = vld [vmem:[#allocation10 + $0xcc4] sm:$0xf]  ;;  %v14549_v37 = vor.u32 %v17695_v39, %v14546_v51 }
 0x2e3   :  { %9935 = vmatpush.bf16.msrb.mxu0 %v13701_v41  ;;  %9948 = vmatpush.bf16.msrb.mxu1 %v13829_v48  ;;  %v14709_v60 = vor.u32 %v17735_v36, %v14706_v46  ;;  %v14690_v41 = vld [vmem:[#allocation10 + $0xcd0] sm:$0xf0]  ;;  %v17627_v48 = vld [vmem:[#allocation10 + $0x984] sm:$0xf]  ;;  %v9729_v47 = vpop.f32.mrf.mxu1 }
 0x2e4   :  { %v14402_v45 = vld [vmem:[#allocation10 + $0xa90] sm:$0xf0]  ;;  %v17691_v30 = vld [vmem:[#allocation10 + $0xb84] sm:$0xf] }
 0x2e5   :  { %9972 = vmatpush.bf16.msra.mxu3 %v14117_v19  ;;  %9961 = vmatpush.bf16.msrb.mxu2 %v13957_v43  ;;  %v17631_v19 = vld [vmem:[#allocation10 + $0x9a4] sm:$0xf]  ;;  %v14274_v43 = vld [vmem:[#allocation10 + $0x990] sm:$0xf0] }
 0x2e6   :  { %9936 = vmatmul.bf16.vlgmr.msrb.gmra.mxu0 %v19233_v59  ;;  %9949 = vmatmul.bf16.vlgmr.msrb.gmra.mxu1 %v19235_v44  ;;  %v14293_v22 = vor.u32 %v17631_v19, %v14290_v0  ;;  %v17727_v6 = vld [vmem:[#allocation10 + $0xca4] sm:$0xf]  ;;  %v14277_v23 = vor.u32 %v17627_v48, %v14274_v43  ;;  %v14386_v19 = vld [vmem:[#allocation10 + $0xa70] sm:$0xf0] }
 0x2e7   :  { %9980 = vmatpush.bf16.msra.mxu0 %v14325_v18  ;;  %9993 = vmatpush.bf16.msra.mxu1 %v14453_v2  ;;  %v14693_v18 = vor.u32 %v17731_v14, %v14690_v41  ;;  %v14530_v2 = vld [vmem:[#allocation10 + $0xb90] sm:$0xf0]  ;;  %v17623_v46 = vld [vmem:[#allocation10 + $0x964] sm:$0xf] }
 0x2e8   :  { %9962 = vmatmul.bf16.vlgmr.msrb.gmra.mxu2 %v19237_v3  ;;  %v14533_v36 = vor.u32 %v17691_v30, %v14530_v2  ;;  %v17687_v0 = vld [vmem:[#allocation10 + $0xb64] sm:$0xf]  ;;  %v14514_v9 = vld [vmem:[#allocation10 + $0xb70] sm:$0xf0] }
 0x2e9   :  { %9973 = vmatpush.bf16.msra.mxu3 %v14101_v12  ;;  %10006 = vmatpush.bf16.msra.mxu2 %v14581_v21  ;;  %v17659_v12 = vld [vmem:[#allocation10 + $0xa84] sm:$0xf]  ;;  %v9716_v21 = vpop.f32.mrf.mxu0  ;;  %v14658_v40 = vld [vmem:[#allocation10 + $0xc90] sm:$0xf0]  ;;  %v14517_v51 = vor.u32 %v17687_v0, %v14514_v9 }
 0x2ea   :  { %v9717_v57 = vadd.f32 %v9716_v21, %v19396_v62  ;;  %v14405_v27 = vor.u32 %v17659_v12, %v14402_v45  ;;  %v17619_v14 = vld [vmem:[#allocation10 + $0x944] sm:$0xf]  ;;  %v14242_v41 = vld [vmem:[#allocation10 + $0x950] sm:$0xf0] }
 0x2eb   :  { %9981 = vmatpush.bf16.msra.mxu0 %v14309_v28  ;;  %9994 = vmatpush.bf16.msra.mxu1 %v14437_v53  ;;  %v17655_v28 = vld [vmem:[#allocation10 + $0xa64] sm:$0xf]  ;;  %v14370_v48 = vld [vmem:[#allocation10 + $0xa50] sm:$0xf0]  ;;  %v9755_v45 = vpop.f32.mrf.mxu3 }
 0x2ec   :  { %v9730_v53 = vadd.f32 %v9729_v47, %v9717_v57  ;;  %v14389_v62 = vor.u32 %v17655_v28, %v14386_v19  ;;  %v17683_v43 = vld [vmem:[#allocation10 + $0xb44] sm:$0xf]  ;;  %v14498_v12 = vld [vmem:[#allocation10 + $0xb50] sm:$0xf0] }
 0x2ed   :  { %9974 = vmatpush.bf16.msra.mxu3 %v14085_v4  ;;  %10007 = vmatpush.bf16.msra.mxu2 %v14565_v20  ;;  %v14258_v4 = vld [vmem:[#allocation10 + $0x970] sm:$0xf0]  ;;  %v14677_v20 = vor.u32 %v17727_v6, %v14674_v5  ;;  %v17719_v2 = vld [vmem:[#allocation10 + $0xc64] sm:$0xf]  ;;  %v9731_v6 = vpop.f32.mrf.mxu1  ;;  %v14245_v5 = vor.u32 %v17619_v14, %v14242_v41 }
 0x2ee   :  { %v14261_v39 = vor.u32 %v17623_v46, %v14258_v4  ;;  %v14642_v21 = vld [vmem:[#allocation10 + $0xc70] sm:$0xf0]  ;;  %v17647_v46 = vld [vmem:[#allocation10 + $0xa24] sm:$0xf] }
 0x2ef   :  { %9982 = vmatpush.bf16.msra.mxu0 %v14293_v22  ;;  %9995 = vmatpush.bf16.msra.mxu1 %v14421_v42  ;;  %v17651_v22 = vld [vmem:[#allocation10 + $0xa44] sm:$0xf]  ;;  %v9742_v42 = vpop.f32.mrf.mxu2  ;;  %v14645_v4 = vor.u32 %v17719_v2, %v14642_v21  ;;  %v14354_v28 = vld [vmem:[#allocation10 + $0xa30] sm:$0xf0] }
 0x2f0   :  { %9975 = vmatmul.bf16.vlgmr.msra.gmra.mxu3 %v19256_v17  ;;  %v14373_v47 = vor.u32 %v17651_v22, %v14370_v48  ;;  %v17715_v19 = vld [vmem:[#allocation10 + $0xc44] sm:$0xf]  ;;  %v14626_v0 = vld [vmem:[#allocation10 + $0xc50] sm:$0xf0] }
 0x2f1   :  { %10019 = vmatpush.bf16.msrb.mxu3 %v14709_v60  ;;  %10008 = vmatpush.bf16.msra.mxu2 %v14549_v37  ;;  %v17723_v60 = vld [vmem:[#allocation10 + $0xc84] sm:$0xf]  ;;  %v9718_v30 = vpop.f32.mrf.mxu0  ;;  %v14338_v14 = vld [vmem:[#allocation10 + $0xa10] sm:$0xf0] }
 0x2f2   :  { %v14661_v37 = vor.u32 %v17723_v60, %v14658_v40  ;;  %v17611_v60 = vld [vmem:[#allocation10 + $0x904] sm:$0xf]  ;;  %v14210_v40 = vld [vmem:[#allocation10 + $0x910] sm:$0xf0] }
 0x2f3   :  { %9983 = vmatpush.bf16.msra.mxu0 %v14277_v23  ;;  %9996 = vmatpush.bf16.msra.mxu1 %v14405_v27  ;;  %v14501_v23 = vor.u32 %v17683_v43, %v14498_v12  ;;  %v17615_v27 = vld [vmem:[#allocation10 + $0x924] sm:$0xf]  ;;  %v14610_v43 = vld [vmem:[#allocation10 + $0xc30] sm:$0xf0]  ;;  %v9757_v12 = vpop.f32.mrf.mxu3  ;;  %v14213_v2 = vor.u32 %v17611_v60, %v14210_v40 }
 0x2f4   :  { %v17675_v41 = vld [vmem:[#allocation10 + $0xb04] sm:$0xf]  ;;  %v14962_v21 = vld [vmem:[#allocation10 + $0xef0] sm:$0xf0] }
 0x2f5   :  { %10020 = vmatpush.bf16.msrb.mxu3 %v14693_v18  ;;  %10009 = vmatpush.bf16.msra.mxu2 %v14533_v36  ;;  %v9743_v18 = vadd.f32 %v9742_v42, %v9730_v53  ;;  %v14226_v36 = vld [vmem:[#allocation10 + $0x930] sm:$0xf0]  ;;  %v17679_v53 = vld [vmem:[#allocation10 + $0xb24] sm:$0xf]  ;;  %v14629_v42 = vor.u32 %v17715_v19, %v14626_v0 }
 0x2f6   :  { %v14229_v9 = vor.u32 %v17615_v27, %v14226_v36  ;;  %v17711_v48 = vld [vmem:[#allocation10 + $0xc24] sm:$0xf]  ;;  %v14818_v19 = vld [vmem:[#allocation10 + $0xdd0] sm:$0xf0] }
 0x2f7   :  { %9984 = vmatpush.bf16.msra.mxu0 %v14261_v39  ;;  %9997 = vmatpush.bf16.msra.mxu1 %v14389_v62  ;;  %v19403_v57 = vadd.f32 %v9755_v45, %v9743_v18  ;;  %v14357_v39 = vor.u32 %v17647_v46, %v14354_v28  ;;  %v9744_v22 = vpop.f32.mrf.mxu2  ;;  %v17767_v18 = vld [vmem:[#allocation10 + $0xde4] sm:$0xf]  ;;  %v14834_v45 = vld [vmem:[#allocation10 + $0xdf0] sm:$0xf0]  ;;  %v14613_v27 = vor.u32 %v17711_v48, %v14610_v43 }
 0x2f8   :  { %v17799_v30 = vld [vmem:[#allocation10 + $0xee4] sm:$0xf]  ;;  %v14837_v36 = vor.u32 %v17767_v18, %v14834_v45  ;;  %v15074_v40 = vld [vmem:[#allocation10 + $0xfd0] sm:$0xf0] }
 0x2f9   :  { %10021 = vmatpush.bf16.msrb.mxu3 %v14677_v20  ;;  %10010 = vmatpush.bf16.msra.mxu2 %v14517_v51  ;;  %v14482_v20 = vld [vmem:[#allocation10 + $0xb30] sm:$0xf0]  ;;  %v17643_v51 = vld [vmem:[#allocation10 + $0xa04] sm:$0xf]  ;;  %v14965_v28 = vor.u32 %v17799_v30, %v14962_v21 }
 0x2fa   :  { %v14485_v62 = vor.u32 %v17679_v53, %v14482_v20  ;;  %v17831_v6 = vld [vmem:[#allocation10 + $0xfe4] sm:$0xf]  ;;  %v14930_v12 = vld [vmem:[#allocation10 + $0xeb0] sm:$0xf0] }
 0x2fb   :  { %9985 = vmatpush.bf16.msra.mxu0 %v14245_v5  ;;  %9998 = vmatpush.bf16.msra.mxu1 %v14373_v47  ;;  %v15090_v5 = vld [vmem:[#allocation10 + $0xff0] sm:$0xf0]  ;;  %v14341_v47 = vor.u32 %v17643_v51, %v14338_v14  ;;  %v17707_v46 = vld [vmem:[#allocation10 + $0xc04] sm:$0xf] }
 0x2fc   :  { %v15093_v53 = vor.u32 %v17831_v6, %v15090_v5  ;;  %v17763_v20 = vld [vmem:[#allocation10 + $0xdc4] sm:$0xf]  ;;  %v15058_v45 = vld [vmem:[#allocation10 + $0xfb0] sm:$0xf0] }
 0x2fd   :  { %10022 = vmatpush.bf16.msrb.mxu3 %v14661_v37  ;;  %10011 = vmatpush.bf16.msra.mxu2 %v14501_v23  ;;  %v14466_v37 = vld [vmem:[#allocation10 + $0xb10] sm:$0xf0]  ;;  %v17795_v0 = vld [vmem:[#allocation10 + $0xec4] sm:$0xf]  ;;  %v14821_v14 = vor.u32 %v17763_v20, %v14818_v19 }
 0x2fe   :  { %v14469_v23 = vor.u32 %v17675_v41, %v14466_v37  ;;  %v17827_v60 = vld [vmem:[#allocation10 + $0xfc4] sm:$0xf]  ;;  %v14802_v37 = vld [vmem:[#allocation10 + $0xdb0] sm:$0xf0] }
 0x2ff   :  { %9986 = vmatpush.bf16.msra.mxu0 %v14229_v9  ;;  %9999 = vmatpush.bf16.msra.mxu1 %v14357_v39  ;;  %v14946_v9 = vld [vmem:[#allocation10 + $0xed0] sm:$0xf0]  ;;  %v17863_v39 = vld [vmem:[#allocation10 + $0x10e4] sm:$0xf]  ;;  %v15077_v22 = vor.u32 %v17827_v60, %v15074_v40 }
 0x300   :  { %v14949_v41 = vor.u32 %v17795_v0, %v14946_v9  ;;  %v17791_v48 = vld [vmem:[#allocation10 + $0xea4] sm:$0xf]  ;;  %v15186_v19 = vld [vmem:[#allocation10 + $0x10b0] sm:$0xf0] }
 0x301   :  { %10023 = vmatpush.bf16.msrb.mxu3 %v14645_v4  ;;  %10012 = vmatpush.bf16.msra.mxu2 %v14485_v62  ;;  %v14594_v4 = vld [vmem:[#allocation10 + $0xc10] sm:$0xf0]  ;;  %v17823_v18 = vld [vmem:[#allocation10 + $0xfa4] sm:$0xf]  ;;  %v14933_v6 = vor.u32 %v17791_v48, %v14930_v12 }
 0x302   :  { %v15218_v62 = vld [vmem:[#allocation10 + $0x10f0] sm:$0xf0]  ;;  %v14597_v51 = vor.u32 %v17707_v46, %v14594_v4  ;;  %v17859_v30 = vld [vmem:[#allocation10 + $0x10c4] sm:$0xf]  ;;  %v15061_v5 = vor.u32 %v17823_v18, %v15058_v45 }
 0x303   :  { %9987 = vmatpush.bf16.msra.mxu0 %v14213_v2  ;;  %10000 = vmatpush.bf16.msra.mxu1 %v14341_v47  ;;  %v15221_v43 = vor.u32 %v17863_v39, %v15218_v62  ;;  %v15202_v2 = vld [vmem:[#allocation10 + $0x10d0] sm:$0xf0]  ;;  %v17755_v47 = vld [vmem:[#allocation10 + $0xd84] sm:$0xf]  ;;  %v9781_v9 = vpop.f32.mrf.mxu1 }
 0x304   :  { %v14914_v46 = vld [vmem:[#allocation10 + $0xe90] sm:$0xf0]  ;;  %v17819_v4 = vld [vmem:[#allocation10 + $0xf84] sm:$0xf] }
 0x305   :  { %10024 = vmatpush.bf16.msrb.mxu3 %v14629_v42  ;;  %10013 = vmatpush.bf16.msra.mxu2 %v14469_v23  ;;  %v17759_v42 = vld [vmem:[#allocation10 + $0xda4] sm:$0xf]  ;;  %v14786_v23 = vld [vmem:[#allocation10 + $0xd90] sm:$0xf0] }
 0x306   :  { %9988 = vmatmul.bf16.vlgmr.msra.gmra.mxu0 %v19258_v11  ;;  %10001 = vmatmul.bf16.vlgmr.msra.gmra.mxu1 %v19260_v32  ;;  %v14805_v21 = vor.u32 %v17759_v42, %v14802_v37  ;;  %v17855_v20 = vld [vmem:[#allocation10 + $0x10a4] sm:$0xf]  ;;  %v14789_v60 = vor.u32 %v17755_v47, %v14786_v23  ;;  %v14898_v42 = vld [vmem:[#allocation10 + $0xe70] sm:$0xf0] }
 0x307   :  { %10032 = vmatpush.bf16.msrb.mxu0 %v14837_v36  ;;  %10045 = vmatpush.bf16.msrb.mxu1 %v14965_v28  ;;  %v15205_v36 = vor.u32 %v17859_v30, %v15202_v2  ;;  %v15042_v28 = vld [vmem:[#allocation10 + $0xf90] sm:$0xf0]  ;;  %v17751_v62 = vld [vmem:[#allocation10 + $0xd64] sm:$0xf] }
 0x308   :  { %10014 = vmatmul.bf16.vlgmr.msra.gmra.mxu2 %v19262_v24  ;;  %v15045_v39 = vor.u32 %v17819_v4, %v15042_v28  ;;  %v17815_v37 = vld [vmem:[#allocation10 + $0xf64] sm:$0xf]  ;;  %v15026_v48 = vld [vmem:[#allocation10 + $0xf70] sm:$0xf0] }
 0x309   :  { %10025 = vmatpush.bf16.msrb.mxu3 %v14613_v27  ;;  %10058 = vmatpush.bf16.msrb.mxu2 %v15093_v53  ;;  %v17787_v27 = vld [vmem:[#allocation10 + $0xe84] sm:$0xf]  ;;  %v9768_v53 = vpop.f32.mrf.mxu0  ;;  %v15170_v12 = vld [vmem:[#allocation10 + $0x1090] sm:$0xf0]  ;;  %v15029_v45 = vor.u32 %v17815_v37, %v15026_v48 }
 0x30a   :  { %v9769_v0 = vadd.f32 %v9768_v53, %v19403_v57  ;;  %v14917_v40 = vor.u32 %v17787_v27, %v14914_v46  ;;  %v17747_v30 = vld [vmem:[#allocation10 + $0xd44] sm:$0xf]  ;;  %v14754_v2 = vld [vmem:[#allocation10 + $0xd50] sm:$0xf0] }
 0x30b   :  { %10033 = vmatpush.bf16.msrb.mxu0 %v14821_v14  ;;  %10046 = vmatpush.bf16.msrb.mxu1 %v14949_v41  ;;  %v17783_v14 = vld [vmem:[#allocation10 + $0xe64] sm:$0xf]  ;;  %v14882_v47 = vld [vmem:[#allocation10 + $0xe50] sm:$0xf0]  ;;  %v9807_v46 = vpop.f32.mrf.mxu3 }
 0x30c   :  { %v9782_v41 = vadd.f32 %v9781_v9, %v9769_v0  ;;  %v14901_v57 = vor.u32 %v17783_v14, %v14898_v42  ;;  %v17811_v23 = vld [vmem:[#allocation10 + $0xf44] sm:$0xf]  ;;  %v15010_v27 = vld [vmem:[#allocation10 + $0xf50] sm:$0xf0] }
 0x30d   :  { %10026 = vmatpush.bf16.msrb.mxu3 %v14597_v51  ;;  %10059 = vmatpush.bf16.msrb.mxu2 %v15077_v22  ;;  %v14770_v51 = vld [vmem:[#allocation10 + $0xd70] sm:$0xf0]  ;;  %v15189_v22 = vor.u32 %v17855_v20, %v15186_v19  ;;  %v17847_v28 = vld [vmem:[#allocation10 + $0x1064] sm:$0xf]  ;;  %v9783_v20 = vpop.f32.mrf.mxu1  ;;  %v14757_v19 = vor.u32 %v17747_v30, %v14754_v2 }
 0x30e   :  { %v14773_v18 = vor.u32 %v17751_v62, %v14770_v51  ;;  %v15154_v53 = vld [vmem:[#allocation10 + $0x1070] sm:$0xf0]  ;;  %v17775_v62 = vld [vmem:[#allocation10 + $0xe24] sm:$0xf] }
 0x30f   :  { %10034 = vmatpush.bf16.msrb.mxu0 %v14805_v21  ;;  %10047 = vmatpush.bf16.msrb.mxu1 %v14933_v6  ;;  %v17779_v21 = vld [vmem:[#allocation10 + $0xe44] sm:$0xf]  ;;  %v9794_v6 = vpop.f32.mrf.mxu2  ;;  %v15157_v51 = vor.u32 %v17847_v28, %v15154_v53  ;;  %v14866_v14 = vld [vmem:[#allocation10 + $0xe30] sm:$0xf0] }
 0x310   :  { %10027 = vmatmul.bf16.vlgmr.msrb.gmra.mxu3 %v19278_v33  ;;  %v14885_v9 = vor.u32 %v17779_v21, %v14882_v47  ;;  %v17843_v42 = vld [vmem:[#allocation10 + $0x1044] sm:$0xf]  ;;  %v15138_v37 = vld [vmem:[#allocation10 + $0x1050] sm:$0xf0] }
 0x311   :  { %10071 = vmatpush.bf16.msra.mxu3 %v15221_v43  ;;  %10060 = vmatpush.bf16.msrb.mxu2 %v15061_v5  ;;  %v17851_v43 = vld [vmem:[#allocation10 + $0x1084] sm:$0xf]  ;;  %v9770_v4 = vpop.f32.mrf.mxu0  ;;  %v14850_v30 = vld [vmem:[#allocation10 + $0xe10] sm:$0xf0] }
 0x312   :  { %v15173_v5 = vor.u32 %v17851_v43, %v15170_v12  ;;  %v17739_v43 = vld [vmem:[#allocation10 + $0xd04] sm:$0xf]  ;;  %v14722_v12 = vld [vmem:[#allocation10 + $0xd10] sm:$0xf0] }
 0x313   :  { %10035 = vmatpush.bf16.msrb.mxu0 %v14789_v60  ;;  %10048 = vmatpush.bf16.msrb.mxu1 %v14917_v40  ;;  %v15013_v60 = vor.u32 %v17811_v23, %v15010_v27  ;;  %v17743_v40 = vld [vmem:[#allocation10 + $0xd24] sm:$0xf]  ;;  %v15122_v23 = vld [vmem:[#allocation10 + $0x1030] sm:$0xf0]  ;;  %v9809_v27 = vpop.f32.mrf.mxu3  ;;  %v14725_v28 = vor.u32 %v17739_v43, %v14722_v12 }
 0x314   :  { %v17803_v2 = vld [vmem:[#allocation10 + $0xf04] sm:$0xf]  ;;  %v15474_v53 = vld [vmem:[#allocation10 + $0x12f0] sm:$0xf0] }
 0x315   :  { %10072 = vmatpush.bf16.msra.mxu3 %v15205_v36  ;;  %10061 = vmatpush.bf16.msrb.mxu2 %v15045_v39  ;;  %v9795_v36 = vadd.f32 %v9794_v6, %v9782_v41  ;;  %v14738_v39 = vld [vmem:[#allocation10 + $0xd30] sm:$0xf0]  ;;  %v17807_v41 = vld [vmem:[#allocation10 + $0xf24] sm:$0xf]  ;;  %v15141_v6 = vor.u32 %v17843_v42, %v15138_v37 }
 0x316   :  { %v14741_v48 = vor.u32 %v17743_v40, %v14738_v39  ;;  %v17839_v47 = vld [vmem:[#allocation10 + $0x1024] sm:$0xf]  ;;  %v15330_v42 = vld [vmem:[#allocation10 + $0x11d0] sm:$0xf0] }
 0x317   :  { %10036 = vmatpush.bf16.msrb.mxu0 %v14773_v18  ;;  %10049 = vmatpush.bf16.msrb.mxu1 %v14901_v57  ;;  %v19410_v0 = vadd.f32 %v9807_v46, %v9795_v36  ;;  %v14869_v18 = vor.u32 %v17775_v62, %v14866_v14  ;;  %v9796_v21 = vpop.f32.mrf.mxu2  ;;  %v17895_v36 = vld [vmem:[#allocation10 + $0x11e4] sm:$0xf]  ;;  %v15346_v46 = vld [vmem:[#allocation10 + $0x11f0] sm:$0xf0]  ;;  %v15125_v40 = vor.u32 %v17839_v47, %v15122_v23 }
 0x318   :  { %v17927_v4 = vld [vmem:[#allocation10 + $0x12e4] sm:$0xf]  ;;  %v15349_v39 = vor.u32 %v17895_v36, %v15346_v46  ;;  %v15586_v12 = vld [vmem:[#allocation10 + $0x13d0] sm:$0xf0] }
 0x319   :  { %10073 = vmatpush.bf16.msra.mxu3 %v15189_v22  ;;  %10062 = vmatpush.bf16.msrb.mxu2 %v15029_v45  ;;  %v14994_v22 = vld [vmem:[#allocation10 + $0xf30] sm:$0xf0]  ;;  %v17771_v45 = vld [vmem:[#allocation10 + $0xe04] sm:$0xf]  ;;  %v15477_v14 = vor.u32 %v17927_v4, %v15474_v53 }
 0x31a   :  { %v14997_v57 = vor.u32 %v17807_v41, %v14994_v22  ;;  %v17959_v20 = vld [vmem:[#allocation10 + $0x13e4] sm:$0xf]  ;;  %v15314_v47 = vld [vmem:[#allocation10 + $0x11b0] sm:$0xf0] }
 0x31b   :  { %10037 = vmatpush.bf16.msrb.mxu0 %v14757_v19  ;;  %10050 = vmatpush.bf16.msrb.mxu1 %v14885_v9  ;;  %v15602_v19 = vld [vmem:[#allocation10 + $0x13f0] sm:$0xf0]  ;;  %v14853_v9 = vor.u32 %v17771_v45, %v14850_v30  ;;  %v17835_v62 = vld [vmem:[#allocation10 + $0x1004] sm:$0xf] }
 0x31c   :  { %v15605_v41 = vor.u32 %v17959_v20, %v15602_v19  ;;  %v17891_v22 = vld [vmem:[#allocation10 + $0x11c4] sm:$0xf]  ;;  %v15442_v36 = vld [vmem:[#allocation10 + $0x12b0] sm:$0xf0] }
 0x31d   :  { %10074 = vmatpush.bf16.msra.mxu3 %v15173_v5  ;;  %10063 = vmatpush.bf16.msrb.mxu2 %v15013_v60  ;;  %v14978_v5 = vld [vmem:[#allocation10 + $0xf10] sm:$0xf0]  ;;  %v17923_v37 = vld [vmem:[#allocation10 + $0x12c4] sm:$0xf]  ;;  %v15333_v30 = vor.u32 %v17891_v22, %v15330_v42 }
 0x31e   :  { %v14981_v60 = vor.u32 %v17803_v2, %v14978_v5  ;;  %v17955_v43 = vld [vmem:[#allocation10 + $0x13c4] sm:$0xf]  ;;  %v19412_v2 = vpop.f32.mrf.mxu3  ;;  %v15570_v4 = vld [vmem:[#allocation10 + $0x13b0] sm:$0xf0] }
 0x31f   :  { %10038 = vmatpush.bf16.msrb.mxu0 %v14741_v48  ;;  %10051 = vmatpush.bf16.msrb.mxu1 %v14869_v18  ;;  %v15458_v48 = vld [vmem:[#allocation10 + $0x12d0] sm:$0xf0]  ;;  %v17991_v18 = vld [vmem:[#allocation10 + $0x14e4] sm:$0xf] }
 0x320   :  { %v15461_v21 = vor.u32 %v17923_v37, %v15458_v48  ;;  %v17887_v5 = vld [vmem:[#allocation10 + $0x11a4] sm:$0xf]  ;;  %v15714_v53 = vld [vmem:[#allocation10 + $0x14d0] sm:$0xf0] }
 0x321   :  { %10075 = vmatpush.bf16.msra.mxu3 %v15157_v51  ;;  %10064 = vmatpush.bf16.msrb.mxu2 %v14997_v57  ;;  %v15106_v51 = vld [vmem:[#allocation10 + $0x1010] sm:$0xf0]  ;;  %v17919_v23 = vld [vmem:[#allocation10 + $0x12a4] sm:$0xf]  ;;  %v15317_v20 = vor.u32 %v17887_v5, %v15314_v47 }
 0x322   :  { %v15730_v57 = vld [vmem:[#allocation10 + $0x14f0] sm:$0xf0]  ;;  %v15109_v45 = vor.u32 %v17835_v62, %v15106_v51  ;;  %v17951_v46 = vld [vmem:[#allocation10 + $0x13a4] sm:$0xf]  ;;  %v15445_v19 = vor.u32 %v17919_v23, %v15442_v36 }
 0x323   :  { %10039 = vmatpush.bf16.msrb.mxu0 %v14725_v28  ;;  %10052 = vmatpush.bf16.msrb.mxu1 %v14853_v9  ;;  %v15733_v27 = vor.u32 %v17991_v18, %v15730_v57  ;;  %v17987_v28 = vld [vmem:[#allocation10 + $0x14c4] sm:$0xf]  ;;  %v15573_v9 = vor.u32 %v17951_v46, %v15570_v4  ;;  %v15426_v51 = vld [vmem:[#allocation10 + $0x1290] sm:$0xf0]  ;;  %v9820_v22 = vpop.f32.mrf.mxu0  ;;  %v9833_v42 = vpop.f32.mrf.mxu1 }
 0x324   :  { %v15717_v62 = vor.u32 %v17987_v28, %v15714_v53  ;;  %v17983_v37 = vld [vmem:[#allocation10 + $0x14a4] sm:$0xf]  ;;  %v15698_v48 = vld [vmem:[#allocation10 + $0x14b0] sm:$0xf0] }
 0x325   :  { %10076 = vmatpush.bf16.msra.mxu3 %v15141_v6  ;;  %10065 = vmatpush.bf16.msrb.mxu2 %v14981_v60  ;;  %v15589_v6 = vor.u32 %v17955_v43, %v15586_v12  ;;  %v17883_v60 = vld [vmem:[#allocation10 + $0x1184] sm:$0xf]  ;;  %v9821_v43 = vadd.f32 %v9820_v22, %v19410_v0  ;;  %v15701_v47 = vor.u32 %v17983_v37, %v15698_v48  ;;  %v15410_v23 = vld [vmem:[#allocation10 + $0x1270] sm:$0xf0] }
 0x326   :  { %10040 = vmatmul.bf16.vlgmr.msrb.gmra.mxu0 %v19280_v7  ;;  %10053 = vmatmul.bf16.vlgmr.msrb.gmra.mxu1 %v19282_v38  ;;  %v9861_v18 = vpop.f32.mrf.mxu3  ;;  %v15538_v36 = vld [vmem:[#allocation10 + $0x1370] sm:$0xf0]  ;;  %v17979_v46 = vld [vmem:[#allocation10 + $0x1484] sm:$0xf] }
 0x327   :  { %10084 = vmatpush.bf16.msra.mxu0 %v15349_v39  ;;  %10097 = vmatpush.bf16.msra.mxu1 %v15477_v14  ;;  %v17915_v39 = vld [vmem:[#allocation10 + $0x1284] sm:$0xf]  ;;  %v9834_v5 = vadd.f32 %v9833_v42, %v9821_v43  ;;  %v15682_v4 = vld [vmem:[#allocation10 + $0x1490] sm:$0xf0] }
 0x328   :  { %10066 = vmatmul.bf16.vlgmr.msrb.gmra.mxu2 %v19284_v35  ;;  %v17947_v14 = vld [vmem:[#allocation10 + $0x1384] sm:$0xf]  ;;  %v15429_v57 = vor.u32 %v17915_v39, %v15426_v51  ;;  %v15394_v39 = vld [vmem:[#allocation10 + $0x1250] sm:$0xf0] }
 0x329   :  { %10077 = vmatpush.bf16.msra.mxu3 %v15125_v40  ;;  %10110 = vmatpush.bf16.msra.mxu2 %v15605_v41  ;;  %v15298_v40 = vld [vmem:[#allocation10 + $0x1190] sm:$0xf0]  ;;  %v17975_v42 = vld [vmem:[#allocation10 + $0x1464] sm:$0xf] }
 0x32a   :  { %v15554_v41 = vld [vmem:[#allocation10 + $0x1390] sm:$0xf0]  ;;  %v15301_v12 = vor.u32 %v17883_v60, %v15298_v40  ;;  %v15685_v40 = vor.u32 %v17979_v46, %v15682_v4 }
 0x32b   :  { %10085 = vmatpush.bf16.msra.mxu0 %v15333_v30  ;;  %10098 = vmatpush.bf16.msra.mxu1 %v15461_v21  ;;  %v17879_v30 = vld [vmem:[#allocation10 + $0x1164] sm:$0xf]  ;;  %v15282_v21 = vld [vmem:[#allocation10 + $0x1170] sm:$0xf0]  ;;  %v9846_v60 = vpop.f32.mrf.mxu2  ;;  %v9835_v22 = vpop.f32.mrf.mxu1 }
 0x32c   :  { %v15285_v28 = vor.u32 %v17879_v30, %v15282_v21  ;;  %v15522_v51 = vld [vmem:[#allocation10 + $0x1350] sm:$0xf0]  ;;  %v17903_v30 = vld [vmem:[#allocation10 + $0x1224] sm:$0xf] }
 0x32d   :  { %10078 = vmatpush.bf16.msra.mxu3 %v15109_v45  ;;  %10111 = vmatpush.bf16.msra.mxu2 %v15589_v6  ;;  %v15557_v45 = vor.u32 %v17947_v14, %v15554_v41  ;;  %v17911_v6 = vld [vmem:[#allocation10 + $0x1264] sm:$0xf]  ;;  %v9847_v14 = vadd.f32 %v9846_v60, %v9834_v5  ;;  %v9822_v41 = vpop.f32.mrf.mxu0  ;;  %v15666_v37 = vld [vmem:[#allocation10 + $0x1470] sm:$0xf0] }
 0x32e   :  { %v15413_v0 = vor.u32 %v17911_v6, %v15410_v23  ;;  %v15669_v21 = vor.u32 %v17975_v42, %v15666_v37  ;;  %v15378_v6 = vld [vmem:[#allocation10 + $0x1230] sm:$0xf0]  ;;  %v17935_v5 = vld [vmem:[#allocation10 + $0x1324] sm:$0xf] }
 0x32f   :  { %10086 = vmatpush.bf16.msra.mxu0 %v15317_v20  ;;  %10099 = vmatpush.bf16.msra.mxu1 %v15445_v19  ;;  %v17875_v20 = vld [vmem:[#allocation10 + $0x1144] sm:$0xf]  ;;  %v15266_v19 = vld [vmem:[#allocation10 + $0x1150] sm:$0xf0]  ;;  %v19420_v43 = vadd.f32 %v19412_v2, %v9847_v14 }
 0x330   :  { %10079 = vmatmul.bf16.vlgmr.msra.gmra.mxu3 %v19303_v10  ;;  %v15269_v48 = vor.u32 %v17875_v20, %v15266_v19  ;;  %v17867_v2 = vld [vmem:[#allocation10 + $0x1104] sm:$0xf]  ;;  %v15362_v19 = vld [vmem:[#allocation10 + $0x1210] sm:$0xf0] }
 0x331   :  { %10123 = vmatpush.bf16.msrb.mxu3 %v15733_v27  ;;  %10112 = vmatpush.bf16.msra.mxu2 %v15573_v9  ;;  %v17943_v27 = vld [vmem:[#allocation10 + $0x1364] sm:$0xf]  ;;  %v15858_v41 = vld [vmem:[#allocation10 + $0x15f0] sm:$0xf0] }
 0x332   :  { %v15541_v53 = vor.u32 %v17943_v27, %v15538_v36  ;;  %v17907_v9 = vld [vmem:[#allocation10 + $0x1244] sm:$0xf]  ;;  %v15650_v36 = vld [vmem:[#allocation10 + $0x1450] sm:$0xf0] }
 0x333   :  { %10087 = vmatpush.bf16.msra.mxu0 %v15301_v12  ;;  %10100 = vmatpush.bf16.msra.mxu1 %v15429_v57  ;;  %v15397_v12 = vor.u32 %v17907_v9, %v15394_v39  ;;  %v17871_v57 = vld [vmem:[#allocation10 + $0x1124] sm:$0xf]  ;;  %v9872_v23 = vpop.f32.mrf.mxu3  ;;  %v9848_v60 = vpop.f32.mrf.mxu2  ;;  %v15490_v39 = vld [vmem:[#allocation10 + $0x1310] sm:$0xf0] }
 0x334   :  { %v17971_v27 = vld [vmem:[#allocation10 + $0x1444] sm:$0xf]  ;;  %v19423_v46 = vadd.f32 %v9872_v23, %v19196_v15  ;;  %v15986_v42 = vld [vmem:[#allocation10 + $0x16f0] sm:$0xf0] }
 0x335   :  { %10124 = vmatpush.bf16.msrb.mxu3 %v15717_v62  ;;  %10113 = vmatpush.bf16.msra.mxu2 %v15557_v45  ;;  %v17939_v62 = vld [vmem:[#allocation10 + $0x1344] sm:$0xf]  ;;  %v15250_v45 = vld [vmem:[#allocation10 + $0x1130] sm:$0xf0] }
 0x336   :  { %v15525_v18 = vor.u32 %v17939_v62, %v15522_v51  ;;  %v15253_v4 = vor.u32 %v17871_v57, %v15250_v45  ;;  %v17899_v20 = vld [vmem:[#allocation10 + $0x1204] sm:$0xf]  ;;  %v15634_v51 = vld [vmem:[#allocation10 + $0x1430] sm:$0xf0] }
 0x337   :  { %10088 = vmatpush.bf16.msra.mxu0 %v15285_v28  ;;  %10101 = vmatpush.bf16.msra.mxu1 %v15413_v0  ;;  %v15234_v28 = vld [vmem:[#allocation10 + $0x1110] sm:$0xf0]  ;;  %v15381_v0 = vor.u32 %v17903_v30, %v15378_v6  ;;  %v17931_v9 = vld [vmem:[#allocation10 + $0x1304] sm:$0xf] }
 0x338   :  { %v17967_v62 = vld [vmem:[#allocation10 + $0x1424] sm:$0xf]  ;;  %v15237_v22 = vor.u32 %v17867_v2, %v15234_v28  ;;  %v16098_v28 = vld [vmem:[#allocation10 + $0x17d0] sm:$0xf0] }
 0x339   :  { %10125 = vmatpush.bf16.msrb.mxu3 %v15701_v47  ;;  %10114 = vmatpush.bf16.msra.mxu2 %v15541_v53  ;;  %v15506_v47 = vld [vmem:[#allocation10 + $0x1330] sm:$0xf0]  ;;  %v18023_v14 = vld [vmem:[#allocation10 + $0x15e4] sm:$0xf]  ;;  %v15637_v57 = vor.u32 %v17967_v62, %v15634_v51 }
 0x33a   :  { %v15509_v53 = vor.u32 %v17935_v5, %v15506_v47  ;;  %v18055_v15 = vld [vmem:[#allocation10 + $0x16e4] sm:$0xf]  ;;  %v15861_v45 = vor.u32 %v18023_v14, %v15858_v41  ;;  %v15954_v14 = vld [vmem:[#allocation10 + $0x16b0] sm:$0xf0] }
 0x33b   :  { %10089 = vmatpush.bf16.msra.mxu0 %v15269_v48  ;;  %10102 = vmatpush.bf16.msra.mxu1 %v15397_v12  ;;  %v18087_v37 = vld [vmem:[#allocation10 + $0x17e4] sm:$0xf]  ;;  %v16114_v48 = vld [vmem:[#allocation10 + $0x17f0] sm:$0xf0]  ;;  %v15365_v12 = vor.u32 %v17899_v20, %v15362_v19  ;;  %v15989_v6 = vor.u32 %v18055_v15, %v15986_v42  ;;  %v9874_v47 = vpop.f32.mrf.mxu3 }
 0x33c   :  { %v17963_v30 = vld [vmem:[#allocation10 + $0x1404] sm:$0xf]  ;;  %v16117_v5 = vor.u32 %v18087_v37, %v16114_v48  ;;  %v16082_v15 = vld [vmem:[#allocation10 + $0x17b0] sm:$0xf0] }
 0x33d   :  { %10126 = vmatpush.bf16.msrb.mxu3 %v15685_v40  ;;  %10115 = vmatpush.bf16.msra.mxu2 %v15525_v18  ;;  %v15653_v40 = vor.u32 %v17971_v27, %v15650_v36  ;;  %v15493_v18 = vor.u32 %v17931_v9, %v15490_v39  ;;  %v18019_v23 = vld [vmem:[#allocation10 + $0x15c4] sm:$0xf]  ;;  %v15842_v27 = vld [vmem:[#allocation10 + $0x15d0] sm:$0xf0] }
 0x33e   :  { %v18051_v36 = vld [vmem:[#allocation10 + $0x16c4] sm:$0xf]  ;;  %v15845_v19 = vor.u32 %v18019_v23, %v15842_v27  ;;  %v15826_v39 = vld [vmem:[#allocation10 + $0x15b0] sm:$0xf0] }
 0x33f   :  { %10090 = vmatpush.bf16.msra.mxu0 %v15253_v4  ;;  %10103 = vmatpush.bf16.msra.mxu1 %v15381_v0  ;;  %v15970_v4 = vld [vmem:[#allocation10 + $0x16d0] sm:$0xf0]  ;;  %v18083_v2 = vld [vmem:[#allocation10 + $0x17c4] sm:$0xf] }
 0x340   :  { %v18119_v0 = vld [vmem:[#allocation10 + $0x18e4] sm:$0xf]  ;;  %v15973_v9 = vor.u32 %v18051_v36, %v15970_v4  ;;  %v16101_v60 = vor.u32 %v18083_v2, %v16098_v28  ;;  %v16226_v42 = vld [vmem:[#allocation10 + $0x18d0] sm:$0xf0] }
 0x341   :  { %10127 = vmatpush.bf16.msrb.mxu3 %v15669_v21  ;;  %10116 = vmatpush.bf16.msra.mxu2 %v15509_v53  ;;  %v15618_v21 = vld [vmem:[#allocation10 + $0x1410] sm:$0xf0]  ;;  %v18047_v62 = vld [vmem:[#allocation10 + $0x16a4] sm:$0xf] }
 0x342   :  { %v16242_v53 = vld [vmem:[#allocation10 + $0x18f0] sm:$0xf0]  ;;  %v15621_v20 = vor.u32 %v17963_v30, %v15618_v21  ;;  %v18079_v41 = vld [vmem:[#allocation10 + $0x17a4] sm:$0xf]  ;;  %v15957_v48 = vor.u32 %v18047_v62, %v15954_v14 }
 0x343   :  { %10091 = vmatpush.bf16.msra.mxu0 %v15237_v22  ;;  %10104 = vmatpush.bf16.msra.mxu1 %v15365_v12  ;;  %v16245_v51 = vor.u32 %v18119_v0, %v16242_v53  ;;  %v18115_v22 = vld [vmem:[#allocation10 + $0x18c4] sm:$0xf]  ;;  %v16085_v12 = vor.u32 %v18079_v41, %v16082_v15  ;;  %v15938_v21 = vld [vmem:[#allocation10 + $0x1690] sm:$0xf0]  ;;  %v9885_v47 = vpop.f32.mrf.mxu0  ;;  %v9898_v23 = vpop.f32.mrf.mxu1 }
 0x344   :  { %v16229_v30 = vor.u32 %v18115_v22, %v16226_v42  ;;  %v18111_v27 = vld [vmem:[#allocation10 + $0x18a4] sm:$0xf]  ;;  %v16210_v36 = vld [vmem:[#allocation10 + $0x18b0] sm:$0xf0]  ;;  %v9886_v4 = vadd.f32 %v9885_v47, %v19423_v46 }
 0x345   :  { %10128 = vmatpush.bf16.msrb.mxu3 %v15653_v40  ;;  %10117 = vmatpush.bf16.msra.mxu2 %v15493_v18  ;;  %v18015_v40 = vld [vmem:[#allocation10 + $0x15a4] sm:$0xf]  ;;  %v16050_v62 = vld [vmem:[#allocation10 + $0x1770] sm:$0xf0] }
 0x346   :  { %10092 = vmatmul.bf16.vlgmr.msra.gmra.mxu0 %v19305_v16  ;;  %10105 = vmatmul.bf16.vlgmr.msra.gmra.mxu1 %v19307_v58  ;;  %v15829_v37 = vor.u32 %v18015_v40, %v15826_v39  ;;  %v18011_v18 = vld [vmem:[#allocation10 + $0x1584] sm:$0xf]  ;;  %v15922_v40 = vld [vmem:[#allocation10 + $0x1670] sm:$0xf0] }
 0x347   :  { %10136 = vmatpush.bf16.msrb.mxu0 %v15861_v45  ;;  %10149 = vmatpush.bf16.msrb.mxu1 %v15989_v6  ;;  %v18043_v45 = vld [vmem:[#allocation10 + $0x1684] sm:$0xf]  ;;  %v16194_v14 = vld [vmem:[#allocation10 + $0x1890] sm:$0xf0] }
 0x348   :  { %10118 = vmatmul.bf16.vlgmr.msra.gmra.mxu2 %v19309_v29  ;;  %v18075_v6 = vld [vmem:[#allocation10 + $0x1784] sm:$0xf]  ;;  %v15941_v28 = vor.u32 %v18043_v45, %v15938_v21  ;;  %v15778_v42 = vld [vmem:[#allocation10 + $0x1550] sm:$0xf0] }
 0x349   :  { %10129 = vmatpush.bf16.msrb.mxu3 %v15637_v57  ;;  %10162 = vmatpush.bf16.msrb.mxu2 %v16117_v5  ;;  %v15810_v57 = vld [vmem:[#allocation10 + $0x1590] sm:$0xf0]  ;;  %v18007_v53 = vld [vmem:[#allocation10 + $0x1564] sm:$0xf] }
 0x34a   :  { %v16066_v5 = vld [vmem:[#allocation10 + $0x1790] sm:$0xf0]  ;;  %v15813_v2 = vor.u32 %v18011_v18, %v15810_v57  ;;  %v18071_v39 = vld [vmem:[#allocation10 + $0x1764] sm:$0xf] }
 0x34b   :  { %10137 = vmatpush.bf16.msrb.mxu0 %v15845_v19  ;;  %10150 = vmatpush.bf16.msrb.mxu1 %v15973_v9  ;;  %v16069_v0 = vor.u32 %v18075_v6, %v16066_v5  ;;  %v18039_v19 = vld [vmem:[#allocation10 + $0x1664] sm:$0xf]  ;;  %v9899_v9 = vadd.f32 %v9898_v23, %v9886_v4  ;;  %v16053_v15 = vor.u32 %v18071_v39, %v16050_v62  ;;  %v15906_v18 = vld [vmem:[#allocation10 + $0x1650] sm:$0xf0]  ;;  %v9887_v21 = vpop.f32.mrf.mxu0  ;;  %v9900_v6 = vpop.f32.mrf.mxu1 }
 0x34c   :  { %v15925_v46 = vor.u32 %v18039_v19, %v15922_v40  ;;  %v18003_v22 = vld [vmem:[#allocation10 + $0x1544] sm:$0xf]  ;;  %v16034_v45 = vld [vmem:[#allocation10 + $0x1750] sm:$0xf0] }
 0x34d   :  { %10130 = vmatpush.bf16.msrb.mxu3 %v15621_v20  ;;  %10163 = vmatpush.bf16.msrb.mxu2 %v16101_v60  ;;  %v15794_v20 = vld [vmem:[#allocation10 + $0x1570] sm:$0xf0]  ;;  %v16213_v60 = vor.u32 %v18111_v27, %v16210_v36  ;;  %v18067_v57 = vld [vmem:[#allocation10 + $0x1744] sm:$0xf]  ;;  %v15781_v23 = vor.u32 %v18003_v22, %v15778_v42 }
 0x34e   :  { %v15797_v41 = vor.u32 %v18007_v53, %v15794_v20  ;;  %v18103_v5 = vld [vmem:[#allocation10 + $0x1864] sm:$0xf]  ;;  %v16178_v47 = vld [vmem:[#allocation10 + $0x1870] sm:$0xf0]  ;;  %v16037_v36 = vor.u32 %v18067_v57, %v16034_v45 }
 0x34f   :  { %10138 = vmatpush.bf16.msrb.mxu0 %v15829_v37  ;;  %10151 = vmatpush.bf16.msrb.mxu1 %v15957_v48  ;;  %v18035_v37 = vld [vmem:[#allocation10 + $0x1644] sm:$0xf]  ;;  %v9911_v48 = vpop.f32.mrf.mxu2  ;;  %v15890_v20 = vld [vmem:[#allocation10 + $0x1630] sm:$0xf0] }
 0x350   :  { %10131 = vmatmul.bf16.vlgmr.msrb.gmra.mxu3 %v19326_v50  ;;  %v15909_v27 = vor.u32 %v18035_v37, %v15906_v18  ;;  %v17999_v4 = vld [vmem:[#allocation10 + $0x1524] sm:$0xf]  ;;  %v16162_v39 = vld [vmem:[#allocation10 + $0x1850] sm:$0xf0] }
 0x351   :  { %10175 = vmatpush.bf16.msra.mxu3 %v16245_v51  ;;  %10164 = vmatpush.bf16.msrb.mxu2 %v16085_v12  ;;  %v18107_v51 = vld [vmem:[#allocation10 + $0x1884] sm:$0xf]  ;;  %v15874_v22 = vld [vmem:[#allocation10 + $0x1610] sm:$0xf0] }
 0x352   :  { %v16197_v12 = vor.u32 %v18107_v51, %v16194_v14  ;;  %v18063_v19 = vld [vmem:[#allocation10 + $0x1724] sm:$0xf]  ;;  %v15746_v14 = vld [vmem:[#allocation10 + $0x1510] sm:$0xf0] }
 0x353   :  { %10139 = vmatpush.bf16.msrb.mxu0 %v15813_v2  ;;  %10152 = vmatpush.bf16.msrb.mxu1 %v15941_v28  ;;  %v15762_v2 = vld [vmem:[#allocation10 + $0x1530] sm:$0xf0]  ;;  %v18031_v28 = vld [vmem:[#allocation10 + $0x1624] sm:$0xf]  ;;  %v9924_v53 = vpop.f32.mrf.mxu3 }
 0x354   :  { %v18099_v40 = vld [vmem:[#allocation10 + $0x1844] sm:$0xf]  ;;  %v15765_v62 = vor.u32 %v17999_v4, %v15762_v2  ;;  %v16146_v57 = vld [vmem:[#allocation10 + $0x1830] sm:$0xf0] }
 0x355   :  { %10176 = vmatpush.bf16.msra.mxu3 %v16229_v30  ;;  %10165 = vmatpush.bf16.msrb.mxu2 %v16069_v0  ;;  %v9912_v30 = vadd.f32 %v9911_v48, %v9899_v9  ;;  %v16181_v0 = vor.u32 %v18103_v5, %v16178_v47  ;;  %v17995_v51 = vld [vmem:[#allocation10 + $0x1504] sm:$0xf]  ;;  %v16165_v48 = vor.u32 %v18099_v40, %v16162_v39  ;;  %v16498_v5 = vld [vmem:[#allocation10 + $0x1af0] sm:$0xf0] }
 0x356   :  { %v18059_v42 = vld [vmem:[#allocation10 + $0x1704] sm:$0xf]  ;;  %v15749_v6 = vor.u32 %v17995_v51, %v15746_v14  ;;  %v16354_v40 = vld [vmem:[#allocation10 + $0x19d0] sm:$0xf0] }
 0x357   :  { %10140 = vmatpush.bf16.msrb.mxu0 %v15797_v41  ;;  %10153 = vmatpush.bf16.msrb.mxu1 %v15925_v46  ;;  %v19430_v9 = vadd.f32 %v9924_v53, %v9912_v30  ;;  %v15893_v41 = vor.u32 %v18031_v28, %v15890_v20  ;;  %v9913_v37 = vpop.f32.mrf.mxu2  ;;  %v18095_v18 = vld [vmem:[#allocation10 + $0x1824] sm:$0xf]  ;;  %v16370_v30 = vld [vmem:[#allocation10 + $0x19f0] sm:$0xf0] }
 0x358   :  { %v18151_v45 = vld [vmem:[#allocation10 + $0x19e4] sm:$0xf]  ;;  %v16149_v4 = vor.u32 %v18095_v18, %v16146_v57  ;;  %v16130_v53 = vld [vmem:[#allocation10 + $0x1810] sm:$0xf0] }
 0x359   :  { %10177 = vmatpush.bf16.msra.mxu3 %v16213_v60  ;;  %10166 = vmatpush.bf16.msrb.mxu2 %v16053_v15  ;;  %v16018_v60 = vld [vmem:[#allocation10 + $0x1730] sm:$0xf0]  ;;  %v18027_v15 = vld [vmem:[#allocation10 + $0x1604] sm:$0xf]  ;;  %v16373_v2 = vor.u32 %v18151_v45, %v16370_v30 }
 0x35a   :  { %v16021_v46 = vor.u32 %v18063_v19, %v16018_v60  ;;  %v18183_v21 = vld [vmem:[#allocation10 + $0x1ae4] sm:$0xf]  ;;  %v16610_v14 = vld [vmem:[#allocation10 + $0x1bd0] sm:$0xf0] }
 0x35b   :  { %10141 = vmatpush.bf16.msrb.mxu0 %v15781_v23  ;;  %10154 = vmatpush.bf16.msrb.mxu1 %v15909_v27  ;;  %v18215_v47 = vld [vmem:[#allocation10 + $0x1be4] sm:$0xf]  ;;  %v16626_v23 = vld [vmem:[#allocation10 + $0x1bf0] sm:$0xf0]  ;;  %v15877_v27 = vor.u32 %v18027_v15, %v15874_v22  ;;  %v9926_v28 = vpop.f32.mrf.mxu3  ;;  %v16501_v20 = vor.u32 %v18183_v21, %v16498_v5 }
 0x35c   :  { %v16629_v19 = vor.u32 %v18215_v47, %v16626_v23  ;;  %v18147_v60 = vld [vmem:[#allocation10 + $0x19c4] sm:$0xf]  ;;  %v16466_v45 = vld [vmem:[#allocation10 + $0x1ab0] sm:$0xf0] }
 0x35d   :  { %10178 = vmatpush.bf16.msra.mxu3 %v16197_v12  ;;  %10167 = vmatpush.bf16.msrb.mxu2 %v16037_v36  ;;  %v16002_v12 = vld [vmem:[#allocation10 + $0x1710] sm:$0xf0]  ;;  %v18179_v39 = vld [vmem:[#allocation10 + $0x1ac4] sm:$0xf]  ;;  %v16357_v22 = vor.u32 %v18147_v60, %v16354_v40 }
 0x35e   :  { %v16005_v36 = vor.u32 %v18059_v42, %v16002_v12  ;;  %v18211_v51 = vld [vmem:[#allocation10 + $0x1bc4] sm:$0xf]  ;;  %v16338_v12 = vld [vmem:[#allocation10 + $0x19b0] sm:$0xf0] }
 0x35f   :  { %10142 = vmatpush.bf16.msrb.mxu0 %v15765_v62  ;;  %10155 = vmatpush.bf16.msrb.mxu1 %v15893_v41  ;;  %v16482_v62 = vld [vmem:[#allocation10 + $0x1ad0] sm:$0xf0]  ;;  %v18247_v41 = vld [vmem:[#allocation10 + $0x1ce4] sm:$0xf]  ;;  %v16613_v37 = vor.u32 %v18211_v51, %v16610_v14 }
 0x360   :  { %v16485_v42 = vor.u32 %v18179_v39, %v16482_v62  ;;  %v18175_v18 = vld [vmem:[#allocation10 + $0x1aa4] sm:$0xf]  ;;  %v16594_v21 = vld [vmem:[#allocation10 + $0x1bb0] sm:$0xf0] }
 0x361   :  { %10179 = vmatpush.bf16.msra.mxu3 %v16181_v0  ;;  %10168 = vmatpush.bf16.msrb.mxu2 %v16021_v46  ;;  %v18091_v0 = vld [vmem:[#allocation10 + $0x1804] sm:$0xf]  ;;  %v16754_v46 = vld [vmem:[#allocation10 + $0x1cf0] sm:$0xf0]  ;;  %v16469_v23 = vor.u32 %v18175_v18, %v16466_v45 }
 0x362   :  { %v16133_v15 = vor.u32 %v18091_v0, %v16130_v53  ;;  %v16757_v57 = vor.u32 %v18247_v41, %v16754_v46  ;;  %v18207_v30 = vld [vmem:[#allocation10 + $0x1ba4] sm:$0xf]  ;;  %v16738_v5 = vld [vmem:[#allocation10 + $0x1cd0] sm:$0xf0] }
 0x363   :  { %10143 = vmatpush.bf16.msrb.mxu0 %v15749_v6  ;;  %10156 = vmatpush.bf16.msrb.mxu1 %v15877_v27  ;;  %v18243_v6 = vld [vmem:[#allocation10 + $0x1cc4] sm:$0xf]  ;;  %v16597_v27 = vor.u32 %v18207_v30, %v16594_v21  ;;  %v16450_v0 = vld [vmem:[#allocation10 + $0x1a90] sm:$0xf0]  ;;  %v9950_v60 = vpop.f32.mrf.mxu1 }
 0x364   :  { %v16741_v28 = vor.u32 %v18243_v6, %v16738_v5  ;;  %v18203_v53 = vld [vmem:[#allocation10 + $0x1b84] sm:$0xf]  ;;  %v16722_v39 = vld [vmem:[#allocation10 + $0x1cb0] sm:$0xf0] }
 0x365   :  { %10180 = vmatpush.bf16.msra.mxu3 %v16165_v48  ;;  %10169 = vmatpush.bf16.msrb.mxu2 %v16005_v36  ;;  %v18143_v48 = vld [vmem:[#allocation10 + $0x19a4] sm:$0xf]  ;;  %v16562_v18 = vld [vmem:[#allocation10 + $0x1b70] sm:$0xf0] }
 0x366   :  { %10144 = vmatmul.bf16.vlgmr.msrb.gmra.mxu0 %v19328_v26  ;;  %10157 = vmatmul.bf16.vlgmr.msrb.gmra.mxu1 %v19330_v31  ;;  %v16341_v47 = vor.u32 %v18143_v48, %v16338_v12  ;;  %v18139_v36 = vld [vmem:[#allocation10 + $0x1984] sm:$0xf]  ;;  %v16434_v48 = vld [vmem:[#allocation10 + $0x1a70] sm:$0xf0] }
 0x367   :  { %10188 = vmatpush.bf16.msra.mxu0 %v16373_v2  ;;  %10201 = vmatpush.bf16.msra.mxu1 %v16501_v20  ;;  %v18171_v2 = vld [vmem:[#allocation10 + $0x1a84] sm:$0xf]  ;;  %v16578_v20 = vld [vmem:[#allocation10 + $0x1b90] sm:$0xf0] }
 0x368   :  { %10170 = vmatmul.bf16.vlgmr.msrb.gmra.mxu2 %v19332_v49  ;;  %v18239_v40 = vld [vmem:[#allocation10 + $0x1ca4] sm:$0xf]  ;;  %v16453_v14 = vor.u32 %v18171_v2, %v16450_v0  ;;  %v16581_v41 = vor.u32 %v18203_v53, %v16578_v20  ;;  %v16706_v45 = vld [vmem:[#allocation10 + $0x1c90] sm:$0xf0] }
 0x369   :  { %10181 = vmatpush.bf16.msra.mxu3 %v16149_v4  ;;  %10214 = vmatpush.bf16.msra.mxu2 %v16629_v19  ;;  %v16322_v4 = vld [vmem:[#allocation10 + $0x1990] sm:$0xf0]  ;;  %v9937_v19 = vpop.f32.mrf.mxu0  ;;  %v18135_v46 = vld [vmem:[#allocation10 + $0x1964] sm:$0xf] }
 0x36a   :  { %v9938_v62 = vadd.f32 %v9937_v19, %v19430_v9  ;;  %v16325_v51 = vor.u32 %v18139_v36, %v16322_v4  ;;  %v18199_v12 = vld [vmem:[#allocation10 + $0x1b64] sm:$0xf]  ;;  %v16290_v5 = vld [vmem:[#allocation10 + $0x1950] sm:$0xf0] }
 0x36b   :  { %10189 = vmatpush.bf16.msra.mxu0 %v16357_v22  ;;  %10202 = vmatpush.bf16.msra.mxu1 %v16485_v42  ;;  %v18167_v22 = vld [vmem:[#allocation10 + $0x1a64] sm:$0xf]  ;;  %v16565_v21 = vor.u32 %v18199_v12, %v16562_v18  ;;  %v16418_v36 = vld [vmem:[#allocation10 + $0x1a50] sm:$0xf0]  ;;  %v9952_v53 = vpop.f32.mrf.mxu1 }
 0x36c   :  { %v9951_v42 = vadd.f32 %v9950_v60, %v9938_v62  ;;  %v16437_v9 = vor.u32 %v18167_v22, %v16434_v48  ;;  %v18131_v6 = vld [vmem:[#allocation10 + $0x1944] sm:$0xf]  ;;  %v16546_v2 = vld [vmem:[#allocation10 + $0x1b50] sm:$0xf0] }
 0x36d   :  { %10182 = vmatpush.bf16.msra.mxu3 %v16133_v15  ;;  %10215 = vmatpush.bf16.msra.mxu2 %v16613_v37  ;;  %v16306_v15 = vld [vmem:[#allocation10 + $0x1970] sm:$0xf0]  ;;  %v16725_v37 = vor.u32 %v18239_v40, %v16722_v39  ;;  %v18195_v4 = vld [vmem:[#allocation10 + $0x1b44] sm:$0xf]  ;;  %v16293_v60 = vor.u32 %v18131_v6, %v16290_v5 }
 0x36e   :  { %v16309_v30 = vor.u32 %v18135_v46, %v16306_v15  ;;  %v18231_v20 = vld [vmem:[#allocation10 + $0x1c64] sm:$0xf]  ;;  %v16690_v19 = vld [vmem:[#allocation10 + $0x1c70] sm:$0xf0]  ;;  %v16549_v39 = vor.u32 %v18195_v4, %v16546_v2 }
 0x36f   :  { %10190 = vmatpush.bf16.msra.mxu0 %v16341_v47  ;;  %10203 = vmatpush.bf16.msra.mxu1 %v16469_v23  ;;  %v18163_v47 = vld [vmem:[#allocation10 + $0x1a44] sm:$0xf]  ;;  %v9963_v23 = vpop.f32.mrf.mxu2  ;;  %v16402_v15 = vld [vmem:[#allocation10 + $0x1a30] sm:$0xf0] }
 0x370   :  { %10183 = vmatmul.bf16.vlgmr.msra.gmra.mxu3 %v19351_v8  ;;  %v16421_v40 = vor.u32 %v18163_v47, %v16418_v36  ;;  %v18127_v62 = vld [vmem:[#allocation10 + $0x1924] sm:$0xf]  ;;  %v16674_v12 = vld [vmem:[#allocation10 + $0x1c50] sm:$0xf0] }
 0x371   :  { %10227 = vmatpush.bf16.msrb.mxu3 %v16757_v57  ;;  %10216 = vmatpush.bf16.msra.mxu2 %v16597_v27  ;;  %v18235_v57 = vld [vmem:[#allocation10 + $0x1c84] sm:$0xf]  ;;  %v9939_v0 = vpop.f32.mrf.mxu0  ;;  %v16386_v6 = vld [vmem:[#allocation10 + $0x1a10] sm:$0xf0] }
 0x372   :  { %v16709_v27 = vor.u32 %v18235_v57, %v16706_v45  ;;  %v18191_v22 = vld [vmem:[#allocation10 + $0x1b24] sm:$0xf]  ;;  %v16258_v45 = vld [vmem:[#allocation10 + $0x1910] sm:$0xf0] }
 0x373   :  { %10191 = vmatpush.bf16.msra.mxu0 %v16325_v51  ;;  %10204 = vmatpush.bf16.msra.mxu1 %v16453_v14  ;;  %v16274_v51 = vld [vmem:[#allocation10 + $0x1930] sm:$0xf0]  ;;  %v18159_v14 = vld [vmem:[#allocation10 + $0x1a24] sm:$0xf]  ;;  %v9976_v46 = vpop.f32.mrf.mxu3 }
 0x374   :  { %v18227_v48 = vld [vmem:[#allocation10 + $0x1c44] sm:$0xf]  ;;  %v16277_v18 = vor.u32 %v18127_v62, %v16274_v51  ;;  %v16658_v4 = vld [vmem:[#allocation10 + $0x1c30] sm:$0xf0] }
 0x375   :  { %10228 = vmatpush.bf16.msrb.mxu3 %v16741_v28  ;;  %10217 = vmatpush.bf16.msra.mxu2 %v16581_v41  ;;  %v9964_v28 = vadd.f32 %v9963_v23, %v9951_v42  ;;  %v16693_v41 = vor.u32 %v18231_v20, %v16690_v19  ;;  %v18123_v57 = vld [vmem:[#allocation10 + $0x1904] sm:$0xf]  ;;  %v16677_v23 = vor.u32 %v18227_v48, %v16674_v12  ;;  %v17010_v20 = vld [vmem:[#allocation10 + $0x1ef0] sm:$0xf0] }
 0x376   :  { %v18187_v5 = vld [vmem:[#allocation10 + $0x1b04] sm:$0xf]  ;;  %v16261_v53 = vor.u32 %v18123_v57, %v16258_v45  ;;  %v16866_v48 = vld [vmem:[#allocation10 + $0x1dd0] sm:$0xf0] }
 0x377   :  { %10192 = vmatpush.bf16.msra.mxu0 %v16309_v30  ;;  %10205 = vmatpush.bf16.msra.mxu1 %v16437_v9  ;;  %v19437_v42 = vadd.f32 %v9976_v46, %v9964_v28  ;;  %v16405_v30 = vor.u32 %v18159_v14, %v16402_v15  ;;  %v9965_v47 = vpop.f32.mrf.mxu2  ;;  %v18223_v36 = vld [vmem:[#allocation10 + $0x1c24] sm:$0xf]  ;;  %v16882_v28 = vld [vmem:[#allocation10 + $0x1df0] sm:$0xf0] }
 0x378   :  { %v18279_v2 = vld [vmem:[#allocation10 + $0x1de4] sm:$0xf]  ;;  %v16661_v62 = vor.u32 %v18223_v36, %v16658_v4  ;;  %v16642_v46 = vld [vmem:[#allocation10 + $0x1c10] sm:$0xf0]  ;;  %v13176_v47 = vld [vmem:[#allocation10 + $0xe8] sm:$0xf] }
 0x379   :  { %10229 = vmatpush.bf16.msrb.mxu3 %v16725_v37  ;;  %10218 = vmatpush.bf16.msra.mxu2 %v16565_v21  ;;  %v16530_v37 = vld [vmem:[#allocation10 + $0x1b30] sm:$0xf0]  ;;  %v18155_v21 = vld [vmem:[#allocation10 + $0x1a04] sm:$0xf]  ;;  %v16885_v51 = vor.u32 %v18279_v2, %v16882_v28 }
 0x37a   :  { %v16533_v9 = vor.u32 %v18191_v22, %v16530_v37  ;;  %v18311_v0 = vld [vmem:[#allocation10 + $0x1ee4] sm:$0xf]  ;;  %v17026_v45 = vld [vmem:[#allocation10 + $0x1f10] sm:$0xf0] }
 0x37b   :  { %10193 = vmatpush.bf16.msra.mxu0 %v16293_v60  ;;  %10206 = vmatpush.bf16.msra.mxu1 %v16421_v40  ;;  %v18319_v19 = vld [vmem:[#allocation10 + $0x1f24] sm:$0xf]  ;;  %v17042_v60 = vld [vmem:[#allocation10 + $0x1f30] sm:$0xf0]  ;;  %v16389_v40 = vor.u32 %v18155_v21, %v16386_v6  ;;  %v9978_v14 = vpop.f32.mrf.mxu3  ;;  %v17013_v22 = vor.u32 %v18311_v0, %v17010_v20  ;;  %v17386_v21 = vld [vmem:[#allocation10 + $0x1f4] sm:$0xf0] }
 0x37c   :  { %v18275_v15 = vld [vmem:[#allocation10 + $0x1dc4] sm:$0xf]  ;;  %v17045_v37 = vor.u32 %v18319_v19, %v17042_v60  ;;  %v16850_v4 = vld [vmem:[#allocation10 + $0x1db0] sm:$0xf0]  ;;  %v13160_v20 = vld [vmem:[#allocation10 + $0xc8] sm:$0xf] }
 0x37d   :  { %10230 = vmatpush.bf16.msrb.mxu3 %v16709_v27  ;;  %10219 = vmatpush.bf16.msra.mxu2 %v16549_v39  ;;  %v16514_v27 = vld [vmem:[#allocation10 + $0x1b10] sm:$0xf0]  ;;  %v18307_v12 = vld [vmem:[#allocation10 + $0x1ec4] sm:$0xf]  ;;  %v17350_v60 = vld [vmem:[#allocation10 + $0xd4] sm:$0xf0] }
 0x37e   :  { %v16517_v39 = vor.u32 %v18187_v5, %v16514_v27  ;;  %v18315_v57 = vld [vmem:[#allocation10 + $0x1f04] sm:$0xf]  ;;  %v16869_v5 = vor.u32 %v18275_v15, %v16866_v48  ;;  %v13144_v48 = vld [vmem:[#allocation10 + $0xa8] sm:$0xf] }
 0x37f   :  { %10194 = vmatpush.bf16.msra.mxu0 %v16277_v18  ;;  %10207 = vmatpush.bf16.msra.mxu1 %v16405_v30  ;;  %v16994_v18 = vld [vmem:[#allocation10 + $0x1ed0] sm:$0xf0]  ;;  %v17354_v30 = vld [vmem:[#allocation10 + $0xf4] sm:$0xf0]  ;;  %v17029_v27 = vor.u32 %v18315_v57, %v17026_v45  ;;  %v18271_v36 = vld [vmem:[#allocation10 + $0x1da4] sm:$0xf] }
 0x380   :  { %v13177_v2 = vor.u32 %v17354_v30, %v13176_v47  ;;  %v18303_v0 = vld [vmem:[#allocation10 + $0x1ea4] sm:$0xf]  ;;  %v17346_v57 = vld [vmem:[#allocation10 + $0xb4] sm:$0xf0]  ;;  %v13272_v45 = vld [vmem:[#allocation10 + $0x1a8] sm:$0xf] }
 0x381   :  { %10231 = vmatpush.bf16.msrb.mxu3 %v16693_v41  ;;  %10220 = vmatpush.bf16.msra.mxu2 %v16533_v9  ;;  %v18219_v41 = vld [vmem:[#allocation10 + $0x1c04] sm:$0xf]  ;;  %v13304_v9 = vld [vmem:[#allocation10 + $0x1e8] sm:$0xf]  ;;  %v17378_v47 = vld [vmem:[#allocation10 + $0x1b4] sm:$0xf0] }
 0x382   :  { %v16645_v6 = vor.u32 %v18219_v41, %v16642_v46  ;;  %v13305_v28 = vor.u32 %v17386_v21, %v13304_v9  ;;  %v19726_v19 = vld [vmem:[#allocation24_spill] sm:$0xff]  ;;  %v16834_v41 = vld [vmem:[#allocation10 + $0x1d90] sm:$0xf0]  ;;  %v13161_v46 = vor.u32 %v17350_v60, %v13160_v20  ;;  %v17374_v20 = vld [vmem:[#allocation10 + $0x194] sm:$0xf0] }
 0x383   :  { %10195 = vmatpush.bf16.msra.mxu0 %v16261_v53  ;;  %10208 = vmatpush.bf16.msra.mxu1 %v16389_v40  ;;  %v16978_v53 = vld [vmem:[#allocation10 + $0x1eb0] sm:$0xf0]  ;;  %v13288_v40 = vld [vmem:[#allocation10 + $0x1c8] sm:$0xf]  ;;  %v18267_v14 = vld [vmem:[#allocation10 + $0x1d84] sm:$0xf] }
 0x384   :  { %v16837_v9 = vor.u32 %v18267_v14, %v16834_v41  ;;  %v18291_v41 = vld [vmem:[#allocation10 + $0x1e44] sm:$0xf] }
 0x385   :  { %10232 = vmatpush.bf16.msrb.mxu3 %v16677_v23  ;;  %10221 = vmatpush.bf16.msra.mxu2 %v16517_v39  ;;  %v16997_v23 = vor.u32 %v18307_v12, %v16994_v18  ;;  %v17382_v39 = vld [vmem:[#allocation10 + $0x1d4] sm:$0xf0]  ;;  %v9989_v12 = vpop.f32.mrf.mxu0  ;;  %v10002_v18 = vpop.f32.mrf.mxu1 }
 0x386   :  { %10196 = vmatmul.bf16.vlgmr.msra.gmra.mxu0 %v19353_v54  ;;  %10209 = vmatmul.bf16.vlgmr.msra.gmra.mxu1 %v19355_v56  ;;  %v13289_v15 = vor.u32 %v17382_v39, %v13288_v40  ;;  %v9990_v30 = vadd.f32 %v9989_v12, %v19437_v42  ;;  %v18259_v40 = vld [vmem:[#allocation10 + $0x1d44] sm:$0xf]  ;;  %v16802_v39 = vld [vmem:[#allocation10 + $0x1d50] sm:$0xf0]  ;;  %v17338_v12 = vld [vmem:[#allocation10 + $0x74] sm:$0xf0] }
 0x387   :  { %10240 = vmatpush.bf16.msrb.mxu0 %v16885_v51  ;;  %10253 = vmatpush.bf16.msrb.mxu1 %v17013_v22  ;;  %v16981_v51 = vor.u32 %v18303_v0, %v16978_v53  ;;  %v18299_v22 = vld [vmem:[#allocation10 + $0x1e84] sm:$0xf]  ;;  %v17342_v0 = vld [vmem:[#allocation10 + $0x94] sm:$0xf0]  ;;  %v13256_v53 = vld [vmem:[#allocation10 + $0x188] sm:$0xf] }
 0x388   :  { %10222 = vmatmul.bf16.vlgmr.msra.gmra.mxu2 %v19726_v19  ;;  %v13257_v14 = vor.u32 %v17374_v20, %v13256_v53  ;;  %v17366_v53 = vld [vmem:[#allocation10 + $0x154] sm:$0xf0] }
 0x389   :  { %10233 = vmatpush.bf16.msrb.mxu3 %v16661_v62  ;;  %10272 = vmatpush.bf16.msrb.mxu2 %v17045_v37  ;;  %v16853_v62 = vor.u32 %v18271_v36, %v16850_v4  ;;  %v16962_v37 = vld [vmem:[#allocation10 + $0x1e90] sm:$0xf0]  ;;  %v13273_v36 = vor.u32 %v17378_v47, %v13272_v45  ;;  %v18295_v4 = vld [vmem:[#allocation10 + $0x1e64] sm:$0xf]  ;;  %v16805_v45 = vor.u32 %v18259_v40, %v16802_v39 }
 0x38a   :  { %v16965_v21 = vor.u32 %v18299_v22, %v16962_v37  ;;  %v16770_v40 = vld [vmem:[#allocation10 + $0x1d10] sm:$0xf0]  ;;  %v18283_v39 = vld [vmem:[#allocation10 + $0x1e04] sm:$0xf] }
 0x38b   :  { %10241 = vmatpush.bf16.msrb.mxu0 %v16869_v5  ;;  %10254 = vmatpush.bf16.msrb.mxu1 %v16997_v23  ;;  %v16818_v5 = vld [vmem:[#allocation10 + $0x1d70] sm:$0xf0]  ;;  %v10003_v23 = vadd.f32 %v10002_v18, %v9990_v30  ;;  %v13240_v18 = vld [vmem:[#allocation10 + $0x168] sm:$0xf]  ;;  %v18255_v30 = vld [vmem:[#allocation10 + $0x1d24] sm:$0xf] }
 0x38d   :  { %10234 = vmatpush.bf16.msrb.mxu3 %v16645_v6  ;;  %10273 = vmatpush.bf16.msrb.mxu2 %v17029_v27  ;;  %v18263_v6 = vld [vmem:[#allocation10 + $0x1d64] sm:$0xf]  ;;  %v13145_v27 = vor.u32 %v17346_v57, %v13144_v48  ;;  %v9991_v37 = vpop.f32.mrf.mxu0  ;;  %v10004_v48 = vpop.f32.mrf.mxu1  ;;  %v17370_v57 = vld [vmem:[#allocation10 + $0x174] sm:$0xf0] }
 0x38e   :  { %v16821_v60 = vor.u32 %v18263_v6, %v16818_v5  ;;  %v13241_v6 = vor.u32 %v17370_v57, %v13240_v18  ;;  %v17330_v37 = vld [vmem:[#allocation10 + $0x34] sm:$0xf0]  ;;  %v13208_v48 = vld [vmem:[#allocation10 + $0x128] sm:$0xf] }
 0x38f   :  { %10242 = vmatpush.bf16.msrb.mxu0 %v16853_v62  ;;  %10255 = vmatpush.bf16.msrb.mxu1 %v16981_v51  ;;  %v10015_v62 = vpop.f32.mrf.mxu2  ;;  %v13560_v57 = vld [vmem:[#allocation10 + $0x3e8] sm:$0xf] }
 0x390   :  { %10235 = vmatmul.bf16.vlgmr.msrb.gmra.mxu3 %v19378_v55  ;;  %v10016_v22 = vadd.f32 %v10015_v62, %v10003_v23  ;;  %v19727_v23 = vld [vmem:[#allocation25_spill] sm:$0xff]  ;;  %v16898_v62 = vld [vmem:[#allocation10 + $0x1e10] sm:$0xf0] }
 0x391   :  { %10279 = vmatpush.bf16.msra.mxu2 %v13177_v2  ;;  %10292 = vmatpush.bf16.msra.mxu3 %v13305_v28  ;;  %v16946_v2 = vld [vmem:[#allocation10 + $0x1e70] sm:$0xf0]  ;;  %v13128_v28 = vld [vmem:[#allocation10 + $0x88] sm:$0xf] }
 0x392   :  { %v16949_v42 = vor.u32 %v18295_v4, %v16946_v2  ;;  %v13129_v51 = vor.u32 %v17342_v0, %v13128_v28  ;;  %v13096_v4 = vld [vmem:[#allocation10 + $0x48] sm:$0xf]  ;;  %v17334_v28 = vld [vmem:[#allocation10 + $0x54] sm:$0xf0] }
 0x393   :  { %10243 = vmatpush.bf16.msrb.mxu0 %v16837_v9  ;;  %10256 = vmatpush.bf16.msrb.mxu1 %v16965_v21  ;;  %v16786_v9 = vld [vmem:[#allocation10 + $0x1d30] sm:$0xf0]  ;;  %v10028_v5 = vpop.f32.mrf.mxu3  ;;  %v13224_v0 = vld [vmem:[#allocation10 + $0x148] sm:$0xf] }
 0x394   :  { %v19446_v2 = vadd.f32 %v10028_v5, %v10016_v22  ;;  %v16789_v20 = vor.u32 %v18255_v30, %v16786_v9  ;;  %v17418_v22 = vld [vmem:[#allocation10 + $0x2f4] sm:$0xf0]  ;;  %v13064_v9 = vld [vmem:[#allocation10 + $0x8] sm:$0xf] }
 0x395   :  { %10280 = vmatpush.bf16.msra.mxu2 %v13161_v46  ;;  %10293 = vmatpush.bf16.msra.mxu3 %v13289_v15  ;;  %v16930_v46 = vld [vmem:[#allocation10 + $0x1e50] sm:$0xf0]  ;;  %v13112_v15 = vld [vmem:[#allocation10 + $0x68] sm:$0xf] }
 0x396   :  { %v16933_v47 = vor.u32 %v18291_v41, %v16930_v46  ;;  %v13113_v21 = vor.u32 %v17338_v12, %v13112_v15  ;;  %v13225_v41 = vor.u32 %v17366_v53, %v13224_v0  ;;  %v13080_v46 = vld [vmem:[#allocation10 + $0x28] sm:$0xf]  ;;  %v17362_v12 = vld [vmem:[#allocation10 + $0x134] sm:$0xf0] }
 0x397   :  { %10244 = vmatpush.bf16.msrb.mxu0 %v16821_v60  ;;  %10257 = vmatpush.bf16.msrb.mxu1 %v16949_v42  ;;  %v18251_v60 = vld [vmem:[#allocation10 + $0x1d04] sm:$0xf]  ;;  %v13432_v15 = vld [vmem:[#allocation10 + $0x2e8] sm:$0xf]  ;;  %v17358_v53 = vld [vmem:[#allocation10 + $0x114] sm:$0xf0] }
 0x398   :  { %17055 = vmatmul.msk.bf16.vlgmr.msrb.gmra.mxu2 %vm9443_vm3, %v19727_v23  ;;  %v16773_v18 = vor.u32 %v18251_v60, %v16770_v40  ;;  %v13433_v30 = vor.u32 %v17418_v22, %v13432_v15  ;;  %v13192_v0 = vld [vmem:[#allocation10 + $0x108] sm:$0xf]  ;;  %v17482_v40 = vld [vmem:[#allocation10 + $0x4f4] sm:$0xf0] }
 0x399   :  { %10281 = vmatpush.bf16.msra.mxu2 %v13145_v27  ;;  %10294 = vmatpush.bf16.msra.mxu3 %v13273_v36  ;;  %v18287_v27 = vld [vmem:[#allocation10 + $0x1e24] sm:$0xf]  ;;  %v16914_v36 = vld [vmem:[#allocation10 + $0x1e30] sm:$0xf0]  ;;  %v13688_v60 = vld [vmem:[#allocation10 + $0x4e8] sm:$0xf] }
 0x39a   :  { %v16917_v42 = vor.u32 %v18287_v27, %v16914_v36  ;;  %v17326_v27 = vld [vmem:[#allocation10 + $0x14] sm:$0xf0]  ;;  %v13416_v36 = vld [vmem:[#allocation10 + $0x2c8] sm:$0xf]  ;;  %v13689_v15 = vor.u32 %v17482_v40, %v13688_v60 }
 0x39b   :  { %10245 = vmatpush.bf16.msrb.mxu0 %v16805_v45  ;;  %10258 = vmatpush.bf16.msrb.mxu1 %v16933_v47  ;;  %v17450_v45 = vld [vmem:[#allocation10 + $0x3f4] sm:$0xf0]  ;;  %v16901_v47 = vor.u32 %v18283_v39, %v16898_v62  ;;  %v10030_v5 = vpop.f32.mrf.mxu3  ;;  %v13816_v39 = vld [vmem:[#allocation10 + $0x5e8] sm:$0xf] }
 0x39c   :  { %v17514_v62 = vld [vmem:[#allocation10 + $0x5f4] sm:$0xf0]  ;;  %v13400_v22 = vld [vmem:[#allocation10 + $0x2a8] sm:$0xf] }
 0x39d   :  { %10282 = vmatpush.bf16.msra.mxu2 %v13129_v51  ;;  %10295 = vmatpush.bf16.msra.mxu3 %v13257_v14  ;;  %v10017_v51 = vpop.f32.mrf.mxu2  ;;  %v13097_v14 = vor.u32 %v17334_v28, %v13096_v4  ;;  %v17414_v4 = vld [vmem:[#allocation10 + $0x2d4] sm:$0xf0]  ;;  %v13561_v28 = vor.u32 %v17450_v45, %v13560_v57  ;;  %v13672_v57 = vld [vmem:[#allocation10 + $0x4c8] sm:$0xf] }
 0x39e   :  { %v13544_v51 = vld [vmem:[#allocation10 + $0x3c8] sm:$0xf]  ;;  %v17478_v45 = vld [vmem:[#allocation10 + $0x4d4] sm:$0xf0] }
 0x39f   :  { %10246 = vmatpush.bf16.msrb.mxu0 %v16789_v20  ;;  %10259 = vmatpush.bf16.msrb.mxu1 %v16917_v42  ;;  %v17446_v20 = vld [vmem:[#allocation10 + $0x3d4] sm:$0xf0]  ;;  %v13417_v42 = vor.u32 %v17414_v4, %v13416_v36  ;;  %v13384_v5 = vld [vmem:[#allocation10 + $0x288] sm:$0xf] }
 0x3a0   :  { %v13512_v36 = vld [vmem:[#allocation10 + $0x388] sm:$0xf]  ;;  %v17506_v40 = vld [vmem:[#allocation10 + $0x5b4] sm:$0xf0] }
 0x3a1   :  { %10283 = vmatpush.bf16.msra.mxu2 %v13113_v21  ;;  %10296 = vmatpush.bf16.msra.mxu3 %v13241_v6  ;;  %v13081_v21 = vor.u32 %v17330_v37, %v13080_v46  ;;  %v13209_v6 = vor.u32 %v17362_v12, %v13208_v48  ;;  %v13545_v46 = vor.u32 %v17446_v20, %v13544_v51  ;;  %v17410_v37 = vld [vmem:[#allocation10 + $0x2b4] sm:$0xf0]  ;;  %v13528_v48 = vld [vmem:[#allocation10 + $0x3a8] sm:$0xf] }
 0x3a2   :  { %v13817_v12 = vor.u32 %v17514_v62, %v13816_v39  ;;  %v13784_v60 = vld [vmem:[#allocation10 + $0x5a8] sm:$0xf] }
 0x3a3   :  { %10247 = vmatpush.bf16.msrb.mxu0 %v16773_v18  ;;  %10260 = vmatpush.bf16.msrb.mxu1 %v16901_v47  ;;  %v17442_v18 = vld [vmem:[#allocation10 + $0x3b4] sm:$0xf0]  ;;  %v13800_v47 = vld [vmem:[#allocation10 + $0x5c8] sm:$0xf]  ;;  %v10041_v51 = vpop.f32.mrf.mxu0  ;;  %v10054_v20 = vpop.f32.mrf.mxu1 }
 0x3a5   :  { %10284 = vmatpush.bf16.msra.mxu2 %v13097_v14  ;;  %10297 = vmatpush.bf16.msra.mxu3 %v13225_v41  ;;  %v13065_v14 = vor.u32 %v17326_v27, %v13064_v9  ;;  %v13193_v41 = vor.u32 %v17358_v53, %v13192_v0  ;;  %v13401_v9 = vor.u32 %v17410_v37, %v13400_v22  ;;  %v17406_v27 = vld [vmem:[#allocation10 + $0x294] sm:$0xf0]  ;;  %v13656_v0 = vld [vmem:[#allocation10 + $0x4a8] sm:$0xf] }
 0x3a6   :  { %10248 = vmatmul.bf16.vlgmr.msrb.gmra.mxu0 %v19380_v13  ;;  %10261 = vmatmul.bf16.vlgmr.msrb.gmra.mxu1 %v19382_v25  ;;  %v17474_v53 = vld [vmem:[#allocation10 + $0x4b4] sm:$0xf0]  ;;  %v13385_v39 = vor.u32 %v17406_v27, %v13384_v5  ;;  %v13785_v37 = vor.u32 %v17506_v40, %v13784_v60 }
 0x3a7   :  { %10305 = vmatpush.bf16.msra.mxu0 %v13433_v30  ;;  %10318 = vmatpush.bf16.msra.mxu1 %v13561_v28  ;;  %v17510_v30 = vld [vmem:[#allocation10 + $0x5d4] sm:$0xf0] }
 0x3a8   :  { %v13801_v4 = vor.u32 %v17510_v30, %v13800_v47  ;;  %v17438_v28 = vld [vmem:[#allocation10 + $0x394] sm:$0xf0] }
 0x3a9   :  { %10285 = vmatpush.bf16.msra.mxu2 %v13081_v21  ;;  %10298 = vmatpush.bf16.msra.mxu3 %v13209_v6  ;;  %v13529_v21 = vor.u32 %v17442_v18, %v13528_v48  ;;  %v13673_v6 = vor.u32 %v17478_v45, %v13672_v57  ;;  %v13513_v62 = vor.u32 %v17438_v28, %v13512_v36  ;;  %v17434_v48 = vld [vmem:[#allocation10 + $0x374] sm:$0xf0]  ;;  %v13768_v57 = vld [vmem:[#allocation10 + $0x588] sm:$0xf] }
 0x3aa   :  { %v17470_v18 = vld [vmem:[#allocation10 + $0x494] sm:$0xf0] }
 0x3ab   :  { %10306 = vmatpush.bf16.msra.mxu0 %v13417_v42  ;;  %10319 = vmatpush.bf16.msra.mxu1 %v13545_v46  ;;  %v10042_v42 = vadd.f32 %v10041_v51, %v19446_v2  ;;  %v17402_v46 = vld [vmem:[#allocation10 + $0x274] sm:$0xf0]  ;;  %v10067_v5 = vpop.f32.mrf.mxu2  ;;  %v10056_v51 = vpop.f32.mrf.mxu1 }
 0x3ac   :  { %v17502_v45 = vld [vmem:[#allocation10 + $0x594] sm:$0xf0] }
 0x3ad   :  { %10286 = vmatpush.bf16.msra.mxu2 %v13065_v14  ;;  %10299 = vmatpush.bf16.msra.mxu3 %v13193_v41  ;;  %v13657_v14 = vor.u32 %v17474_v53, %v13656_v0  ;;  %v13368_v41 = vld [vmem:[#allocation10 + $0x268] sm:$0xf]  ;;  %v10055_v22 = vadd.f32 %v10054_v20, %v10042_v42  ;;  %v13769_v27 = vor.u32 %v17502_v45, %v13768_v57  ;;  %v17430_v36 = vld [vmem:[#allocation10 + $0x354] sm:$0xf0]  ;;  %v10043_v53 = vpop.f32.mrf.mxu0 }
 0x3ae   :  { %v13369_v47 = vor.u32 %v17402_v46, %v13368_v41  ;;  %v17466_v28 = vld [vmem:[#allocation10 + $0x474] sm:$0xf0]  ;;  %v13752_v20 = vld [vmem:[#allocation10 + $0x568] sm:$0xf] }
 0x3af   :  { %10307 = vmatpush.bf16.msra.mxu0 %v13401_v9  ;;  %10320 = vmatpush.bf16.msra.mxu1 %v13529_v21  ;;  %v13352_v9 = vld [vmem:[#allocation10 + $0x248] sm:$0xf]  ;;  %v17398_v21 = vld [vmem:[#allocation10 + $0x254] sm:$0xf0]  ;;  %v10068_v0 = vadd.f32 %v10067_v5, %v10055_v22 }
 0x3b0   :  { %10287 = vmatmul.bf16.vlgmr.msra.gmra.mxu2 %v19200_v63  ;;  %10300 = vmatmul.bf16.vlgmr.msra.gmra.mxu3 %v19202_v34  ;;  %v17498_v60 = vld [vmem:[#allocation10 + $0x574] sm:$0xf0]  ;;  %v13353_v40 = vor.u32 %v17398_v21, %v13352_v9  ;;  %v13464_v41 = vld [vmem:[#allocation10 + $0x328] sm:$0xf] }
 0x3b1   :  { %10331 = vmatpush.bf16.msrb.mxu2 %v13689_v15  ;;  %10344 = vmatpush.bf16.msrb.mxu3 %v13817_v12  ;;  %v13496_v15 = vld [vmem:[#allocation10 + $0x368] sm:$0xf]  ;;  %v13753_v46 = vor.u32 %v17498_v60, %v13752_v20  ;;  %v17494_v57 = vld [vmem:[#allocation10 + $0x554] sm:$0xf0] }
 0x3b2   :  { %v13640_v12 = vld [vmem:[#allocation10 + $0x488] sm:$0xf]  ;;  %v13497_v2 = vor.u32 %v17434_v48, %v13496_v15  ;;  %v17390_v9 = vld [vmem:[#allocation10 + $0x214] sm:$0xf0] }
 0x3b3   :  { %10308 = vmatpush.bf16.msra.mxu0 %v13385_v39  ;;  %10321 = vmatpush.bf16.msra.mxu1 %v13513_v62  ;;  %v13641_v30 = vor.u32 %v17470_v18, %v13640_v12  ;;  %v13336_v62 = vld [vmem:[#allocation10 + $0x228] sm:$0xf]  ;;  %v10080_v15 = vpop.f32.mrf.mxu3  ;;  %v17462_v12 = vld [vmem:[#allocation10 + $0x454] sm:$0xf0]  ;;  %v10069_v5 = vpop.f32.mrf.mxu2 }
 0x3b4   :  { %v13608_v48 = vld [vmem:[#allocation10 + $0x448] sm:$0xf]  ;;  %v19453_v22 = vadd.f32 %v10080_v15, %v10068_v0  ;;  %v17490_v0 = vld [vmem:[#allocation10 + $0x534] sm:$0xf0] }
 0x3b5   :  { %10332 = vmatpush.bf16.msrb.mxu2 %v13673_v6  ;;  %10345 = vmatpush.bf16.msrb.mxu3 %v13801_v4  ;;  %v13480_v6 = vld [vmem:[#allocation10 + $0x348] sm:$0xf]  ;;  %v17546_v51 = vld [vmem:[#allocation10 + $0x6f4] sm:$0xf0] }
 0x3b6   :  { %v13624_v4 = vld [vmem:[#allocation10 + $0x468] sm:$0xf]  ;;  %v13481_v42 = vor.u32 %v17430_v36, %v13480_v6  ;;  %v17422_v6 = vld [vmem:[#allocation10 + $0x314] sm:$0xf0] }
 0x3b7   :  { %10309 = vmatpush.bf16.msra.mxu0 %v13369_v47  ;;  %10322 = vmatpush.bf16.msra.mxu1 %v13497_v2  ;;  %v13625_v39 = vor.u32 %v17466_v28, %v13624_v4  ;;  %v13736_v18 = vld [vmem:[#allocation10 + $0x548] sm:$0xf]  ;;  %v17458_v4 = vld [vmem:[#allocation10 + $0x434] sm:$0xf0] }
 0x3b8   :  { %v13320_v47 = vld [vmem:[#allocation10 + $0x208] sm:$0xf]  ;;  %v17454_v15 = vld [vmem:[#allocation10 + $0x414] sm:$0xf0] }
 0x3b9   :  { %10333 = vmatpush.bf16.msrb.mxu2 %v13657_v14  ;;  %10346 = vmatpush.bf16.msrb.mxu3 %v13785_v37  ;;  %v17394_v14 = vld [vmem:[#allocation10 + $0x234] sm:$0xf0]  ;;  %v13448_v21 = vld [vmem:[#allocation10 + $0x308] sm:$0xf]  ;;  %v13321_v20 = vor.u32 %v17390_v9, %v13320_v47 }
 0x3ba   :  { %v17426_v37 = vld [vmem:[#allocation10 + $0x334] sm:$0xf0]  ;;  %v13337_v45 = vor.u32 %v17394_v14, %v13336_v62  ;;  %v13592_v36 = vld [vmem:[#allocation10 + $0x428] sm:$0xf] }
 0x3bb   :  { %10310 = vmatpush.bf16.msra.mxu0 %v13353_v40  ;;  %10323 = vmatpush.bf16.msra.mxu1 %v13481_v42  ;;  %v13465_v2 = vor.u32 %v17426_v37, %v13464_v41  ;;  %v13720_v28 = vld [vmem:[#allocation10 + $0x528] sm:$0xf]  ;;  %v17578_v40 = vld [vmem:[#allocation10 + $0x7f4] sm:$0xf0]  ;;  %v13449_v42 = vor.u32 %v17422_v6, %v13448_v21 }
 0x3bc   :  { %v13944_v53 = vld [vmem:[#allocation10 + $0x6e8] sm:$0xf]  ;;  %v13721_v14 = vor.u32 %v17490_v0, %v13720_v28  ;;  %v17610_v9 = vld [vmem:[#allocation10 + $0x8f4] sm:$0xf0] }
 0x3bd   :  { %10334 = vmatpush.bf16.msrb.mxu2 %v13641_v30  ;;  %10347 = vmatpush.bf16.msrb.mxu3 %v13769_v27  ;;  %v13609_v30 = vor.u32 %v17462_v12, %v13608_v48  ;;  %v13737_v27 = vor.u32 %v17494_v57, %v13736_v18  ;;  %v14072_v60 = vld [vmem:[#allocation10 + $0x7e8] sm:$0xf]  ;;  %v13945_v41 = vor.u32 %v17546_v51, %v13944_v53  ;;  %v17486_v48 = vld [vmem:[#allocation10 + $0x514] sm:$0xf0] }
 0x3be   :  { %v13576_v62 = vld [vmem:[#allocation10 + $0x408] sm:$0xf]  ;;  %v14073_v12 = vor.u32 %v17578_v40, %v14072_v60  ;;  %v17542_v57 = vld [vmem:[#allocation10 + $0x6d4] sm:$0xf0] }
 0x3bf   :  { %10311 = vmatpush.bf16.msra.mxu0 %v13337_v45  ;;  %10324 = vmatpush.bf16.msra.mxu1 %v13465_v2  ;;  %v13704_v37 = vld [vmem:[#allocation10 + $0x508] sm:$0xf]  ;;  %v17574_v45 = vld [vmem:[#allocation10 + $0x7d4] sm:$0xf0]  ;;  %v13577_v2 = vor.u32 %v17454_v15, %v13576_v62 }
 0x3c0   :  { %v13928_v18 = vld [vmem:[#allocation10 + $0x6c8] sm:$0xf]  ;;  %v17642_v21 = vld [vmem:[#allocation10 + $0x9f4] sm:$0xf0]  ;;  %v13705_v6 = vor.u32 %v17486_v48, %v13704_v37 }
 0x3c1   :  { %10335 = vmatpush.bf16.msrb.mxu2 %v13625_v39  ;;  %10348 = vmatpush.bf16.msrb.mxu3 %v13753_v46  ;;  %v13593_v39 = vor.u32 %v17458_v4, %v13592_v36  ;;  %v10082_v46 = vpop.f32.mrf.mxu3  ;;  %v14056_v5 = vld [vmem:[#allocation10 + $0x7c8] sm:$0xf]  ;;  %v17538_v0 = vld [vmem:[#allocation10 + $0x6b4] sm:$0xf0] }
 0x3c2   :  { %v14200_v47 = vld [vmem:[#allocation10 + $0x8e8] sm:$0xf]  ;;  %v14057_v36 = vor.u32 %v17574_v45, %v14056_v5  ;;  %v17606_v40 = vld [vmem:[#allocation10 + $0x8d4] sm:$0xf0] }
 0x3c3   :  { %10312 = vmatpush.bf16.msra.mxu0 %v13321_v20  ;;  %10325 = vmatpush.bf16.msra.mxu1 %v13449_v42  ;;  %v14201_v4 = vor.u32 %v17610_v9, %v14200_v47  ;;  %v13912_v28 = vld [vmem:[#allocation10 + $0x6a8] sm:$0xf]  ;;  %v17570_v20 = vld [vmem:[#allocation10 + $0x7b4] sm:$0xf0]  ;;  %v10093_v5 = vpop.f32.mrf.mxu0  ;;  %v10106_v45 = vpop.f32.mrf.mxu1 }
 0x3c4   :  { %v14040_v53 = vld [vmem:[#allocation10 + $0x7a8] sm:$0xf]  ;;  %v13913_v62 = vor.u32 %v17538_v0, %v13912_v28  ;;  %v17534_v15 = vld [vmem:[#allocation10 + $0x694] sm:$0xf0] }
 0x3c5   :  { %10336 = vmatpush.bf16.msrb.mxu2 %v13609_v30  ;;  %10349 = vmatpush.bf16.msrb.mxu3 %v13737_v27  ;;  %v14328_v30 = vld [vmem:[#allocation10 + $0x9e8] sm:$0xf]  ;;  %v13929_v27 = vor.u32 %v17542_v57, %v13928_v18  ;;  %v17602_v57 = vld [vmem:[#allocation10 + $0x8b4] sm:$0xf0] }
 0x3c6   :  { %10313 = vmatmul.bf16.vlgmr.msra.gmra.mxu0 %v19204_v1  ;;  %10326 = vmatmul.bf16.vlgmr.msra.gmra.mxu1 %v19206_v52  ;;  %v14329_v51 = vor.u32 %v17642_v21, %v14328_v30  ;;  %v14184_v60 = vld [vmem:[#allocation10 + $0x8c8] sm:$0xf]  ;;  %v17634_v9 = vld [vmem:[#allocation10 + $0x9b4] sm:$0xf0] }
 0x3c7   :  { %10357 = vmatpush.bf16.msrb.mxu0 %v13945_v41  ;;  %10370 = vmatpush.bf16.msrb.mxu1 %v14073_v12  ;;  %v14312_v42 = vld [vmem:[#allocation10 + $0x9c8] sm:$0xf]  ;;  %v14185_v41 = vor.u32 %v17606_v40, %v14184_v60  ;;  %v17566_v12 = vld [vmem:[#allocation10 + $0x794] sm:$0xf0] }
 0x3c8   :  { %v13896_v46 = vld [vmem:[#allocation10 + $0x688] sm:$0xf]  ;;  %v17630_v40 = vld [vmem:[#allocation10 + $0x994] sm:$0xf0] }
 0x3c9   :  { %10337 = vmatpush.bf16.msrb.mxu2 %v13593_v39  ;;  %10350 = vmatpush.bf16.msrb.mxu3 %v13721_v14  ;;  %v17638_v39 = vld [vmem:[#allocation10 + $0x9d4] sm:$0xf0]  ;;  %v14041_v14 = vor.u32 %v17570_v20, %v14040_v53  ;;  %v14024_v37 = vld [vmem:[#allocation10 + $0x788] sm:$0xf]  ;;  %v13897_v30 = vor.u32 %v17534_v15, %v13896_v46 }
 0x3ca   :  { %v14313_v48 = vor.u32 %v17638_v39, %v14312_v42  ;;  %v14168_v18 = vld [vmem:[#allocation10 + $0x8a8] sm:$0xf]  ;;  %v14025_v21 = vor.u32 %v17566_v12, %v14024_v37  ;;  %v17562_v53 = vld [vmem:[#allocation10 + $0x774] sm:$0xf0] }
 0x3cb   :  { %10358 = vmatpush.bf16.msrb.mxu0 %v13929_v27  ;;  %10371 = vmatpush.bf16.msrb.mxu1 %v14057_v36  ;;  %v14296_v47 = vld [vmem:[#allocation10 + $0x9a8] sm:$0xf]  ;;  %v17530_v36 = vld [vmem:[#allocation10 + $0x674] sm:$0xf0]  ;;  %v10119_v46 = vpop.f32.mrf.mxu2 }
 0x3cc   :  { %v13880_v27 = vld [vmem:[#allocation10 + $0x668] sm:$0xf]  ;;  %v14297_v0 = vor.u32 %v17634_v9, %v14296_v47  ;;  %v17598_v20 = vld [vmem:[#allocation10 + $0x894] sm:$0xf0] }
 0x3cd   :  { %10338 = vmatpush.bf16.msrb.mxu2 %v13577_v2  ;;  %10351 = vmatpush.bf16.msrb.mxu3 %v13705_v6  ;;  %v10094_v2 = vadd.f32 %v10093_v5, %v19453_v22  ;;  %v14169_v6 = vor.u32 %v17602_v57, %v14168_v18  ;;  %v14280_v60 = vld [vmem:[#allocation10 + $0x988] sm:$0xf]  ;;  %v13881_v42 = vor.u32 %v17530_v36, %v13880_v27  ;;  %v17558_v37 = vld [vmem:[#allocation10 + $0x754] sm:$0xf0]  ;;  %v10095_v57 = vpop.f32.mrf.mxu0  ;;  %v10108_v5 = vpop.f32.mrf.mxu1 }
 0x3ce   :  { %v14281_v15 = vor.u32 %v17630_v40, %v14280_v60  ;;  %v17594_v12 = vld [vmem:[#allocation10 + $0x874] sm:$0xf0]  ;;  %v13976_v27 = vld [vmem:[#allocation10 + $0x728] sm:$0xf] }
 0x3cf   :  { %10359 = vmatpush.bf16.msrb.mxu0 %v13913_v62  ;;  %10372 = vmatpush.bf16.msrb.mxu1 %v14041_v14  ;;  %v10107_v28 = vadd.f32 %v10106_v45, %v10094_v2  ;;  %v13864_v62 = vld [vmem:[#allocation10 + $0x648] sm:$0xf]  ;;  %v17526_v14 = vld [vmem:[#allocation10 + $0x654] sm:$0xf0] }
 0x3d0   :  { %10339 = vmatmul.bf16.vlgmr.msrb.gmra.mxu2 %v19231_v61  ;;  %10352 = vmatmul.bf16.vlgmr.msrb.gmra.mxu3 %v19233_v59  ;;  %v14264_v45 = vld [vmem:[#allocation10 + $0x968] sm:$0xf]  ;;  %v17626_v47 = vld [vmem:[#allocation10 + $0x974] sm:$0xf0]  ;;  %v13865_v9 = vor.u32 %v17526_v14, %v13864_v62 }
 0x3d1   :  { %10383 = vmatpush.bf16.msra.mxu2 %v14201_v4  ;;  %10396 = vmatpush.bf16.msra.mxu3 %v14329_v51  ;;  %v14008_v4 = vld [vmem:[#allocation10 + $0x768] sm:$0xf]  ;;  %v10120_v18 = vadd.f32 %v10119_v46, %v10107_v28  ;;  %v14265_v36 = vor.u32 %v17626_v47, %v14264_v45  ;;  %v17622_v60 = vld [vmem:[#allocation10 + $0x954] sm:$0xf0] }
 0x3d2   :  { %v14152_v51 = vld [vmem:[#allocation10 + $0x888] sm:$0xf]  ;;  %v14009_v22 = vor.u32 %v17562_v53, %v14008_v4  ;;  %v17518_v62 = vld [vmem:[#allocation10 + $0x614] sm:$0xf0] }
 0x3d3   :  { %10360 = vmatpush.bf16.msrb.mxu0 %v13897_v30  ;;  %10373 = vmatpush.bf16.msrb.mxu1 %v14025_v21  ;;  %v14153_v39 = vor.u32 %v17598_v20, %v14152_v51  ;;  %v13848_v21 = vld [vmem:[#allocation10 + $0x628] sm:$0xf]  ;;  %v10132_v4 = vpop.f32.mrf.mxu3  ;;  %v17590_v51 = vld [vmem:[#allocation10 + $0x854] sm:$0xf0]  ;;  %v10121_v46 = vpop.f32.mrf.mxu2 }
 0x3d4   :  { %v14120_v53 = vld [vmem:[#allocation10 + $0x848] sm:$0xf]  ;;  %v19460_v28 = vadd.f32 %v10132_v4, %v10120_v18  ;;  %v17618_v18 = vld [vmem:[#allocation10 + $0x934] sm:$0xf0] }
 0x3d5   :  { %10384 = vmatpush.bf16.msra.mxu2 %v14185_v41  ;;  %10397 = vmatpush.bf16.msra.mxu3 %v14313_v48  ;;  %v13992_v41 = vld [vmem:[#allocation10 + $0x748] sm:$0xf]  ;;  %v17674_v5 = vld [vmem:[#allocation10 + $0xaf4] sm:$0xf0] }
 0x3d6   :  { %v14136_v48 = vld [vmem:[#allocation10 + $0x868] sm:$0xf]  ;;  %v13993_v2 = vor.u32 %v17558_v37, %v13992_v41  ;;  %v17550_v41 = vld [vmem:[#allocation10 + $0x714] sm:$0xf0] }
 0x3d7   :  { %10361 = vmatpush.bf16.msrb.mxu0 %v13881_v42  ;;  %10374 = vmatpush.bf16.msrb.mxu1 %v14009_v22  ;;  %v14137_v30 = vor.u32 %v17594_v12, %v14136_v48  ;;  %v14248_v20 = vld [vmem:[#allocation10 + $0x948] sm:$0xf]  ;;  %v17586_v48 = vld [vmem:[#allocation10 + $0x834] sm:$0xf0] }
 0x3d8   :  { %v13832_v42 = vld [vmem:[#allocation10 + $0x608] sm:$0xf]  ;;  %v17582_v4 = vld [vmem:[#allocation10 + $0x814] sm:$0xf0] }
 0x3d9   :  { %10385 = vmatpush.bf16.msra.mxu2 %v14169_v6  ;;  %10398 = vmatpush.bf16.msra.mxu3 %v14297_v0  ;;  %v17522_v6 = vld [vmem:[#allocation10 + $0x634] sm:$0xf0]  ;;  %v13960_v14 = vld [vmem:[#allocation10 + $0x708] sm:$0xf]  ;;  %v13833_v45 = vor.u32 %v17518_v62, %v13832_v42 }
 0x3da   :  { %v17554_v0 = vld [vmem:[#allocation10 + $0x734] sm:$0xf0]  ;;  %v13849_v40 = vor.u32 %v17522_v6, %v13848_v21  ;;  %v14104_v37 = vld [vmem:[#allocation10 + $0x828] sm:$0xf] }
 0x3db   :  { %10362 = vmatpush.bf16.msrb.mxu0 %v13865_v9  ;;  %10375 = vmatpush.bf16.msrb.mxu1 %v13993_v2  ;;  %v13977_v22 = vor.u32 %v17554_v0, %v13976_v27  ;;  %v14232_v12 = vld [vmem:[#allocation10 + $0x928] sm:$0xf]  ;;  %v17706_v9 = vld [vmem:[#allocation10 + $0xbf4] sm:$0xf0]  ;;  %v13961_v2 = vor.u32 %v17550_v41, %v13960_v14 }
 0x3dc   :  { %v14456_v57 = vld [vmem:[#allocation10 + $0xae8] sm:$0xf]  ;;  %v14233_v6 = vor.u32 %v17618_v18, %v14232_v12  ;;  %v17738_v62 = vld [vmem:[#allocation10 + $0xcf4] sm:$0xf0] }
 0x3dd   :  { %10386 = vmatpush.bf16.msra.mxu2 %v14153_v39  ;;  %10399 = vmatpush.bf16.msra.mxu3 %v14281_v15  ;;  %v14121_v39 = vor.u32 %v17590_v51, %v14120_v53  ;;  %v14249_v15 = vor.u32 %v17622_v60, %v14248_v20  ;;  %v14584_v47 = vld [vmem:[#allocation10 + $0xbe8] sm:$0xf]  ;;  %v14457_v27 = vor.u32 %v17674_v5, %v14456_v57  ;;  %v17614_v53 = vld [vmem:[#allocation10 + $0x914] sm:$0xf0] }
 0x3de   :  { %v14088_v21 = vld [vmem:[#allocation10 + $0x808] sm:$0xf]  ;;  %v14585_v51 = vor.u32 %v17706_v9, %v14584_v47  ;;  %v17670_v60 = vld [vmem:[#allocation10 + $0xad4] sm:$0xf0] }
 0x3df   :  { %10363 = vmatpush.bf16.msrb.mxu0 %v13849_v40  ;;  %10376 = vmatpush.bf16.msrb.mxu1 %v13977_v22  ;;  %v14216_v0 = vld [vmem:[#allocation10 + $0x908] sm:$0xf]  ;;  %v17702_v40 = vld [vmem:[#allocation10 + $0xbd4] sm:$0xf0]  ;;  %v14089_v22 = vor.u32 %v17582_v4, %v14088_v21 }
 0x3e0   :  { %v14440_v20 = vld [vmem:[#allocation10 + $0xac8] sm:$0xf]  ;;  %v17770_v14 = vld [vmem:[#allocation10 + $0xdf4] sm:$0xf0]  ;;  %v14217_v41 = vor.u32 %v17614_v53, %v14216_v0 }
 0x3e1   :  { %10387 = vmatpush.bf16.msra.mxu2 %v14137_v30  ;;  %10400 = vmatpush.bf16.msra.mxu3 %v14265_v36  ;;  %v14105_v30 = vor.u32 %v17586_v48, %v14104_v37  ;;  %v10134_v36 = vpop.f32.mrf.mxu3  ;;  %v14568_v46 = vld [vmem:[#allocation10 + $0xbc8] sm:$0xf]  ;;  %v17666_v18 = vld [vmem:[#allocation10 + $0xab4] sm:$0xf0] }
 0x3e2   :  { %v14712_v42 = vld [vmem:[#allocation10 + $0xce8] sm:$0xf]  ;;  %v14569_v37 = vor.u32 %v17702_v40, %v14568_v46  ;;  %v17734_v9 = vld [vmem:[#allocation10 + $0xcd4] sm:$0xf0] }
 0x3e3   :  { %10364 = vmatpush.bf16.msrb.mxu0 %v13833_v45  ;;  %10377 = vmatpush.bf16.msrb.mxu1 %v13961_v2  ;;  %v14713_v48 = vor.u32 %v17738_v62, %v14712_v42  ;;  %v14424_v12 = vld [vmem:[#allocation10 + $0xaa8] sm:$0xf]  ;;  %v17698_v45 = vld [vmem:[#allocation10 + $0xbb4] sm:$0xf0]  ;;  %v10145_v46 = vpop.f32.mrf.mxu0  ;;  %v10158_v40 = vpop.f32.mrf.mxu1 }
 0x3e4   :  { %v14552_v57 = vld [vmem:[#allocation10 + $0xba8] sm:$0xf]  ;;  %v14425_v21 = vor.u32 %v17666_v18, %v14424_v12  ;;  %v17662_v4 = vld [vmem:[#allocation10 + $0xa94] sm:$0xf0] }
 0x3e5   :  { %10388 = vmatpush.bf16.msra.mxu2 %v14121_v39  ;;  %10401 = vmatpush.bf16.msra.mxu3 %v14249_v15  ;;  %v14840_v39 = vld [vmem:[#allocation10 + $0xde8] sm:$0xf]  ;;  %v14441_v15 = vor.u32 %v17670_v60, %v14440_v20  ;;  %v17730_v60 = vld [vmem:[#allocation10 + $0xcb4] sm:$0xf0] }
 0x3e6   :  { %10365 = vmatmul.bf16.vlgmr.msrb.gmra.mxu0 %v19235_v44  ;;  %10378 = vmatmul.bf16.vlgmr.msrb.gmra.mxu1 %v19237_v3  ;;  %v14841_v5 = vor.u32 %v17770_v14, %v14840_v39  ;;  %v14696_v47 = vld [vmem:[#allocation10 + $0xcc8] sm:$0xf]  ;;  %v17762_v62 = vld [vmem:[#allocation10 + $0xdb4] sm:$0xf0] }
 0x3e7   :  { %10409 = vmatpush.bf16.msra.mxu0 %v14457_v27  ;;  %10422 = vmatpush.bf16.msra.mxu1 %v14585_v51  ;;  %v14824_v2 = vld [vmem:[#allocation10 + $0xdc8] sm:$0xf]  ;;  %v14697_v27 = vor.u32 %v17734_v9, %v14696_v47  ;;  %v17694_v51 = vld [vmem:[#allocation10 + $0xb94] sm:$0xf0] }
 0x3e8   :  { %v14408_v36 = vld [vmem:[#allocation10 + $0xa88] sm:$0xf]  ;;  %v17758_v9 = vld [vmem:[#allocation10 + $0xd94] sm:$0xf0] }
 0x3e9   :  { %10389 = vmatpush.bf16.msra.mxu2 %v14105_v30  ;;  %10402 = vmatpush.bf16.msra.mxu3 %v14233_v6  ;;  %v17766_v30 = vld [vmem:[#allocation10 + $0xdd4] sm:$0xf0]  ;;  %v14553_v6 = vor.u32 %v17698_v45, %v14552_v57  ;;  %v14536_v0 = vld [vmem:[#allocation10 + $0xb88] sm:$0xf]  ;;  %v14409_v39 = vor.u32 %v17662_v4, %v14408_v36 }
 0x3ea   :  { %v14825_v53 = vor.u32 %v17766_v30, %v14824_v2  ;;  %v14680_v20 = vld [vmem:[#allocation10 + $0xca8] sm:$0xf]  ;;  %v14537_v14 = vor.u32 %v17694_v51, %v14536_v0  ;;  %v17690_v57 = vld [vmem:[#allocation10 + $0xb74] sm:$0xf0] }
 0x3eb   :  { %10410 = vmatpush.bf16.msra.mxu0 %v14441_v15  ;;  %10423 = vmatpush.bf16.msra.mxu1 %v14569_v37  ;;  %v14808_v42 = vld [vmem:[#allocation10 + $0xda8] sm:$0xf]  ;;  %v17658_v37 = vld [vmem:[#allocation10 + $0xa74] sm:$0xf0]  ;;  %v10171_v36 = vpop.f32.mrf.mxu2 }
 0x3ec   :  { %v14392_v15 = vld [vmem:[#allocation10 + $0xa68] sm:$0xf]  ;;  %v14809_v18 = vor.u32 %v17762_v62, %v14808_v42  ;;  %v17726_v45 = vld [vmem:[#allocation10 + $0xc94] sm:$0xf0] }
 0x3ed   :  { %10390 = vmatpush.bf16.msra.mxu2 %v14089_v22  ;;  %10403 = vmatpush.bf16.msra.mxu3 %v14217_v41  ;;  %v10146_v22 = vadd.f32 %v10145_v46, %v19460_v28  ;;  %v14681_v41 = vor.u32 %v17730_v60, %v14680_v20  ;;  %v14792_v47 = vld [vmem:[#allocation10 + $0xd88] sm:$0xf]  ;;  %v14393_v2 = vor.u32 %v17658_v37, %v14392_v15  ;;  %v17686_v0 = vld [vmem:[#allocation10 + $0xb54] sm:$0xf0]  ;;  %v10147_v60 = vpop.f32.mrf.mxu0  ;;  %v10160_v46 = vpop.f32.mrf.mxu1 }
 0x3ee   :  { %v14793_v4 = vor.u32 %v17758_v9, %v14792_v47  ;;  %v17722_v51 = vld [vmem:[#allocation10 + $0xc74] sm:$0xf0]  ;;  %v14488_v15 = vld [vmem:[#allocation10 + $0xb28] sm:$0xf] }
 0x3ef   :  { %10411 = vmatpush.bf16.msra.mxu0 %v14425_v21  ;;  %10424 = vmatpush.bf16.msra.mxu1 %v14553_v6  ;;  %v10159_v12 = vadd.f32 %v10158_v40, %v10146_v22  ;;  %v14376_v21 = vld [vmem:[#allocation10 + $0xa48] sm:$0xf]  ;;  %v17654_v6 = vld [vmem:[#allocation10 + $0xa54] sm:$0xf0] }
 0x3f0   :  { %10391 = vmatmul.bf16.vlgmr.msra.gmra.mxu2 %v19256_v17  ;;  %10404 = vmatmul.bf16.vlgmr.msra.gmra.mxu3 %v19258_v11  ;;  %v14776_v40 = vld [vmem:[#allocation10 + $0xd68] sm:$0xf]  ;;  %v17754_v42 = vld [vmem:[#allocation10 + $0xd74] sm:$0xf0]  ;;  %v14377_v62 = vor.u32 %v17654_v6, %v14376_v21 }
 0x3f1   :  { %10435 = vmatpush.bf16.msrb.mxu2 %v14713_v48  ;;  %10448 = vmatpush.bf16.msrb.mxu3 %v14841_v5  ;;  %v14520_v48 = vld [vmem:[#allocation10 + $0xb68] sm:$0xf]  ;;  %v10172_v20 = vadd.f32 %v10171_v36, %v10159_v12  ;;  %v14777_v37 = vor.u32 %v17754_v42, %v14776_v40  ;;  %v17750_v47 = vld [vmem:[#allocation10 + $0xd54] sm:$0xf0] }
 0x3f2   :  { %v14664_v5 = vld [vmem:[#allocation10 + $0xc88] sm:$0xf]  ;;  %v14521_v28 = vor.u32 %v17690_v57, %v14520_v48  ;;  %v17646_v21 = vld [vmem:[#allocation10 + $0xa14] sm:$0xf0] }
 0x3f3   :  { %10412 = vmatpush.bf16.msra.mxu0 %v14409_v39  ;;  %10425 = vmatpush.bf16.msra.mxu1 %v14537_v14  ;;  %v14665_v30 = vor.u32 %v17726_v45, %v14664_v5  ;;  %v14360_v14 = vld [vmem:[#allocation10 + $0xa28] sm:$0xf]  ;;  %v10184_v48 = vpop.f32.mrf.mxu3  ;;  %v17718_v5 = vld [vmem:[#allocation10 + $0xc54] sm:$0xf0]  ;;  %v10173_v36 = vpop.f32.mrf.mxu2 }
 0x3f4   :  { %v14632_v57 = vld [vmem:[#allocation10 + $0xc48] sm:$0xf]  ;;  %v19467_v12 = vadd.f32 %v10184_v48, %v10172_v20  ;;  %v17746_v20 = vld [vmem:[#allocation10 + $0xd34] sm:$0xf0] }
 0x3f5   :  { %10436 = vmatpush.bf16.msrb.mxu2 %v14697_v27  ;;  %10449 = vmatpush.bf16.msrb.mxu3 %v14825_v53  ;;  %v14504_v27 = vld [vmem:[#allocation10 + $0xb48] sm:$0xf]  ;;  %v17802_v46 = vld [vmem:[#allocation10 + $0xef4] sm:$0xf0] }
 0x3f6   :  { %v14648_v53 = vld [vmem:[#allocation10 + $0xc68] sm:$0xf]  ;;  %v14505_v22 = vor.u32 %v17686_v0, %v14504_v27  ;;  %v17678_v27 = vld [vmem:[#allocation10 + $0xb14] sm:$0xf0] }
 0x3f7   :  { %10413 = vmatpush.bf16.msra.mxu0 %v14393_v2  ;;  %10426 = vmatpush.bf16.msra.mxu1 %v14521_v28  ;;  %v14649_v39 = vor.u32 %v17722_v51, %v14648_v53  ;;  %v14760_v45 = vld [vmem:[#allocation10 + $0xd48] sm:$0xf]  ;;  %v17714_v53 = vld [vmem:[#allocation10 + $0xc34] sm:$0xf0] }
 0x3f8   :  { %v14344_v2 = vld [vmem:[#allocation10 + $0xa08] sm:$0xf]  ;;  %v17710_v48 = vld [vmem:[#allocation10 + $0xc14] sm:$0xf0] }
 0x3f9   :  { %10437 = vmatpush.bf16.msrb.mxu2 %v14681_v41  ;;  %10450 = vmatpush.bf16.msrb.mxu3 %v14809_v18  ;;  %v17650_v41 = vld [vmem:[#allocation10 + $0xa34] sm:$0xf0]  ;;  %v14472_v6 = vld [vmem:[#allocation10 + $0xb08] sm:$0xf]  ;;  %v14345_v40 = vor.u32 %v17646_v21, %v14344_v2 }
 0x3fa   :  { %v17682_v18 = vld [vmem:[#allocation10 + $0xb34] sm:$0xf0]  ;;  %v14361_v9 = vor.u32 %v17650_v41, %v14360_v14  ;;  %v14616_v0 = vld [vmem:[#allocation10 + $0xc28] sm:$0xf] }
 0x3fb   :  { %10414 = vmatpush.bf16.msra.mxu0 %v14377_v62  ;;  %10427 = vmatpush.bf16.msra.mxu1 %v14505_v22  ;;  %v14489_v28 = vor.u32 %v17682_v18, %v14488_v15  ;;  %v14744_v51 = vld [vmem:[#allocation10 + $0xd28] sm:$0xf]  ;;  %v17834_v62 = vld [vmem:[#allocation10 + $0xff4] sm:$0xf0]  ;;  %v14473_v22 = vor.u32 %v17678_v27, %v14472_v6 }
 0x3fc   :  { %v14968_v60 = vld [vmem:[#allocation10 + $0xee8] sm:$0xf]  ;;  %v14745_v41 = vor.u32 %v17746_v20, %v14744_v51  ;;  %v17866_v21 = vld [vmem:[#allocation10 + $0x10f4] sm:$0xf0] }
 0x3fd   :  { %10438 = vmatpush.bf16.msrb.mxu2 %v14665_v30  ;;  %10451 = vmatpush.bf16.msrb.mxu3 %v14793_v4  ;;  %v14633_v30 = vor.u32 %v17718_v5, %v14632_v57  ;;  %v14761_v4 = vor.u32 %v17750_v47, %v14760_v45  ;;  %v15096_v42 = vld [vmem:[#allocation10 + $0xfe8] sm:$0xf]  ;;  %v14969_v15 = vor.u32 %v17802_v46, %v14968_v60  ;;  %v17742_v57 = vld [vmem:[#allocation10 + $0xd14] sm:$0xf0] }
 0x3fe   :  { %v14600_v14 = vld [vmem:[#allocation10 + $0xc08] sm:$0xf]  ;;  %v15097_v5 = vor.u32 %v17834_v62, %v15096_v42  ;;  %v17798_v47 = vld [vmem:[#allocation10 + $0xed4] sm:$0xf0] }
 0x3ff   :  { %10415 = vmatpush.bf16.msra.mxu0 %v14361_v9  ;;  %10428 = vmatpush.bf16.msra.mxu1 %v14489_v28  ;;  %v14728_v18 = vld [vmem:[#allocation10 + $0xd08] sm:$0xf]  ;;  %v17830_v9 = vld [vmem:[#allocation10 + $0xfd4] sm:$0xf0]  ;;  %v14601_v28 = vor.u32 %v17710_v48, %v14600_v14 }
 0x400   :  { %v14952_v45 = vld [vmem:[#allocation10 + $0xec8] sm:$0xf]  ;;  %v17898_v6 = vld [vmem:[#allocation10 + $0x11f4] sm:$0xf0]  ;;  %v14729_v27 = vor.u32 %v17742_v57, %v14728_v18 }
 0x401   :  { %10439 = vmatpush.bf16.msrb.mxu2 %v14649_v39  ;;  %10452 = vmatpush.bf16.msrb.mxu3 %v14777_v37  ;;  %v14617_v39 = vor.u32 %v17714_v53, %v14616_v0  ;;  %v10186_v37 = vpop.f32.mrf.mxu3  ;;  %v15080_v36 = vld [vmem:[#allocation10 + $0xfc8] sm:$0xf]  ;;  %v17794_v20 = vld [vmem:[#allocation10 + $0xeb4] sm:$0xf0] }
 0x402   :  { %v15224_v2 = vld [vmem:[#allocation10 + $0x10e8] sm:$0xf]  ;;  %v15081_v0 = vor.u32 %v17830_v9, %v15080_v36  ;;  %v17862_v62 = vld [vmem:[#allocation10 + $0x10d4] sm:$0xf0] }
 0x403   :  { %10416 = vmatpush.bf16.msra.mxu0 %v14345_v40  ;;  %10429 = vmatpush.bf16.msra.mxu1 %v14473_v22  ;;  %v15225_v53 = vor.u32 %v17866_v21, %v15224_v2  ;;  %v14936_v51 = vld [vmem:[#allocation10 + $0xea8] sm:$0xf]  ;;  %v17826_v40 = vld [vmem:[#allocation10 + $0xfb4] sm:$0xf0]  ;;  %v10197_v36 = vpop.f32.mrf.mxu0  ;;  %v10210_v9 = vpop.f32.mrf.mxu1 }
 0x404   :  { %v15064_v60 = vld [vmem:[#allocation10 + $0xfa8] sm:$0xf]  ;;  %v14937_v14 = vor.u32 %v17794_v20, %v14936_v51  ;;  %v17790_v48 = vld [vmem:[#allocation10 + $0xe94] sm:$0xf0] }
 0x405   :  { %10440 = vmatpush.bf16.msrb.mxu2 %v14633_v30  ;;  %10453 = vmatpush.bf16.msrb.mxu3 %v14761_v4  ;;  %v15352_v30 = vld [vmem:[#allocation10 + $0x11e8] sm:$0xf]  ;;  %v14953_v4 = vor.u32 %v17798_v47, %v14952_v45  ;;  %v17858_v47 = vld [vmem:[#allocation10 + $0x10b4] sm:$0xf0] }
 0x406   :  { %10417 = vmatmul.bf16.vlgmr.msra.gmra.mxu0 %v19260_v32  ;;  %10430 = vmatmul.bf16.vlgmr.msra.gmra.mxu1 %v19262_v24  ;;  %v15353_v46 = vor.u32 %v17898_v6, %v15352_v30  ;;  %v15208_v42 = vld [vmem:[#allocation10 + $0x10c8] sm:$0xf]  ;;  %v17890_v21 = vld [vmem:[#allocation10 + $0x11b4] sm:$0xf0] }
 0x407   :  { %10461 = vmatpush.bf16.msrb.mxu0 %v14969_v15  ;;  %10474 = vmatpush.bf16.msrb.mxu1 %v15097_v5  ;;  %v15336_v22 = vld [vmem:[#allocation10 + $0x11c8] sm:$0xf]  ;;  %v15209_v15 = vor.u32 %v17862_v62, %v15208_v42  ;;  %v17822_v5 = vld [vmem:[#allocation10 + $0xf94] sm:$0xf0] }
 0x408   :  { %v14920_v37 = vld [vmem:[#allocation10 + $0xe88] sm:$0xf]  ;;  %v17886_v62 = vld [vmem:[#allocation10 + $0x1194] sm:$0xf0] }
 0x409   :  { %10441 = vmatpush.bf16.msrb.mxu2 %v14617_v39  ;;  %10454 = vmatpush.bf16.msrb.mxu3 %v14745_v41  ;;  %v17894_v39 = vld [vmem:[#allocation10 + $0x11d4] sm:$0xf0]  ;;  %v15065_v41 = vor.u32 %v17826_v40, %v15064_v60  ;;  %v15048_v18 = vld [vmem:[#allocation10 + $0xf88] sm:$0xf]  ;;  %v14921_v30 = vor.u32 %v17790_v48, %v14920_v37 }
 0x40a   :  { %v15337_v57 = vor.u32 %v17894_v39, %v15336_v22  ;;  %v15192_v45 = vld [vmem:[#allocation10 + $0x10a8] sm:$0xf]  ;;  %v15049_v6 = vor.u32 %v17822_v5, %v15048_v18  ;;  %v17818_v60 = vld [vmem:[#allocation10 + $0xf74] sm:$0xf0] }
 0x40b   :  { %10462 = vmatpush.bf16.msrb.mxu0 %v14953_v4  ;;  %10475 = vmatpush.bf16.msrb.mxu1 %v15081_v0  ;;  %v15320_v2 = vld [vmem:[#allocation10 + $0x11a8] sm:$0xf]  ;;  %v17786_v0 = vld [vmem:[#allocation10 + $0xe74] sm:$0xf0]  ;;  %v10223_v37 = vpop.f32.mrf.mxu2 }
 0x40c   :  { %v14904_v4 = vld [vmem:[#allocation10 + $0xe68] sm:$0xf]  ;;  %v15321_v20 = vor.u32 %v17890_v21, %v15320_v2  ;;  %v17854_v40 = vld [vmem:[#allocation10 + $0x1094] sm:$0xf0] }
 0x40d   :  { %10442 = vmatpush.bf16.msrb.mxu2 %v14601_v28  ;;  %10455 = vmatpush.bf16.msrb.mxu3 %v14729_v27  ;;  %v10198_v28 = vadd.f32 %v10197_v36, %v19467_v12  ;;  %v15193_v27 = vor.u32 %v17858_v47, %v15192_v45  ;;  %v15304_v42 = vld [vmem:[#allocation10 + $0x1188] sm:$0xf]  ;;  %v14905_v22 = vor.u32 %v17786_v0, %v14904_v4  ;;  %v17814_v18 = vld [vmem:[#allocation10 + $0xf54] sm:$0xf0]  ;;  %v10199_v47 = vpop.f32.mrf.mxu0  ;;  %v10212_v36 = vpop.f32.mrf.mxu1 }
 0x40e   :  { %v15305_v48 = vor.u32 %v17886_v62, %v15304_v42  ;;  %v17850_v5 = vld [vmem:[#allocation10 + $0x1074] sm:$0xf0]  ;;  %v15000_v4 = vld [vmem:[#allocation10 + $0xf28] sm:$0xf] }
 0x40f   :  { %10463 = vmatpush.bf16.msrb.mxu0 %v14937_v14  ;;  %10476 = vmatpush.bf16.msrb.mxu1 %v15065_v41  ;;  %v10211_v51 = vadd.f32 %v10210_v9, %v10198_v28  ;;  %v14888_v14 = vld [vmem:[#allocation10 + $0xe48] sm:$0xf]  ;;  %v17782_v41 = vld [vmem:[#allocation10 + $0xe54] sm:$0xf0] }
 0x410   :  { %10443 = vmatmul.bf16.vlgmr.msrb.gmra.mxu2 %v19278_v33  ;;  %10456 = vmatmul.bf16.vlgmr.msrb.gmra.mxu3 %v19280_v7  ;;  %v15288_v9 = vld [vmem:[#allocation10 + $0x1168] sm:$0xf]  ;;  %v17882_v2 = vld [vmem:[#allocation10 + $0x1174] sm:$0xf0]  ;;  %v14889_v21 = vor.u32 %v17782_v41, %v14888_v14 }
 0x411   :  { %10487 = vmatpush.bf16.msra.mxu2 %v15225_v53  ;;  %10500 = vmatpush.bf16.msra.mxu3 %v15353_v46  ;;  %v15032_v53 = vld [vmem:[#allocation10 + $0xf68] sm:$0xf]  ;;  %v10224_v45 = vadd.f32 %v10223_v37, %v10211_v51  ;;  %v15289_v0 = vor.u32 %v17882_v2, %v15288_v9  ;;  %v17878_v42 = vld [vmem:[#allocation10 + $0x1154] sm:$0xf0] }
 0x412   :  { %v15176_v46 = vld [vmem:[#allocation10 + $0x1088] sm:$0xf]  ;;  %v15033_v12 = vor.u32 %v17818_v60, %v15032_v53  ;;  %v17774_v14 = vld [vmem:[#allocation10 + $0xe14] sm:$0xf0] }
 0x413   :  { %10464 = vmatpush.bf16.msrb.mxu0 %v14921_v30  ;;  %10477 = vmatpush.bf16.msrb.mxu1 %v15049_v6  ;;  %v15177_v39 = vor.u32 %v17854_v40, %v15176_v46  ;;  %v14872_v6 = vld [vmem:[#allocation10 + $0xe28] sm:$0xf]  ;;  %v10236_v53 = vpop.f32.mrf.mxu3  ;;  %v17846_v46 = vld [vmem:[#allocation10 + $0x1054] sm:$0xf0]  ;;  %v10225_v37 = vpop.f32.mrf.mxu2 }
 0x414   :  { %v15144_v60 = vld [vmem:[#allocation10 + $0x1048] sm:$0xf]  ;;  %v19474_v51 = vadd.f32 %v10236_v53, %v10224_v45  ;;  %v17874_v45 = vld [vmem:[#allocation10 + $0x1134] sm:$0xf0] }
 0x415   :  { %10488 = vmatpush.bf16.msra.mxu2 %v15209_v15  ;;  %10501 = vmatpush.bf16.msra.mxu3 %v15337_v57  ;;  %v15016_v15 = vld [vmem:[#allocation10 + $0xf48] sm:$0xf]  ;;  %v17930_v36 = vld [vmem:[#allocation10 + $0x12f4] sm:$0xf0] }
 0x416   :  { %v15160_v57 = vld [vmem:[#allocation10 + $0x1068] sm:$0xf]  ;;  %v15017_v28 = vor.u32 %v17814_v18, %v15016_v15  ;;  %v17806_v15 = vld [vmem:[#allocation10 + $0xf14] sm:$0xf0] }
 0x417   :  { %10465 = vmatpush.bf16.msrb.mxu0 %v14905_v22  ;;  %10478 = vmatpush.bf16.msrb.mxu1 %v15033_v12  ;;  %v15161_v30 = vor.u32 %v17850_v5, %v15160_v57  ;;  %v15272_v40 = vld [vmem:[#allocation10 + $0x1148] sm:$0xf]  ;;  %v17842_v57 = vld [vmem:[#allocation10 + $0x1034] sm:$0xf0] }
 0x418   :  { %v14856_v22 = vld [vmem:[#allocation10 + $0xe08] sm:$0xf]  ;;  %v17838_v53 = vld [vmem:[#allocation10 + $0x1014] sm:$0xf0] }
 0x419   :  { %10489 = vmatpush.bf16.msra.mxu2 %v15193_v27  ;;  %10502 = vmatpush.bf16.msra.mxu3 %v15321_v20  ;;  %v17778_v27 = vld [vmem:[#allocation10 + $0xe34] sm:$0xf0]  ;;  %v14984_v41 = vld [vmem:[#allocation10 + $0xf08] sm:$0xf]  ;;  %v14857_v9 = vor.u32 %v17774_v14, %v14856_v22 }
 0x41a   :  { %v17810_v20 = vld [vmem:[#allocation10 + $0xf34] sm:$0xf0]  ;;  %v14873_v62 = vor.u32 %v17778_v27, %v14872_v6  ;;  %v15128_v18 = vld [vmem:[#allocation10 + $0x1028] sm:$0xf] }
 0x41b   :  { %10466 = vmatpush.bf16.msrb.mxu0 %v14889_v21  ;;  %10479 = vmatpush.bf16.msrb.mxu1 %v15017_v28  ;;  %v15001_v12 = vor.u32 %v17810_v20, %v15000_v4  ;;  %v15256_v5 = vld [vmem:[#allocation10 + $0x1128] sm:$0xf]  ;;  %v17962_v21 = vld [vmem:[#allocation10 + $0x13f4] sm:$0xf0]  ;;  %v14985_v28 = vor.u32 %v17806_v15, %v14984_v41  ;;  %v10275_v15 = vpop.f32.mrf.mxu2 }
 0x41c   :  { %v15480_v47 = vld [vmem:[#allocation10 + $0x12e8] sm:$0xf]  ;;  %v15257_v27 = vor.u32 %v17874_v45, %v15256_v5  ;;  %v17994_v14 = vld [vmem:[#allocation10 + $0x14f4] sm:$0xf0] }
 0x41d   :  { %10490 = vmatpush.bf16.msra.mxu2 %v15177_v39  ;;  %10503 = vmatpush.bf16.msra.mxu3 %v15305_v48  ;;  %v15145_v39 = vor.u32 %v17846_v46, %v15144_v60  ;;  %v15273_v48 = vor.u32 %v17878_v42, %v15272_v40  ;;  %v15608_v2 = vld [vmem:[#allocation10 + $0x13e8] sm:$0xf]  ;;  %v15481_v4 = vor.u32 %v17930_v36, %v15480_v47  ;;  %v17870_v60 = vld [vmem:[#allocation10 + $0x1114] sm:$0xf0] }
 0x41e   :  { %v15112_v6 = vld [vmem:[#allocation10 + $0x1008] sm:$0xf]  ;;  %v15609_v46 = vor.u32 %v17962_v21, %v15608_v2  ;;  %v17926_v42 = vld [vmem:[#allocation10 + $0x12d4] sm:$0xf0] }
 0x41f   :  { %10467 = vmatpush.bf16.msrb.mxu0 %v14873_v62  ;;  %10480 = vmatpush.bf16.msrb.mxu1 %v15001_v12  ;;  %v15240_v20 = vld [vmem:[#allocation10 + $0x1108] sm:$0xf]  ;;  %v17958_v62 = vld [vmem:[#allocation10 + $0x13d4] sm:$0xf0]  ;;  %v15113_v12 = vor.u32 %v17838_v53, %v15112_v6 }
 0x420   :  { %v15464_v40 = vld [vmem:[#allocation10 + $0x12c8] sm:$0xf]  ;;  %v18026_v41 = vld [vmem:[#allocation10 + $0x15f4] sm:$0xf0] }
 0x421   :  { %10491 = vmatpush.bf16.msra.mxu2 %v15161_v30  ;;  %10504 = vmatpush.bf16.msra.mxu3 %v15289_v0  ;;  %v15129_v30 = vor.u32 %v17842_v57, %v15128_v18  ;;  %v10238_v0 = vpop.f32.mrf.mxu3  ;;  %v15592_v37 = vld [vmem:[#allocation10 + $0x13c8] sm:$0xf]  ;;  %v15465_v18 = vor.u32 %v17926_v42, %v15464_v40  ;;  %v17922_v47 = vld [vmem:[#allocation10 + $0x12b4] sm:$0xf0] }
 0x422   :  { %v15736_v22 = vld [vmem:[#allocation10 + $0x14e8] sm:$0xf]  ;;  %v15593_v57 = vor.u32 %v17958_v62, %v15592_v37  ;;  %v17954_v2 = vld [vmem:[#allocation10 + $0x13b4] sm:$0xf0] }
 0x423   :  { %10468 = vmatpush.bf16.msrb.mxu0 %v14857_v9  ;;  %10481 = vmatpush.bf16.msrb.mxu1 %v14985_v28  ;;  %v15737_v5 = vor.u32 %v17994_v14, %v15736_v22  ;;  %v15448_v45 = vld [vmem:[#allocation10 + $0x12a8] sm:$0xf]  ;;  %v17990_v28 = vld [vmem:[#allocation10 + $0x14d4] sm:$0xf0]  ;;  %v10249_v40 = vpop.f32.mrf.mxu0  ;;  %v10262_v14 = vpop.f32.mrf.mxu1 }
 0x424   :  { %v15576_v36 = vld [vmem:[#allocation10 + $0x13a8] sm:$0xf]  ;;  %v18022_v6 = vld [vmem:[#allocation10 + $0x15d4] sm:$0xf0]  ;;  %v10250_v22 = vadd.f32 %v10249_v40, %v19474_v51 }
 0x425   :  { %10492 = vmatpush.bf16.msra.mxu2 %v15145_v39  ;;  %10505 = vmatpush.bf16.msra.mxu3 %v15273_v48  ;;  %v15864_v39 = vld [vmem:[#allocation10 + $0x15e8] sm:$0xf]  ;;  %v15241_v48 = vor.u32 %v17870_v60, %v15240_v20  ;;  %v17918_v20 = vld [vmem:[#allocation10 + $0x1294] sm:$0xf0] }
 0x426   :  { %10469 = vmatmul.bf16.vlgmr.msrb.gmra.mxu0 %v19282_v38  ;;  %10482 = vmatmul.bf16.vlgmr.msrb.gmra.mxu1 %v19284_v35  ;;  %v15865_v9 = vor.u32 %v18026_v41, %v15864_v39  ;;  %v15720_v21 = vld [vmem:[#allocation10 + $0x14c8] sm:$0xf]  ;;  %v17950_v42 = vld [vmem:[#allocation10 + $0x1394] sm:$0xf0]  ;;  %v10277_v41 = vpop.f32.mrf.mxu2 }
 0x427   :  { %10513 = vmatpush.bf16.msra.mxu0 %v15481_v4  ;;  %10526 = vmatpush.bf16.msra.mxu1 %v15609_v46  ;;  %v15577_v4 = vor.u32 %v17954_v2, %v15576_v36  ;;  %v15721_v0 = vor.u32 %v17990_v28, %v15720_v21  ;;  %v15432_v53 = vld [vmem:[#allocation10 + $0x1288] sm:$0xf]  ;;  %v17986_v62 = vld [vmem:[#allocation10 + $0x14b4] sm:$0xf0] }
 0x428   :  { %v15560_v60 = vld [vmem:[#allocation10 + $0x1388] sm:$0xf]  ;;  %v18018_v39 = vld [vmem:[#allocation10 + $0x15b4] sm:$0xf0] }
 0x429   :  { %10493 = vmatpush.bf16.msra.mxu2 %v15129_v30  ;;  %10506 = vmatpush.bf16.msra.mxu3 %v15257_v27  ;;  %v15848_v30 = vld [vmem:[#allocation10 + $0x15c8] sm:$0xf]  ;;  %v15449_v27 = vor.u32 %v17922_v47, %v15448_v45  ;;  %v17914_v47 = vld [vmem:[#allocation10 + $0x1274] sm:$0xf0] }
 0x42a   :  { %v15849_v46 = vor.u32 %v18022_v6, %v15848_v30  ;;  %v15704_v37 = vld [vmem:[#allocation10 + $0x14a8] sm:$0xf]  ;;  %v17946_v2 = vld [vmem:[#allocation10 + $0x1374] sm:$0xf0] }
 0x42b   :  { %10514 = vmatpush.bf16.msra.mxu0 %v15465_v18  ;;  %10527 = vmatpush.bf16.msra.mxu1 %v15593_v57  ;;  %v10263_v18 = vadd.f32 %v10262_v14, %v10250_v22  ;;  %v15561_v57 = vor.u32 %v17950_v42, %v15560_v60  ;;  %v15416_v45 = vld [vmem:[#allocation10 + $0x1268] sm:$0xf]  ;;  %v17982_v28 = vld [vmem:[#allocation10 + $0x1494] sm:$0xf0]  ;;  %v10264_v22 = vpop.f32.mrf.mxu1 }
 0x42c   :  { %v15544_v36 = vld [vmem:[#allocation10 + $0x1368] sm:$0xf]  ;;  %v18014_v6 = vld [vmem:[#allocation10 + $0x1594] sm:$0xf0] }
 0x42d   :  { %10494 = vmatpush.bf16.msra.mxu2 %v15113_v12  ;;  %10507 = vmatpush.bf16.msra.mxu3 %v15241_v48  ;;  %v15832_v12 = vld [vmem:[#allocation10 + $0x15a8] sm:$0xf]  ;;  %v15433_v48 = vor.u32 %v17918_v20, %v15432_v53  ;;  %v19481_v51 = vadd.f32 %v10275_v15, %v10263_v18  ;;  %v17910_v20 = vld [vmem:[#allocation10 + $0x1254] sm:$0xf0] }
 0x42e   :  { %v15688_v21 = vld [vmem:[#allocation10 + $0x1488] sm:$0xf]  ;;  %v17942_v42 = vld [vmem:[#allocation10 + $0x1354] sm:$0xf0] }
 0x42f   :  { %10515 = vmatpush.bf16.msra.mxu0 %v15449_v27  ;;  %10528 = vmatpush.bf16.msra.mxu1 %v15577_v4  ;;  %19728 = vst [vmem:[#allocation26_spill] sm:$0xff] %v19481_v51  ;;  %v15816_v30 = vld [vmem:[#allocation10 + $0x1588] sm:$0xf]  ;;  %v15417_v27 = vor.u32 %v17914_v47, %v15416_v45  ;;  %v15545_v4 = vor.u32 %v17946_v2, %v15544_v36  ;;  %v18010_v14 = vld [vmem:[#allocation10 + $0x1574] sm:$0xf0] }
 0x430   :  { %10495 = vmatmul.bf16.vlgmr.msra.gmra.mxu2 %v19303_v10  ;;  %10508 = vmatmul.bf16.vlgmr.msra.gmra.mxu3 %v19305_v16  ;;  %v15400_v53 = vld [vmem:[#allocation10 + $0x1248] sm:$0xf]  ;;  %v15817_v40 = vor.u32 %v18014_v6, %v15816_v30  ;;  %v17906_v18 = vld [vmem:[#allocation10 + $0x1234] sm:$0xf0] }
 0x431   :  { %10539 = vmatpush.bf16.msrb.mxu2 %v15737_v5  ;;  %10552 = vmatpush.bf16.msrb.mxu3 %v15865_v9  ;;  %v15705_v5 = vor.u32 %v17986_v62, %v15704_v37  ;;  %v15833_v9 = vor.u32 %v18018_v39, %v15832_v12  ;;  %v15528_v60 = vld [vmem:[#allocation10 + $0x1348] sm:$0xf]  ;;  %v17978_v62 = vld [vmem:[#allocation10 + $0x1474] sm:$0xf0]  ;;  %v15401_v12 = vor.u32 %v17910_v20, %v15400_v53 }
 0x432   :  { %v15672_v37 = vld [vmem:[#allocation10 + $0x1468] sm:$0xf]  ;;  %v15529_v39 = vor.u32 %v17942_v42, %v15528_v60  ;;  %v17938_v36 = vld [vmem:[#allocation10 + $0x1334] sm:$0xf0] }
 0x433   :  { %10516 = vmatpush.bf16.msra.mxu0 %v15433_v48  ;;  %10529 = vmatpush.bf16.msra.mxu1 %v15561_v57  ;;  %v15800_v15 = vld [vmem:[#allocation10 + $0x1568] sm:$0xf]  ;;  %v15673_v41 = vor.u32 %v17978_v62, %v15672_v37  ;;  %v10288_v45 = vpop.f32.mrf.mxu2  ;;  %v10301_v47 = vpop.f32.mrf.mxu3  ;;  %v17974_v2 = vld [vmem:[#allocation10 + $0x1454] sm:$0xf0] }
 0x434   :  { %v15384_v48 = vld [vmem:[#allocation10 + $0x1228] sm:$0xf]  ;;  %v18006_v6 = vld [vmem:[#allocation10 + $0x1554] sm:$0xf0] }
 0x435   :  { %10540 = vmatpush.bf16.msrb.mxu2 %v15721_v0  ;;  %10553 = vmatpush.bf16.msrb.mxu3 %v15849_v46  ;;  %v15689_v0 = vor.u32 %v17982_v28, %v15688_v21  ;;  %v10251_v46 = vpop.f32.mrf.mxu0  ;;  %v15512_v57 = vld [vmem:[#allocation10 + $0x1328] sm:$0xf]  ;;  %v19729_v21 = vld [vmem:[#allocation34_spill] sm:$0xff]  ;;  %v17902_v60 = vld [vmem:[#allocation10 + $0x1214] sm:$0xf0] }
 0x436   :  { %v10289_v28 = vadd.f32 %v10288_v45, %v19729_v21  ;;  %v15784_v30 = vld [vmem:[#allocation10 + $0x1548] sm:$0xf]  ;;  %v15513_v53 = vor.u32 %v17938_v36, %v15512_v57  ;;  %v17934_v46 = vld [vmem:[#allocation10 + $0x1314] sm:$0xf0] }
 0x437   :  { %10517 = vmatpush.bf16.msra.mxu0 %v15417_v27  ;;  %10530 = vmatpush.bf16.msra.mxu1 %v15545_v4  ;;  %v15385_v27 = vor.u32 %v17906_v18, %v15384_v48  ;;  %v15368_v4 = vld [vmem:[#allocation10 + $0x1208] sm:$0xf]  ;;  %v15785_v42 = vor.u32 %v18006_v6, %v15784_v30  ;;  %v17970_v62 = vld [vmem:[#allocation10 + $0x1434] sm:$0xf0] }
 0x438   :  { %v15640_v37 = vld [vmem:[#allocation10 + $0x1428] sm:$0xf]  ;;  %v18058_v45 = vld [vmem:[#allocation10 + $0x16f4] sm:$0xf0] }
 0x439   :  { %10541 = vmatpush.bf16.msrb.mxu2 %v15705_v5  ;;  %10554 = vmatpush.bf16.msrb.mxu3 %v15833_v9  ;;  %v15801_v5 = vor.u32 %v18010_v14, %v15800_v15  ;;  %v15656_v9 = vld [vmem:[#allocation10 + $0x1448] sm:$0xf]  ;;  %v18002_v15 = vld [vmem:[#allocation10 + $0x1534] sm:$0xf0]  ;;  %v15641_v18 = vor.u32 %v17970_v62, %v15640_v37 }
 0x43a   :  { %v15657_v20 = vor.u32 %v17974_v2, %v15656_v9  ;;  %v15768_v22 = vld [vmem:[#allocation10 + $0x1528] sm:$0xf]  ;;  %v17966_v2 = vld [vmem:[#allocation10 + $0x1414] sm:$0xf0] }
 0x43b   :  { %10518 = vmatpush.bf16.msra.mxu0 %v15401_v12  ;;  %10531 = vmatpush.bf16.msra.mxu1 %v15529_v39  ;;  %v15992_v14 = vld [vmem:[#allocation10 + $0x16e8] sm:$0xf]  ;;  %v15369_v12 = vor.u32 %v17902_v60, %v15368_v4  ;;  %v18090_v39 = vld [vmem:[#allocation10 + $0x17f4] sm:$0xf0]  ;;  %v10303_v9 = vpop.f32.mrf.mxu3 }
 0x43c   :  { %v16120_v48 = vld [vmem:[#allocation10 + $0x17e8] sm:$0xf]  ;;  %v15993_v36 = vor.u32 %v18058_v45, %v15992_v14  ;;  %v18054_v51 = vld [vmem:[#allocation10 + $0x16d4] sm:$0xf0] }
 0x43d   :  { %10542 = vmatpush.bf16.msrb.mxu2 %v15689_v0  ;;  %10555 = vmatpush.bf16.msrb.mxu3 %v15817_v40  ;;  %v19484_v0 = vadd.f32 %v10301_v47, %v10289_v28  ;;  %v15496_v40 = vld [vmem:[#allocation10 + $0x1308] sm:$0xf]  ;;  %v15769_v47 = vor.u32 %v18002_v15, %v15768_v22  ;;  %v17998_v28 = vld [vmem:[#allocation10 + $0x1514] sm:$0xf0]  ;;  %v16121_v30 = vor.u32 %v18090_v39, %v16120_v48 }
 0x43e   :  { %v15624_v57 = vld [vmem:[#allocation10 + $0x1408] sm:$0xf]  ;;  %v18086_v4 = vld [vmem:[#allocation10 + $0x17d4] sm:$0xf0] }
 0x43f   :  { %10519 = vmatpush.bf16.msra.mxu0 %v15385_v27  ;;  %10532 = vmatpush.bf16.msra.mxu1 %v15513_v53  ;;  %v15752_v21 = vld [vmem:[#allocation10 + $0x1508] sm:$0xf]  ;;  %v18122_v53 = vld [vmem:[#allocation10 + $0x18f4] sm:$0xf0] }
 0x440   :  { %v15976_v6 = vld [vmem:[#allocation10 + $0x16c8] sm:$0xf]  ;;  %v18050_v14 = vld [vmem:[#allocation10 + $0x16b4] sm:$0xf0] }
 0x441   :  { %10543 = vmatpush.bf16.msrb.mxu2 %v15673_v41  ;;  %10556 = vmatpush.bf16.msrb.mxu3 %v15801_v5  ;;  %v15497_v41 = vor.u32 %v17934_v46, %v15496_v40  ;;  %v10290_v5 = vpop.f32.mrf.mxu2  ;;  %v16104_v27 = vld [vmem:[#allocation10 + $0x17c8] sm:$0xf]  ;;  %v18154_v46 = vld [vmem:[#allocation10 + $0x19f4] sm:$0xf0]  ;;  %v15977_v37 = vor.u32 %v18054_v51, %v15976_v6 }
 0x442   :  { %v16248_v60 = vld [vmem:[#allocation10 + $0x18e8] sm:$0xf]  ;;  %v16105_v62 = vor.u32 %v18086_v4, %v16104_v27  ;;  %v18082_v48 = vld [vmem:[#allocation10 + $0x17b4] sm:$0xf0] }
 0x443   :  { %10520 = vmatpush.bf16.msra.mxu0 %v15369_v12  ;;  %10533 = vmatpush.bf16.msra.mxu1 %v15497_v41  ;;  %v16376_v40 = vld [vmem:[#allocation10 + $0x19e8] sm:$0xf]  ;;  %v16249_v22 = vor.u32 %v18122_v53, %v16248_v60  ;;  %v18118_v41 = vld [vmem:[#allocation10 + $0x18d4] sm:$0xf0]  ;;  %v10327_v60 = vpop.f32.mrf.mxu1 }
 0x444   :  { %v15960_v15 = vld [vmem:[#allocation10 + $0x16a8] sm:$0xf]  ;;  %v16377_v12 = vor.u32 %v18154_v46, %v16376_v40  ;;  %v18046_v9 = vld [vmem:[#allocation10 + $0x1694] sm:$0xf0] }
 0x445   :  { %10544 = vmatpush.bf16.msrb.mxu2 %v15657_v20  ;;  %10557 = vmatpush.bf16.msrb.mxu3 %v15785_v42  ;;  %v15625_v20 = vor.u32 %v17966_v2, %v15624_v57  ;;  %v15753_v42 = vor.u32 %v17998_v28, %v15752_v21  ;;  %v16088_v45 = vld [vmem:[#allocation10 + $0x17a8] sm:$0xf]  ;;  %v18150_v57 = vld [vmem:[#allocation10 + $0x19d4] sm:$0xf0]  ;;  %v15961_v51 = vor.u32 %v18050_v14, %v15960_v15  ;;  %v10314_v28 = vpop.f32.mrf.mxu0 }
 0x446   :  { %10521 = vmatmul.bf16.vlgmr.msra.gmra.mxu0 %v19307_v58  ;;  %10534 = vmatmul.bf16.vlgmr.msra.gmra.mxu1 %v19309_v29  ;;  %v16232_v39 = vld [vmem:[#allocation10 + $0x18c8] sm:$0xf]  ;;  %v18114_v27 = vld [vmem:[#allocation10 + $0x18b4] sm:$0xf0]  ;;  %v10315_v4 = vadd.f32 %v10314_v28, %v19484_v0 }
 0x447   :  { %10565 = vmatpush.bf16.msrb.mxu0 %v15993_v36  ;;  %10578 = vmatpush.bf16.msrb.mxu1 %v16121_v30  ;;  %v16233_v36 = vor.u32 %v18118_v41, %v16232_v39  ;;  %v15944_v5 = vld [vmem:[#allocation10 + $0x1688] sm:$0xf]  ;;  %v18078_v30 = vld [vmem:[#allocation10 + $0x1794] sm:$0xf0] }
 0x448   :  { %v16072_v2 = vld [vmem:[#allocation10 + $0x1788] sm:$0xf]  ;;  %v15945_v40 = vor.u32 %v18046_v9, %v15944_v5  ;;  %v10328_v46 = vadd.f32 %v10327_v60, %v10315_v4  ;;  %v18142_v0 = vld [vmem:[#allocation10 + $0x1994] sm:$0xf0] }
 0x449   :  { %10545 = vmatpush.bf16.msrb.mxu2 %v15641_v18  ;;  %10558 = vmatpush.bf16.msrb.mxu3 %v15769_v47  ;;  %v16360_v18 = vld [vmem:[#allocation10 + $0x19c8] sm:$0xf]  ;;  %v16089_v47 = vor.u32 %v18082_v48, %v16088_v45  ;;  %v18074_v45 = vld [vmem:[#allocation10 + $0x1774] sm:$0xf0] }
 0x44a   :  { %v16361_v21 = vor.u32 %v18150_v57, %v16360_v18  ;;  %v16216_v6 = vld [vmem:[#allocation10 + $0x18a8] sm:$0xf]  ;;  %v18110_v48 = vld [vmem:[#allocation10 + $0x1894] sm:$0xf0] }
 0x44b   :  { %10566 = vmatpush.bf16.msrb.mxu0 %v15977_v37  ;;  %10579 = vmatpush.bf16.msrb.mxu1 %v16105_v62  ;;  %v16344_v53 = vld [vmem:[#allocation10 + $0x19a8] sm:$0xf]  ;;  %v16217_v37 = vor.u32 %v18114_v27, %v16216_v6  ;;  %v18106_v28 = vld [vmem:[#allocation10 + $0x1874] sm:$0xf0] }
 0x44c   :  { %v15928_v62 = vld [vmem:[#allocation10 + $0x1668] sm:$0xf]  ;;  %v18138_v27 = vld [vmem:[#allocation10 + $0x1974] sm:$0xf0] }
 0x44d   :  { %10546 = vmatpush.bf16.msrb.mxu2 %v15625_v20  ;;  %10559 = vmatpush.bf16.msrb.mxu3 %v15753_v42  ;;  %v18146_v20 = vld [vmem:[#allocation10 + $0x19b4] sm:$0xf0]  ;;  %v16073_v42 = vor.u32 %v18078_v30, %v16072_v2  ;;  %v16056_v15 = vld [vmem:[#allocation10 + $0x1768] sm:$0xf]  ;;  %v10316_v9 = vpop.f32.mrf.mxu0  ;;  %v10329_v30 = vpop.f32.mrf.mxu1 }
 0x44e   :  { %v16345_v14 = vor.u32 %v18146_v20, %v16344_v53  ;;  %v16328_v39 = vld [vmem:[#allocation10 + $0x1988] sm:$0xf]  ;;  %v16057_v18 = vor.u32 %v18074_v45, %v16056_v15  ;;  %v18070_v2 = vld [vmem:[#allocation10 + $0x1754] sm:$0xf0] }
 0x44f   :  { %10567 = vmatpush.bf16.msrb.mxu0 %v15961_v51  ;;  %10580 = vmatpush.bf16.msrb.mxu1 %v16089_v47  ;;  %v15912_v51 = vld [vmem:[#allocation10 + $0x1648] sm:$0xf]  ;;  %v18038_v47 = vld [vmem:[#allocation10 + $0x1654] sm:$0xf0]  ;;  %v16329_v5 = vor.u32 %v18142_v0, %v16328_v39 }
 0x450   :  { %10547 = vmatmul.bf16.vlgmr.msrb.gmra.mxu2 %v19326_v50  ;;  %10560 = vmatmul.bf16.vlgmr.msrb.gmra.mxu3 %v19328_v26  ;;  %v16312_v6 = vld [vmem:[#allocation10 + $0x1968] sm:$0xf]  ;;  %v15913_v4 = vor.u32 %v18038_v47, %v15912_v51  ;;  %v18134_v39 = vld [vmem:[#allocation10 + $0x1954] sm:$0xf0] }
 0x451   :  { %10591 = vmatpush.bf16.msra.mxu2 %v16249_v22  ;;  %10604 = vmatpush.bf16.msra.mxu3 %v16377_v12  ;;  %v18042_v22 = vld [vmem:[#allocation10 + $0x1674] sm:$0xf0]  ;;  %v16200_v12 = vld [vmem:[#allocation10 + $0x1888] sm:$0xf] }
 0x452   :  { %v15929_v41 = vor.u32 %v18042_v22, %v15928_v62  ;;  %v16201_v57 = vor.u32 %v18110_v48, %v16200_v12  ;;  %v16313_v62 = vor.u32 %v18138_v27, %v16312_v6  ;;  %v16168_v45 = vld [vmem:[#allocation10 + $0x1848] sm:$0xf]  ;;  %v18102_v12 = vld [vmem:[#allocation10 + $0x1854] sm:$0xf0] }
 0x453   :  { %10568 = vmatpush.bf16.msrb.mxu0 %v15945_v40  ;;  %10581 = vmatpush.bf16.msrb.mxu1 %v16073_v42  ;;  %v10340_v20 = vpop.f32.mrf.mxu2  ;;  %v15896_v40 = vld [vmem:[#allocation10 + $0x1628] sm:$0xf]  ;;  %v18034_v42 = vld [vmem:[#allocation10 + $0x1634] sm:$0xf0]  ;;  %v10353_v15 = vpop.f32.mrf.mxu3  ;;  %v16169_v51 = vor.u32 %v18102_v12, %v16168_v45 }
 0x454   :  { %v10341_v22 = vadd.f32 %v10340_v20, %v10328_v46  ;;  %v16296_v48 = vld [vmem:[#allocation10 + $0x1948] sm:$0xf]  ;;  %v18030_v47 = vld [vmem:[#allocation10 + $0x1614] sm:$0xf0] }
 0x455   :  { %10592 = vmatpush.bf16.msra.mxu2 %v16233_v36  ;;  %10605 = vmatpush.bf16.msra.mxu3 %v16361_v21  ;;  %v16040_v36 = vld [vmem:[#allocation10 + $0x1748] sm:$0xf]  ;;  %v16297_v46 = vor.u32 %v18134_v39, %v16296_v48  ;;  %v18186_v6 = vld [vmem:[#allocation10 + $0x1af4] sm:$0xf0] }
 0x456   :  { %v16184_v21 = vld [vmem:[#allocation10 + $0x1868] sm:$0xf]  ;;  %v16041_v60 = vor.u32 %v18070_v2, %v16040_v36  ;;  %v19491_v0 = vadd.f32 %v10353_v15, %v10341_v22  ;;  %v18098_v2 = vld [vmem:[#allocation10 + $0x1834] sm:$0xf0] }
 0x457   :  { %10569 = vmatpush.bf16.msrb.mxu0 %v15929_v41  ;;  %10582 = vmatpush.bf16.msrb.mxu1 %v16057_v18  ;;  %v16185_v53 = vor.u32 %v18106_v28, %v16184_v21  ;;  %v15897_v41 = vor.u32 %v18034_v42, %v15896_v40  ;;  %v15880_v18 = vld [vmem:[#allocation10 + $0x1608] sm:$0xf]  ;;  %v18130_v28 = vld [vmem:[#allocation10 + $0x1934] sm:$0xf0] }
 0x458   :  { %v16008_v36 = vld [vmem:[#allocation10 + $0x1708] sm:$0xf]  ;;  %v15881_v27 = vor.u32 %v18030_v47, %v15880_v18  ;;  %v18218_v20 = vld [vmem:[#allocation10 + $0x1bf4] sm:$0xf0] }
 0x459   :  { %10593 = vmatpush.bf16.msra.mxu2 %v16217_v37  ;;  %10606 = vmatpush.bf16.msra.mxu3 %v16345_v14  ;;  %v16024_v37 = vld [vmem:[#allocation10 + $0x1728] sm:$0xf]  ;;  %v18066_v14 = vld [vmem:[#allocation10 + $0x1734] sm:$0xf0] }
 0x45a   :  { %v16152_v9 = vld [vmem:[#allocation10 + $0x1828] sm:$0xf]  ;;  %v18094_v15 = vld [vmem:[#allocation10 + $0x1814] sm:$0xf0] }
 0x45b   :  { %10570 = vmatpush.bf16.msrb.mxu0 %v15913_v4  ;;  %10583 = vmatpush.bf16.msrb.mxu1 %v16041_v60  ;;  %v16280_v21 = vld [vmem:[#allocation10 + $0x1928] sm:$0xf]  ;;  %v10342_v40 = vpop.f32.mrf.mxu2  ;;  %v10355_v22 = vpop.f32.mrf.mxu3  ;;  %v18126_v45 = vld [vmem:[#allocation10 + $0x1914] sm:$0xf0] }
 0x45c   :  { %v16504_v30 = vld [vmem:[#allocation10 + $0x1ae8] sm:$0xf]  ;;  %v18182_v39 = vld [vmem:[#allocation10 + $0x1ad4] sm:$0xf0] }
 0x45d   :  { %10594 = vmatpush.bf16.msra.mxu2 %v16201_v57  ;;  %10607 = vmatpush.bf16.msra.mxu3 %v16329_v5  ;;  %v16025_v57 = vor.u32 %v18066_v14, %v16024_v37  ;;  %v18062_v5 = vld [vmem:[#allocation10 + $0x1714] sm:$0xf0]  ;;  %v16632_v4 = vld [vmem:[#allocation10 + $0x1be8] sm:$0xf]  ;;  %v16281_v37 = vor.u32 %v18130_v28, %v16280_v21 }
 0x45e   :  { %v16009_v60 = vor.u32 %v18062_v5, %v16008_v36  ;;  %v16136_v42 = vld [vmem:[#allocation10 + $0x1808] sm:$0xf]  ;;  %v16633_v12 = vor.u32 %v18218_v20, %v16632_v4  ;;  %v18214_v18 = vld [vmem:[#allocation10 + $0x1bd4] sm:$0xf0] }
 0x45f   :  { %10571 = vmatpush.bf16.msrb.mxu0 %v15897_v41  ;;  %10584 = vmatpush.bf16.msrb.mxu1 %v16025_v57  ;;  %v16264_v14 = vld [vmem:[#allocation10 + $0x1908] sm:$0xf]  ;;  %v18250_v57 = vld [vmem:[#allocation10 + $0x1cf4] sm:$0xf0] }
 0x460   :  { %v16488_v48 = vld [vmem:[#allocation10 + $0x1ac8] sm:$0xf]  ;;  %v18282_v5 = vld [vmem:[#allocation10 + $0x1df4] sm:$0xf0] }
 0x461   :  { %10595 = vmatpush.bf16.msra.mxu2 %v16185_v53  ;;  %10608 = vmatpush.bf16.msra.mxu3 %v16313_v62  ;;  %v16153_v53 = vor.u32 %v18098_v2, %v16152_v9  ;;  %v16505_v62 = vor.u32 %v18186_v6, %v16504_v30  ;;  %v16616_v41 = vld [vmem:[#allocation10 + $0x1bc8] sm:$0xf]  ;;  %v16489_v9 = vor.u32 %v18182_v39, %v16488_v48  ;;  %v18178_v30 = vld [vmem:[#allocation10 + $0x1ab4] sm:$0xf0] }
 0x462   :  { %v16760_v47 = vld [vmem:[#allocation10 + $0x1ce8] sm:$0xf]  ;;  %v16617_v2 = vor.u32 %v18214_v18, %v16616_v41  ;;  %v18210_v4 = vld [vmem:[#allocation10 + $0x1bb4] sm:$0xf0] }
 0x463   :  { %10572 = vmatpush.bf16.msrb.mxu0 %v15881_v27  ;;  %10585 = vmatpush.bf16.msrb.mxu1 %v16009_v60  ;;  %v16888_v36 = vld [vmem:[#allocation10 + $0x1de8] sm:$0xf]  ;;  %v16761_v21 = vor.u32 %v18250_v57, %v16760_v47  ;;  %v18246_v60 = vld [vmem:[#allocation10 + $0x1cd4] sm:$0xf0]  ;;  %v10379_v47 = vpop.f32.mrf.mxu1 }
 0x464   :  { %v16472_v28 = vld [vmem:[#allocation10 + $0x1aa8] sm:$0xf]  ;;  %v16889_v27 = vor.u32 %v18282_v5, %v16888_v36  ;;  %v18278_v40 = vld [vmem:[#allocation10 + $0x1dd4] sm:$0xf0] }
 0x465   :  { %10596 = vmatpush.bf16.msra.mxu2 %v16169_v51  ;;  %10609 = vmatpush.bf16.msra.mxu3 %v16297_v46  ;;  %v16137_v51 = vor.u32 %v18094_v15, %v16136_v42  ;;  %v16265_v46 = vor.u32 %v18126_v45, %v16264_v14  ;;  %v16600_v6 = vld [vmem:[#allocation10 + $0x1ba8] sm:$0xf]  ;;  %v16473_v42 = vor.u32 %v18178_v30, %v16472_v28  ;;  %v18174_v15 = vld [vmem:[#allocation10 + $0x1a94] sm:$0xf0] }
 0x466   :  { %10573 = vmatmul.bf16.vlgmr.msrb.gmra.mxu0 %v19330_v31  ;;  %10586 = vmatmul.bf16.vlgmr.msrb.gmra.mxu1 %v19332_v49  ;;  %v16744_v20 = vld [vmem:[#allocation10 + $0x1cc8] sm:$0xf]  ;;  %v18206_v48 = vld [vmem:[#allocation10 + $0x1b94] sm:$0xf0] }
 0x467   :  { %10617 = vmatpush.bf16.msra.mxu0 %v16505_v62  ;;  %10630 = vmatpush.bf16.msra.mxu1 %v16633_v12  ;;  %v16745_v62 = vor.u32 %v18246_v60, %v16744_v20  ;;  %v16456_v22 = vld [vmem:[#allocation10 + $0x1a88] sm:$0xf]  ;;  %v10366_v12 = vpop.f32.mrf.mxu0  ;;  %v18242_v41 = vld [vmem:[#allocation10 + $0x1cb4] sm:$0xf0] }
 0x468   :  { %v16584_v14 = vld [vmem:[#allocation10 + $0x1b88] sm:$0xf]  ;;  %v10367_v18 = vadd.f32 %v10366_v12, %v19491_v0  ;;  %v16457_v36 = vor.u32 %v18174_v15, %v16456_v22  ;;  %v18270_v0 = vld [vmem:[#allocation10 + $0x1d94] sm:$0xf0] }
 0x469   :  { %10597 = vmatpush.bf16.msra.mxu2 %v16153_v53  ;;  %10610 = vmatpush.bf16.msra.mxu3 %v16281_v37  ;;  %v16872_v53 = vld [vmem:[#allocation10 + $0x1dc8] sm:$0xf]  ;;  %v16601_v37 = vor.u32 %v18210_v4, %v16600_v6  ;;  %v18202_v6 = vld [vmem:[#allocation10 + $0x1b74] sm:$0xf0] }
 0x46a   :  { %v16873_v45 = vor.u32 %v18278_v40, %v16872_v53  ;;  %v16728_v39 = vld [vmem:[#allocation10 + $0x1ca8] sm:$0xf]  ;;  %v10380_v5 = vadd.f32 %v10379_v47, %v10367_v18  ;;  %v18238_v4 = vld [vmem:[#allocation10 + $0x1c94] sm:$0xf0] }
 0x46b   :  { %10618 = vmatpush.bf16.msra.mxu0 %v16489_v9  ;;  %10631 = vmatpush.bf16.msra.mxu1 %v16617_v2  ;;  %v16856_v57 = vld [vmem:[#allocation10 + $0x1da8] sm:$0xf]  ;;  %v16729_v9 = vor.u32 %v18242_v41, %v16728_v39  ;;  %v18234_v12 = vld [vmem:[#allocation10 + $0x1c74] sm:$0xf0] }
 0x46c   :  { %v16440_v2 = vld [vmem:[#allocation10 + $0x1a68] sm:$0xf]  ;;  %v18266_v41 = vld [vmem:[#allocation10 + $0x1d74] sm:$0xf0] }
 0x46d   :  { %10598 = vmatpush.bf16.msra.mxu2 %v16137_v51  ;;  %10611 = vmatpush.bf16.msra.mxu3 %v16265_v46  ;;  %v18274_v51 = vld [vmem:[#allocation10 + $0x1db4] sm:$0xf0]  ;;  %v16585_v46 = vor.u32 %v18206_v48, %v16584_v14  ;;  %v16568_v28 = vld [vmem:[#allocation10 + $0x1b68] sm:$0xf]  ;;  %v10381_v48 = vpop.f32.mrf.mxu1 }
 0x46e   :  { %v16857_v30 = vor.u32 %v18274_v51, %v16856_v57  ;;  %v16840_v20 = vld [vmem:[#allocation10 + $0x1d88] sm:$0xf]  ;;  %v16569_v53 = vor.u32 %v18202_v6, %v16568_v28  ;;  %v18198_v14 = vld [vmem:[#allocation10 + $0x1b54] sm:$0xf0] }
 0x46f   :  { %10619 = vmatpush.bf16.msra.mxu0 %v16473_v42  ;;  %10632 = vmatpush.bf16.msra.mxu1 %v16601_v37  ;;  %v16424_v42 = vld [vmem:[#allocation10 + $0x1a48] sm:$0xf]  ;;  %v18166_v37 = vld [vmem:[#allocation10 + $0x1a54] sm:$0xf0]  ;;  %v16841_v22 = vor.u32 %v18270_v0, %v16840_v20  ;;  %v10368_v15 = vpop.f32.mrf.mxu0 }
 0x470   :  { %10599 = vmatmul.bf16.vlgmr.msra.gmra.mxu2 %v19351_v8  ;;  %10612 = vmatmul.bf16.vlgmr.msra.gmra.mxu3 %v19353_v54  ;;  %v16824_v39 = vld [vmem:[#allocation10 + $0x1d68] sm:$0xf]  ;;  %v16425_v18 = vor.u32 %v18166_v37, %v16424_v42  ;;  %v18262_v20 = vld [vmem:[#allocation10 + $0x1d54] sm:$0xf0] }
 0x471   :  { %10643 = vmatpush.bf16.msrb.mxu2 %v16761_v21  ;;  %10656 = vmatpush.bf16.msrb.mxu3 %v16889_v27  ;;  %v18170_v21 = vld [vmem:[#allocation10 + $0x1a74] sm:$0xf0]  ;;  %v16712_v27 = vld [vmem:[#allocation10 + $0x1c88] sm:$0xf] }
 0x472   :  { %v16441_v60 = vor.u32 %v18170_v21, %v16440_v2  ;;  %v16713_v40 = vor.u32 %v18238_v4, %v16712_v27  ;;  %v16825_v2 = vor.u32 %v18266_v41, %v16824_v39  ;;  %v16680_v6 = vld [vmem:[#allocation10 + $0x1c48] sm:$0xf]  ;;  %v18230_v27 = vld [vmem:[#allocation10 + $0x1c54] sm:$0xf0] }
 0x473   :  { %10620 = vmatpush.bf16.msra.mxu0 %v16457_v36  ;;  %10633 = vmatpush.bf16.msra.mxu1 %v16585_v46  ;;  %v10392_v51 = vpop.f32.mrf.mxu2  ;;  %v16408_v36 = vld [vmem:[#allocation10 + $0x1a28] sm:$0xf]  ;;  %v18162_v46 = vld [vmem:[#allocation10 + $0x1a34] sm:$0xf0]  ;;  %v10405_v28 = vpop.f32.mrf.mxu3  ;;  %v16681_v42 = vor.u32 %v18230_v27, %v16680_v6 }
 0x474   :  { %v10393_v21 = vadd.f32 %v10392_v51, %v10380_v5  ;;  %v16808_v4 = vld [vmem:[#allocation10 + $0x1d48] sm:$0xf]  ;;  %v18158_v37 = vld [vmem:[#allocation10 + $0x1a14] sm:$0xf0] }
 0x475   :  { %10644 = vmatpush.bf16.msrb.mxu2 %v16745_v62  ;;  %10657 = vmatpush.bf16.msrb.mxu3 %v16873_v45  ;;  %v16552_v62 = vld [vmem:[#allocation10 + $0x1b48] sm:$0xf]  ;;  %v16809_v5 = vor.u32 %v18262_v20, %v16808_v4  ;;  %v18314_v39 = vld [vmem:[#allocation10 + $0x1ef4] sm:$0xf0] }
 0x476   :  { %v16696_v45 = vld [vmem:[#allocation10 + $0x1c68] sm:$0xf]  ;;  %v16553_v47 = vor.u32 %v18198_v14, %v16552_v62  ;;  %v19498_v0 = vadd.f32 %v10405_v28, %v10393_v21  ;;  %v18226_v14 = vld [vmem:[#allocation10 + $0x1c34] sm:$0xf0] }
 0x477   :  { %10621 = vmatpush.bf16.msra.mxu0 %v16441_v60  ;;  %10634 = vmatpush.bf16.msra.mxu1 %v16569_v53  ;;  %v16697_v57 = vor.u32 %v18234_v12, %v16696_v45  ;;  %v16409_v60 = vor.u32 %v18162_v46, %v16408_v36  ;;  %v16392_v53 = vld [vmem:[#allocation10 + $0x1a08] sm:$0xf]  ;;  %v18258_v12 = vld [vmem:[#allocation10 + $0x1d34] sm:$0xf0] }
 0x478   :  { %v16520_v62 = vld [vmem:[#allocation10 + $0x1b08] sm:$0xf]  ;;  %v16393_v41 = vor.u32 %v18158_v37, %v16392_v53  ;;  %v18322_v51 = vld [vmem:[#allocation10 + $0x1f34] sm:$0xf0]  ;;  %v17352_v37 = vld [vmem:[#allocation10 + $0xec] sm:$0xf] }
 0x479   :  { %10645 = vmatpush.bf16.msrb.mxu2 %v16729_v9  ;;  %10658 = vmatpush.bf16.msrb.mxu3 %v16857_v30  ;;  %v16536_v9 = vld [vmem:[#allocation10 + $0x1b28] sm:$0xf]  ;;  %v18194_v30 = vld [vmem:[#allocation10 + $0x1b34] sm:$0xf0] }
 0x47a   :  { %v16664_v15 = vld [vmem:[#allocation10 + $0x1c28] sm:$0xf]  ;;  %v18254_v6 = vld [vmem:[#allocation10 + $0x1d14] sm:$0xf0] }
 0x47b   :  { %10622 = vmatpush.bf16.msra.mxu0 %v16425_v18  ;;  %10635 = vmatpush.bf16.msra.mxu1 %v16553_v47  ;;  %v16792_v45 = vld [vmem:[#allocation10 + $0x1d28] sm:$0xf]  ;;  %v10394_v36 = vpop.f32.mrf.mxu2  ;;  %v10407_v28 = vpop.f32.mrf.mxu3  ;;  %v18310_v20 = vld [vmem:[#allocation10 + $0x1ed4] sm:$0xf0] }
 0x47c   :  { %v17016_v48 = vld [vmem:[#allocation10 + $0x1ee8] sm:$0xf]  ;;  %v18318_v53 = vld [vmem:[#allocation10 + $0x1f14] sm:$0xf0]  ;;  %v13290_v36 = vld [vmem:[#allocation10 + $0x1d8] sm:$0xf0] }
 0x47d   :  { %10646 = vmatpush.bf16.msrb.mxu2 %v16713_v40  ;;  %10659 = vmatpush.bf16.msrb.mxu3 %v16841_v22  ;;  %v16537_v40 = vor.u32 %v18194_v30, %v16536_v9  ;;  %v18190_v22 = vld [vmem:[#allocation10 + $0x1b14] sm:$0xf0]  ;;  %v17048_v18 = vld [vmem:[#allocation10 + $0x1f28] sm:$0xf]  ;;  %v17017_v21 = vor.u32 %v18314_v39, %v17016_v48 }
 0x47e   :  { %v16521_v47 = vor.u32 %v18190_v22, %v16520_v62  ;;  %v16648_v46 = vld [vmem:[#allocation10 + $0x1c08] sm:$0xf]  ;;  %v18222_v9 = vld [vmem:[#allocation10 + $0x1c14] sm:$0xf0]  ;;  %v17049_v4 = vor.u32 %v18322_v51, %v17048_v18  ;;  %v13178_v22 = vld [vmem:[#allocation10 + $0xf8] sm:$0xf0] }
 0x47f   :  { %10623 = vmatpush.bf16.msra.mxu0 %v16409_v60  ;;  %10636 = vmatpush.bf16.msra.mxu1 %v16537_v40  ;;  %v16776_v30 = vld [vmem:[#allocation10 + $0x1d08] sm:$0xf]  ;;  %v17384_v40 = vld [vmem:[#allocation10 + $0x1ec] sm:$0xf]  ;;  %v16649_v62 = vor.u32 %v18222_v9, %v16648_v46  ;;  %v13181_v18 = vor.u32 %v17352_v37, %v13178_v22  ;;  %v13162_v46 = vld [vmem:[#allocation10 + $0xd8] sm:$0xf0] }
 0x480   :  { %v17000_v27 = vld [vmem:[#allocation10 + $0x1ec8] sm:$0xf]  ;;  %v17412_v9 = vld [vmem:[#allocation10 + $0x2cc] sm:$0xf]  ;;  %v13274_v37 = vld [vmem:[#allocation10 + $0x1b8] sm:$0xf0] }
 0x481   :  { %10647 = vmatpush.bf16.msrb.mxu2 %v16697_v57  ;;  %10660 = vmatpush.bf16.msrb.mxu3 %v16825_v2  ;;  %v16665_v57 = vor.u32 %v18226_v14, %v16664_v15  ;;  %v16793_v2 = vor.u32 %v18258_v12, %v16792_v45  ;;  %v17032_v60 = vld [vmem:[#allocation10 + $0x1f08] sm:$0xf]  ;;  %v17416_v15 = vld [vmem:[#allocation10 + $0x2ec] sm:$0xf]  ;;  %v16777_v14 = vor.u32 %v18254_v6, %v16776_v30  ;;  %v18302_v6 = vld [vmem:[#allocation10 + $0x1e94] sm:$0xf0] }
 0x482   :  { %v17001_v45 = vor.u32 %v18310_v20, %v17000_v27  ;;  %v17033_v12 = vor.u32 %v18318_v53, %v17032_v60  ;;  %v16984_v39 = vld [vmem:[#allocation10 + $0x1ea8] sm:$0xf]  ;;  %v17344_v60 = vld [vmem:[#allocation10 + $0xac] sm:$0xf] }
 0x483   :  { %10624 = vmatpush.bf16.msra.mxu0 %v16393_v41  ;;  %10637 = vmatpush.bf16.msra.mxu1 %v16521_v47  ;;  %v18306_v41 = vld [vmem:[#allocation10 + $0x1eb4] sm:$0xf0]  ;;  %v17348_v47 = vld [vmem:[#allocation10 + $0xcc] sm:$0xf]  ;;  %v16968_v30 = vld [vmem:[#allocation10 + $0x1e88] sm:$0xf]  ;;  %v10418_v20 = vpop.f32.mrf.mxu0 }
 0x484   :  { %v13165_v27 = vor.u32 %v17348_v47, %v13162_v46  ;;  %v17376_v53 = vld [vmem:[#allocation10 + $0x1ac] sm:$0xf]  ;;  %v13258_v47 = vld [vmem:[#allocation10 + $0x198] sm:$0xf0] }
 0x485   :  { %10648 = vmatpush.bf16.msrb.mxu2 %v16681_v42  ;;  %10661 = vmatpush.bf16.msrb.mxu3 %v16809_v5  ;;  %v13306_v42 = vld [vmem:[#allocation10 + $0x1f8] sm:$0xf0]  ;;  %v17408_v22 = vld [vmem:[#allocation10 + $0x2ac] sm:$0xf] }
 0x486   :  { %v13434_v5 = vld [vmem:[#allocation10 + $0x2f8] sm:$0xf0]  ;;  %10625 = vmatmul.bf16.vlgmr.msra.gmra.mxu0 %v19355_v56  ;;  %v13309_v48 = vor.u32 %v17384_v40, %v13306_v42  ;;  %10638 = vmatmul.bf16.vlgmr.msra.gmra.mxu1 %v19726_v19  ;;  %v10419_v40 = vadd.f32 %v10418_v20, %v19498_v0  ;;  %v10431_v42 = vpop.f32.mrf.mxu1  ;;  %v17404_v0 = vld [vmem:[#allocation10 + $0x28c] sm:$0xf] }
 0x487   :  { %10669 = vmatpush.bf16.msrb.mxu0 %v17017_v21  ;;  %10688 = vmatpush.bf16.msrb.mxu1 %v17049_v4  ;;  %v13437_v51 = vor.u32 %v17416_v15, %v13434_v5  ;;  %v16985_v21 = vor.u32 %v18306_v41, %v16984_v39  ;;  %v13402_v15 = vld [vmem:[#allocation10 + $0x2b8] sm:$0xf0]  ;;  %v16969_v5 = vor.u32 %v18302_v6, %v16968_v30 }
 0x488   :  { %v13405_v41 = vor.u32 %v17408_v22, %v13402_v15  ;;  %v13242_v20 = vld [vmem:[#allocation10 + $0x178] sm:$0xf0]  ;;  %v16920_v15 = vld [vmem:[#allocation10 + $0x1e28] sm:$0xf] }
 0x489   :  { %10649 = vmatpush.bf16.msrb.mxu2 %v16665_v57  ;;  %10662 = vmatpush.bf16.msrb.mxu3 %v16793_v2  ;;  %v17380_v57 = vld [vmem:[#allocation10 + $0x1cc] sm:$0xf]  ;;  %v13418_v2 = vld [vmem:[#allocation10 + $0x2d8] sm:$0xf0] }
 0x48a   :  { %v13293_v28 = vor.u32 %v17380_v57, %v13290_v36  ;;  %v13421_v4 = vor.u32 %v17412_v9, %v13418_v2  ;;  %v13130_v57 = vld [vmem:[#allocation10 + $0x98] sm:$0xf0]  ;;  %v16936_v2 = vld [vmem:[#allocation10 + $0x1e48] sm:$0xf] }
 0x48b   :  { %10670 = vmatpush.bf16.msrb.mxu0 %v17001_v45  ;;  %10689 = vmatpush.bf16.msrb.mxu1 %v17033_v12  ;;  %v13277_v45 = vor.u32 %v17376_v53, %v13274_v37  ;;  %v16952_v12 = vld [vmem:[#allocation10 + $0x1e68] sm:$0xf]  ;;  %v13386_v36 = vld [vmem:[#allocation10 + $0x298] sm:$0xf0]  ;;  %v10420_v6 = vpop.f32.mrf.mxu0  ;;  %v17400_v37 = vld [vmem:[#allocation10 + $0x26c] sm:$0xf] }
 0x48c   :  { %v13389_v30 = vor.u32 %v17404_v0, %v13386_v36  ;;  %v13114_v53 = vld [vmem:[#allocation10 + $0x78] sm:$0xf0] }
 0x48d   :  { %10650 = vmatpush.bf16.msrb.mxu2 %v16649_v62  ;;  %10663 = vmatpush.bf16.msrb.mxu3 %v16777_v14  ;;  %v13146_v62 = vld [vmem:[#allocation10 + $0xb8] sm:$0xf0]  ;;  %v10432_v14 = vadd.f32 %v10431_v42, %v10419_v40 }
 0x48e   :  { %v13149_v39 = vor.u32 %v17344_v60, %v13146_v62  ;;  %v10433_v60 = vpop.f32.mrf.mxu1  ;;  %v13370_v40 = vld [vmem:[#allocation10 + $0x278] sm:$0xf0] }
 0x48f   :  { %10695 = vmatpush.bf16.msra.mxu1 %v13181_v18  ;;  %10671 = vmatpush.bf16.msrb.mxu0 %v16985_v21  ;;  %v17340_v18 = vld [vmem:[#allocation10 + $0x8c] sm:$0xf]  ;;  %v18294_v21 = vld [vmem:[#allocation10 + $0x1e54] sm:$0xf0]  ;;  %v13354_v0 = vld [vmem:[#allocation10 + $0x258] sm:$0xf0] }
 0x490   :  { %10651 = vmatmul.bf16.vlgmr.msrb.gmra.mxu2 %v19378_v55  ;;  %10664 = vmatmul.bf16.vlgmr.msrb.gmra.mxu3 %v19380_v13  ;;  %v16937_v42 = vor.u32 %v18294_v21, %v16936_v2  ;;  %v18286_v21 = vld [vmem:[#allocation10 + $0x1e14] sm:$0xf0]  ;;  %v13082_v60 = vld [vmem:[#allocation10 + $0x38] sm:$0xf0] }
 0x491   :  { %10708 = vmatpush.bf16.msra.mxu2 %v13309_v48  ;;  %10721 = vmatpush.bf16.msra.mxu3 %v13437_v51  ;;  %v18298_v48 = vld [vmem:[#allocation10 + $0x1e74] sm:$0xf0]  ;;  %v17372_v51 = vld [vmem:[#allocation10 + $0x18c] sm:$0xf] }
 0x492   :  { %v16953_v46 = vor.u32 %v18298_v48, %v16952_v12  ;;  %v13261_v9 = vor.u32 %v17372_v51, %v13258_v47  ;;  %v13373_v12 = vor.u32 %v17400_v37, %v13370_v40  ;;  %v13226_v51 = vld [vmem:[#allocation10 + $0x158] sm:$0xf0] }
 0x493   :  { %10696 = vmatpush.bf16.msra.mxu1 %v13165_v27  ;;  %10672 = vmatpush.bf16.msrb.mxu0 %v16969_v5  ;;  %v17336_v27 = vld [vmem:[#allocation10 + $0x6c] sm:$0xf]  ;;  %v10444_v22 = vpop.f32.mrf.mxu2  ;;  %v18290_v5 = vld [vmem:[#allocation10 + $0x1e34] sm:$0xf0]  ;;  %v13098_v47 = vld [vmem:[#allocation10 + $0x58] sm:$0xf0] }
 0x494   :  { %v10445_v48 = vadd.f32 %v10444_v22, %v10432_v14  ;;  %v17360_v14 = vld [vmem:[#allocation10 + $0x12c] sm:$0xf]  ;;  %v13338_v37 = vld [vmem:[#allocation10 + $0x238] sm:$0xf0] }
 0x495   :  { %10709 = vmatpush.bf16.msra.mxu2 %v13293_v28  ;;  %10722 = vmatpush.bf16.msra.mxu3 %v13421_v4  ;;  %v13133_v28 = vor.u32 %v17340_v18, %v13130_v57  ;;  %v17368_v4 = vld [vmem:[#allocation10 + $0x16c] sm:$0xf] }
 0x496   :  { %v13245_v62 = vor.u32 %v17368_v4, %v13242_v20  ;;  %v17364_v18 = vld [vmem:[#allocation10 + $0x14c] sm:$0xf]  ;;  %17056 = vmatmul.msk.bf16.vlgmr.msrb.gmra.mxu1 %vm9443_vm3, %v19727_v23  ;;  %v13562_v20 = vld [vmem:[#allocation10 + $0x3f8] sm:$0xf0] }
 0x497   :  { %10697 = vmatpush.bf16.msra.mxu1 %v13149_v39  ;;  %10673 = vmatpush.bf16.msrb.mxu0 %v16953_v46  ;;  %v10457_v39 = vpop.f32.mrf.mxu3  ;;  %v17396_v57 = vld [vmem:[#allocation10 + $0x24c] sm:$0xf]  ;;  %v16921_v46 = vor.u32 %v18290_v5, %v16920_v15  ;;  %v13229_v2 = vor.u32 %v17364_v18, %v13226_v51  ;;  %v13066_v5 = vld [vmem:[#allocation10 + $0x18] sm:$0xf0] }
 0x498   :  { %v19507_v36 = vadd.f32 %v10457_v39, %v10445_v48  ;;  %v13357_v6 = vor.u32 %v17396_v57, %v13354_v0  ;;  %v17448_v4 = vld [vmem:[#allocation10 + $0x3ec] sm:$0xf]  ;;  %v13546_v51 = vld [vmem:[#allocation10 + $0x3d8] sm:$0xf0] }
 0x499   :  { %10710 = vmatpush.bf16.msra.mxu2 %v13277_v45  ;;  %10723 = vmatpush.bf16.msra.mxu3 %v13405_v41  ;;  %v13117_v45 = vor.u32 %v17336_v27, %v13114_v53  ;;  %v17332_v41 = vld [vmem:[#allocation10 + $0x4c] sm:$0xf]  ;;  %v13210_v27 = vld [vmem:[#allocation10 + $0x138] sm:$0xf0]  ;;  %v13565_v22 = vor.u32 %v17448_v4, %v13562_v20 }
 0x49a   :  { %v17392_v53 = vld [vmem:[#allocation10 + $0x22c] sm:$0xf]  ;;  %v13322_v57 = vld [vmem:[#allocation10 + $0x218] sm:$0xf0] }
 0x49b   :  { %10698 = vmatpush.bf16.msra.mxu1 %v13133_v28  ;;  %10674 = vmatpush.bf16.msrb.mxu0 %v16937_v42  ;;  %v17328_v28 = vld [vmem:[#allocation10 + $0x2c] sm:$0xf]  ;;  %v13213_v42 = vor.u32 %v17360_v14, %v13210_v27 }
 0x49c   :  { %v17324_v15 = vld [vmem:[#allocation10 + $0xc] sm:$0xf] }
 0x49d   :  { %10711 = vmatpush.bf16.msra.mxu2 %v13261_v9  ;;  %10724 = vmatpush.bf16.msra.mxu3 %v13389_v30  ;;  %v16904_v9 = vld [vmem:[#allocation10 + $0x1e08] sm:$0xf]  ;;  %v13101_v30 = vor.u32 %v17332_v41, %v13098_v47  ;;  %v17356_v48 = vld [vmem:[#allocation10 + $0x10c] sm:$0xf]  ;;  %v13194_v41 = vld [vmem:[#allocation10 + $0x118] sm:$0xf0] }
 0x49e   :  { %v16905_v40 = vor.u32 %v18286_v21, %v16904_v9  ;;  %v17444_v18 = vld [vmem:[#allocation10 + $0x3cc] sm:$0xf]  ;;  %v13197_v21 = vor.u32 %v17356_v48, %v13194_v41  ;;  %v13930_v48 = vld [vmem:[#allocation10 + $0x6d8] sm:$0xf0] }
 0x49f   :  { %10699 = vmatpush.bf16.msra.mxu1 %v13117_v45  ;;  %10675 = vmatpush.bf16.msrb.mxu0 %v16921_v46  ;;  %v13085_v45 = vor.u32 %v17328_v28, %v13082_v60  ;;  %v10459_v39 = vpop.f32.mrf.mxu3  ;;  %v17388_v47 = vld [vmem:[#allocation10 + $0x20c] sm:$0xf]  ;;  %v13690_v46 = vld [vmem:[#allocation10 + $0x4f8] sm:$0xf0]  ;;  %v13549_v14 = vor.u32 %v17444_v18, %v13546_v51  ;;  %v13069_v28 = vor.u32 %v17324_v15, %v13066_v5 }
 0x4a0   :  { %v17480_v0 = vld [vmem:[#allocation10 + $0x4ec] sm:$0xf]  ;;  %v13514_v41 = vld [vmem:[#allocation10 + $0x398] sm:$0xf0] }
 0x4a1   :  { %10712 = vmatpush.bf16.msra.mxu2 %v13245_v62  ;;  %10725 = vmatpush.bf16.msra.mxu3 %v13373_v12  ;;  %v10446_v62 = vpop.f32.mrf.mxu2  ;;  %v13341_v12 = vor.u32 %v17392_v53, %v13338_v37  ;;  %v17512_v9 = vld [vmem:[#allocation10 + $0x5ec] sm:$0xf]  ;;  %v13693_v4 = vor.u32 %v17480_v0, %v13690_v46  ;;  %v13530_v53 = vld [vmem:[#allocation10 + $0x3b8] sm:$0xf0] }
 0x4a2   :  { %v17544_v27 = vld [vmem:[#allocation10 + $0x6ec] sm:$0xf]  ;;  %v13674_v62 = vld [vmem:[#allocation10 + $0x4d8] sm:$0xf0] }
 0x4a3   :  { %10700 = vmatpush.bf16.msra.mxu1 %v13101_v30  ;;  %10676 = vmatpush.bf16.msrb.mxu0 %v16905_v40  ;;  %v13946_v30 = vld [vmem:[#allocation10 + $0x6f8] sm:$0xf0]  ;;  %v17440_v60 = vld [vmem:[#allocation10 + $0x3ac] sm:$0xf] }
 0x4a4   :  { %v17476_v37 = vld [vmem:[#allocation10 + $0x4cc] sm:$0xf]  ;;  %v13949_v40 = vor.u32 %v17544_v27, %v13946_v30  ;;  %v13786_v46 = vld [vmem:[#allocation10 + $0x5b8] sm:$0xf0] }
 0x4a5   :  { %10713 = vmatpush.bf16.msra.mxu2 %v13229_v2  ;;  %10726 = vmatpush.bf16.msra.mxu3 %v13357_v6  ;;  %v13818_v2 = vld [vmem:[#allocation10 + $0x5f8] sm:$0xf0]  ;;  %v13325_v6 = vor.u32 %v17388_v47, %v13322_v57  ;;  %v17508_v39 = vld [vmem:[#allocation10 + $0x5cc] sm:$0xf]  ;;  %v13677_v15 = vor.u32 %v17476_v37, %v13674_v62  ;;  %v10470_v47 = vpop.f32.mrf.mxu0 }
 0x4a6   :  { %10677 = vmatmul.bf16.vlgmr.msrb.gmra.mxu0 %v19382_v25  ;;  %v13821_v20 = vor.u32 %v17512_v9, %v13818_v2  ;;  %v17472_v18 = vld [vmem:[#allocation10 + $0x4ac] sm:$0xf]  ;;  %v13658_v57 = vld [vmem:[#allocation10 + $0x4b8] sm:$0xf0]  ;;  %v10471_v9 = vadd.f32 %v10470_v47, %v19507_v36  ;;  %v10483_v2 = vpop.f32.mrf.mxu1 }
 0x4a7   :  { %10734 = vmatpush.bf16.msra.mxu0 %v13565_v22  ;;  %10701 = vmatpush.bf16.msra.mxu1 %v13085_v45  ;;  %v17540_v22 = vld [vmem:[#allocation10 + $0x6cc] sm:$0xf]  ;;  %v13533_v45 = vor.u32 %v17440_v60, %v13530_v53  ;;  %v13898_v36 = vld [vmem:[#allocation10 + $0x698] sm:$0xf0] }
 0x4a8   :  { %v13933_v51 = vor.u32 %v17540_v22, %v13930_v48  ;;  %v17504_v0 = vld [vmem:[#allocation10 + $0x5ac] sm:$0xf]  ;;  %v10484_v30 = vadd.f32 %v10483_v2, %v10471_v9  ;;  %v13482_v22 = vld [vmem:[#allocation10 + $0x358] sm:$0xf0] }
 0x4a9   :  { %10714 = vmatpush.bf16.msra.mxu2 %v13213_v42  ;;  %10727 = vmatpush.bf16.msra.mxu3 %v13341_v12  ;;  %v13802_v42 = vld [vmem:[#allocation10 + $0x5d8] sm:$0xf0]  ;;  %v17436_v12 = vld [vmem:[#allocation10 + $0x38c] sm:$0xf] }
 0x4aa   :  { %v13805_v5 = vor.u32 %v17508_v39, %v13802_v42  ;;  %v13517_v27 = vor.u32 %v17436_v12, %v13514_v41  ;;  %v17500_v53 = vld [vmem:[#allocation10 + $0x58c] sm:$0xf]  ;;  %v13754_v41 = vld [vmem:[#allocation10 + $0x578] sm:$0xf0] }
 0x4ab   :  { %10735 = vmatpush.bf16.msra.mxu0 %v13549_v14  ;;  %10702 = vmatpush.bf16.msra.mxu1 %v13069_v28  ;;  %v13914_v14 = vld [vmem:[#allocation10 + $0x6b8] sm:$0xf0]  ;;  %v13789_v28 = vor.u32 %v17504_v0, %v13786_v46  ;;  %v17532_v37 = vld [vmem:[#allocation10 + $0x68c] sm:$0xf] }
 0x4ac   :  { %v17428_v42 = vld [vmem:[#allocation10 + $0x34c] sm:$0xf]  ;;  %v13882_v47 = vld [vmem:[#allocation10 + $0x678] sm:$0xf0] }
 0x4ad   :  { %10715 = vmatpush.bf16.msra.mxu2 %v13197_v21  ;;  %10728 = vmatpush.bf16.msra.mxu3 %v13325_v6  ;;  %v17536_v21 = vld [vmem:[#allocation10 + $0x6ac] sm:$0xf] }
 0x4ae   :  { %10703 = vmatmul.bf16.vlgmr.msra.gmra.mxu1 %v19200_v63  ;;  %v17432_v6 = vld [vmem:[#allocation10 + $0x36c] sm:$0xf]  ;;  %v13917_v60 = vor.u32 %v17536_v21, %v13914_v14  ;;  %v13642_v63 = vld [vmem:[#allocation10 + $0x498] sm:$0xf0] }
 0x4af   :  { %10747 = vmatpush.bf16.msrb.mxu1 %v13693_v4  ;;  %10736 = vmatpush.bf16.msra.mxu0 %v13533_v45  ;;  %v13498_v4 = vld [vmem:[#allocation10 + $0x378] sm:$0xf0]  ;;  %v17464_v48 = vld [vmem:[#allocation10 + $0x46c] sm:$0xf]  ;;  %v13901_v45 = vor.u32 %v17532_v37, %v13898_v36 }
 0x4b0   :  { %10716 = vmatmul.bf16.vlgmr.msra.gmra.mxu2 %v19202_v34  ;;  %10729 = vmatmul.bf16.vlgmr.msra.gmra.mxu3 %v19204_v1  ;;  %v13661_v34 = vor.u32 %v17472_v18, %v13658_v57  ;;  %v13770_v1 = vld [vmem:[#allocation10 + $0x598] sm:$0xf0]  ;;  %v17496_v12 = vld [vmem:[#allocation10 + $0x56c] sm:$0xf]  ;;  %v10485_v18 = vpop.f32.mrf.mxu1  ;;  %v13485_v57 = vor.u32 %v17428_v42, %v13482_v22 }
 0x4b1   :  { %10760 = vmatpush.bf16.msrb.mxu2 %v13821_v20  ;;  %10773 = vmatpush.bf16.msrb.mxu3 %v13949_v40  ;;  %v17468_v20 = vld [vmem:[#allocation10 + $0x48c] sm:$0xf]  ;;  %v13501_v40 = vor.u32 %v17432_v6, %v13498_v4  ;;  %v13773_v39 = vor.u32 %v17500_v53, %v13770_v1  ;;  %v13757_v46 = vor.u32 %v17496_v12, %v13754_v41  ;;  %v13466_v21 = vld [vmem:[#allocation10 + $0x338] sm:$0xf0] }
 0x4b2   :  { %v13645_v62 = vor.u32 %v17468_v20, %v13642_v63  ;;  %v17424_v2 = vld [vmem:[#allocation10 + $0x32c] sm:$0xf]  ;;  %v13610_v6 = vld [vmem:[#allocation10 + $0x458] sm:$0xf0] }
 0x4b3   :  { %10748 = vmatpush.bf16.msrb.mxu1 %v13677_v15  ;;  %10737 = vmatpush.bf16.msra.mxu0 %v13517_v27  ;;  %v10472_v15 = vpop.f32.mrf.mxu0  ;;  %v10496_v9 = vpop.f32.mrf.mxu2  ;;  %v17460_v14 = vld [vmem:[#allocation10 + $0x44c] sm:$0xf]  ;;  %v13738_v20 = vld [vmem:[#allocation10 + $0x558] sm:$0xf0]  ;;  %v13469_v1 = vor.u32 %v17424_v2, %v13466_v21 }
 0x4b4   :  { %v17492_v4 = vld [vmem:[#allocation10 + $0x54c] sm:$0xf]  ;;  %v13866_v63 = vld [vmem:[#allocation10 + $0x658] sm:$0xf0]  ;;  %v13613_v36 = vor.u32 %v17460_v14, %v13610_v6 }
 0x4b5   :  { %10761 = vmatpush.bf16.msrb.mxu2 %v13805_v5  ;;  %10774 = vmatpush.bf16.msrb.mxu3 %v13933_v51  ;;  %v13626_v5 = vld [vmem:[#allocation10 + $0x478] sm:$0xf0]  ;;  %v17528_v51 = vld [vmem:[#allocation10 + $0x66c] sm:$0xf] }
 0x4b6   :  { %v13629_v0 = vor.u32 %v17464_v48, %v13626_v5  ;;  %v13885_v27 = vor.u32 %v17528_v51, %v13882_v47  ;;  %v17420_v37 = vld [vmem:[#allocation10 + $0x30c] sm:$0xf]  ;;  %v13594_v42 = vld [vmem:[#allocation10 + $0x438] sm:$0xf0] }
 0x4b7   :  { %10749 = vmatpush.bf16.msrb.mxu1 %v13661_v34  ;;  %10738 = vmatpush.bf16.msra.mxu0 %v13501_v40  ;;  %v10497_v34 = vadd.f32 %v10496_v9, %v10484_v30  ;;  %v13741_v40 = vor.u32 %v17492_v4, %v13738_v20  ;;  %v17488_v22 = vld [vmem:[#allocation10 + $0x52c] sm:$0xf]  ;;  %v13722_v48 = vld [vmem:[#allocation10 + $0x538] sm:$0xf0] }
 0x4b8   :  { %v13850_v15 = vld [vmem:[#allocation10 + $0x638] sm:$0xf0]  ;;  %v17576_v5 = vld [vmem:[#allocation10 + $0x7ec] sm:$0xf]  ;;  %v13725_v51 = vor.u32 %v17488_v22, %v13722_v48 }
 0x4b9   :  { %10762 = vmatpush.bf16.msrb.mxu2 %v13789_v28  ;;  %10775 = vmatpush.bf16.msrb.mxu3 %v13917_v60  ;;  %v10509_v28 = vpop.f32.mrf.mxu3  ;;  %v17524_v60 = vld [vmem:[#allocation10 + $0x64c] sm:$0xf]  ;;  %v14074_v12 = vld [vmem:[#allocation10 + $0x7f8] sm:$0xf0] }
 0x4ba   :  { %v19514_v53 = vadd.f32 %v10509_v28, %v10497_v34  ;;  %v13869_v30 = vor.u32 %v17524_v60, %v13866_v63  ;;  %v14077_v2 = vor.u32 %v17576_v5, %v14074_v12  ;;  %v13706_v14 = vld [vmem:[#allocation10 + $0x518] sm:$0xf0]  ;;  %v17572_v28 = vld [vmem:[#allocation10 + $0x7cc] sm:$0xf] }
 0x4bb   :  { %10750 = vmatpush.bf16.msrb.mxu1 %v13645_v62  ;;  %10739 = vmatpush.bf16.msra.mxu0 %v13485_v57  ;;  %v13450_v62 = vld [vmem:[#allocation10 + $0x318] sm:$0xf0]  ;;  %v10498_v47 = vpop.f32.mrf.mxu2  ;;  %v17452_v57 = vld [vmem:[#allocation10 + $0x40c] sm:$0xf] }
 0x4bc   :  { %v13453_v41 = vor.u32 %v17420_v37, %v13450_v62  ;;  %v13834_v34 = vld [vmem:[#allocation10 + $0x618] sm:$0xf0]  ;;  %v17608_v4 = vld [vmem:[#allocation10 + $0x8ec] sm:$0xf] }
 0x4bd   :  { %10763 = vmatpush.bf16.msrb.mxu2 %v13773_v39  ;;  %10776 = vmatpush.bf16.msrb.mxu3 %v13901_v45  ;;  %v17456_v39 = vld [vmem:[#allocation10 + $0x42c] sm:$0xf]  ;;  %v14058_v6 = vld [vmem:[#allocation10 + $0x7d8] sm:$0xf0] }
 0x4be   :  { %v17520_v45 = vld [vmem:[#allocation10 + $0x62c] sm:$0xf]  ;;  %v13597_v18 = vor.u32 %v17456_v39, %v13594_v42  ;;  %v14202_v20 = vld [vmem:[#allocation10 + $0x8f8] sm:$0xf0]  ;;  %v14061_v39 = vor.u32 %v17572_v28, %v14058_v6 }
 0x4bf   :  { %10751 = vmatpush.bf16.msrb.mxu1 %v13629_v0  ;;  %10740 = vmatpush.bf16.msra.mxu0 %v13469_v1  ;;  %v13578_v0 = vld [vmem:[#allocation10 + $0x418] sm:$0xf0]  ;;  %v13853_v9 = vor.u32 %v17520_v45, %v13850_v15  ;;  %v17640_v60 = vld [vmem:[#allocation10 + $0x9ec] sm:$0xf]  ;;  %v14205_v42 = vor.u32 %v17608_v4, %v14202_v20 }
 0x4c0   :  { %v14330_v63 = vld [vmem:[#allocation10 + $0x9f8] sm:$0xf0]  ;;  %v13581_v1 = vor.u32 %v17452_v57, %v13578_v0  ;;  %v17568_v22 = vld [vmem:[#allocation10 + $0x7ac] sm:$0xf] }
 0x4c1   :  { %10764 = vmatpush.bf16.msrb.mxu2 %v13757_v46  ;;  %10777 = vmatpush.bf16.msrb.mxu3 %v13885_v27  ;;  %v17484_v46 = vld [vmem:[#allocation10 + $0x50c] sm:$0xf]  ;;  %v10511_v21 = vpop.f32.mrf.mxu3  ;;  %v14042_v48 = vld [vmem:[#allocation10 + $0x7b8] sm:$0xf0] }
 0x4c2   :  { %v17516_v27 = vld [vmem:[#allocation10 + $0x60c] sm:$0xf]  ;;  %v13709_v37 = vor.u32 %v17484_v46, %v13706_v14  ;;  %v14186_v5 = vld [vmem:[#allocation10 + $0x8d8] sm:$0xf0]  ;;  %v14045_v47 = vor.u32 %v17568_v22, %v14042_v48 }
 0x4c3   :  { %10752 = vmatpush.bf16.msrb.mxu1 %v13613_v36  ;;  %10741 = vmatpush.bf16.msra.mxu0 %v13453_v41  ;;  %v17672_v36 = vld [vmem:[#allocation10 + $0xaec] sm:$0xf]  ;;  %v13837_v62 = vor.u32 %v17516_v27, %v13834_v34  ;;  %v14314_v41 = vld [vmem:[#allocation10 + $0x9d8] sm:$0xf0]  ;;  %v10522_v21 = vpop.f32.mrf.mxu0  ;;  %v10535_v6 = vpop.f32.mrf.mxu1 }
 0x4c4   :  { %v17604_v45 = vld [vmem:[#allocation10 + $0x8cc] sm:$0xf]  ;;  %v14026_v46 = vld [vmem:[#allocation10 + $0x798] sm:$0xf0]  ;;  %v10523_v28 = vadd.f32 %v10522_v21, %v19514_v53 }
 0x4c5   :  { %10765 = vmatpush.bf16.msrb.mxu2 %v13741_v40  ;;  %10778 = vmatpush.bf16.msrb.mxu3 %v13869_v30  ;;  %v14458_v40 = vld [vmem:[#allocation10 + $0xaf8] sm:$0xf0]  ;;  %v14333_v30 = vor.u32 %v17640_v60, %v14330_v63  ;;  %v17636_v12 = vld [vmem:[#allocation10 + $0x9cc] sm:$0xf]  ;;  %v14189_v57 = vor.u32 %v17604_v45, %v14186_v5 }
 0x4c6   :  { %10742 = vmatmul.bf16.vlgmr.msra.gmra.mxu0 %v19206_v52  ;;  %v14461_v15 = vor.u32 %v17672_v36, %v14458_v40  ;;  %v14317_v52 = vor.u32 %v17636_v12, %v14314_v41  ;;  %v17564_v0 = vld [vmem:[#allocation10 + $0x78c] sm:$0xf]  ;;  %v14170_v14 = vld [vmem:[#allocation10 + $0x8b8] sm:$0xf0]  ;;  %v10536_v63 = vadd.f32 %v10535_v6, %v10523_v28 }
 0x4c7   :  { %10753 = vmatpush.bf16.msrb.mxu1 %v13597_v18  ;;  %10786 = vmatpush.bf16.msrb.mxu0 %v14077_v2  ;;  %v17668_v18 = vld [vmem:[#allocation10 + $0xacc] sm:$0xf]  ;;  %v14298_v34 = vld [vmem:[#allocation10 + $0x9b8] sm:$0xf0]  ;;  %v14029_v60 = vor.u32 %v17564_v0, %v14026_v46 }
 0x4c8   :  { %v17632_v27 = vld [vmem:[#allocation10 + $0x9ac] sm:$0xf]  ;;  %v14426_v20 = vld [vmem:[#allocation10 + $0xab8] sm:$0xf0] }
 0x4c9   :  { %10766 = vmatpush.bf16.msrb.mxu2 %v13725_v51  ;;  %10779 = vmatpush.bf16.msrb.mxu3 %v13853_v9  ;;  %v14442_v51 = vld [vmem:[#allocation10 + $0xad8] sm:$0xf0]  ;;  %v17600_v9 = vld [vmem:[#allocation10 + $0x8ac] sm:$0xf] }
 0x4ca   :  { %v14445_v2 = vor.u32 %v17668_v18, %v14442_v51  ;;  %v17664_v4 = vld [vmem:[#allocation10 + $0xaac] sm:$0xf]  ;;  %v14010_v36 = vld [vmem:[#allocation10 + $0x778] sm:$0xf0] }
 0x4cb   :  { %10754 = vmatpush.bf16.msrb.mxu1 %v13581_v1  ;;  %10787 = vmatpush.bf16.msrb.mxu0 %v14061_v39  ;;  %v14301_v1 = vor.u32 %v17632_v27, %v14298_v34  ;;  %v17596_v40 = vld [vmem:[#allocation10 + $0x88c] sm:$0xf]  ;;  %v14410_v53 = vld [vmem:[#allocation10 + $0xa98] sm:$0xf0]  ;;  %v10524_v41 = vpop.f32.mrf.mxu0 }
 0x4cc   :  { %v17628_v39 = vld [vmem:[#allocation10 + $0x98c] sm:$0xf]  ;;  %v14138_v18 = vld [vmem:[#allocation10 + $0x878] sm:$0xf0] }
 0x4cd   :  { %10767 = vmatpush.bf16.msrb.mxu2 %v13709_v37  ;;  %10780 = vmatpush.bf16.msrb.mxu3 %v13837_v62  ;;  %v17560_v37 = vld [vmem:[#allocation10 + $0x76c] sm:$0xf]  ;;  %v14429_v62 = vor.u32 %v17664_v4, %v14426_v20  ;;  %v14394_v0 = vld [vmem:[#allocation10 + $0xa78] sm:$0xf0] }
 0x4ce   :  { %10755 = vmatmul.bf16.vlgmr.msrb.gmra.mxu1 %v19231_v61  ;;  %v14173_v61 = vor.u32 %v17600_v9, %v14170_v14  ;;  %v17556_v45 = vld [vmem:[#allocation10 + $0x74c] sm:$0xf]  ;;  %v13978_v27 = vld [vmem:[#allocation10 + $0x738] sm:$0xf0] }
 0x4cf   :  { %10799 = vmatpush.bf16.msra.mxu1 %v14205_v42  ;;  %10788 = vmatpush.bf16.msrb.mxu0 %v14045_v47  ;;  %v17660_v42 = vld [vmem:[#allocation10 + $0xa8c] sm:$0xf]  ;;  %v14266_v47 = vld [vmem:[#allocation10 + $0x978] sm:$0xf0] }
 0x4d0   :  { %10768 = vmatmul.bf16.vlgmr.msrb.gmra.mxu2 %v19233_v59  ;;  %10781 = vmatmul.bf16.vlgmr.msrb.gmra.mxu3 %v19235_v44  ;;  %v14154_v59 = vld [vmem:[#allocation10 + $0x898] sm:$0xf0]  ;;  %v17592_v5 = vld [vmem:[#allocation10 + $0x86c] sm:$0xf]  ;;  %v14413_v12 = vor.u32 %v17660_v42, %v14410_v53 }
 0x4d1   :  { %10812 = vmatpush.bf16.msra.mxu2 %v14333_v30  ;;  %10825 = vmatpush.bf16.msra.mxu3 %v14461_v15  ;;  %v14282_v44 = vld [vmem:[#allocation10 + $0x998] sm:$0xf0]  ;;  %v14013_v30 = vor.u32 %v17560_v37, %v14010_v36  ;;  %v14157_v22 = vor.u32 %v17596_v40, %v14154_v59  ;;  %v17624_v51 = vld [vmem:[#allocation10 + $0x96c] sm:$0xf]  ;;  %v14141_v9 = vor.u32 %v17592_v5, %v14138_v18 }
 0x4d2   :  { %v14285_v48 = vor.u32 %v17628_v39, %v14282_v44  ;;  %v13994_v15 = vld [vmem:[#allocation10 + $0x758] sm:$0xf0]  ;;  %v17552_v14 = vld [vmem:[#allocation10 + $0x72c] sm:$0xf] }
 0x4d3   :  { %10800 = vmatpush.bf16.msra.mxu1 %v14189_v57  ;;  %10789 = vmatpush.bf16.msrb.mxu0 %v14029_v60  ;;  %v10537_v57 = vpop.f32.mrf.mxu1  ;;  %v13997_v46 = vor.u32 %v17556_v45, %v13994_v15  ;;  %v10548_v21 = vpop.f32.mrf.mxu2  ;;  %v17588_v34 = vld [vmem:[#allocation10 + $0x84c] sm:$0xf]  ;;  %v14122_v20 = vld [vmem:[#allocation10 + $0x858] sm:$0xf0]  ;;  %v13981_v40 = vor.u32 %v17552_v14, %v13978_v27 }
 0x4d4   :  { %v10549_v6 = vadd.f32 %v10548_v21, %v10536_v63  ;;  %v10561_v4 = vpop.f32.mrf.mxu3  ;;  %v17620_v60 = vld [vmem:[#allocation10 + $0x94c] sm:$0xf]  ;;  %v14378_v37 = vld [vmem:[#allocation10 + $0xa58] sm:$0xf0]  ;;  %v14125_v59 = vor.u32 %v17588_v34, %v14122_v20 }
 0x4d5   :  { %10813 = vmatpush.bf16.msra.mxu2 %v14317_v52  ;;  %10826 = vmatpush.bf16.msra.mxu3 %v14445_v2  ;;  %v17656_v52 = vld [vmem:[#allocation10 + $0xa6c] sm:$0xf]  ;;  %v14269_v2 = vor.u32 %v17624_v51, %v14266_v47  ;;  %v13962_v44 = vld [vmem:[#allocation10 + $0x718] sm:$0xf0] }
 0x4d6   :  { %v14397_v28 = vor.u32 %v17656_v52, %v14394_v0  ;;  %v19521_v36 = vadd.f32 %v10561_v4, %v10549_v6  ;;  %v17584_v42 = vld [vmem:[#allocation10 + $0x82c] sm:$0xf]  ;;  %v14106_v53 = vld [vmem:[#allocation10 + $0x838] sm:$0xf0] }
 0x4d7   :  { %10801 = vmatpush.bf16.msra.mxu1 %v14173_v61  ;;  %10790 = vmatpush.bf16.msrb.mxu0 %v14013_v30  ;;  %v14250_v61 = vld [vmem:[#allocation10 + $0x958] sm:$0xf0]  ;;  %v17616_v30 = vld [vmem:[#allocation10 + $0x92c] sm:$0xf]  ;;  %v14109_v41 = vor.u32 %v17584_v42, %v14106_v53 }
 0x4d8   :  { %v14253_v39 = vor.u32 %v17620_v60, %v14250_v61  ;;  %v14362_v45 = vld [vmem:[#allocation10 + $0xa38] sm:$0xf0]  ;;  %v17704_v15 = vld [vmem:[#allocation10 + $0xbec] sm:$0xf] }
 0x4d9   :  { %10814 = vmatpush.bf16.msra.mxu2 %v14301_v1  ;;  %10827 = vmatpush.bf16.msra.mxu3 %v14429_v62  ;;  %v17652_v1 = vld [vmem:[#allocation10 + $0xa4c] sm:$0xf]  ;;  %v14586_v5 = vld [vmem:[#allocation10 + $0xbf8] sm:$0xf0] }
 0x4da   :  { %v17548_v62 = vld [vmem:[#allocation10 + $0x70c] sm:$0xf]  ;;  %v14381_v63 = vor.u32 %v17652_v1, %v14378_v37  ;;  %v14090_v57 = vld [vmem:[#allocation10 + $0x818] sm:$0xf0] }
 0x4db   :  { %10802 = vmatpush.bf16.msra.mxu1 %v14157_v22  ;;  %10791 = vmatpush.bf16.msrb.mxu0 %v13997_v46  ;;  %v14234_v22 = vld [vmem:[#allocation10 + $0x938] sm:$0xf0]  ;;  %v10550_v51 = vpop.f32.mrf.mxu2  ;;  %v17580_v47 = vld [vmem:[#allocation10 + $0x80c] sm:$0xf]  ;;  %v14589_v46 = vor.u32 %v17704_v15, %v14586_v5 }
 0x4dc   :  { %v14237_v18 = vor.u32 %v17616_v30, %v14234_v22  ;;  %v17612_v52 = vld [vmem:[#allocation10 + $0x90c] sm:$0xf]  ;;  %v14346_v14 = vld [vmem:[#allocation10 + $0xa18] sm:$0xf0]  ;;  %v14093_v60 = vor.u32 %v17580_v47, %v14090_v57 }
 0x4dd   :  { %10815 = vmatpush.bf16.msra.mxu2 %v14285_v48  ;;  %10828 = vmatpush.bf16.msra.mxu3 %v14413_v12  ;;  %v17648_v48 = vld [vmem:[#allocation10 + $0xa2c] sm:$0xf]  ;;  %v13965_v12 = vor.u32 %v17548_v62, %v13962_v44  ;;  %v14570_v34 = vld [vmem:[#allocation10 + $0xbd8] sm:$0xf0] }
 0x4de   :  { %v14365_v0 = vor.u32 %v17648_v48, %v14362_v45  ;;  %v17644_v21 = vld [vmem:[#allocation10 + $0xa0c] sm:$0xf]  ;;  %v14714_v6 = vld [vmem:[#allocation10 + $0xcf8] sm:$0xf0] }
 0x4df   :  { %10803 = vmatpush.bf16.msra.mxu1 %v14141_v9  ;;  %10792 = vmatpush.bf16.msrb.mxu0 %v13981_v40  ;;  %v10563_v9 = vpop.f32.mrf.mxu3  ;;  %v17700_v27 = vld [vmem:[#allocation10 + $0xbcc] sm:$0xf]  ;;  %v14842_v20 = vld [vmem:[#allocation10 + $0xdf8] sm:$0xf0]  ;;  %v14349_v40 = vor.u32 %v17644_v21, %v14346_v14 }
 0x4e0   :  { %v17768_v4 = vld [vmem:[#allocation10 + $0xdec] sm:$0xf]  ;;  %v14970_v37 = vld [vmem:[#allocation10 + $0xef8] sm:$0xf0]  ;;  %v14573_v62 = vor.u32 %v17700_v27, %v14570_v34 }
 0x4e1   :  { %10816 = vmatpush.bf16.msra.mxu2 %v14269_v2  ;;  %10829 = vmatpush.bf16.msra.mxu3 %v14397_v28  ;;  %v14218_v2 = vld [vmem:[#allocation10 + $0x918] sm:$0xf0]  ;;  %v17736_v28 = vld [vmem:[#allocation10 + $0xcec] sm:$0xf] }
 0x4e2   :  { %v14221_v61 = vor.u32 %v17612_v52, %v14218_v2  ;;  %v17800_v1 = vld [vmem:[#allocation10 + $0xeec] sm:$0xf]  ;;  %v14554_v42 = vld [vmem:[#allocation10 + $0xbb8] sm:$0xf0] }
 0x4e3   :  { %10804 = vmatpush.bf16.msra.mxu1 %v14125_v59  ;;  %10793 = vmatpush.bf16.msrb.mxu0 %v13965_v12  ;;  %v14717_v59 = vor.u32 %v17736_v28, %v14714_v6  ;;  %v17696_v44 = vld [vmem:[#allocation10 + $0xbac] sm:$0xf]  ;;  %v14698_v30 = vld [vmem:[#allocation10 + $0xcd8] sm:$0xf0]  ;;  %v10574_v57 = vpop.f32.mrf.mxu0  ;;  %v10587_v2 = vpop.f32.mrf.mxu1 }
 0x4e4   :  { %v17732_v53 = vld [vmem:[#allocation10 + $0xccc] sm:$0xf]  ;;  %v14826_v48 = vld [vmem:[#allocation10 + $0xdd8] sm:$0xf0]  ;;  %v14557_v5 = vor.u32 %v17696_v44, %v14554_v42  ;;  %v10575_v9 = vadd.f32 %v10574_v57, %v19521_v36 }
 0x4e5   :  { %10817 = vmatpush.bf16.msra.mxu2 %v14253_v39  ;;  %10830 = vmatpush.bf16.msra.mxu3 %v14381_v63  ;;  %v14845_v39 = vor.u32 %v17768_v4, %v14842_v20  ;;  %v14973_v63 = vor.u32 %v17800_v1, %v14970_v37  ;;  %v17764_v22 = vld [vmem:[#allocation10 + $0xdcc] sm:$0xf]  ;;  %v14954_v15 = vld [vmem:[#allocation10 + $0xed8] sm:$0xf0]  ;;  %v14701_v12 = vor.u32 %v17732_v53, %v14698_v30 }
 0x4e6   :  { %10794 = vmatmul.bf16.vlgmr.msrb.gmra.mxu0 %v19237_v3  ;;  %v17796_v45 = vld [vmem:[#allocation10 + $0xecc] sm:$0xf]  ;;  %v14829_v3 = vor.u32 %v17764_v22, %v14826_v48  ;;  %v14682_v52 = vld [vmem:[#allocation10 + $0xcb8] sm:$0xf0]  ;;  %v10588_v34 = vadd.f32 %v10587_v2, %v10575_v9 }
 0x4e7   :  { %10805 = vmatpush.bf16.msra.mxu1 %v14109_v41  ;;  %10838 = vmatpush.bf16.msra.mxu0 %v14589_v46  ;;  %v17692_v41 = vld [vmem:[#allocation10 + $0xb8c] sm:$0xf]  ;;  %v14957_v47 = vor.u32 %v17796_v45, %v14954_v15  ;;  %v14810_v46 = vld [vmem:[#allocation10 + $0xdb8] sm:$0xf0] }
 0x4e8   :  { %v17728_v51 = vld [vmem:[#allocation10 + $0xcac] sm:$0xf]  ;;  %v14938_v14 = vld [vmem:[#allocation10 + $0xeb8] sm:$0xf0] }
 0x4e9   :  { %10818 = vmatpush.bf16.msra.mxu2 %v14237_v18  ;;  %10831 = vmatpush.bf16.msra.mxu3 %v14365_v0  ;;  %v14538_v18 = vld [vmem:[#allocation10 + $0xb98] sm:$0xf0]  ;;  %v17760_v0 = vld [vmem:[#allocation10 + $0xdac] sm:$0xf] }
 0x4ea   :  { %v17792_v21 = vld [vmem:[#allocation10 + $0xeac] sm:$0xf]  ;;  %v14541_v27 = vor.u32 %v17692_v41, %v14538_v18  ;;  %v14813_v28 = vor.u32 %v17760_v0, %v14810_v46  ;;  %v14522_v4 = vld [vmem:[#allocation10 + $0xb78] sm:$0xf0] }
 0x4eb   :  { %10806 = vmatpush.bf16.msra.mxu1 %v14093_v60  ;;  %10839 = vmatpush.bf16.msra.mxu0 %v14573_v62  ;;  %v17688_v6 = vld [vmem:[#allocation10 + $0xb6c] sm:$0xf]  ;;  %v14941_v60 = vor.u32 %v17792_v21, %v14938_v14  ;;  %v14922_v36 = vld [vmem:[#allocation10 + $0xe98] sm:$0xf0]  ;;  %v10576_v53 = vpop.f32.mrf.mxu0  ;;  %v10589_v48 = vpop.f32.mrf.mxu1 }
 0x4ec   :  { %v17724_v20 = vld [vmem:[#allocation10 + $0xc8c] sm:$0xf]  ;;  %v14525_v37 = vor.u32 %v17688_v6, %v14522_v4  ;;  %v14778_v22 = vld [vmem:[#allocation10 + $0xd78] sm:$0xf0] }
 0x4ed   :  { %10819 = vmatpush.bf16.msra.mxu2 %v14221_v61  ;;  %10832 = vmatpush.bf16.msra.mxu3 %v14349_v40  ;;  %v17756_v61 = vld [vmem:[#allocation10 + $0xd8c] sm:$0xf]  ;;  %v14906_v15 = vld [vmem:[#allocation10 + $0xe78] sm:$0xf0] }
 0x4ee   :  { %10807 = vmatmul.bf16.vlgmr.msra.gmra.mxu1 %v19256_v17  ;;  %v14685_v17 = vor.u32 %v17728_v51, %v14682_v52  ;;  %v17788_v1 = vld [vmem:[#allocation10 + $0xe8c] sm:$0xf]  ;;  %v14490_v51 = vld [vmem:[#allocation10 + $0xb38] sm:$0xf0] }
 0x4ef   :  { %10851 = vmatpush.bf16.msrb.mxu1 %v14717_v59  ;;  %10840 = vmatpush.bf16.msra.mxu0 %v14557_v5  ;;  %v17684_v59 = vld [vmem:[#allocation10 + $0xb4c] sm:$0xf]  ;;  %v14925_v42 = vor.u32 %v17788_v1, %v14922_v36  ;;  %v14634_v46 = vld [vmem:[#allocation10 + $0xc58] sm:$0xf0] }
 0x4f0   :  { %10820 = vmatmul.bf16.vlgmr.msra.gmra.mxu2 %v19258_v11  ;;  %10833 = vmatmul.bf16.vlgmr.msra.gmra.mxu3 %v19260_v32  ;;  %v14666_v11 = vld [vmem:[#allocation10 + $0xc98] sm:$0xf0]  ;;  %v17720_v44 = vld [vmem:[#allocation10 + $0xc6c] sm:$0xf] }
 0x4f1   :  { %10864 = vmatpush.bf16.msrb.mxu2 %v14845_v39  ;;  %10877 = vmatpush.bf16.msrb.mxu3 %v14973_v63  ;;  %v14794_v32 = vld [vmem:[#allocation10 + $0xd98] sm:$0xf0]  ;;  %v14669_v40 = vor.u32 %v17724_v20, %v14666_v11  ;;  %v17752_v30 = vld [vmem:[#allocation10 + $0xd6c] sm:$0xf] }
 0x4f2   :  { %v14797_v62 = vor.u32 %v17756_v61, %v14794_v32  ;;  %v14506_v39 = vld [vmem:[#allocation10 + $0xb58] sm:$0xf0]  ;;  %v17784_v45 = vld [vmem:[#allocation10 + $0xe6c] sm:$0xf] }
 0x4f3   :  { %10852 = vmatpush.bf16.msrb.mxu1 %v14701_v12  ;;  %10841 = vmatpush.bf16.msra.mxu0 %v14541_v27  ;;  %v14650_v63 = vld [vmem:[#allocation10 + $0xc78] sm:$0xf0]  ;;  %v14509_v5 = vor.u32 %v17684_v59, %v14506_v39  ;;  %v10600_v41 = vpop.f32.mrf.mxu2  ;;  %v17680_v18 = vld [vmem:[#allocation10 + $0xb2c] sm:$0xf]  ;;  %v14909_v57 = vor.u32 %v17784_v45, %v14906_v15  ;;  %v10613_v0 = vpop.f32.mrf.mxu3 }
 0x4f4   :  { %v14653_v12 = vor.u32 %v17720_v44, %v14650_v63  ;;  %v10601_v52 = vadd.f32 %v10600_v41, %v10588_v34  ;;  %v17748_v9 = vld [vmem:[#allocation10 + $0xd4c] sm:$0xf]  ;;  %v14762_v2 = vld [vmem:[#allocation10 + $0xd58] sm:$0xf0] }
 0x4f5   :  { %10865 = vmatpush.bf16.msrb.mxu2 %v14829_v3  ;;  %10878 = vmatpush.bf16.msrb.mxu3 %v14957_v47  ;;  %v14781_v3 = vor.u32 %v17752_v30, %v14778_v22  ;;  %v17716_v47 = vld [vmem:[#allocation10 + $0xc4c] sm:$0xf]  ;;  %v14890_v14 = vld [vmem:[#allocation10 + $0xe58] sm:$0xf0]  ;;  %v14765_v4 = vor.u32 %v17748_v9, %v14762_v2 }
 0x4f6   :  { %v17780_v21 = vld [vmem:[#allocation10 + $0xe4c] sm:$0xf]  ;;  %v19528_v27 = vadd.f32 %v10613_v0, %v10601_v52  ;;  %v14637_v6 = vor.u32 %v17716_v47, %v14634_v46  ;;  %v14474_v20 = vld [vmem:[#allocation10 + $0xb18] sm:$0xf0] }
 0x4f7   :  { %10853 = vmatpush.bf16.msrb.mxu1 %v14685_v17  ;;  %10842 = vmatpush.bf16.msra.mxu0 %v14525_v37  ;;  %v14493_v17 = vor.u32 %v17680_v18, %v14490_v51  ;;  %v14618_v11 = vld [vmem:[#allocation10 + $0xc38] sm:$0xf0]  ;;  %v14893_v34 = vor.u32 %v17780_v21, %v14890_v14  ;;  %v17744_v61 = vld [vmem:[#allocation10 + $0xd2c] sm:$0xf] }
 0x4f8   :  { %v14746_v32 = vld [vmem:[#allocation10 + $0xd38] sm:$0xf0]  ;;  %v17776_v1 = vld [vmem:[#allocation10 + $0xe2c] sm:$0xf] }
 0x4f9   :  { %10866 = vmatpush.bf16.msrb.mxu2 %v14813_v28  ;;  %10879 = vmatpush.bf16.msrb.mxu3 %v14941_v60  ;;  %v17676_v28 = vld [vmem:[#allocation10 + $0xb0c] sm:$0xf]  ;;  %v14874_v36 = vld [vmem:[#allocation10 + $0xe38] sm:$0xf0]  ;;  %v14749_v39 = vor.u32 %v17744_v61, %v14746_v32 }
 0x4fa   :  { %v17712_v60 = vld [vmem:[#allocation10 + $0xc2c] sm:$0xf]  ;;  %v14602_v53 = vld [vmem:[#allocation10 + $0xc18] sm:$0xf0]  ;;  %v14877_v30 = vor.u32 %v17776_v1, %v14874_v36 }
 0x4fb   :  { %10854 = vmatpush.bf16.msrb.mxu1 %v14669_v40  ;;  %10843 = vmatpush.bf16.msra.mxu0 %v14509_v5  ;;  %v17832_v37 = vld [vmem:[#allocation10 + $0xfec] sm:$0xf]  ;;  %v15098_v40 = vld [vmem:[#allocation10 + $0xff8] sm:$0xf0]  ;;  %v14621_v59 = vor.u32 %v17712_v60, %v14618_v11  ;;  %v10602_v44 = vpop.f32.mrf.mxu2  ;;  %v10615_v48 = vpop.f32.mrf.mxu3 }
 0x4fc   :  { %v17740_v63 = vld [vmem:[#allocation10 + $0xd0c] sm:$0xf]  ;;  %v15101_v22 = vor.u32 %v17832_v37, %v15098_v40  ;;  %v14730_v45 = vld [vmem:[#allocation10 + $0xd18] sm:$0xf0] }
 0x4fd   :  { %10867 = vmatpush.bf16.msrb.mxu2 %v14797_v62  ;;  %10880 = vmatpush.bf16.msrb.mxu3 %v14925_v42  ;;  %v14477_v62 = vor.u32 %v17676_v28, %v14474_v20  ;;  %v17708_v42 = vld [vmem:[#allocation10 + $0xc0c] sm:$0xf]  ;;  %v14858_v5 = vld [vmem:[#allocation10 + $0xe18] sm:$0xf0]  ;;  %v14733_v52 = vor.u32 %v17740_v63, %v14730_v45 }
 0x4fe   :  { %v17772_v15 = vld [vmem:[#allocation10 + $0xe0c] sm:$0xf]  ;;  %v15226_v18 = vld [vmem:[#allocation10 + $0x10f8] sm:$0xf0] }
 0x4ff   :  { %10855 = vmatpush.bf16.msrb.mxu1 %v14653_v12  ;;  %10844 = vmatpush.bf16.msra.mxu0 %v14493_v17  ;;  %v17828_v12 = vld [vmem:[#allocation10 + $0xfcc] sm:$0xf]  ;;  %v15354_v47 = vld [vmem:[#allocation10 + $0x11f8] sm:$0xf0]  ;;  %v14861_v9 = vor.u32 %v17772_v15, %v14858_v5 }
 0x500   :  { %v17864_v41 = vld [vmem:[#allocation10 + $0x10ec] sm:$0xf]  ;;  %v15482_v46 = vld [vmem:[#allocation10 + $0x12f8] sm:$0xf0] }
 0x501   :  { %10868 = vmatpush.bf16.msrb.mxu2 %v14781_v3  ;;  %10881 = vmatpush.bf16.msrb.mxu3 %v14909_v57  ;;  %v15082_v3 = vld [vmem:[#allocation10 + $0xfd8] sm:$0xf0]  ;;  %v17896_v51 = vld [vmem:[#allocation10 + $0x11ec] sm:$0xf]  ;;  %v14605_v57 = vor.u32 %v17708_v42, %v14602_v53  ;;  %v15229_v21 = vor.u32 %v17864_v41, %v15226_v18 }
 0x502   :  { %v17928_v0 = vld [vmem:[#allocation10 + $0x12ec] sm:$0xf]  ;;  %v15085_v2 = vor.u32 %v17828_v12, %v15082_v3  ;;  %v15357_v14 = vor.u32 %v17896_v51, %v15354_v47  ;;  %v15066_v28 = vld [vmem:[#allocation10 + $0xfb8] sm:$0xf0] }
 0x503   :  { %10856 = vmatpush.bf16.msrb.mxu1 %v14637_v6  ;;  %10845 = vmatpush.bf16.msra.mxu0 %v14477_v62  ;;  %v17824_v17 = vld [vmem:[#allocation10 + $0xfac] sm:$0xf]  ;;  %v15210_v20 = vld [vmem:[#allocation10 + $0x10d8] sm:$0xf0]  ;;  %v10639_v63 = vpop.f32.mrf.mxu1 }
 0x504   :  { %v17860_v6 = vld [vmem:[#allocation10 + $0x10cc] sm:$0xf]  ;;  %v15338_v11 = vld [vmem:[#allocation10 + $0x11d8] sm:$0xf0]  ;;  %v15069_v32 = vor.u32 %v17824_v17, %v15066_v28 }
 0x505   :  { %10869 = vmatpush.bf16.msrb.mxu2 %v14765_v4  ;;  %10882 = vmatpush.bf16.msrb.mxu3 %v14893_v34  ;;  %v15485_v4 = vor.u32 %v17928_v0, %v15482_v46  ;;  %v17892_v60 = vld [vmem:[#allocation10 + $0x11cc] sm:$0xf]  ;;  %v15466_v61 = vld [vmem:[#allocation10 + $0x12d8] sm:$0xf0]  ;;  %v15213_v1 = vor.u32 %v17860_v6, %v15210_v20 }
 0x506   :  { %10846 = vmatmul.bf16.vlgmr.msra.gmra.mxu0 %v19262_v24  ;;  %v17924_v34 = vld [vmem:[#allocation10 + $0x12cc] sm:$0xf]  ;;  %v15341_v24 = vor.u32 %v17892_v60, %v15338_v11  ;;  %v15050_v37 = vld [vmem:[#allocation10 + $0xf98] sm:$0xf0] }
 0x507   :  { %10857 = vmatpush.bf16.msrb.mxu1 %v14621_v59  ;;  %10890 = vmatpush.bf16.msrb.mxu0 %v15101_v22  ;;  %v17820_v36 = vld [vmem:[#allocation10 + $0xf8c] sm:$0xf]  ;;  %v15469_v62 = vor.u32 %v17924_v34, %v15466_v61  ;;  %v10626_v59 = vpop.f32.mrf.mxu0  ;;  %v15322_v42 = vld [vmem:[#allocation10 + $0x11b8] sm:$0xf0] }
 0x508   :  { %v17856_v40 = vld [vmem:[#allocation10 + $0x10ac] sm:$0xf]  ;;  %v10627_v53 = vadd.f32 %v10626_v59, %v19528_v27  ;;  %v15450_v22 = vld [vmem:[#allocation10 + $0x12b8] sm:$0xf0]  ;;  %v15053_v48 = vor.u32 %v17820_v36, %v15050_v37 }
 0x509   :  { %10870 = vmatpush.bf16.msrb.mxu2 %v14749_v39  ;;  %10883 = vmatpush.bf16.msrb.mxu3 %v14877_v30  ;;  %v15194_v39 = vld [vmem:[#allocation10 + $0x10b8] sm:$0xf0]  ;;  %v17888_v44 = vld [vmem:[#allocation10 + $0x11ac] sm:$0xf] }
 0x50a   :  { %v17920_v30 = vld [vmem:[#allocation10 + $0x12ac] sm:$0xf]  ;;  %v10640_v45 = vadd.f32 %v10639_v63, %v10627_v53  ;;  %v15325_v15 = vor.u32 %v17888_v44, %v15322_v42  ;;  %v15034_v12 = vld [vmem:[#allocation10 + $0xf78] sm:$0xf0] }
 0x50b   :  { %10858 = vmatpush.bf16.msrb.mxu1 %v14605_v57  ;;  %10891 = vmatpush.bf16.msrb.mxu0 %v15085_v2  ;;  %v17816_v5 = vld [vmem:[#allocation10 + $0xf6c] sm:$0xf]  ;;  %v15453_v41 = vor.u32 %v17920_v30, %v15450_v22  ;;  %v15434_v27 = vld [vmem:[#allocation10 + $0x1298] sm:$0xf0]  ;;  %v10641_v6 = vpop.f32.mrf.mxu1 }
 0x50c   :  { %v17852_v3 = vld [vmem:[#allocation10 + $0x108c] sm:$0xf]  ;;  %v15037_v47 = vor.u32 %v17816_v5, %v15034_v12  ;;  %v15018_v46 = vld [vmem:[#allocation10 + $0xf58] sm:$0xf0] }
 0x50d   :  { %10871 = vmatpush.bf16.msrb.mxu2 %v14733_v52  ;;  %10884 = vmatpush.bf16.msrb.mxu3 %v14861_v9  ;;  %v17884_v18 = vld [vmem:[#allocation10 + $0x118c] sm:$0xf]  ;;  %v15290_v28 = vld [vmem:[#allocation10 + $0x1178] sm:$0xf0] }
 0x50e   :  { %10859 = vmatmul.bf16.vlgmr.msrb.gmra.mxu1 %v19278_v33  ;;  %v15197_v33 = vor.u32 %v17856_v40, %v15194_v39  ;;  %v17916_v51 = vld [vmem:[#allocation10 + $0x128c] sm:$0xf]  ;;  %v15418_v20 = vld [vmem:[#allocation10 + $0x1278] sm:$0xf0] }
 0x50f   :  { %10903 = vmatpush.bf16.msra.mxu1 %v15229_v21  ;;  %10892 = vmatpush.bf16.msrb.mxu0 %v15069_v32  ;;  %v17812_v0 = vld [vmem:[#allocation10 + $0xf4c] sm:$0xf]  ;;  %v15437_v2 = vor.u32 %v17916_v51, %v15434_v27  ;;  %v10628_v21 = vpop.f32.mrf.mxu0  ;;  %v15002_v32 = vld [vmem:[#allocation10 + $0xf38] sm:$0xf0] }
 0x510   :  { %10872 = vmatmul.bf16.vlgmr.msrb.gmra.mxu2 %v19280_v7  ;;  %10885 = vmatmul.bf16.vlgmr.msrb.gmra.mxu3 %v19282_v38  ;;  %v15178_v7 = vld [vmem:[#allocation10 + $0x1098] sm:$0xf0]  ;;  %v17848_v9 = vld [vmem:[#allocation10 + $0x106c] sm:$0xf]  ;;  %v15021_v60 = vor.u32 %v17812_v0, %v15018_v46 }
 0x511   :  { %10916 = vmatpush.bf16.msra.mxu2 %v15357_v14  ;;  %10929 = vmatpush.bf16.msra.mxu3 %v15485_v4  ;;  %v15306_v38 = vld [vmem:[#allocation10 + $0x1198] sm:$0xf0]  ;;  %v15181_v57 = vor.u32 %v17852_v3, %v15178_v7  ;;  %v17880_v17 = vld [vmem:[#allocation10 + $0x116c] sm:$0xf] }
 0x512   :  { %v15309_v52 = vor.u32 %v17884_v18, %v15306_v38  ;;  %v15162_v14 = vld [vmem:[#allocation10 + $0x1078] sm:$0xf0]  ;;  %v17912_v4 = vld [vmem:[#allocation10 + $0x126c] sm:$0xf]  ;;  %v15293_v34 = vor.u32 %v17880_v17, %v15290_v28 }
 0x513   :  { %10904 = vmatpush.bf16.msra.mxu1 %v15213_v1  ;;  %10893 = vmatpush.bf16.msrb.mxu0 %v15053_v48  ;;  %v15165_v11 = vor.u32 %v17848_v9, %v15162_v14  ;;  %v17808_v61 = vld [vmem:[#allocation10 + $0xf2c] sm:$0xf]  ;;  %v10652_v36 = vpop.f32.mrf.mxu2  ;;  %v10665_v37 = vpop.f32.mrf.mxu3  ;;  %v15146_v40 = vld [vmem:[#allocation10 + $0x1058] sm:$0xf0] }
 0x514   :  { %v17844_v1 = vld [vmem:[#allocation10 + $0x104c] sm:$0xf]  ;;  %v15274_v59 = vld [vmem:[#allocation10 + $0x1158] sm:$0xf0]  ;;  %v10653_v39 = vadd.f32 %v10652_v36, %v10640_v45  ;;  %v15005_v53 = vor.u32 %v17808_v61, %v15002_v32  ;;  %v19537_v51 = vpop.f32.mrf.mxu1 }
 0x515   :  { %10917 = vmatpush.bf16.msra.mxu2 %v15341_v24  ;;  %10930 = vmatpush.bf16.msra.mxu3 %v15469_v62  ;;  %v15421_v24 = vor.u32 %v17912_v4, %v15418_v20  ;;  %v17876_v62 = vld [vmem:[#allocation10 + $0x114c] sm:$0xf]  ;;  %v15402_v42 = vld [vmem:[#allocation10 + $0x1258] sm:$0xf0]  ;;  %v15149_v22 = vor.u32 %v17844_v1, %v15146_v40 }
 0x516   :  { %v17908_v44 = vld [vmem:[#allocation10 + $0x124c] sm:$0xf]  ;;  %v19535_v30 = vadd.f32 %v10665_v37, %v10653_v39  ;;  %v15277_v48 = vor.u32 %v17876_v62, %v15274_v59  ;;  %v15130_v5 = vld [vmem:[#allocation10 + $0x1038] sm:$0xf0] }
 0x517   :  { %10905 = vmatpush.bf16.msra.mxu1 %v15197_v33  ;;  %10894 = vmatpush.bf16.msrb.mxu0 %v15037_v47  ;;  %v17804_v63 = vld [vmem:[#allocation10 + $0xf0c] sm:$0xf]  ;;  %v14986_v33 = vld [vmem:[#allocation10 + $0xf18] sm:$0xf0]  ;;  %v15405_v12 = vor.u32 %v17908_v44, %v15402_v42 }
 0x518   :  { %v17872_v3 = vld [vmem:[#allocation10 + $0x112c] sm:$0xf]  ;;  %v15386_v45 = vld [vmem:[#allocation10 + $0x1238] sm:$0xf0]  ;;  %v14989_v27 = vor.u32 %v17804_v63, %v14986_v33 }
 0x519   :  { %10918 = vmatpush.bf16.msra.mxu2 %v15325_v15  ;;  %10931 = vmatpush.bf16.msra.mxu3 %v15453_v41  ;;  %v17840_v15 = vld [vmem:[#allocation10 + $0x102c] sm:$0xf]  ;;  %v15258_v41 = vld [vmem:[#allocation10 + $0x1138] sm:$0xf0] }
 0x51a   :  { %v17904_v7 = vld [vmem:[#allocation10 + $0x122c] sm:$0xf]  ;;  %v15610_v38 = vld [vmem:[#allocation10 + $0x13f8] sm:$0xf0]  ;;  %v15133_v47 = vor.u32 %v17840_v15, %v15130_v5 }
 0x51b   :  { %10906 = vmatpush.bf16.msra.mxu1 %v15181_v57  ;;  %10895 = vmatpush.bf16.msrb.mxu0 %v15021_v60  ;;  %v17960_v18 = vld [vmem:[#allocation10 + $0x13ec] sm:$0xf]  ;;  %v15261_v57 = vor.u32 %v17872_v3, %v15258_v41  ;;  %v15114_v0 = vld [vmem:[#allocation10 + $0x1018] sm:$0xf0]  ;;  %v15389_v9 = vor.u32 %v17904_v7, %v15386_v45  ;;  %v10654_v21 = vpop.f32.mrf.mxu2  ;;  %v10667_v14 = vpop.f32.mrf.mxu3 }
 0x51c   :  { %v17868_v46 = vld [vmem:[#allocation10 + $0x110c] sm:$0xf]  ;;  %v15242_v17 = vld [vmem:[#allocation10 + $0x1118] sm:$0xf0]  ;;  %v10693_v63 = vpop.f32.mrf.mxu1 }
 0x51d   :  { %10919 = vmatpush.bf16.msra.mxu2 %v15309_v52  ;;  %10932 = vmatpush.bf16.msra.mxu3 %v15437_v2  ;;  %v17836_v52 = vld [vmem:[#allocation10 + $0x100c] sm:$0xf]  ;;  %v15613_v2 = vor.u32 %v17960_v18, %v15610_v38  ;;  %v15370_v6 = vld [vmem:[#allocation10 + $0x1218] sm:$0xf0]  ;;  %v15245_v1 = vor.u32 %v17868_v46, %v15242_v17 }
 0x51e   :  { %v17900_v28 = vld [vmem:[#allocation10 + $0x120c] sm:$0xf]  ;;  %v15594_v20 = vld [vmem:[#allocation10 + $0x13d8] sm:$0xf0]  ;;  %v15117_v32 = vor.u32 %v17836_v52, %v15114_v0 }
 0x51f   :  { %10907 = vmatpush.bf16.msra.mxu1 %v15165_v11  ;;  %10896 = vmatpush.bf16.msrb.mxu0 %v15005_v53  ;;  %v17956_v4 = vld [vmem:[#allocation10 + $0x13cc] sm:$0xf]  ;;  %v15738_v11 = vld [vmem:[#allocation10 + $0x14f8] sm:$0xf0]  ;;  %v15373_v37 = vor.u32 %v17900_v28, %v15370_v6 }
 0x520   :  { %v17992_v60 = vld [vmem:[#allocation10 + $0x14ec] sm:$0xf]  ;;  %v15866_v61 = vld [vmem:[#allocation10 + $0x15f8] sm:$0xf0]  ;;  %v15597_v40 = vor.u32 %v17956_v4, %v15594_v20 }
 0x521   :  { %10920 = vmatpush.bf16.msra.mxu2 %v15293_v34  ;;  %10933 = vmatpush.bf16.msra.mxu3 %v15421_v24  ;;  %v18024_v34 = vld [vmem:[#allocation10 + $0x15ec] sm:$0xf]  ;;  %v15994_v36 = vld [vmem:[#allocation10 + $0x16f8] sm:$0xf0]  ;;  %v15741_v62 = vor.u32 %v17992_v60, %v15738_v11 }
 0x522   :  { %v18056_v24 = vld [vmem:[#allocation10 + $0x16ec] sm:$0xf]  ;;  %v15869_v59 = vor.u32 %v18024_v34, %v15866_v61  ;;  %v15578_v44 = vld [vmem:[#allocation10 + $0x13b8] sm:$0xf0] }
 0x523   :  { %10908 = vmatpush.bf16.msra.mxu1 %v15149_v22  ;;  %10897 = vmatpush.bf16.msrb.mxu0 %v14989_v27  ;;  %v17952_v39 = vld [vmem:[#allocation10 + $0x13ac] sm:$0xf]  ;;  %v15997_v53 = vor.u32 %v18056_v24, %v15994_v36  ;;  %v15722_v22 = vld [vmem:[#allocation10 + $0x14d8] sm:$0xf0]  ;;  %v10678_v38 = vpop.f32.mrf.mxu0 }
 0x524   :  { %v17988_v42 = vld [vmem:[#allocation10 + $0x14cc] sm:$0xf]  ;;  %v15850_v33 = vld [vmem:[#allocation10 + $0x15d8] sm:$0xf0]  ;;  %v10679_v52 = vadd.f32 %v10678_v38, %v19535_v30 }
 0x525   :  { %10921 = vmatpush.bf16.msra.mxu2 %v15277_v48  ;;  %10934 = vmatpush.bf16.msra.mxu3 %v15405_v12  ;;  %v18020_v48 = vld [vmem:[#allocation10 + $0x15cc] sm:$0xf]  ;;  %v15978_v5 = vld [vmem:[#allocation10 + $0x16d8] sm:$0xf0]  ;;  %v15581_v12 = vor.u32 %v17952_v39, %v15578_v44 }
 0x526   :  { %10898 = vmatmul.bf16.vlgmr.msrb.gmra.mxu0 %v19284_v35  ;;  %v18052_v15 = vld [vmem:[#allocation10 + $0x16cc] sm:$0xf]  ;;  %v15725_v35 = vor.u32 %v17988_v42, %v15722_v22  ;;  %v15853_v3 = vor.u32 %v18020_v48, %v15850_v33  ;;  %v15562_v7 = vld [vmem:[#allocation10 + $0x1398] sm:$0xf0] }
 0x527   :  { %10909 = vmatpush.bf16.msra.mxu1 %v15133_v47  ;;  %10942 = vmatpush.bf16.msra.mxu0 %v15613_v2  ;;  %v17948_v41 = vld [vmem:[#allocation10 + $0x138c] sm:$0xf]  ;;  %v15981_v18 = vor.u32 %v18052_v15, %v15978_v5  ;;  %v15706_v27 = vld [vmem:[#allocation10 + $0x14b8] sm:$0xf0]  ;;  %v19545_v2 = vadd.f32 %v19537_v51, %v10679_v52 }
 0x528   :  { %v17984_v45 = vld [vmem:[#allocation10 + $0x14ac] sm:$0xf]  ;;  %v15962_v46 = vld [vmem:[#allocation10 + $0x16b8] sm:$0xf0] }
 0x529   :  { %10922 = vmatpush.bf16.msra.mxu2 %v15261_v57  ;;  %10935 = vmatpush.bf16.msra.mxu3 %v15389_v9  ;;  %v18016_v47 = vld [vmem:[#allocation10 + $0x15ac] sm:$0xf]  ;;  %v15834_v57 = vld [vmem:[#allocation10 + $0x15b8] sm:$0xf0]  ;;  %v15565_v9 = vor.u32 %v17948_v41, %v15562_v7 }
 0x52a   :  { %v18048_v0 = vld [vmem:[#allocation10 + $0x16ac] sm:$0xf]  ;;  %v15837_v21 = vor.u32 %v18016_v47, %v15834_v57  ;;  %v15546_v17 = vld [vmem:[#allocation10 + $0x1378] sm:$0xf0] }
 0x52b   :  { %10910 = vmatpush.bf16.msra.mxu1 %v15117_v32  ;;  %10943 = vmatpush.bf16.msra.mxu0 %v15597_v40  ;;  %v17944_v14 = vld [vmem:[#allocation10 + $0x136c] sm:$0xf]  ;;  %v15690_v6 = vld [vmem:[#allocation10 + $0x1498] sm:$0xf0]  ;;  %v10704_v60 = vpop.f32.mrf.mxu1  ;;  %v10680_v40 = vpop.f32.mrf.mxu0 }
 0x52c   :  { %v17980_v28 = vld [vmem:[#allocation10 + $0x148c] sm:$0xf]  ;;  %v15818_v4 = vld [vmem:[#allocation10 + $0x1598] sm:$0xf0]  ;;  %v15549_v11 = vor.u32 %v17944_v14, %v15546_v17 }
 0x52d   :  { %10923 = vmatpush.bf16.msra.mxu2 %v15245_v1  ;;  %10936 = vmatpush.bf16.msra.mxu3 %v15373_v37  ;;  %v18044_v30 = vld [vmem:[#allocation10 + $0x168c] sm:$0xf]  ;;  %v15946_v20 = vld [vmem:[#allocation10 + $0x1698] sm:$0xf0]  ;;  %v15693_v61 = vor.u32 %v17980_v28, %v15690_v6 }
 0x52e   :  { %10911 = vmatmul.bf16.vlgmr.msra.gmra.mxu1 %v19303_v10  ;;  %v15709_v10 = vor.u32 %v17984_v45, %v15706_v27  ;;  %v19730_v34 = vld [vmem:[#allocation35_spill] sm:$0xff]  ;;  %v17940_v1 = vld [vmem:[#allocation10 + $0x134c] sm:$0xf]  ;;  %v15949_v37 = vor.u32 %v18044_v30, %v15946_v20 }
 0x52f   :  { %10955 = vmatpush.bf16.msrb.mxu1 %v15741_v62  ;;  %10944 = vmatpush.bf16.msra.mxu0 %v15581_v12  ;;  %v10705_v51 = vadd.f32 %v10704_v60, %v19730_v34  ;;  %v15530_v24 = vld [vmem:[#allocation10 + $0x1358] sm:$0xf0]  ;;  %v17976_v36 = vld [vmem:[#allocation10 + $0x146c] sm:$0xf] }
 0x530   :  { %10924 = vmatmul.bf16.vlgmr.msra.gmra.mxu2 %v19305_v16  ;;  %10937 = vmatmul.bf16.vlgmr.msra.gmra.mxu3 %v19307_v58  ;;  %v15965_v16 = vor.u32 %v18048_v0, %v15962_v46  ;;  %v18012_v58 = vld [vmem:[#allocation10 + $0x158c] sm:$0xf]  ;;  %v15674_v62 = vld [vmem:[#allocation10 + $0x1478] sm:$0xf0] }
 0x531   :  { %10968 = vmatpush.bf16.msrb.mxu2 %v15869_v59  ;;  %10981 = vmatpush.bf16.msrb.mxu3 %v15997_v53  ;;  %v15821_v32 = vor.u32 %v18012_v58, %v15818_v4  ;;  %v18008_v59 = vld [vmem:[#allocation10 + $0x156c] sm:$0xf]  ;;  %v15802_v39 = vld [vmem:[#allocation10 + $0x1578] sm:$0xf0]  ;;  %v15533_v53 = vor.u32 %v17940_v1, %v15530_v24  ;;  %v15677_v63 = vor.u32 %v17976_v36, %v15674_v62 }
 0x532   :  { %v18040_v44 = vld [vmem:[#allocation10 + $0x166c] sm:$0xf]  ;;  %v15930_v42 = vld [vmem:[#allocation10 + $0x1678] sm:$0xf0]  ;;  %v15805_v22 = vor.u32 %v18008_v59, %v15802_v39 }
 0x533   :  { %10956 = vmatpush.bf16.msrb.mxu1 %v15725_v35  ;;  %10945 = vmatpush.bf16.msra.mxu0 %v15565_v9  ;;  %v10717_v48 = vpop.f32.mrf.mxu2  ;;  %v17936_v33 = vld [vmem:[#allocation10 + $0x132c] sm:$0xf]  ;;  %v15514_v15 = vld [vmem:[#allocation10 + $0x1338] sm:$0xf0]  ;;  %v15933_v12 = vor.u32 %v18040_v44, %v15930_v42  ;;  %v10706_v47 = vpop.f32.mrf.mxu1 }
 0x534   :  { %v17972_v5 = vld [vmem:[#allocation10 + $0x144c] sm:$0xf]  ;;  %v10718_v35 = vadd.f32 %v10717_v48, %v10705_v51  ;;  %v15658_v41 = vld [vmem:[#allocation10 + $0x1458] sm:$0xf0]  ;;  %v15517_v57 = vor.u32 %v17936_v33, %v15514_v15 }
 0x535   :  { %10969 = vmatpush.bf16.msrb.mxu2 %v15853_v3  ;;  %10982 = vmatpush.bf16.msrb.mxu3 %v15981_v18  ;;  %v10730_v3 = vpop.f32.mrf.mxu3  ;;  %v18004_v7 = vld [vmem:[#allocation10 + $0x154c] sm:$0xf]  ;;  %v15786_v45 = vld [vmem:[#allocation10 + $0x1558] sm:$0xf0]  ;;  %v15661_v0 = vor.u32 %v17972_v5, %v15658_v41 }
 0x536   :  { %v18036_v18 = vld [vmem:[#allocation10 + $0x164c] sm:$0xf]  ;;  %v15914_v38 = vld [vmem:[#allocation10 + $0x1658] sm:$0xf0]  ;;  %v19548_v27 = vadd.f32 %v10730_v3, %v10718_v35  ;;  %v15789_v46 = vor.u32 %v18004_v7, %v15786_v45 }
 0x537   :  { %10957 = vmatpush.bf16.msrb.mxu1 %v15709_v10  ;;  %10946 = vmatpush.bf16.msra.mxu0 %v15549_v11  ;;  %v17932_v52 = vld [vmem:[#allocation10 + $0x130c] sm:$0xf]  ;;  %v15498_v9 = vld [vmem:[#allocation10 + $0x1318] sm:$0xf0]  ;;  %v15917_v14 = vor.u32 %v18036_v18, %v15914_v38 }
 0x538   :  { %v17968_v10 = vld [vmem:[#allocation10 + $0x142c] sm:$0xf]  ;;  %v15770_v28 = vld [vmem:[#allocation10 + $0x1538] sm:$0xf0]  ;;  %v15501_v30 = vor.u32 %v17932_v52, %v15498_v9 }
 0x539   :  { %10970 = vmatpush.bf16.msrb.mxu2 %v15837_v21  ;;  %10983 = vmatpush.bf16.msrb.mxu3 %v15965_v16  ;;  %v15642_v21 = vld [vmem:[#allocation10 + $0x1438] sm:$0xf0]  ;;  %v18000_v17 = vld [vmem:[#allocation10 + $0x152c] sm:$0xf] }
 0x53a   :  { %v18032_v16 = vld [vmem:[#allocation10 + $0x162c] sm:$0xf]  ;;  %v15898_v6 = vld [vmem:[#allocation10 + $0x1638] sm:$0xf0]  ;;  %v15645_v20 = vor.u32 %v17968_v10, %v15642_v21  ;;  %v15773_v60 = vor.u32 %v18000_v17, %v15770_v28 }
 0x53b   :  { %10958 = vmatpush.bf16.msrb.mxu1 %v15693_v61  ;;  %10947 = vmatpush.bf16.msra.mxu0 %v15533_v53  ;;  %v18088_v58 = vld [vmem:[#allocation10 + $0x17ec] sm:$0xf]  ;;  %v16122_v4 = vld [vmem:[#allocation10 + $0x17f8] sm:$0xf0]  ;;  %v10719_v11 = vpop.f32.mrf.mxu2 }
 0x53c   :  { %v17964_v34 = vld [vmem:[#allocation10 + $0x140c] sm:$0xf]  ;;  %v15626_v51 = vld [vmem:[#allocation10 + $0x1418] sm:$0xf0]  ;;  %v16125_v1 = vor.u32 %v18088_v58, %v16122_v4 }
 0x53d   :  { %10971 = vmatpush.bf16.msrb.mxu2 %v15821_v32  ;;  %10984 = vmatpush.bf16.msrb.mxu3 %v15949_v37  ;;  %v17996_v61 = vld [vmem:[#allocation10 + $0x150c] sm:$0xf]  ;;  %v15901_v32 = vor.u32 %v18032_v16, %v15898_v6  ;;  %v10732_v24 = vpop.f32.mrf.mxu3  ;;  %v15754_v36 = vld [vmem:[#allocation10 + $0x1518] sm:$0xf0] }
 0x53e   :  { %v18028_v37 = vld [vmem:[#allocation10 + $0x160c] sm:$0xf]  ;;  %v15882_v40 = vld [vmem:[#allocation10 + $0x1618] sm:$0xf0] }
 0x53f   :  { %10959 = vmatpush.bf16.msrb.mxu1 %v15677_v63  ;;  %10948 = vmatpush.bf16.msra.mxu0 %v15517_v57  ;;  %v18084_v62 = vld [vmem:[#allocation10 + $0x17cc] sm:$0xf]  ;;  %v16106_v59 = vld [vmem:[#allocation10 + $0x17d8] sm:$0xf0]  ;;  %v15629_v63 = vor.u32 %v17964_v34, %v15626_v51  ;;  %v15885_v15 = vor.u32 %v18028_v37, %v15882_v40 }
 0x540   :  { %v18120_v39 = vld [vmem:[#allocation10 + $0x18ec] sm:$0xf]  ;;  %v16250_v44 = vld [vmem:[#allocation10 + $0x18f8] sm:$0xf0]  ;;  %v16109_v5 = vor.u32 %v18084_v62, %v16106_v59 }
 0x541   :  { %10972 = vmatpush.bf16.msrb.mxu2 %v15805_v22  ;;  %10985 = vmatpush.bf16.msrb.mxu3 %v15933_v12  ;;  %v18152_v42 = vld [vmem:[#allocation10 + $0x19ec] sm:$0xf]  ;;  %v16378_v53 = vld [vmem:[#allocation10 + $0x19f8] sm:$0xf0]  ;;  %v15757_v22 = vor.u32 %v17996_v61, %v15754_v36  ;;  %v16253_v12 = vor.u32 %v18120_v39, %v16250_v44 }
 0x542   :  { %v18184_v48 = vld [vmem:[#allocation10 + $0x1aec] sm:$0xf]  ;;  %v16506_v33 = vld [vmem:[#allocation10 + $0x1af8] sm:$0xf0]  ;;  %v16381_v35 = vor.u32 %v18152_v42, %v16378_v53 }
 0x543   :  { %10960 = vmatpush.bf16.msrb.mxu1 %v15661_v0  ;;  %10949 = vmatpush.bf16.msra.mxu0 %v15501_v30  ;;  %v18080_v3 = vld [vmem:[#allocation10 + $0x17ac] sm:$0xf]  ;;  %v16090_v41 = vld [vmem:[#allocation10 + $0x17b8] sm:$0xf0]  ;;  %v16509_v45 = vor.u32 %v18184_v48, %v16506_v33  ;;  %v10743_v17 = vpop.f32.mrf.mxu0 }
 0x544   :  { %v18116_v7 = vld [vmem:[#allocation10 + $0x18cc] sm:$0xf]  ;;  %v16234_v18 = vld [vmem:[#allocation10 + $0x18d8] sm:$0xf0]  ;;  %v16093_v0 = vor.u32 %v18080_v3, %v16090_v41  ;;  %v10744_v58 = vadd.f32 %v10743_v17, %v19548_v27 }
 0x545   :  { %10973 = vmatpush.bf16.msrb.mxu2 %v15789_v46  ;;  %10986 = vmatpush.bf16.msrb.mxu3 %v15917_v14  ;;  %v18148_v38 = vld [vmem:[#allocation10 + $0x19cc] sm:$0xf]  ;;  %v16362_v47 = vld [vmem:[#allocation10 + $0x19d8] sm:$0xf0]  ;;  %v16237_v46 = vor.u32 %v18116_v7, %v16234_v18 }
 0x546   :  { %10950 = vmatmul.bf16.vlgmr.msra.gmra.mxu0 %v19309_v29  ;;  %v18180_v57 = vld [vmem:[#allocation10 + $0x1acc] sm:$0xf]  ;;  %v16490_v52 = vld [vmem:[#allocation10 + $0x1ad8] sm:$0xf0]  ;;  %v16365_v29 = vor.u32 %v18148_v38, %v16362_v47 }
 0x547   :  { %10961 = vmatpush.bf16.msrb.mxu1 %v15645_v20  ;;  %10994 = vmatpush.bf16.msrb.mxu0 %v16125_v1  ;;  %v18076_v9 = vld [vmem:[#allocation10 + $0x178c] sm:$0xf]  ;;  %v16074_v10 = vld [vmem:[#allocation10 + $0x1798] sm:$0xf0]  ;;  %v16493_v14 = vor.u32 %v18180_v57, %v16490_v52 }
 0x548   :  { %v18112_v21 = vld [vmem:[#allocation10 + $0x18ac] sm:$0xf]  ;;  %v16218_v28 = vld [vmem:[#allocation10 + $0x18b8] sm:$0xf0]  ;;  %v16077_v20 = vor.u32 %v18076_v9, %v16074_v10 }
 0x549   :  { %10974 = vmatpush.bf16.msrb.mxu2 %v15773_v60  ;;  %10987 = vmatpush.bf16.msrb.mxu3 %v15901_v32  ;;  %v18144_v16 = vld [vmem:[#allocation10 + $0x19ac] sm:$0xf]  ;;  %v16346_v6 = vld [vmem:[#allocation10 + $0x19b8] sm:$0xf0]  ;;  %v16221_v60 = vor.u32 %v18112_v21, %v16218_v28 }
 0x54a   :  { %v18176_v4 = vld [vmem:[#allocation10 + $0x1aac] sm:$0xf]  ;;  %v16474_v30 = vld [vmem:[#allocation10 + $0x1ab8] sm:$0xf0]  ;;  %v16349_v11 = vor.u32 %v18144_v16, %v16346_v6 }
 0x54b   :  { %10962 = vmatpush.bf16.msrb.mxu1 %v15629_v63  ;;  %10995 = vmatpush.bf16.msrb.mxu0 %v16109_v5  ;;  %v16058_v34 = vld [vmem:[#allocation10 + $0x1778] sm:$0xf0]  ;;  %v18108_v51 = vld [vmem:[#allocation10 + $0x188c] sm:$0xf]  ;;  %v16477_v61 = vor.u32 %v18176_v4, %v16474_v30  ;;  %v10756_v24 = vpop.f32.mrf.mxu1  ;;  %v10745_v53 = vpop.f32.mrf.mxu0 }
 0x54c   :  { %v16202_v32 = vld [vmem:[#allocation10 + $0x1898] sm:$0xf0]  ;;  %v18140_v1 = vld [vmem:[#allocation10 + $0x198c] sm:$0xf]  ;;  %v10757_v27 = vadd.f32 %v10756_v24, %v10744_v58 }
 0x54d   :  { %10975 = vmatpush.bf16.msrb.mxu2 %v15757_v22  ;;  %10988 = vmatpush.bf16.msrb.mxu3 %v15885_v15  ;;  %v16458_v36 = vld [vmem:[#allocation10 + $0x1a98] sm:$0xf0]  ;;  %v16205_v40 = vor.u32 %v18108_v51, %v16202_v32  ;;  %v18068_v59 = vld [vmem:[#allocation10 + $0x174c] sm:$0xf] }
 0x54e   :  { %10963 = vmatmul.bf16.vlgmr.msrb.gmra.mxu1 %v19326_v50  ;;  %v18072_v50 = vld [vmem:[#allocation10 + $0x176c] sm:$0xf]  ;;  %v16042_v39 = vld [vmem:[#allocation10 + $0x1758] sm:$0xf0] }
 0x54f   :  { %11007 = vmatpush.bf16.msra.mxu1 %v16253_v12  ;;  %10996 = vmatpush.bf16.msrb.mxu0 %v16093_v0  ;;  %v16061_v37 = vor.u32 %v18072_v50, %v16058_v34  ;;  %v18104_v44 = vld [vmem:[#allocation10 + $0x186c] sm:$0xf]  ;;  %v16186_v63 = vld [vmem:[#allocation10 + $0x1878] sm:$0xf0]  ;;  %v16045_v5 = vor.u32 %v18068_v59, %v16042_v39 }
 0x550   :  { %10976 = vmatmul.bf16.vlgmr.msrb.gmra.mxu2 %v19328_v26  ;;  %10989 = vmatmul.bf16.vlgmr.msrb.gmra.mxu3 %v19330_v31  ;;  %v16330_v26 = vld [vmem:[#allocation10 + $0x1998] sm:$0xf0]  ;;  %v18172_v31 = vld [vmem:[#allocation10 + $0x1a8c] sm:$0xf]  ;;  %v16189_v12 = vor.u32 %v18104_v44, %v16186_v63 }
 0x551   :  { %11020 = vmatpush.bf16.msra.mxu2 %v16381_v35  ;;  %11033 = vmatpush.bf16.msra.mxu3 %v16509_v45  ;;  %v16333_v62 = vor.u32 %v18140_v1, %v16330_v26  ;;  %v16461_v42 = vor.u32 %v18172_v31, %v16458_v36  ;;  %v18136_v22 = vld [vmem:[#allocation10 + $0x196c] sm:$0xf]  ;;  %v16314_v48 = vld [vmem:[#allocation10 + $0x1978] sm:$0xf0] }
 0x552   :  { %v18168_v33 = vld [vmem:[#allocation10 + $0x1a6c] sm:$0xf]  ;;  %v16442_v15 = vld [vmem:[#allocation10 + $0x1a78] sm:$0xf0]  ;;  %v16317_v35 = vor.u32 %v18136_v22, %v16314_v48 }
 0x553   :  { %11008 = vmatpush.bf16.msra.mxu1 %v16237_v46  ;;  %10997 = vmatpush.bf16.msrb.mxu0 %v16077_v20  ;;  %v18064_v3 = vld [vmem:[#allocation10 + $0x172c] sm:$0xf]  ;;  %v16026_v41 = vld [vmem:[#allocation10 + $0x1738] sm:$0xf0]  ;;  %v16445_v45 = vor.u32 %v18168_v33, %v16442_v15  ;;  %v10769_v18 = vpop.f32.mrf.mxu2  ;;  %v10782_v38 = vpop.f32.mrf.mxu3 }
 0x554   :  { %v18100_v7 = vld [vmem:[#allocation10 + $0x184c] sm:$0xf]  ;;  %v16170_v47 = vld [vmem:[#allocation10 + $0x1858] sm:$0xf0]  ;;  %v10770_v0 = vadd.f32 %v10769_v18, %v10757_v27  ;;  %v10758_v46 = vpop.f32.mrf.mxu1  ;;  %v16029_v10 = vor.u32 %v18064_v3, %v16026_v41 }
 0x555   :  { %11021 = vmatpush.bf16.msra.mxu2 %v16365_v29  ;;  %11034 = vmatpush.bf16.msra.mxu3 %v16493_v14  ;;  %v18132_v57 = vld [vmem:[#allocation10 + $0x194c] sm:$0xf]  ;;  %v16298_v52 = vld [vmem:[#allocation10 + $0x1958] sm:$0xf0]  ;;  %v16173_v17 = vor.u32 %v18100_v7, %v16170_v47 }
 0x556   :  { %v18164_v29 = vld [vmem:[#allocation10 + $0x1a4c] sm:$0xf]  ;;  %v16426_v9 = vld [vmem:[#allocation10 + $0x1a58] sm:$0xf0]  ;;  %v19555_v14 = vadd.f32 %v10782_v38, %v10770_v0  ;;  %v16301_v28 = vor.u32 %v18132_v57, %v16298_v52 }
 0x557   :  { %11009 = vmatpush.bf16.msra.mxu1 %v16221_v60  ;;  %10998 = vmatpush.bf16.msrb.mxu0 %v16061_v37  ;;  %v18060_v21 = vld [vmem:[#allocation10 + $0x170c] sm:$0xf]  ;;  %v16010_v16 = vld [vmem:[#allocation10 + $0x1718] sm:$0xf0]  ;;  %v16429_v4 = vor.u32 %v18164_v29, %v16426_v9 }
 0x558   :  { %v18096_v6 = vld [vmem:[#allocation10 + $0x182c] sm:$0xf]  ;;  %v16154_v58 = vld [vmem:[#allocation10 + $0x1838] sm:$0xf0]  ;;  %v16013_v51 = vor.u32 %v18060_v21, %v16010_v16 }
 0x559   :  { %11022 = vmatpush.bf16.msra.mxu2 %v16349_v11  ;;  %11035 = vmatpush.bf16.msra.mxu3 %v16477_v61  ;;  %v18128_v30 = vld [vmem:[#allocation10 + $0x192c] sm:$0xf]  ;;  %v16282_v20 = vld [vmem:[#allocation10 + $0x1938] sm:$0xf0]  ;;  %v16157_v61 = vor.u32 %v18096_v6, %v16154_v58 }
 0x55a   :  { %v18160_v60 = vld [vmem:[#allocation10 + $0x1a2c] sm:$0xf]  ;;  %v16410_v11 = vld [vmem:[#allocation10 + $0x1a38] sm:$0xf0]  ;;  %v16285_v32 = vor.u32 %v18128_v30, %v16282_v20 }
 0x55b   :  { %11010 = vmatpush.bf16.msra.mxu1 %v16205_v40  ;;  %10999 = vmatpush.bf16.msrb.mxu0 %v16045_v5  ;;  %v18216_v50 = vld [vmem:[#allocation10 + $0x1bec] sm:$0xf]  ;;  %v16634_v34 = vld [vmem:[#allocation10 + $0x1bf8] sm:$0xf0]  ;;  %v16413_v31 = vor.u32 %v18160_v60, %v16410_v11  ;;  %v10771_v27 = vpop.f32.mrf.mxu2  ;;  %v10784_v37 = vpop.f32.mrf.mxu3 }
 0x55c   :  { %v18092_v1 = vld [vmem:[#allocation10 + $0x180c] sm:$0xf]  ;;  %v16138_v26 = vld [vmem:[#allocation10 + $0x1818] sm:$0xf0]  ;;  %v16637_v36 = vor.u32 %v18216_v50, %v16634_v34 }
 0x55d   :  { %11023 = vmatpush.bf16.msra.mxu2 %v16333_v62  ;;  %11036 = vmatpush.bf16.msra.mxu3 %v16461_v42  ;;  %v18124_v24 = vld [vmem:[#allocation10 + $0x190c] sm:$0xf]  ;;  %v16266_v40 = vld [vmem:[#allocation10 + $0x1918] sm:$0xf0]  ;;  %v16141_v48 = vor.u32 %v18092_v1, %v16138_v26 }
 0x55e   :  { %v18156_v62 = vld [vmem:[#allocation10 + $0x1a0c] sm:$0xf]  ;;  %v16394_v59 = vld [vmem:[#allocation10 + $0x1a18] sm:$0xf0]  ;;  %v16269_v33 = vor.u32 %v18124_v24, %v16266_v40 }
 0x55f   :  { %11011 = vmatpush.bf16.msra.mxu1 %v16189_v12  ;;  %11000 = vmatpush.bf16.msrb.mxu0 %v16029_v10  ;;  %v18212_v39 = vld [vmem:[#allocation10 + $0x1bcc] sm:$0xf]  ;;  %v16618_v44 = vld [vmem:[#allocation10 + $0x1bd8] sm:$0xf0]  ;;  %v16397_v12 = vor.u32 %v18156_v62, %v16394_v59 }
 0x560   :  { %v18248_v42 = vld [vmem:[#allocation10 + $0x1cec] sm:$0xf]  ;;  %v16762_v53 = vld [vmem:[#allocation10 + $0x1cf8] sm:$0xf0] }
 0x561   :  { %11024 = vmatpush.bf16.msra.mxu2 %v16317_v35  ;;  %11037 = vmatpush.bf16.msra.mxu3 %v16445_v45  ;;  %v18280_v63 = vld [vmem:[#allocation10 + $0x1dec] sm:$0xf]  ;;  %v16890_v22 = vld [vmem:[#allocation10 + $0x1df8] sm:$0xf0]  ;;  %v16621_v35 = vor.u32 %v18212_v39, %v16618_v44  ;;  %v16765_v3 = vor.u32 %v18248_v42, %v16762_v53 }
 0x562   :  { %v18312_v15 = vld [vmem:[#allocation10 + $0x1eec] sm:$0xf]  ;;  %v17018_v5 = vld [vmem:[#allocation10 + $0x1ef8] sm:$0xf0]  ;;  %v16893_v41 = vor.u32 %v18280_v63, %v16890_v22 }
 0x563   :  { %11012 = vmatpush.bf16.msra.mxu1 %v16173_v17  ;;  %11001 = vmatpush.bf16.msrb.mxu0 %v16013_v51  ;;  %v18208_v7 = vld [vmem:[#allocation10 + $0x1bac] sm:$0xf]  ;;  %v16602_v45 = vld [vmem:[#allocation10 + $0x1bb8] sm:$0xf0]  ;;  %v17021_v38 = vor.u32 %v18312_v15, %v17018_v5  ;;  %v10795_v16 = vpop.f32.mrf.mxu0 }
 0x564   :  { %v18244_v18 = vld [vmem:[#allocation10 + $0x1ccc] sm:$0xf]  ;;  %v16746_v47 = vld [vmem:[#allocation10 + $0x1cd8] sm:$0xf0]  ;;  %v16605_v29 = vor.u32 %v18208_v7, %v16602_v45  ;;  %v10796_v30 = vadd.f32 %v10795_v16, %v19555_v14 }
 0x565   :  { %11025 = vmatpush.bf16.msra.mxu2 %v16301_v28  ;;  %11038 = vmatpush.bf16.msra.mxu3 %v16429_v4  ;;  %v18276_v57 = vld [vmem:[#allocation10 + $0x1dcc] sm:$0xf]  ;;  %v16874_v52 = vld [vmem:[#allocation10 + $0x1dd8] sm:$0xf0]  ;;  %v16749_v9 = vor.u32 %v18244_v18, %v16746_v47 }
 0x566   :  { %11002 = vmatmul.bf16.vlgmr.msrb.gmra.mxu0 %v19332_v49  ;;  %v18308_v0 = vld [vmem:[#allocation10 + $0x1ecc] sm:$0xf]  ;;  %v17002_v46 = vld [vmem:[#allocation10 + $0x1ed8] sm:$0xf0]  ;;  %v16877_v49 = vor.u32 %v18276_v57, %v16874_v52 }
 0x567   :  { %11013 = vmatpush.bf16.msra.mxu1 %v16157_v61  ;;  %11046 = vmatpush.bf16.msra.mxu0 %v16637_v36  ;;  %v18204_v10 = vld [vmem:[#allocation10 + $0x1b8c] sm:$0xf]  ;;  %v16586_v21 = vld [vmem:[#allocation10 + $0x1b98] sm:$0xf0]  ;;  %v17005_v28 = vor.u32 %v18308_v0, %v17002_v46 }
 0x568   :  { %v18240_v17 = vld [vmem:[#allocation10 + $0x1cac] sm:$0xf]  ;;  %v16730_v6 = vld [vmem:[#allocation10 + $0x1cb8] sm:$0xf0]  ;;  %v16589_v11 = vor.u32 %v18204_v10, %v16586_v21 }
 0x569   :  { %11026 = vmatpush.bf16.msra.mxu2 %v16285_v32  ;;  %11039 = vmatpush.bf16.msra.mxu3 %v16413_v31  ;;  %v18272_v58 = vld [vmem:[#allocation10 + $0x1dac] sm:$0xf]  ;;  %v16858_v4 = vld [vmem:[#allocation10 + $0x1db8] sm:$0xf0]  ;;  %v16733_v50 = vor.u32 %v18240_v17, %v16730_v6 }
 0x56a   :  { %v18304_v20 = vld [vmem:[#allocation10 + $0x1eac] sm:$0xf]  ;;  %v16986_v60 = vld [vmem:[#allocation10 + $0x1eb8] sm:$0xf0]  ;;  %v16861_v34 = vor.u32 %v18272_v58, %v16858_v4 }
 0x56b   :  { %11014 = vmatpush.bf16.msra.mxu1 %v16141_v48  ;;  %11047 = vmatpush.bf16.msra.mxu0 %v16621_v35  ;;  %v16570_v51 = vld [vmem:[#allocation10 + $0x1b78] sm:$0xf0]  ;;  %v18236_v61 = vld [vmem:[#allocation10 + $0x1c8c] sm:$0xf]  ;;  %v16989_v32 = vor.u32 %v18304_v20, %v16986_v60  ;;  %v10808_v24 = vpop.f32.mrf.mxu1  ;;  %v10797_v44 = vpop.f32.mrf.mxu0 }
 0x56c   :  { %v16714_v1 = vld [vmem:[#allocation10 + $0x1c98] sm:$0xf0]  ;;  %v18268_v26 = vld [vmem:[#allocation10 + $0x1d8c] sm:$0xf]  ;;  %v10809_v14 = vadd.f32 %v10808_v24, %v10796_v30  ;;  %v18586_v44 = vld [vmem:[%s19693_s7 + $0x78] sm:$0xff] }
 0x56d   :  { %11027 = vmatpush.bf16.msra.mxu2 %v16269_v33  ;;  %11040 = vmatpush.bf16.msra.mxu3 %v16397_v12  ;;  %v16970_v31 = vld [vmem:[#allocation10 + $0x1e98] sm:$0xf0]  ;;  %v16717_v27 = vor.u32 %v18236_v61, %v16714_v1  ;;  %v18196_v40 = vld [vmem:[#allocation10 + $0x1b4c] sm:$0xf] }
 0x56e   :  { %11015 = vmatmul.bf16.vlgmr.msra.gmra.mxu1 %v19351_v8  ;;  %v18200_v8 = vld [vmem:[#allocation10 + $0x1b6c] sm:$0xf]  ;;  %v16554_v62 = vld [vmem:[#allocation10 + $0x1b58] sm:$0xf0] }
 0x56f   :  { %11059 = vmatpush.bf16.msrb.mxu1 %v16765_v3  ;;  %11048 = vmatpush.bf16.msra.mxu0 %v16605_v29  ;;  %v16573_v36 = vor.u32 %v18200_v8, %v16570_v51  ;;  %v18232_v59 = vld [vmem:[#allocation10 + $0x1c6c] sm:$0xf]  ;;  %v16698_v42 = vld [vmem:[#allocation10 + $0x1c78] sm:$0xf0]  ;;  %v16557_v33 = vor.u32 %v18196_v40, %v16554_v62 }
 0x570   :  { %11028 = vmatmul.bf16.vlgmr.msra.gmra.mxu2 %v19353_v54  ;;  %11041 = vmatmul.bf16.vlgmr.msra.gmra.mxu3 %v19355_v56  ;;  %v16842_v54 = vld [vmem:[#allocation10 + $0x1d98] sm:$0xf0]  ;;  %v18300_v56 = vld [vmem:[#allocation10 + $0x1e8c] sm:$0xf]  ;;  %v16701_v15 = vor.u32 %v18232_v59, %v16698_v42  ;;  %v18594_v42 = vld [vmem:[%s19693_s7 + $0xb8] sm:$0xff] }
 0x571   :  { %11072 = vmatpush.bf16.msrb.mxu2 %v16893_v41  ;;  %11085 = vmatpush.bf16.msrb.mxu3 %v17021_v38  ;;  %v16845_v37 = vor.u32 %v18268_v26, %v16842_v54  ;;  %v16973_v39 = vor.u32 %v18300_v56, %v16970_v31  ;;  %v18264_v53 = vld [vmem:[#allocation10 + $0x1d6c] sm:$0xf]  ;;  %v16826_v63 = vld [vmem:[#allocation10 + $0x1d78] sm:$0xf0] }
 0x572   :  { %v18296_v22 = vld [vmem:[#allocation10 + $0x1e6c] sm:$0xf]  ;;  %v16954_v48 = vld [vmem:[#allocation10 + $0x1e78] sm:$0xf0]  ;;  %v16829_v5 = vor.u32 %v18264_v53, %v16826_v63 }
 0x573   :  { %11060 = vmatpush.bf16.msrb.mxu1 %v16749_v9  ;;  %11049 = vmatpush.bf16.msra.mxu0 %v16589_v11  ;;  %v18192_v12 = vld [vmem:[#allocation10 + $0x1b2c] sm:$0xf]  ;;  %v16538_v35 = vld [vmem:[#allocation10 + $0x1b38] sm:$0xf0]  ;;  %v16957_v41 = vor.u32 %v18296_v22, %v16954_v48  ;;  %v10821_v7 = vpop.f32.mrf.mxu2  ;;  %v10834_v45 = vpop.f32.mrf.mxu3 }
 0x574   :  { %v18228_v3 = vld [vmem:[#allocation10 + $0x1c4c] sm:$0xf]  ;;  %v16682_v18 = vld [vmem:[#allocation10 + $0x1c58] sm:$0xf0]  ;;  %v10822_v57 = vadd.f32 %v10821_v7, %v10809_v14  ;;  %v10810_v52 = vpop.f32.mrf.mxu1  ;;  %v16541_v29 = vor.u32 %v18192_v12, %v16538_v35  ;;  %v18582_v7 = vld [vmem:[%s19693_s7 + $0x58] sm:$0xff] }
 0x575   :  { %11073 = vmatpush.bf16.msrb.mxu2 %v16877_v49  ;;  %11086 = vmatpush.bf16.msrb.mxu3 %v17005_v28  ;;  %v18260_v38 = vld [vmem:[#allocation10 + $0x1d4c] sm:$0xf]  ;;  %v16810_v47 = vld [vmem:[#allocation10 + $0x1d58] sm:$0xf0]  ;;  %v16685_v10 = vor.u32 %v18228_v3, %v16682_v18 }
 0x576   :  { %v18292_v0 = vld [vmem:[#allocation10 + $0x1e4c] sm:$0xf]  ;;  %v16938_v46 = vld [vmem:[#allocation10 + $0x1e58] sm:$0xf0]  ;;  %v10835_v49 = vadd.f32 %v10834_v45, %v10822_v57  ;;  %v16813_v21 = vor.u32 %v18260_v38, %v16810_v47  ;;  %v18590_v45 = vld [vmem:[%s19693_s7 + $0x98] sm:$0xff] }
 0x577   :  { %11061 = vmatpush.bf16.msrb.mxu1 %v16733_v50  ;;  %11050 = vmatpush.bf16.msra.mxu0 %v16573_v36  ;;  %v18188_v9 = vld [vmem:[#allocation10 + $0x1b0c] sm:$0xf]  ;;  %v16522_v17 = vld [vmem:[#allocation10 + $0x1b18] sm:$0xf0]  ;;  %v16941_v6 = vor.u32 %v18292_v0, %v16938_v46  ;;  %v19613_v47 = vld [vmem:[#allocation13] sm:$0xf] }
 0x578   :  { %v18224_v28 = vld [vmem:[#allocation10 + $0x1c2c] sm:$0xf]  ;;  %v16666_v16 = vld [vmem:[#allocation10 + $0x1c38] sm:$0xf0]  ;;  %v16525_v50 = vor.u32 %v18188_v9, %v16522_v17  ;;  %v11114_v9 = vperm.slane %v19613_v47, 1  ;;  %v18580_v17 = vld [vmem:[%s19693_s7 + $0x48] sm:$0xff] }
 0x579   :  { %11074 = vmatpush.bf16.msrb.mxu2 %v16861_v34  ;;  %11087 = vmatpush.bf16.msrb.mxu3 %v16989_v32  ;;  %v18256_v58 = vld [vmem:[#allocation10 + $0x1d2c] sm:$0xf]  ;;  %v16794_v4 = vld [vmem:[#allocation10 + $0x1d38] sm:$0xf0]  ;;  %v16669_v34 = vor.u32 %v18224_v28, %v16666_v16  ;;  %v19731_v16 = vld [vmem:[#allocation26_spill] sm:$0xff] }
 0x57a   :  { %v18288_v30 = vld [vmem:[#allocation10 + $0x1e2c] sm:$0xf]  ;;  %v16922_v20 = vld [vmem:[#allocation10 + $0x1e38] sm:$0xf0]  ;;  %v16797_v8 = vor.u32 %v18256_v58, %v16794_v4  ;;  %v18588_v58 = vld [vmem:[%s19693_s7 + $0x88] sm:$0xff] }
 0x57b   :  { %11062 = vmatpush.bf16.msrb.mxu1 %v16717_v27  ;;  %11051 = vmatpush.bf16.msra.mxu0 %v16557_v33  ;;  %v18320_v60 = vld [vmem:[#allocation10 + $0x1f2c] sm:$0xf]  ;;  %v17050_v11 = vld [vmem:[#allocation10 + $0x1f38] sm:$0xf0]  ;;  %v16925_v32 = vor.u32 %v18288_v30, %v16922_v20  ;;  %v10823_v26 = vpop.f32.mrf.mxu2  ;;  %v10836_v54 = vpop.f32.mrf.mxu3  ;;  %v18576_v33 = vld [vmem:[%s19693_s7 + $0x28] sm:$0xff] }
 0x57c   :  { %v18220_v51 = vld [vmem:[#allocation10 + $0x1c0c] sm:$0xf]  ;;  %v16650_v61 = vld [vmem:[#allocation10 + $0x1c18] sm:$0xf0]  ;;  %v17053_v1 = vor.u32 %v18320_v60, %v17050_v11 }
 0x57d   :  { %11075 = vmatpush.bf16.msrb.mxu2 %v16845_v37  ;;  %11088 = vmatpush.bf16.msrb.mxu3 %v16973_v39  ;;  %v18252_v24 = vld [vmem:[#allocation10 + $0x1d0c] sm:$0xf]  ;;  %v16778_v56 = vld [vmem:[#allocation10 + $0x1d18] sm:$0xf0]  ;;  %v16653_v37 = vor.u32 %v18220_v51, %v16650_v61  ;;  %v18578_v39 = vld [vmem:[%s19693_s7 + $0x38] sm:$0xff] }
 0x57e   :  { %v18284_v31 = vld [vmem:[#allocation10 + $0x1e0c] sm:$0xf]  ;;  %v16906_v14 = vld [vmem:[#allocation10 + $0x1e18] sm:$0xf0]  ;;  %v16781_v40 = vor.u32 %v18252_v24, %v16778_v56 }
 0x57f   :  { %11063 = vmatpush.bf16.msrb.mxu1 %v16701_v15  ;;  %11052 = vmatpush.bf16.msra.mxu0 %v16541_v29  ;;  %v18316_v36 = vld [vmem:[#allocation10 + $0x1f0c] sm:$0xf]  ;;  %v17034_v27 = vld [vmem:[#allocation10 + $0x1f18] sm:$0xf0]  ;;  %v16909_v62 = vor.u32 %v18284_v31, %v16906_v14  ;;  %v18592_v15 = vld [vmem:[%s19693_s7 + $0xa8] sm:$0xff]  ;;  %v11113_v29 = vperm.slane %v19613_v47, 0 }
 0x580   :  { %v17037_v59 = vor.u32 %v18316_v36, %v17034_v27  ;;  %v18585_v53 = vld [vmem:[%s19693_s7 + $0x70] sm:$0xff]  ;;  %v18583_v12 = vld [vmem:[%s19693_s7 + $0x60] sm:$0xff] }
 0x581   :  { %11076 = vmatpush.bf16.msrb.mxu2 %v16829_v5  ;;  %11089 = vmatpush.bf16.msrb.mxu3 %v16957_v41  ;;  %v18593_v63 = vld [vmem:[%s19693_s7 + $0xb0] sm:$0xff]  ;;  %v18591_v35 = vld [vmem:[%s19693_s7 + $0xa0] sm:$0xff]  ;;  %v18574_v41 = vld [vmem:[%s19693_s7 + $0x18] sm:$0xff]  ;;  %v11121_v28 = vadd.f32 %v11113_v29, %v19420_v43 }
 0x582   :  { %v18573_v46 = vld [vmem:[%s19693_s7 + $0x10] sm:$0xff]  ;;  %v18571_v60 = vld [vmem:[%s19693_s7] sm:$0xff] }
 0x583   :  { %11064 = vmatpush.bf16.msrb.mxu1 %v16685_v10  ;;  %11053 = vmatpush.bf16.msra.mxu0 %v16525_v50  ;;  %v10847_v22 = vpop.f32.mrf.mxu0  ;;  %v11115_v10 = vperm.slane %v19613_v47, 2  ;;  %v18579_v43 = vld [vmem:[%s19693_s7 + $0x40] sm:$0xff]  ;;  %v11125_v11 = vmax.f32 %v11121_v28, 0.0 }
 0x584   :  { %v10848_v48 = vadd.f32 %v10847_v22, %v10835_v49  ;;  %v18589_v49 = vld [vmem:[%s19693_s7 + $0x90] sm:$0xff] }
 0x585   :  { %11077 = vmatpush.bf16.msrb.mxu2 %v16813_v21  ;;  %11090 = vmatpush.bf16.msrb.mxu3 %v16941_v6  ;;  %v18572_v21 = vld [vmem:[%s19693_s7 + $0x8] sm:$0xff]  ;;  %v11122_v6 = vadd.f32 %v11114_v9, %v19731_v16  ;;  %v11123_v20 = vadd.f32 %v11115_v10, %v19545_v2  ;;  %v11129_v2 = vpack.c.bf16 %v11125_v11, %v11125_v11 }
 0x586   :  { %11054 = vmatmul.bf16.vlgmr.msra.gmra.mxu0 %v19726_v19  ;;  %v18577_v19 = vld [vmem:[%s19693_s7 + $0x30] sm:$0xff] }
 0x587   :  { %11065 = vmatpush.bf16.msrb.mxu1 %v16669_v34  ;;  %11104 = vmatpush.bf16.msrb.mxu0 %v17053_v1  ;;  %v11126_v50 = vmax.f32 %v11122_v6, 0.0  ;;  %v18587_v34 = vld [vmem:[%s19693_s7 + $0x80] sm:$0xff] }
 0x589   :  { %11078 = vmatpush.bf16.msrb.mxu2 %v16797_v8  ;;  %11091 = vmatpush.bf16.msrb.mxu3 %v16925_v32  ;;  %v11127_v8 = vmax.f32 %v11123_v20, 0.0  ;;  %v11130_v51 = vpack.c.bf16 %v11126_v50, %v11126_v50  ;;  %v11451_v50 = vld [vmem:[%s19695_s9 + $0x10] sm:$0xf] }
 0x58b   :  { %11066 = vmatpush.bf16.msrb.mxu1 %v16653_v37  ;;  %11105 = vmatpush.bf16.msrb.mxu0 %v17037_v59  ;;  %v10860_v5 = vpop.f32.mrf.mxu1  ;;  %v10849_v3 = vpop.f32.mrf.mxu0  ;;  %v11131_v61 = vpack.c.bf16 %v11127_v8, %v11127_v8 }
 0x58c   :  { %v18597_v3 = vld [vmem:[%s19693_s7 + $0xd0] sm:$0xff] }
 0x58d   :  { %11079 = vmatpush.bf16.msrb.mxu2 %v16781_v40  ;;  %11092 = vmatpush.bf16.msrb.mxu3 %v16909_v62 }
 0x58e   :  { %11067 = vmatmul.bf16.vlgmr.msrb.gmra.mxu1 %v19378_v55  ;;  %v18584_v55 = vld [vmem:[%s19693_s7 + $0x68] sm:$0xff] }
 0x58f   :  { %11393 = vmatpush.bf16.msra.mxu0 %v18578_v39  ;;  %11406 = vmatpush.bf16.msra.mxu1 %v18586_v44 }
 0x590   :  { %11080 = vmatmul.bf16.vlgmr.msrb.gmra.mxu2 %v19380_v13  ;;  %11093 = vmatmul.bf16.vlgmr.msrb.gmra.mxu3 %v19382_v25  ;;  %v10861_v13 = vadd.f32 %v10860_v5, %v10848_v48  ;;  %v18575_v25 = vld [vmem:[%s19693_s7 + $0x20] sm:$0xff]  ;;  %v18601_v48 = vld [vmem:[%s19693_s7 + $0xf0] sm:$0xff] }
 0x591   :  { %11419 = vmatpush.bf16.msra.mxu2 %v18594_v42 }
 0x593   :  { %11394 = vmatpush.bf16.msra.mxu0 %v18577_v19  ;;  %11407 = vmatpush.bf16.msra.mxu1 %v18585_v53  ;;  %v10873_v18 = vpop.f32.mrf.mxu2  ;;  %v10886_v38 = vpop.f32.mrf.mxu3  ;;  %v18602_v53 = vld [vmem:[%s19693_s7 + $0xf8] sm:$0xff] }
 0x594   :  { %v10874_v57 = vadd.f32 %v10873_v18, %v10861_v13  ;;  %v10862_v52 = vpop.f32.mrf.mxu1  ;;  %11432 = vmatpush.bf16.msra.mxu3 %v18602_v53  ;;  %v18598_v13 = vld [vmem:[%s19693_s7 + $0xd8] sm:$0xff] }
 0x595   :  { %11420 = vmatpush.bf16.msra.mxu2 %v18593_v63 }
 0x596   :  { %17057 = vmatmul.msk.bf16.vlgmr.msrb.gmra.mxu0 %vm9443_vm3, %v19727_v23  ;;  %v10887_v0 = vadd.f32 %v10886_v38, %v10874_v57  ;;  %v18581_v23 = vld [vmem:[%s19693_s7 + $0x50] sm:$0xff]  ;;  %v18595_v57 = vld [vmem:[%s19693_s7 + $0xc0] sm:$0xff] }
 0x597   :  { %11395 = vmatpush.bf16.msra.mxu0 %v18576_v33  ;;  %11408 = vmatpush.bf16.msra.mxu1 %v18584_v55  ;;  %v18600_v33 = vld [vmem:[%s19693_s7 + $0xe8] sm:$0xff] }
 0x598   :  { %11433 = vmatpush.bf16.msra.mxu3 %v18601_v48 }
 0x599   :  { %11421 = vmatpush.bf16.msra.mxu2 %v18592_v15  ;;  %v18599_v15 = vld [vmem:[%s19693_s7 + $0xe0] sm:$0xff] }
 0x59b   :  { %11396 = vmatpush.bf16.msra.mxu0 %v18575_v25  ;;  %11409 = vmatpush.bf16.msra.mxu1 %v18583_v12  ;;  %v10875_v4 = vpop.f32.mrf.mxu2  ;;  %v10888_v30 = vpop.f32.mrf.mxu3 }
 0x59c   :  { %11434 = vmatpush.bf16.msra.mxu3 %v18600_v33 }
 0x59d   :  { %11422 = vmatpush.bf16.msra.mxu2 %v18591_v35 }
 0x59f   :  { %11397 = vmatpush.bf16.msra.mxu0 %v18574_v41  ;;  %11410 = vmatpush.bf16.msra.mxu1 %v18582_v7  ;;  %v18596_v7 = vld [vmem:[%s19693_s7 + $0xc8] sm:$0xff] }
 0x5a0   :  { %11435 = vmatpush.bf16.msra.mxu3 %v18599_v15 }
 0x5a1   :  { %11423 = vmatpush.bf16.msra.mxu2 %v18590_v45 }
 0x5a3   :  { %11398 = vmatpush.bf16.msra.mxu0 %v18573_v46  ;;  %11411 = vmatpush.bf16.msra.mxu1 %v18581_v23  ;;  %v10899_v32 = vpop.f32.mrf.mxu0 }
 0x5a4   :  { %v10900_v1 = vadd.f32 %v10899_v32, %v10887_v0  ;;  %11436 = vmatpush.bf16.msra.mxu3 %v18598_v13 }
 0x5a5   :  { %11424 = vmatpush.bf16.msra.mxu2 %v18589_v49 }
 0x5a7   :  { %11399 = vmatpush.bf16.msra.mxu0 %v18572_v21  ;;  %11412 = vmatpush.bf16.msra.mxu1 %v18580_v17 }
 0x5a8   :  { %11437 = vmatpush.bf16.msra.mxu3 %v18597_v3 }
 0x5a9   :  { %11425 = vmatpush.bf16.msra.mxu2 %v18588_v58 }
 0x5ab   :  { %11400 = vmatpush.bf16.msra.mxu0 %v18571_v60  ;;  %11413 = vmatpush.bf16.msra.mxu1 %v18579_v43  ;;  %v10912_v26 = vpop.f32.mrf.mxu1  ;;  %v10901_v24 = vpop.f32.mrf.mxu0  ;;  %v11116_v60 = vperm.slane %v19613_v47, 3  ;;  %v18604_v47 = vld [vmem:[%s19695_s9 + $0x8] sm:$0xff] }
 0x5ac   :  { %v10913_v54 = vadd.f32 %v10912_v26, %v10900_v1  ;;  %11438 = vmatpush.bf16.msra.mxu3 %v18596_v7  ;;  %v18619_v24 = vld [vmem:[#allocation14] ss:$0 sm:$0xff] }
 0x5ad   :  { %11426 = vmatpush.bf16.msra.mxu2 %v18587_v34  ;;  %v11465_v34 = vunpack.c.l.b16 %v11451_v50 }
 0x5ae   :  { %11401 = vmatmul.bf16.vlgmr.msra.gmra.mxu0 %v11129_v2  ;;  %11414 = vmatmul.bf16.vlgmr.msra.gmra.mxu1 %v11130_v51 }
 0x5b0   :  { %11427 = vmatmul.bf16.vlgmr.msra.gmra.mxu2 %v11131_v61  ;;  %11439 = vmatpush.bf16.msra.mxu3 %v18595_v57  ;;  %v11468_v61 = vpack.c.b16 %v11465_v34, %v11465_v34 }
 0x5b2   :  { %v11476_v1 = vsel %vm4014_vm1, %v11468_v61, 0 }
 0x5b3   :  { %v10925_v56 = vpop.f32.mrf.mxu2  ;;  %v10938_v31 = vpop.f32.mrf.mxu3  ;;  %11483 = vmatpush.bf16.msrb.mxu0 %v11476_v1 }
 0x5b4   :  { %v10926_v14 = vadd.f32 %v10925_v56, %v10913_v54  ;;  %v10914_v36 = vpop.f32.mrf.mxu1 }
 0x5b6   :  { %v10939_v27 = vadd.f32 %v10938_v31, %v10926_v14 }
 0x5b7   :  { %11484 = vmatpush.bf16.msrb.mxu0 %v18604_v47 }
 0x5bb   :  { %v10927_v37 = vpop.f32.mrf.mxu2  ;;  %v10940_v40 = vpop.f32.mrf.mxu3 }
 0x5c3   :  { %v10951_v62 = vpop.f32.mrf.mxu0 }
 0x5c4   :  { %v10952_v45 = vadd.f32 %v10951_v62, %v10939_v27 }
 0x5cb   :  { %v10964_v59 = vpop.f32.mrf.mxu1  ;;  %v10953_v39 = vpop.f32.mrf.mxu0 }
 0x5cc   :  { %v10965_v52 = vadd.f32 %v10964_v59, %v10952_v45  ;;  %v18603_v39 = vld [vmem:[%s19695_s9] sm:$0xff] }
 0x5cd   :  { %11485 = vmatpush.bf16.msrb.mxu0 %v18603_v39 }
 0x5d3   :  { %v10977_v44 = vpop.f32.mrf.mxu2  ;;  %v10990_v42 = vpop.f32.mrf.mxu3 }
 0x5d4   :  { %v10966_v19 = vpop.f32.mrf.mxu1  ;;  %v10978_v0 = vadd.f32 %v10977_v44, %v10965_v52 }
 0x5d6   :  { %v10991_v46 = vadd.f32 %v10990_v42, %v10978_v0 }
 0x5db   :  { %v10979_v63 = vpop.f32.mrf.mxu2  ;;  %v10992_v22 = vpop.f32.mrf.mxu3 }
 0x5dc   :  { %v18620_v22 = vld [vmem:[#allocation16] ss:$0 sm:$0xff] }
 0x5e3   :  { %v11003_v55 = vpop.f32.mrf.mxu0 }
 0x5e4   :  { %v11004_v23 = vadd.f32 %v11003_v55, %v10991_v46 }
 0x5eb   :  { %v11016_v5 = vpop.f32.mrf.mxu1  ;;  %v11005_v25 = vpop.f32.mrf.mxu0 }
 0x5ec   :  { %v11017_v9 = vadd.f32 %v11016_v5, %v11004_v23 }
 0x5f3   :  { %v11029_v12 = vpop.f32.mrf.mxu2  ;;  %v11042_v35 = vpop.f32.mrf.mxu3 }
 0x5f4   :  { %v11018_v41 = vpop.f32.mrf.mxu1  ;;  %v11030_v49 = vadd.f32 %v11029_v12, %v11017_v9 }
 0x5f6   :  { %v11043_v21 = vadd.f32 %v11042_v35, %v11030_v49 }
 0x5fb   :  { %v11031_v18 = vpop.f32.mrf.mxu2  ;;  %v11044_v38 = vpop.f32.mrf.mxu3 }
 0x603   :  { %v11055_v29 = vpop.f32.mrf.mxu0 }
 0x604   :  { %v11056_v28 = vadd.f32 %v11055_v29, %v11043_v21 }
 0x60b   :  { %v11068_v10 = vpop.f32.mrf.mxu1  ;;  %v11057_v17 = vpop.f32.mrf.mxu0 }
 0x60c   :  { %v11069_v16 = vadd.f32 %v11068_v10, %v11056_v28 }
 0x613   :  { %v11081_v6 = vpop.f32.mrf.mxu2  ;;  %v11094_v58 = vpop.f32.mrf.mxu3 }
 0x614   :  { %v11082_v4 = vadd.f32 %v11081_v6, %v11069_v16  ;;  %v11070_v30 = vpop.f32.mrf.mxu1  ;;  %v11107_v43 = vpop.f32.mrf.mxu0 }
 0x616   :  { %v11095_v20 = vadd.f32 %v11094_v58, %v11082_v4 }
 0x618   :  { %v11108_v11 = vadd.f32 %v11107_v43, %v11095_v20 }
 0x61a   :  { %v11124_v8 = vadd.f32 %v11116_v60, %v11108_v11 }
 0x61b   :  { %v11083_v2 = vpop.f32.mrf.mxu2  ;;  %v11096_v51 = vpop.f32.mrf.mxu3 }
 0x61c   :  { %v11128_v32 = vmax.f32 %v11124_v8, 0.0  ;;  %v11109_v54 = vpop.f32.mrf.mxu0 }
 0x61e   :  { %v11132_v26 = vpack.c.bf16 %v11128_v32, %v11128_v32 }
 0x620   :  { %11440 = vmatmul.bf16.vlgmr.msra.gmra.mxu3 %v11132_v26 }
 0x62b   :  { %v11402_v56 = vpop.f32.mrf.mxu0  ;;  %v11415_v31 = vpop.f32.mrf.mxu1 }
 0x62c   :  { %v11403_v14 = vadd.f32 %v18619_v24, %v11402_v56 }
 0x62e   :  { %v11416_v36 = vadd.f32 %v11415_v31, %v11403_v14 }
 0x633   :  { %v11428_v27 = vpop.f32.mrf.mxu2  ;;  %v11404_v40 = vpop.f32.mrf.mxu0 }
 0x634   :  { %v11429_v37 = vadd.f32 %v11428_v27, %v11416_v36  ;;  %v11417_v62 = vpop.f32.mrf.mxu1 }
 0x63b   :  { %v11430_v59 = vpop.f32.mrf.mxu2 }
 0x6a3   :  { %v11441_v44 = vpop.f32.mrf.mxu3 }
 0x6a4   :  { %v11442_v42 = vadd.f32 %v11441_v44, %v11429_v37 }
 0x6a6   :  { %v11445_v19 = vmax.f32 %v11442_v42, 0.0 }
 0x6a8   :  { %v11446_v53 = vpack.c.bf16 %v11445_v19, %v11445_v19 }
 0x6aa   :  { %17194 = vmatmul.msk.bf16.vlgmr.msrb.gmra.mxu0 %vm11471_vm4, %v11446_v53 }
 0x6ab   :  { %v11443_v63 = vpop.f32.mrf.mxu3 }
 0x727   :  { %v11487_v48 = vpop.f32.mrf.mxu0 }
 0x728   :  { %v11488_v33 = vadd.f32 %v18620_v22, %v11487_v48 }
 0x72a   :  { %11492 = vst.msk [vmem:[#allocation17] sm:$0xff] %vm11491_vm5, %v11488_v33 }
 0x72b   :  { %11503 = dma.vmem_to_hbm [thread:$0]  %s11499_s0, 128, %s11501_s30, [#allocation4]  }
 0x72f   :  { %v11489_v55 = vpop.f32.mrf.mxu0 }
 0x730   :  { %18871 = dma.done.wait [#allocation4], 128  }
 0x731   :  { %18872 = vsyncadd [#allocation4], 4294967168 }
 0x732   :  { %11508 = vsyncpa [#allocation3], 1 }
 0x733   :  { %11509 = vsyncpa [#allocation6], 1 }
 0x734   :  { %11510 = vsyncpa [#allocation9], 1 }
 0x735   :  { %11511 = vsyncpa [#allocation12], 1 }
 0x736   :  { %11512 = vsyncpa [#allocation15], 1 }
 0x737   :  { %11513 = vsyncpa [#allocation4], 1 }

</bundles_post_ra>
